<compile_context>
chip_gen: v6e
topology: v6e:2x2x1
jax: 0.10.0
libtpu: 0.0.40
codegen_flags: <defaults>
</compile_context>

<pallas_src>
import numpy as np
import jax
import jax.numpy as jnp
from jax.experimental import pallas as pl
from jax.experimental.pallas import tpu as pltpu

# ---------------------------------------------------------------------------
# DbMelFeatureExtraction (preprocessing under torch.no_grad) — plain JAX.
# TODO(synk): exact parity with torchaudio MelSpectrogram/AmplitudeToDB
# (periodic hann window, power=2.0, 10*log10 / top_db clamp) is approximated.
# ---------------------------------------------------------------------------
SAMPLE_RATE = 16000
N_FFT = 512
WIN_LENGTH = 400      # 0.025 s
HOP_LENGTH = 160      # 0.010 s
F_MIN = 60.0
F_MAX = 7600.0
N_MELS = 40           # == input_dim of the model
MIN_AMP = 1e-10

NUM_CLASSES = 8
# (c_in, c_out, context_size, dilation) for tdnn1..tdnn5
TDNN_CFG = [
    (N_MELS, 512, 5, 1),
    (512, 512, 3, 2),
    (512, 512, 2, 3),
    (512, 512, 1, 1),
    (512, 1500, 1, 1),
]
BN_EPS = 1e-5
C5 = 1500
C5_PAD = 1536          # pad 1500 -> 12*128 for lane-dense tiles
K1_PAD = 256           # pad layer-1 im2col contraction 200 -> 256

PARAM_ORDER = ["w1", "b1",
               "w2a", "w2b", "w2c", "b2",
               "w3a", "w3b", "b3",
               "w4", "b4",
               "w5", "b5",
               "w6m", "w6s", "b6",
               "w7", "b7",
               "wo", "bo"]


def _mel_filterbank():
    n_freqs = N_FFT // 2 + 1
    all_freqs = np.linspace(0.0, SAMPLE_RATE / 2.0, n_freqs)
    hz2mel = lambda f: 2595.0 * np.log10(1.0 + f / 700.0)
    mel2hz = lambda m: 700.0 * (10.0 ** (m / 2595.0) - 1.0)
    m_pts = np.linspace(hz2mel(F_MIN), hz2mel(F_MAX), N_MELS + 2)
    f_pts = mel2hz(m_pts)
    f_diff = f_pts[1:] - f_pts[:-1]
    slopes = f_pts[None, :] - all_freqs[:, None]            # (n_freqs, n_mels+2)
    down = -slopes[:, :-2] / f_diff[:-1]
    up = slopes[:, 2:] / f_diff[1:]
    fb = np.maximum(0.0, np.minimum(down, up))              # (n_freqs, n_mels)
    return jnp.asarray(fb, jnp.float32)


def db_mel_features(raw_audio, raw_audio_lengths):
    """raw_audio: (B, L) float32. Returns ((B, T, 40), lengths)."""
    _, L = raw_audio.shape
    n_frames = (L - N_FFT) // HOP_LENGTH + 1                # center=False framing
    idx = np.arange(n_frames)[:, None] * HOP_LENGTH + np.arange(N_FFT)[None, :]
    frames = raw_audio[:, idx]                              # (B, T, n_fft)
    win = np.hanning(WIN_LENGTH)
    pad_l = (N_FFT - WIN_LENGTH) // 2
    win = np.pad(win, (pad_l, N_FFT - WIN_LENGTH - pad_l))
    spec = jnp.abs(jnp.fft.rfft(frames * jnp.asarray(win, jnp.float32), axis=-1))
    mel = jnp.einsum("btf,fm->btm", spec, _mel_filterbank())
    feats = jnp.log10(jnp.maximum(mel, MIN_AMP))
    feat_lengths = (raw_audio_lengths - N_FFT) // HOP_LENGTH + 1
    return feats.astype(jnp.float32), feat_lengths


# ---------------------------------------------------------------------------
# Fused Pallas kernel: one grid step == one batch element.
# 5 TDNN layers + statistics pooling + segment6/segment7/output/softmax head.
# All weights are VMEM-resident (constant-index BlockSpecs); BatchNorm (eval)
# is already folded into the weights, Dropout(p=0.5) is identity at inference.
# ---------------------------------------------------------------------------
def _fused_xvector_kernel(
        x1_ref,
        w1_ref, b1_ref,
        w2a_ref, w2b_ref, w2c_ref, b2_ref,
        w3a_ref, w3b_ref, b3_ref,
        w4_ref, b4_ref,
        w5_ref, b5_ref,
        w6m_ref, w6s_ref, b6_ref,
        w7_ref, b7_ref,
        wo_ref, bo_ref,
        logits_ref, preds_ref, xvec_ref):

    def relu_bf16(acc_f32, b_ref):
        # conv bias + ReLU in f32 (accumulator), then one cast to bf16 so the
        # next matmul LHS and the activation that stays live are half width.
        return jnp.maximum(acc_f32 + b_ref[...], 0.0).astype(jnp.bfloat16)

    x = x1_ref[0]                                           # (T1, 256) bf16
    t1 = x.shape[0]

    # tdnn1: context 5 / dilation 1 (im2col built in the wrapper, K padded to 256)
    h1 = relu_bf16(jnp.dot(x, w1_ref[...],
                           preferred_element_type=jnp.float32), b1_ref)

    # tdnn2: context 3 / dilation 2 — per-tap accumulated dots (no concat temporaries)
    l2 = t1 - 4
    acc2 = jnp.dot(h1[0:l2], w2a_ref[...], preferred_element_type=jnp.float32)
    acc2 += jnp.dot(h1[2:2 + l2], w2b_ref[...], preferred_element_type=jnp.float32)
    acc2 += jnp.dot(h1[4:4 + l2], w2c_ref[...], preferred_element_type=jnp.float32)
    h2 = relu_bf16(acc2, b2_ref)

    # tdnn3: context 2 / dilation 3
    l3 = l2 - 3
    acc3 = jnp.dot(h2[0:l3], w3a_ref[...], preferred_element_type=jnp.float32)
    acc3 += jnp.dot(h2[3:3 + l3], w3b_ref[...], preferred_element_type=jnp.float32)
    h3 = relu_bf16(acc3, b3_ref)

    # tdnn4 / tdnn5 (1x1 convs)
    h4 = relu_bf16(jnp.dot(h3, w4_ref[...],
                           preferred_element_type=jnp.float32), b4_ref)
    r5 = jnp.maximum(jnp.dot(h4, w5_ref[...],
                             preferred_element_type=jnp.float32)
                     + b5_ref[...], 0.0)                    # (T5, 1536) f32

    # statistics pooling: fused sum / sum-of-squares (unbiased var, matching
    # torch.std).  tdnn5's eval BatchNorm is folded into w6m/w6s/b6 offline.
    t_pool = l3
    inv_t = 1.0 / float(t_pool)
    inv_tm1 = 1.0 / float(max(t_pool - 1, 1))
    s1 = jnp.sum(r5, axis=0, keepdims=True)                 # (1, 1536)
    s2 = jnp.sum(r5 * r5, axis=0, keepdims=True)            # (1, 1536)
    mean = s1 * inv_t
    var = jnp.maximum((s2 - float(t_pool) * mean * mean) * inv_tm1, 0.0)
    std = jnp.sqrt(var)

    # segment6 on (mean, std) halves separately (no (1,3000) concat)
    h6 = (jnp.dot(mean.astype(jnp.bfloat16), w6m_ref[...],
                  preferred_element_type=jnp.float32)
          + jnp.dot(std.astype(jnp.bfloat16), w6s_ref[...],
                    preferred_element_type=jnp.float32)
          + b6_ref[...])
    xv = jnp.dot(h6.astype(jnp.bfloat16), w7_ref[...],
                 preferred_element_type=jnp.float32) + b7_ref[...]
    logits = jnp.dot(xv.astype(jnp.bfloat16), wo_ref[...],
                     preferred_element_type=jnp.float32) + bo_ref[...]

    m = jnp.max(logits, axis=-1, keepdims=True)             # Softmax(dim=1)
    e = jnp.exp(logits - m)
    probs = e / jnp.sum(e, axis=-1, keepdims=True)

    logits_ref[0] = logits
    preds_ref[0] = probs
    xvec_ref[0] = xv


# ---------------------------------------------------------------------------
# Parameter setup (deterministic, PyTorch-default-style init) with offline
# BatchNorm folding into the following layer's weights / bias.
# ---------------------------------------------------------------------------
def init_params(key):
    keys = jax.random.split(key, len(TDNN_CFG) + 3)

    def uniform(k, shape, bound):
        return jax.random.uniform(k, shape, jnp.float32, -bound, bound)

    # raw conv weights/biases (im2col layout: (context*c_in, c_out))
    conv_w, conv_b = [], []
    for i, (ci, co, ctx, _d) in enumerate(TDNN_CFG):
        k1, k2 = jax.random.split(keys[i])
        bound = 1.0 / np.sqrt(ci * ctx)
        conv_w.append(uniform(k1, (ctx * ci, co), bound))
        conv_b.append(uniform(k2, (co,), bound))

    k6a, k6b = jax.random.split(keys[len(TDNN_CFG)])
    bound6 = 1.0 / np.sqrt(2 * C5)
    w6 = uniform(k6a, (2 * C5, 512), bound6)
    b6 = uniform(k6b, (512,), bound6)

    k7a, k7b = jax.random.split(keys[len(TDNN_CFG) + 1])
    bound7 = 1.0 / np.sqrt(512)
    w7 = uniform(k7a, (512, 512), bound7)
    b7 = uniform(k7b, (512,), bound7)

    koa, kob = jax.random.split(keys[len(TDNN_CFG) + 2])
    wo = uniform(koa, (512, NUM_CLASSES), bound7)
    bo = uniform(kob, (NUM_CLASSES,), bound7)

    # eval-mode BatchNorm1d (PyTorch defaults: gamma=1, beta=0, mean=0, var=1)
    bn_scale, bn_shift = [], []
    for (_ci, co, _ctx, _d) in TDNN_CFG:
        gamma = jnp.ones((co,), jnp.float32)
        beta = jnp.zeros((co,), jnp.float32)
        r_mean = jnp.zeros((co,), jnp.float32)
        r_var = jnp.ones((co,), jnp.float32)
        scale = gamma / jnp.sqrt(r_var + BN_EPS)
        bn_scale.append(scale)
        bn_shift.append(beta - r_mean * scale)

    def fold_prev_bn(w, b, ctx, layer_idx):
        """Fold layer (layer_idx-1)'s eval BatchNorm into this conv's W / b."""
        if layer_idx == 0:
            return w, b
        sc, sh = bn_scale[layer_idx - 1], bn_shift[layer_idx - 1]
        w_f = w * jnp.tile(sc, ctx)[:, None]
        b_f = b + jnp.tile(sh, ctx) @ w
        return w_f, b_f

    params = {}

    # tdnn1 (context 5): K = 200 zero-padded to 256 (matches x1 padding)
    w1, b1 = fold_prev_bn(conv_w[0], conv_b[0], TDNN_CFG[0][2], 0)
    params["w1"] = jnp.pad(w1, ((0, K1_PAD - w1.shape[0]), (0, 0))).astype(jnp.bfloat16)
    params["b1"] = b1[None, :]

    # tdnn2 (context 3, dilation 2) -> per-tap (512,512) weights
    w2, b2 = fold_prev_bn(conv_w[1], conv_b[1], TDNN_CFG[1][2], 1)
    params["w2a"] = w2[0:512].astype(jnp.bfloat16)
    params["w2b"] = w2[512:1024].astype(jnp.bfloat16)
    params["w2c"] = w2[1024:1536].astype(jnp.bfloat16)
    params["b2"] = b2[None, :]

    # tdnn3 (context 2, dilation 3)
    w3, b3 = fold_prev_bn(conv_w[2], conv_b[2], TDNN_CFG[2][2], 2)
    params["w3a"] = w3[0:512].astype(jnp.bfloat16)
    params["w3b"] = w3[512:1024].astype(jnp.bfloat16)
    params["b3"] = b3[None, :]

    # tdnn4 (1x1)
    w4, b4 = fold_prev_bn(conv_w[3], conv_b[3], TDNN_CFG[3][2], 3)
    params["w4"] = w4.astype(jnp.bfloat16)
    params["b4"] = b4[None, :]

    # tdnn5 (1x1): 1500 channels padded to 1536; padded channels are exactly 0
    w5, b5 = fold_prev_bn(conv_w[4], conv_b[4], TDNN_CFG[4][2], 4)
    params["w5"] = jnp.pad(w5, ((0, 0), (0, C5_PAD - C5))).astype(jnp.bfloat16)
    params["b5"] = jnp.pad(b5, (0, C5_PAD - C5))[None, :]

    # segment6: Linear(3000, 512) split into mean / std halves; tdnn5's eval
    # BN folded in (mean_z = sc*mean_r + sh, std_z = |sc|*std_r); rows padded
    # 1500 -> 1536 with zeros (padded tdnn5 channels are exactly zero).
    sc5, sh5 = bn_scale[4], bn_shift[4]
    w6m = w6[:C5] * sc5[:, None]
    w6s = w6[C5:] * jnp.abs(sc5)[:, None]
    b6_f = b6 + sh5 @ w6[:C5]
    params["w6m"] = jnp.pad(w6m, ((0, C5_PAD - C5), (0, 0))).astype(jnp.bfloat16)
    params["w6s"] = jnp.pad(w6s, ((0, C5_PAD - C5), (0, 0))).astype(jnp.bfloat16)
    params["b6"] = b6_f[None, :]

    params["w7"] = w7.astype(jnp.bfloat16)
    params["b7"] = b7[None, :]
    params["wo"] = wo.astype(jnp.bfloat16)
    params["bo"] = bo[None, :]
    return params


def _vmem_limit_bytes():
    # Per-generation ceiling: ~100 MiB on v5e/v6e (128 MiB physical VMEM),
    # ~54 MiB on v7x (64 MiB physical per TensorCore).
    try:
        cap = int(getattr(pltpu.get_tpu_info(), "vmem_capacity_bytes"))
    except Exception:
        cap = 128 * 1024 * 1024
    return int(min(100 * 1024 * 1024, cap * 0.85))


# ---------------------------------------------------------------------------
# Full forward pass (matches Model.forward: returns (output, predictions, x_vec))
# ---------------------------------------------------------------------------
def model_forward(params, raw_audio, raw_audio_lengths):
    squeezed = jnp.squeeze(raw_audio, axis=-1)               # torch.squeeze
    feats, _ = db_mel_features(squeezed, raw_audio_lengths)  # (B, T, 40)
    B, T, C = feats.shape

    ctx1, dil1 = TDNN_CFG[0][2], TDNN_CFG[0][3]
    T1 = T - dil1 * (ctx1 - 1)
    shrink23 = (TDNN_CFG[1][3] * (TDNN_CFG[1][2] - 1)
                + TDNN_CFG[2][3] * (TDNN_CFG[2][2] - 1))     # 4 + 3 = 7
    T5 = T1 - shrink23
    assert T5 >= 2, "utterance too short for the TDNN receptive field"

    # layer-1 im2col in the XLA wrapper (40 channels are not lane-aligned);
    # contraction dim zero-padded 200 -> 256 so the first matmul is MXU-aligned.
    taps = [feats[:, k * dil1:k * dil1 + T1, :] for k in range(ctx1)]
    x1 = jnp.concatenate(taps, axis=-1)                      # (B, T1, 200)
    x1 = jnp.pad(x1, ((0, 0), (0, 0), (0, K1_PAD - ctx1 * C)))
    x1 = x1.astype(jnp.bfloat16)                             # (B, T1, 256)

    weights = [params[k] for k in PARAM_ORDER]
    in_specs = [pl.BlockSpec((1, T1, K1_PAD), lambda b: (b, 0, 0))]
    # constant-index BlockSpecs: weights are DMA'd once and stay VMEM-resident
    in_specs += [pl.BlockSpec(w.shape, lambda b: (0, 0)) for w in weights]

    out_shape = (jax.ShapeDtypeStruct((B, 1, NUM_CLASSES), jnp.float32),
                 jax.ShapeDtypeStruct((B, 1, NUM_CLASSES), jnp.float32),
                 jax.ShapeDtypeStruct((B, 1, 512), jnp.float32))
    out_specs = (pl.BlockSpec((1, 1, NUM_CLASSES), lambda b: (b, 0, 0)),
                 pl.BlockSpec((1, 1, NUM_CLASSES), lambda b: (b, 0, 0)),
                 pl.BlockSpec((1, 1, 512), lambda b: (b, 0, 0)))

    logits, preds, x_vec = pl.pallas_call(
        _fused_xvector_kernel,
        out_shape=out_shape,
        grid_spec=pltpu.PrefetchScalarGridSpec(
            num_scalar_prefetch=0,
            grid=(B,),
            in_specs=in_specs,
            out_specs=out_specs),
        compiler_params=pltpu.CompilerParams(
            dimension_semantics=("parallel",),        # shard batch over v7x's 2 TCs
            vmem_limit_bytes=_vmem_limit_bytes()),
    )(x1, *weights)

    return (logits.reshape(B, NUM_CLASSES),
            preds.reshape(B, NUM_CLASSES),
            x_vec.reshape(B, 512))


if __name__ == "__main__":
    key = jax.random.PRNGKey(0)
    pkey, akey = jax.random.split(key)
    params = init_params(pkey)

    B, L = 2, 4800                                           # 0.3 s @ 16 kHz -> 27 frames
    raw_audio = 0.1 * jax.random.normal(akey, (B, L, 1), jnp.float32)
    raw_audio_lengths = jnp.full((B,), L, jnp.int32)

    fwd = jax.jit(model_forward)
    logits, preds, x_vec = fwd(params, raw_audio, raw_audio_lengths)
    jax.block_until_ready((logits, preds, x_vec))

    assert logits.shape == (B, NUM_CLASSES)
    assert preds.shape == (B, NUM_CLASSES)
    assert x_vec.shape == (B, 512)
    assert bool(jnp.all(jnp.isfinite(logits)))
    assert bool(jnp.allclose(jnp.sum(preds, axis=1), 1.0, atol=1e-5))
    print("KERNEL_OK")
</pallas_src>

<mosaic_0001>
module attributes {stable_mosaic.version = 11 : i64} {
  func.func @_fused_xvector_kernel(%arg0: i32, %arg1: memref<1x23x256xbf16, #tpu.memory_space<vmem>>, %arg2: memref<256x512xbf16, #tpu.memory_space<vmem>>, %arg3: memref<1x512xf32, #tpu.memory_space<vmem>>, %arg4: memref<512x512xbf16, #tpu.memory_space<vmem>>, %arg5: memref<512x512xbf16, #tpu.memory_space<vmem>>, %arg6: memref<512x512xbf16, #tpu.memory_space<vmem>>, %arg7: memref<1x512xf32, #tpu.memory_space<vmem>>, %arg8: memref<512x512xbf16, #tpu.memory_space<vmem>>, %arg9: memref<512x512xbf16, #tpu.memory_space<vmem>>, %arg10: memref<1x512xf32, #tpu.memory_space<vmem>>, %arg11: memref<512x512xbf16, #tpu.memory_space<vmem>>, %arg12: memref<1x512xf32, #tpu.memory_space<vmem>>, %arg13: memref<512x1536xbf16, #tpu.memory_space<vmem>>, %arg14: memref<1x1536xf32, #tpu.memory_space<vmem>>, %arg15: memref<1536x512xbf16, #tpu.memory_space<vmem>>, %arg16: memref<1536x512xbf16, #tpu.memory_space<vmem>>, %arg17: memref<1x512xf32, #tpu.memory_space<vmem>>, %arg18: memref<512x512xbf16, #tpu.memory_space<vmem>>, %arg19: memref<1x512xf32, #tpu.memory_space<vmem>>, %arg20: memref<512x8xbf16, #tpu.memory_space<vmem>>, %arg21: memref<1x8xf32, #tpu.memory_space<vmem>>, %arg22: memref<1x1x8xf32, #tpu.memory_space<vmem>>, %arg23: memref<1x1x8xf32, #tpu.memory_space<vmem>>, %arg24: memref<1x1x512xf32, #tpu.memory_space<vmem>>) attributes {dimension_semantics = [#tpu.dimension_semantics<parallel>], iteration_bounds = array<i64: 2>, scalar_prefetch = 0 : i64, scratch_operands = 0 : i64, tpu.core_type = #tpu.core_type<tc>, window_params = [{transform_indices = @transform_0, window_bounds = array<i64: 1, 23, 256>}, {pipeline_mode = #tpu.pipeline_mode<synchronous>, transform_indices = @transform_1, window_bounds = array<i64: 256, 512>}, {pipeline_mode = #tpu.pipeline_mode<synchronous>, transform_indices = @transform_2, window_bounds = array<i64: 1, 512>}, {pipeline_mode = #tpu.pipeline_mode<synchronous>, transform_indices = @transform_3, window_bounds = array<i64: 512, 512>}, {pipeline_mode = #tpu.pipeline_mode<synchronous>, transform_indices = @transform_4, window_bounds = array<i64: 512, 512>}, {pipeline_mode = #tpu.pipeline_mode<synchronous>, transform_indices = @transform_5, window_bounds = array<i64: 512, 512>}, {pipeline_mode = #tpu.pipeline_mode<synchronous>, transform_indices = @transform_6, window_bounds = array<i64: 1, 512>}, {pipeline_mode = #tpu.pipeline_mode<synchronous>, transform_indices = @transform_7, window_bounds = array<i64: 512, 512>}, {pipeline_mode = #tpu.pipeline_mode<synchronous>, transform_indices = @transform_8, window_bounds = array<i64: 512, 512>}, {pipeline_mode = #tpu.pipeline_mode<synchronous>, transform_indices = @transform_9, window_bounds = array<i64: 1, 512>}, {pipeline_mode = #tpu.pipeline_mode<synchronous>, transform_indices = @transform_10, window_bounds = array<i64: 512, 512>}, {pipeline_mode = #tpu.pipeline_mode<synchronous>, transform_indices = @transform_11, window_bounds = array<i64: 1, 512>}, {pipeline_mode = #tpu.pipeline_mode<synchronous>, transform_indices = @transform_12, window_bounds = array<i64: 512, 1536>}, {pipeline_mode = #tpu.pipeline_mode<synchronous>, transform_indices = @transform_13, window_bounds = array<i64: 1, 1536>}, {pipeline_mode = #tpu.pipeline_mode<synchronous>, transform_indices = @transform_14, window_bounds = array<i64: 1536, 512>}, {pipeline_mode = #tpu.pipeline_mode<synchronous>, transform_indices = @transform_15, window_bounds = array<i64: 1536, 512>}, {pipeline_mode = #tpu.pipeline_mode<synchronous>, transform_indices = @transform_16, window_bounds = array<i64: 1, 512>}, {pipeline_mode = #tpu.pipeline_mode<synchronous>, transform_indices = @transform_17, window_bounds = array<i64: 512, 512>}, {pipeline_mode = #tpu.pipeline_mode<synchronous>, transform_indices = @transform_18, window_bounds = array<i64: 1, 512>}, {pipeline_mode = #tpu.pipeline_mode<synchronous>, transform_indices = @transform_19, window_bounds = array<i64: 512, 8>}, {pipeline_mode = #tpu.pipeline_mode<synchronous>, transform_indices = @transform_20, window_bounds = array<i64: 1, 8>}, {transform_indices = @transform_21, window_bounds = array<i64: 1, 1, 8>}, {transform_indices = @transform_22, window_bounds = array<i64: 1, 1, 8>}, {transform_indices = @transform_23, window_bounds = array<i64: 1, 1, 512>}]} {
    %c0 = arith.constant 0 : index
    %c0_0 = arith.constant 0 : index
    %c0_1 = arith.constant 0 : index
    %0 = vector.load %arg1[%c0, %c0_0, %c0_1] : memref<1x23x256xbf16, #tpu.memory_space<vmem>>, vector<1x23x256xbf16>
    %1 = vector.shape_cast %0 : vector<1x23x256xbf16> to vector<23x256xbf16>
    %c0_2 = arith.constant 0 : index
    %c0_3 = arith.constant 0 : index
    %2 = vector.load %arg2[%c0_2, %c0_3] : memref<256x512xbf16, #tpu.memory_space<vmem>>, vector<256x512xbf16>
    %cst = arith.constant dense<0.000000e+00> : vector<23x512xf32>
    %3 = tpu.matmul %1, %2, %cst {dimension_numbers = #tpu.dot_dimension_numbers<[1], [0], [0], [1], [0, 0, 1, 1], [], []>} : vector<23x256xbf16>, vector<256x512xbf16>, vector<23x512xf32> -> vector<23x512xf32>
    %c0_4 = arith.constant 0 : index
    %c0_5 = arith.constant 0 : index
    %4 = vector.load %arg3[%c0_4, %c0_5] : memref<1x512xf32, #tpu.memory_space<vmem>>, vector<1x512xf32>
    %5 = vector.broadcast %4 : vector<1x512xf32> to vector<23x512xf32>
    %6 = arith.addf %3, %5 : vector<23x512xf32>
    %cst_6 = arith.constant 0.000000e+00 : f32
    %7 = vector.broadcast %cst_6 : f32 to vector<23x512xf32>
    %8 = arith.maximumf %6, %7 : vector<23x512xf32>
    %9 = arith.truncf %8 : vector<23x512xf32> to vector<23x512xbf16>
    %10 = vector.extract_strided_slice %9 {offsets = [0, 0], sizes = [19, 512], strides = [1, 1]} : vector<23x512xbf16> to vector<19x512xbf16>
    %c0_7 = arith.constant 0 : index
    %c0_8 = arith.constant 0 : index
    %11 = vector.load %arg4[%c0_7, %c0_8] : memref<512x512xbf16, #tpu.memory_space<vmem>>, vector<512x512xbf16>
    %cst_9 = arith.constant dense<0.000000e+00> : vector<19x512xf32>
    %12 = tpu.matmul %10, %11, %cst_9 {dimension_numbers = #tpu.dot_dimension_numbers<[1], [0], [0], [1], [0, 0, 1, 1], [], []>} : vector<19x512xbf16>, vector<512x512xbf16>, vector<19x512xf32> -> vector<19x512xf32>
    %13 = vector.extract_strided_slice %9 {offsets = [2, 0], sizes = [19, 512], strides = [1, 1]} : vector<23x512xbf16> to vector<19x512xbf16>
    %c0_10 = arith.constant 0 : index
    %c0_11 = arith.constant 0 : index
    %14 = vector.load %arg5[%c0_10, %c0_11] : memref<512x512xbf16, #tpu.memory_space<vmem>>, vector<512x512xbf16>
    %cst_12 = arith.constant dense<0.000000e+00> : vector<19x512xf32>
    %15 = tpu.matmul %13, %14, %cst_12 {dimension_numbers = #tpu.dot_dimension_numbers<[1], [0], [0], [1], [0, 0, 1, 1], [], []>} : vector<19x512xbf16>, vector<512x512xbf16>, vector<19x512xf32> -> vector<19x512xf32>
    %16 = arith.addf %12, %15 : vector<19x512xf32>
    %17 = vector.extract_strided_slice %9 {offsets = [4, 0], sizes = [19, 512], strides = [1, 1]} : vector<23x512xbf16> to vector<19x512xbf16>
    %c0_13 = arith.constant 0 : index
    %c0_14 = arith.constant 0 : index
    %18 = vector.load %arg6[%c0_13, %c0_14] : memref<512x512xbf16, #tpu.memory_space<vmem>>, vector<512x512xbf16>
    %cst_15 = arith.constant dense<0.000000e+00> : vector<19x512xf32>
    %19 = tpu.matmul %17, %18, %cst_15 {dimension_numbers = #tpu.dot_dimension_numbers<[1], [0], [0], [1], [0, 0, 1, 1], [], []>} : vector<19x512xbf16>, vector<512x512xbf16>, vector<19x512xf32> -> vector<19x512xf32>
    %20 = arith.addf %16, %19 : vector<19x512xf32>
    %c0_16 = arith.constant 0 : index
    %c0_17 = arith.constant 0 : index
    %21 = vector.load %arg7[%c0_16, %c0_17] : memref<1x512xf32, #tpu.memory_space<vmem>>, vector<1x512xf32>
    %22 = vector.broadcast %21 : vector<1x512xf32> to vector<19x512xf32>
    %23 = arith.addf %20, %22 : vector<19x512xf32>
    %cst_18 = arith.constant 0.000000e+00 : f32
    %24 = vector.broadcast %cst_18 : f32 to vector<19x512xf32>
    %25 = arith.maximumf %23, %24 : vector<19x512xf32>
    %26 = arith.truncf %25 : vector<19x512xf32> to vector<19x512xbf16>
    %27 = vector.extract_strided_slice %26 {offsets = [0, 0], sizes = [16, 512], strides = [1, 1]} : vector<19x512xbf16> to vector<16x512xbf16>
    %c0_19 = arith.constant 0 : index
    %c0_20 = arith.constant 0 : index
    %28 = vector.load %arg8[%c0_19, %c0_20] : memref<512x512xbf16, #tpu.memory_space<vmem>>, vector<512x512xbf16>
    %cst_21 = arith.constant dense<0.000000e+00> : vector<16x512xf32>
    %29 = tpu.matmul %27, %28, %cst_21 {dimension_numbers = #tpu.dot_dimension_numbers<[1], [0], [0], [1], [0, 0, 1, 1], [], []>} : vector<16x512xbf16>, vector<512x512xbf16>, vector<16x512xf32> -> vector<16x512xf32>
    %30 = vector.extract_strided_slice %26 {offsets = [3, 0], sizes = [16, 512], strides = [1, 1]} : vector<19x512xbf16> to vector<16x512xbf16>
    %c0_22 = arith.constant 0 : index
    %c0_23 = arith.constant 0 : index
    %31 = vector.load %arg9[%c0_22, %c0_23] : memref<512x512xbf16, #tpu.memory_space<vmem>>, vector<512x512xbf16>
    %cst_24 = arith.constant dense<0.000000e+00> : vector<16x512xf32>
    %32 = tpu.matmul %30, %31, %cst_24 {dimension_numbers = #tpu.dot_dimension_numbers<[1], [0], [0], [1], [0, 0, 1, 1], [], []>} : vector<16x512xbf16>, vector<512x512xbf16>, vector<16x512xf32> -> vector<16x512xf32>
    %33 = arith.addf %29, %32 : vector<16x512xf32>
    %c0_25 = arith.constant 0 : index
    %c0_26 = arith.constant 0 : index
    %34 = vector.load %arg10[%c0_25, %c0_26] : memref<1x512xf32, #tpu.memory_space<vmem>>, vector<1x512xf32>
    %35 = vector.broadcast %34 : vector<1x512xf32> to vector<16x512xf32>
    %36 = arith.addf %33, %35 : vector<16x512xf32>
    %cst_27 = arith.constant 0.000000e+00 : f32
    %37 = vector.broadcast %cst_27 : f32 to vector<16x512xf32>
    %38 = arith.maximumf %36, %37 : vector<16x512xf32>
    %39 = arith.truncf %38 : vector<16x512xf32> to vector<16x512xbf16>
    %c0_28 = arith.constant 0 : index
    %c0_29 = arith.constant 0 : index
    %40 = vector.load %arg11[%c0_28, %c0_29] : memref<512x512xbf16, #tpu.memory_space<vmem>>, vector<512x512xbf16>
    %cst_30 = arith.constant dense<0.000000e+00> : vector<16x512xf32>
    %41 = tpu.matmul %39, %40, %cst_30 {dimension_numbers = #tpu.dot_dimension_numbers<[1], [0], [0], [1], [0, 0, 1, 1], [], []>} : vector<16x512xbf16>, vector<512x512xbf16>, vector<16x512xf32> -> vector<16x512xf32>
    %c0_31 = arith.constant 0 : index
    %c0_32 = arith.constant 0 : index
    %42 = vector.load %arg12[%c0_31, %c0_32] : memref<1x512xf32, #tpu.memory_space<vmem>>, vector<1x512xf32>
    %43 = vector.broadcast %42 : vector<1x512xf32> to vector<16x512xf32>
    %44 = arith.addf %41, %43 : vector<16x512xf32>
    %cst_33 = arith.constant 0.000000e+00 : f32
    %45 = vector.broadcast %cst_33 : f32 to vector<16x512xf32>
    %46 = arith.maximumf %44, %45 : vector<16x512xf32>
    %47 = arith.truncf %46 : vector<16x512xf32> to vector<16x512xbf16>
    %c0_34 = arith.constant 0 : index
    %c0_35 = arith.constant 0 : index
    %48 = vector.load %arg13[%c0_34, %c0_35] : memref<512x1536xbf16, #tpu.memory_space<vmem>>, vector<512x1536xbf16>
    %cst_36 = arith.constant dense<0.000000e+00> : vector<16x1536xf32>
    %49 = tpu.matmul %47, %48, %cst_36 {dimension_numbers = #tpu.dot_dimension_numbers<[1], [0], [0], [1], [0, 0, 1, 1], [], []>} : vector<16x512xbf16>, vector<512x1536xbf16>, vector<16x1536xf32> -> vector<16x1536xf32>
    %c0_37 = arith.constant 0 : index
    %c0_38 = arith.constant 0 : index
    %50 = vector.load %arg14[%c0_37, %c0_38] : memref<1x1536xf32, #tpu.memory_space<vmem>>, vector<1x1536xf32>
    %51 = vector.broadcast %50 : vector<1x1536xf32> to vector<16x1536xf32>
    %52 = arith.addf %49, %51 : vector<16x1536xf32>
    %cst_39 = arith.constant 0.000000e+00 : f32
    %53 = vector.broadcast %cst_39 : f32 to vector<16x1536xf32>
    %54 = arith.maximumf %52, %53 : vector<16x1536xf32>
    %cst_40 = arith.constant dense<0.000000e+00> : vector<1536xf32>
    %55 = vector.multi_reduction <add>, %54, %cst_40 [0] : vector<16x1536xf32> to vector<1536xf32>
    %56 = vector.shape_cast %55 : vector<1536xf32> to vector<1x1536xf32>
    %57 = arith.mulf %54, %54 : vector<16x1536xf32>
    %cst_41 = arith.constant dense<0.000000e+00> : vector<1536xf32>
    %58 = vector.multi_reduction <add>, %57, %cst_41 [0] : vector<16x1536xf32> to vector<1536xf32>
    %59 = vector.shape_cast %58 : vector<1536xf32> to vector<1x1536xf32>
    %cst_42 = arith.constant 6.250000e-02 : f32
    %60 = vector.broadcast %cst_42 : f32 to vector<1x1536xf32>
    %61 = arith.mulf %56, %60 : vector<1x1536xf32>
    %cst_43 = arith.constant 1.600000e+01 : f32
    %62 = vector.broadcast %cst_43 : f32 to vector<1x1536xf32>
    %63 = arith.mulf %62, %61 : vector<1x1536xf32>
    %64 = arith.mulf %63, %61 : vector<1x1536xf32>
    %65 = arith.subf %59, %64 : vector<1x1536xf32>
    %cst_44 = arith.constant 0.0666666701 : f32
    %66 = vector.broadcast %cst_44 : f32 to vector<1x1536xf32>
    %67 = arith.mulf %65, %66 : vector<1x1536xf32>
    %cst_45 = arith.constant 0.000000e+00 : f32
    %68 = vector.broadcast %cst_45 : f32 to vector<1x1536xf32>
    %69 = arith.maximumf %67, %68 : vector<1x1536xf32>
    %70 = math.sqrt %69 : vector<1x1536xf32>
    %71 = arith.truncf %61 : vector<1x1536xf32> to vector<1x1536xbf16>
    %c0_46 = arith.constant 0 : index
    %c0_47 = arith.constant 0 : index
    %72 = vector.load %arg15[%c0_46, %c0_47] : memref<1536x512xbf16, #tpu.memory_space<vmem>>, vector<1536x512xbf16>
    %cst_48 = arith.constant dense<0.000000e+00> : vector<1x512xf32>
    %73 = tpu.matmul %71, %72, %cst_48 {dimension_numbers = #tpu.dot_dimension_numbers<[1], [0], [0], [1], [0, 0, 1, 1], [], []>} : vector<1x1536xbf16>, vector<1536x512xbf16>, vector<1x512xf32> -> vector<1x512xf32>
    %74 = arith.truncf %70 : vector<1x1536xf32> to vector<1x1536xbf16>
    %c0_49 = arith.constant 0 : index
    %c0_50 = arith.constant 0 : index
    %75 = vector.load %arg16[%c0_49, %c0_50] : memref<1536x512xbf16, #tpu.memory_space<vmem>>, vector<1536x512xbf16>
    %cst_51 = arith.constant dense<0.000000e+00> : vector<1x512xf32>
    %76 = tpu.matmul %74, %75, %cst_51 {dimension_numbers = #tpu.dot_dimension_numbers<[1], [0], [0], [1], [0, 0, 1, 1], [], []>} : vector<1x1536xbf16>, vector<1536x512xbf16>, vector<1x512xf32> -> vector<1x512xf32>
    %77 = arith.addf %73, %76 : vector<1x512xf32>
    %c0_52 = arith.constant 0 : index
    %c0_53 = arith.constant 0 : index
    %78 = vector.load %arg17[%c0_52, %c0_53] : memref<1x512xf32, #tpu.memory_space<vmem>>, vector<1x512xf32>
    %79 = arith.addf %77, %78 : vector<1x512xf32>
    %80 = arith.truncf %79 : vector<1x512xf32> to vector<1x512xbf16>
    %c0_54 = arith.constant 0 : index
    %c0_55 = arith.constant 0 : index
    %81 = vector.load %arg18[%c0_54, %c0_55] : memref<512x512xbf16, #tpu.memory_space<vmem>>, vector<512x512xbf16>
    %cst_56 = arith.constant dense<0.000000e+00> : vector<1x512xf32>
    %82 = tpu.matmul %80, %81, %cst_56 {dimension_numbers = #tpu.dot_dimension_numbers<[1], [0], [0], [1], [0, 0, 1, 1], [], []>} : vector<1x512xbf16>, vector<512x512xbf16>, vector<1x512xf32> -> vector<1x512xf32>
    %c0_57 = arith.constant 0 : index
    %c0_58 = arith.constant 0 : index
    %83 = vector.load %arg19[%c0_57, %c0_58] : memref<1x512xf32, #tpu.memory_space<vmem>>, vector<1x512xf32>
    %84 = arith.addf %82, %83 : vector<1x512xf32>
    %85 = arith.truncf %84 : vector<1x512xf32> to vector<1x512xbf16>
    %c0_59 = arith.constant 0 : index
    %c0_60 = arith.constant 0 : index
    %86 = vector.load %arg20[%c0_59, %c0_60] : memref<512x8xbf16, #tpu.memory_space<vmem>>, vector<512x8xbf16>
    %cst_61 = arith.constant dense<0.000000e+00> : vector<1x8xf32>
    %87 = tpu.matmul %85, %86, %cst_61 {dimension_numbers = #tpu.dot_dimension_numbers<[1], [0], [0], [1], [0, 0, 1, 1], [], []>} : vector<1x512xbf16>, vector<512x8xbf16>, vector<1x8xf32> -> vector<1x8xf32>
    %c0_62 = arith.constant 0 : index
    %c0_63 = arith.constant 0 : index
    %88 = vector.load %arg21[%c0_62, %c0_63] : memref<1x8xf32, #tpu.memory_space<vmem>>, vector<1x8xf32>
    %89 = arith.addf %87, %88 : vector<1x8xf32>
    %cst_64 = arith.constant dense<0xFF800000> : vector<1xf32>
    %90 = vector.multi_reduction <maximumf>, %89, %cst_64 [1] : vector<1x8xf32> to vector<1xf32>
    %91 = vector.shape_cast %90 : vector<1xf32> to vector<1x1xf32>
    %92 = vector.broadcast %91 : vector<1x1xf32> to vector<1x8xf32>
    %93 = arith.subf %89, %92 : vector<1x8xf32>
    %94 = math.exp %93 : vector<1x8xf32>
    %cst_65 = arith.constant dense<0.000000e+00> : vector<1xf32>
    %95 = vector.multi_reduction <add>, %94, %cst_65 [1] : vector<1x8xf32> to vector<1xf32>
    %96 = vector.shape_cast %95 : vector<1xf32> to vector<1x1xf32>
    %97 = vector.broadcast %96 : vector<1x1xf32> to vector<1x8xf32>
    %98 = arith.divf %94, %97 : vector<1x8xf32>
    %c0_66 = arith.constant 0 : index
    %c0_67 = arith.constant 0 : index
    %c0_68 = arith.constant 0 : index
    %99 = vector.load %arg22[%c0_66, %c0_67, %c0_68] : memref<1x1x8xf32, #tpu.memory_space<vmem>>, vector<1x1x8xf32>
    %100 = vector.shape_cast %99 : vector<1x1x8xf32> to vector<1x8xf32>
    %101 = vector.shape_cast %89 : vector<1x8xf32> to vector<1x1x8xf32>
    tpu.vector_store %arg22[%c0_66, %c0_67, %c0_68], %101 {strides = array<i32>} : memref<1x1x8xf32, #tpu.memory_space<vmem>>, vector<1x1x8xf32>,
    %c0_69 = arith.constant 0 : index
    %c0_70 = arith.constant 0 : index
    %c0_71 = arith.constant 0 : index
    %102 = vector.load %arg23[%c0_69, %c0_70, %c0_71] : memref<1x1x8xf32, #tpu.memory_space<vmem>>, vector<1x1x8xf32>
    %103 = vector.shape_cast %102 : vector<1x1x8xf32> to vector<1x8xf32>
    %104 = vector.shape_cast %98 : vector<1x8xf32> to vector<1x1x8xf32>
    tpu.vector_store %arg23[%c0_69, %c0_70, %c0_71], %104 {strides = array<i32>} : memref<1x1x8xf32, #tpu.memory_space<vmem>>, vector<1x1x8xf32>,
    %c0_72 = arith.constant 0 : index
    %c0_73 = arith.constant 0 : index
    %c0_74 = arith.constant 0 : index
    %105 = vector.load %arg24[%c0_72, %c0_73, %c0_74] : memref<1x1x512xf32, #tpu.memory_space<vmem>>, vector<1x1x512xf32>
    %106 = vector.shape_cast %105 : vector<1x1x512xf32> to vector<1x512xf32>
    %107 = vector.shape_cast %84 : vector<1x512xf32> to vector<1x1x512xf32>
    tpu.vector_store %arg24[%c0_72, %c0_73, %c0_74], %107 {strides = array<i32>} : memref<1x1x512xf32, #tpu.memory_space<vmem>>, vector<1x1x512xf32>,
    return
  }
  func.func @transform_0(%arg0: i32) -> (i32, i32, i32) {
    %c0_i32 = arith.constant 0 : i32
    %c0_i32_0 = arith.constant 0 : i32
    %c0_i32_1 = arith.constant 0 : i32
    return %arg0, %c0_i32, %c0_i32_0 : i32, i32, i32
  }
  func.func @transform_1(%arg0: i32) -> (i32, i32) {
    %c0_i32 = arith.constant 0 : i32
    %c0_i32_0 = arith.constant 0 : i32
    %c0_i32_1 = arith.constant 0 : i32
    return %c0_i32, %c0_i32_0 : i32, i32
  }
  func.func @transform_2(%arg0: i32) -> (i32, i32) {
    %c0_i32 = arith.constant 0 : i32
    %c0_i32_0 = arith.constant 0 : i32
    %c0_i32_1 = arith.constant 0 : i32
    return %c0_i32, %c0_i32_0 : i32, i32
  }
  func.func @transform_3(%arg0: i32) -> (i32, i32) {
    %c0_i32 = arith.constant 0 : i32
    %c0_i32_0 = arith.constant 0 : i32
    %c0_i32_1 = arith.constant 0 : i32
    return %c0_i32, %c0_i32_0 : i32, i32
  }
  func.func @transform_4(%arg0: i32) -> (i32, i32) {
    %c0_i32 = arith.constant 0 : i32
    %c0_i32_0 = arith.constant 0 : i32
    %c0_i32_1 = arith.constant 0 : i32
    return %c0_i32, %c0_i32_0 : i32, i32
  }
  func.func @transform_5(%arg0: i32) -> (i32, i32) {
    %c0_i32 = arith.constant 0 : i32
    %c0_i32_0 = arith.constant 0 : i32
    %c0_i32_1 = arith.constant 0 : i32
    return %c0_i32, %c0_i32_0 : i32, i32
  }
  func.func @transform_6(%arg0: i32) -> (i32, i32) {
    %c0_i32 = arith.constant 0 : i32
    %c0_i32_0 = arith.constant 0 : i32
    %c0_i32_1 = arith.constant 0 : i32
    return %c0_i32, %c0_i32_0 : i32, i32
  }
  func.func @transform_7(%arg0: i32) -> (i32, i32) {
    %c0_i32 = arith.constant 0 : i32
    %c0_i32_0 = arith.constant 0 : i32
    %c0_i32_1 = arith.constant 0 : i32
    return %c0_i32, %c0_i32_0 : i32, i32
  }
  func.func @transform_8(%arg0: i32) -> (i32, i32) {
    %c0_i32 = arith.constant 0 : i32
    %c0_i32_0 = arith.constant 0 : i32
    %c0_i32_1 = arith.constant 0 : i32
    return %c0_i32, %c0_i32_0 : i32, i32
  }
  func.func @transform_9(%arg0: i32) -> (i32, i32) {
    %c0_i32 = arith.constant 0 : i32
    %c0_i32_0 = arith.constant 0 : i32
    %c0_i32_1 = arith.constant 0 : i32
    return %c0_i32, %c0_i32_0 : i32, i32
  }
  func.func @transform_10(%arg0: i32) -> (i32, i32) {
    %c0_i32 = arith.constant 0 : i32
    %c0_i32_0 = arith.constant 0 : i32
    %c0_i32_1 = arith.constant 0 : i32
    return %c0_i32, %c0_i32_0 : i32, i32
  }
  func.func @transform_11(%arg0: i32) -> (i32, i32) {
    %c0_i32 = arith.constant 0 : i32
    %c0_i32_0 = arith.constant 0 : i32
    %c0_i32_1 = arith.constant 0 : i32
    return %c0_i32, %c0_i32_0 : i32, i32
  }
  func.func @transform_12(%arg0: i32) -> (i32, i32) {
    %c0_i32 = arith.constant 0 : i32
    %c0_i32_0 = arith.constant 0 : i32
    %c0_i32_1 = arith.constant 0 : i32
    return %c0_i32, %c0_i32_0 : i32, i32
  }
  func.func @transform_13(%arg0: i32) -> (i32, i32) {
    %c0_i32 = arith.constant 0 : i32
    %c0_i32_0 = arith.constant 0 : i32
    %c0_i32_1 = arith.constant 0 : i32
    return %c0_i32, %c0_i32_0 : i32, i32
  }
  func.func @transform_14(%arg0: i32) -> (i32, i32) {
    %c0_i32 = arith.constant 0 : i32
    %c0_i32_0 = arith.constant 0 : i32
    %c0_i32_1 = arith.constant 0 : i32
    return %c0_i32, %c0_i32_0 : i32, i32
  }
  func.func @transform_15(%arg0: i32) -> (i32, i32) {
    %c0_i32 = arith.constant 0 : i32
    %c0_i32_0 = arith.constant 0 : i32
    %c0_i32_1 = arith.constant 0 : i32
    return %c0_i32, %c0_i32_0 : i32, i32
  }
  func.func @transform_16(%arg0: i32) -> (i32, i32) {
    %c0_i32 = arith.constant 0 : i32
    %c0_i32_0 = arith.constant 0 : i32
    %c0_i32_1 = arith.constant 0 : i32
    return %c0_i32, %c0_i32_0 : i32, i32
  }
  func.func @transform_17(%arg0: i32) -> (i32, i32) {
    %c0_i32 = arith.constant 0 : i32
    %c0_i32_0 = arith.constant 0 : i32
    %c0_i32_1 = arith.constant 0 : i32
    return %c0_i32, %c0_i32_0 : i32, i32
  }
  func.func @transform_18(%arg0: i32) -> (i32, i32) {
    %c0_i32 = arith.constant 0 : i32
    %c0_i32_0 = arith.constant 0 : i32
    %c0_i32_1 = arith.constant 0 : i32
    return %c0_i32, %c0_i32_0 : i32, i32
  }
  func.func @transform_19(%arg0: i32) -> (i32, i32) {
    %c0_i32 = arith.constant 0 : i32
    %c0_i32_0 = arith.constant 0 : i32
    %c0_i32_1 = arith.constant 0 : i32
    return %c0_i32, %c0_i32_0 : i32, i32
  }
  func.func @transform_20(%arg0: i32) -> (i32, i32) {
    %c0_i32 = arith.constant 0 : i32
    %c0_i32_0 = arith.constant 0 : i32
    %c0_i32_1 = arith.constant 0 : i32
    return %c0_i32, %c0_i32_0 : i32, i32
  }
  func.func @transform_21(%arg0: i32) -> (i32, i32, i32) {
    %c0_i32 = arith.constant 0 : i32
    %c0_i32_0 = arith.constant 0 : i32
    %c0_i32_1 = arith.constant 0 : i32
    return %arg0, %c0_i32, %c0_i32_0 : i32, i32, i32
  }
  func.func @transform_22(%arg0: i32) -> (i32, i32, i32) {
    %c0_i32 = arith.constant 0 : i32
    %c0_i32_0 = arith.constant 0 : i32
    %c0_i32_1 = arith.constant 0 : i32
    return %arg0, %c0_i32, %c0_i32_0 : i32, i32, i32
  }
  func.func @transform_23(%arg0: i32) -> (i32, i32, i32) {
    %c0_i32 = arith.constant 0 : i32
    %c0_i32_0 = arith.constant 0 : i32
    %c0_i32_1 = arith.constant 0 : i32
    return %arg0, %c0_i32, %c0_i32_0 : i32, i32, i32
  }
}

</mosaic_0001>

<bundles_post_ra>
// kernel: model_forward.1
= control target key start
LH: loop header
LB: loop body
LE: loop exit
PB: predicated region body
PF: predicated region fallthrough
CT: control target
= control target key end

     0   :  { %s30665_s0 = inlined_call_operand.vmem [shape: bf16[2,23,256], index: 0, kind: input, shape index: {}]   ;;  %s30666_s1 = inlined_call_operand.vmem [shape: bf16[256,512], index: 1, kind: input, shape index: {}]   ;;  %s30667_s2 = inlined_call_operand.vmem [shape: f32[1,512], index: 2, kind: input, shape index: {}]   ;;  %s30668_s3 = inlined_call_operand.vmem [shape: bf16[512,512], index: 3, kind: input, shape index: {}]   ;;  %s30669_s4 = inlined_call_operand.vmem [shape: bf16[512,512], index: 4, kind: input, shape index: {}]   ;;  %s30670_s5 = inlined_call_operand.vmem [shape: bf16[512,512], index: 5, kind: input, shape index: {}]   ;;  %s30671_s6 = inlined_call_operand.vmem [shape: f32[1,512], index: 6, kind: input, shape index: {}]   ;;  %s30672_s7 = inlined_call_operand.vmem [shape: bf16[512,512], index: 7, kind: input, shape index: {}]   ;;  %s30673_s8 = inlined_call_operand.vmem [shape: bf16[512,512], index: 8, kind: input, shape index: {}]   ;;  %s30674_s9 = inlined_call_operand.vmem [shape: f32[1,512], index: 9, kind: input, shape index: {}]   ;;  %s30675_s10 = inlined_call_operand.vmem [shape: bf16[512,512], index: 10, kind: input, shape index: {}]   ;;  %s30676_s11 = inlined_call_operand.vmem [shape: f32[1,512], index: 11, kind: input, shape index: {}]   ;;  %s30677_s12 = inlined_call_operand.vmem [shape: bf16[512,1536], index: 12, kind: input, shape index: {}]   ;;  %s30678_s13 = inlined_call_operand.vmem [shape: f32[1,1536], index: 13, kind: input, shape index: {}]   ;;  %s30679_s14 = inlined_call_operand.vmem [shape: bf16[1536,512], index: 14, kind: input, shape index: {}]   ;;  %s30680_s15 = inlined_call_operand.vmem [shape: bf16[1536,512], index: 15, kind: input, shape index: {}]   ;;  %s30681_s16 = inlined_call_operand.vmem [shape: f32[1,512], index: 16, kind: input, shape index: {}]   ;;  %s30682_s17 = inlined_call_operand.vmem [shape: bf16[512,512], index: 17, kind: input, shape index: {}]   ;;  %s30683_s18 = inlined_call_operand.vmem [shape: f32[1,512], index: 18, kind: input, shape index: {}]   ;;  %s30684_s19 = inlined_call_operand.vmem [shape: bf16[512,8], index: 19, kind: input, shape index: {}]   ;;  %s30685_s20 = inlined_call_operand.vmem [shape: f32[1,8], index: 20, kind: input, shape index: {}]   ;;  %s30686_s21 = inlined_call_operand.hbm [shape: f32[2,1,8], index: 21, kind: output, shape index: {0}]   ;;  %s30687_s22 = inlined_call_operand.hbm [shape: f32[2,1,8], index: 22, kind: output, shape index: {1}]   ;;  %s30688_s23 = inlined_call_operand.vmem [shape: f32[2,1,512], index: 23, kind: output, shape index: {2}]  }
   0x1   :  { %30707 = sst [smem:[#allocation15_spill]] %s30665_s0 }
   0x2   :  { %30708 = sst [smem:[#allocation16_spill]] %s30666_s1 }
   0x3   :  { %30709 = sst [smem:[#allocation17_spill]] %s30667_s2 }
   0x4   :  { %30710 = sst [smem:[#allocation18_spill]] %s30668_s3 }
   0x5   :  { %30711 = sst [smem:[#allocation19_spill]] %s30669_s4 }
   0x6   :  { %30712 = sst [smem:[#allocation20_spill]] %s30670_s5 }
   0x7   :  { %30713 = sst [smem:[#allocation21_spill]] %s30671_s6 }
   0x8   :  { %30714 = sst [smem:[#allocation22_spill]] %s30672_s7 }
   0x9   :  { %30715 = sst [smem:[#allocation23_spill]] %s30673_s8 }
   0xa   :  { %30716 = sst [smem:[#allocation24_spill]] %s30674_s9 }
   0xb   :  { %30717 = sst [smem:[#allocation25_spill]] %s30675_s10 }
   0xc   :  { %30718 = sst [smem:[#allocation26_spill]] %s30676_s11 }
   0xd   :  { %30719 = sst [smem:[#allocation27_spill]] %s30686_s21 }
   0xe   :  { %30720 = sst [smem:[#allocation28_spill]] %s30687_s22 }
   0xf   :  { %29 = vsyncpa [#allocation3], 0 }
  0x10   :  { %31 = vsyncpa [#allocation3 + $0x1], 0 }
  0x11   :  { %32 = vsyncpa [#allocation5], 0 }
  0x12   :  { %34 = vsyncpa [#allocation5 + $0x1], 0  ;;  %s23364_s4 = smov 0   ;;  %s23366_s30 = smov 0  }
  0x13   :  { %s23368_s24 = smov 0   ;;  %s23370_s25 = smov 0  }
  0x14 LB: > { %30721 = sst [smem:[#allocation8_spill]] %s23227_s4  ;;  %s23385_s5 = sadd.s32 4294967295, %s23239_s25   ;;  %s23239_s25 = sphi %s23370_s25, %s30751_s25   ;;  %s23235_s24 = sphi %s23368_s24, %s30753_s24   ;;  %s23231_s30 = sphi %s23366_s30, %s30755_s30   ;;  %s23227_s4 = sphi %s23364_s4, %s30754_s4  }
  0x15   : > { %30722 = sst [smem:[#allocation9_spill]] %s23235_s24  ;;  %s17667_s1 = sadd.s32 4294967294, %s23239_s25  }
  0x16   : > { %30723 = sst [smem:[#allocation10_spill]] %s23239_s25  ;;  %s23389_s26 = sadd.s32 1, %s23239_s25  }
  0x17   : > { %30724 = sst [smem:[#allocation11_spill]] %s23389_s26  ;;  %s493_s2 = sadd.s32 1, %s23235_s24 }
  0x18   : > { %s490_s6 = ssub.s32 %s23239_s25, %s23389_s26  ;;  %p503_p0 = scmp.ne.s32.totalorder %s23235_s24, %s23231_s30 }
  0x19   : > { %p491_p1 = scmp.eq.s32.totalorder %s490_s6, 0  ;;  %p504_p2 = scmp.eq.s32.totalorder %s23385_s5, 1 }
  0x1a   : > { %p509_p3 = scmp.ne.s32.totalorder %s23231_s30, %s23227_s4  ;;  %p510_p4 = scmp.eq.s32.totalorder %s17667_s1, 1 }
  0x1b   : > { %s23400_s27 = scalar_select %p491_p1, %s23235_s24, %s493_s2  }
  0x1c   : > { %p23402_p5 = por %p504_p2, %p503_p0  ;;  %p23406_p6 = por %p510_p4, %p509_p3 }
  0x1d   : > { %30725 = sst [smem:[#allocation12_spill]] %s23400_s27  ;;  %p17670_p7 = scmp.ge.s32.totalorder %s23239_s25, 1 }
  0x1e   : > { %s30726_s7 = scalar_select %p23402_p5, 1, 0 }
  0x1f   : > { %s30728_s28 = scalar_select %p23406_p6, 1, 0 }
  0x20   : > { %30727 = sst [smem:[#allocation13_spill]] %s30726_s7  ;;  %p648_p8 = scmp.lt.s32.totalorder %s23239_s25, 3 }
  0x21   : > { %30729 = sst [smem:[#allocation14_spill]] %s30728_s28 }
  0x22   : > { %p649_p9 = pnand %p17670_p7, %p648_p8 }
  0x23   : > { %s30730_s0 = sld [smem:[#allocation16_spill]] (!%p649_p9)  ;;  %p719_p10 = scmp.lt.s32.totalorder (!%p649_p9), %s23385_s5, 1 }
  0x24   : > { %652 = sbr.rel (%p649_p9) target bundleno = 3670 (0xe56), region = 104  ;;  %s30731_s21 = sld [smem:[#allocation15_spill]] (!%p649_p9) }
  0x25   : > { %s30732_s26 = sld [smem:[#allocation19_spill]] (!%p649_p9) }
  0x26   : > { %s30733_s4 = sld [smem:[#allocation17_spill]] (!%p649_p9) }
  0x27   : > { %s30734_s25 = sld [smem:[#allocation18_spill]] (!%p649_p9) }
  0x28   : > { %s30738_s8 = sld [smem:[#allocation23_spill]] (!%p649_p9) }
  0x29   : > { %v19915_v0 = vld [vmem:[%s30730_s0 + $0xe4] ss:$16 sps:$4 sm:$0xff]   ;;  %v19917_v1 = vld [vmem:[%s30730_s0 + $0xec] ss:$16 sps:$4 sm:$0xff]   ;;  %v19919_v2 = vld [vmem:[%s30730_s0 + $0xe0] ss:$16 sps:$4 sm:$0xff]  }
  0x2a   : > { %1155 = vmatprep.subr.bf16.mxu0 %v19915_v0  ;;  %v19920_v3 = vld [vmem:[%s30730_s0 + $0xe8] ss:$16 sps:$4 sm:$0xff]   ;;  %1206 = vmatprep.subr.bf16.mxu1 %v19917_v1  ;;  %v19921_v4 = vld [vmem:[%s30730_s0 + $0xc4] ss:$16 sps:$4 sm:$0xff]   ;;  %v19923_v5 = vld [vmem:[%s30730_s0 + $0xcc] ss:$16 sps:$4 sm:$0xff]  }
  0x2b   : > { %1156 = vmatpush1.bf16.msra.mxu0 %v19919_v2  ;;  %1207 = vmatpush1.bf16.msra.mxu1 %v19920_v3  ;;  %v19925_v6 = vld [vmem:[%s30730_s0 + $0xc0] ss:$16 sps:$4 sm:$0xff]   ;;  %v19926_v7 = vld [vmem:[%s30730_s0 + $0xc8] ss:$16 sps:$4 sm:$0xff]   ;;  %v19927_v8 = vld [vmem:[%s30730_s0 + $0xa4] ss:$16 sps:$4 sm:$0xff]  }
  0x2c   : > { %1157 = vmatprep.subr.bf16.mxu0 %v19921_v4  ;;  %1208 = vmatprep.subr.bf16.mxu1 %v19923_v5  ;;  %v19929_v9 = vld [vmem:[%s30730_s0 + $0xac] ss:$16 sps:$4 sm:$0xff]   ;;  %v19931_v10 = vld [vmem:[%s30730_s0 + $0xa0] ss:$16 sps:$4 sm:$0xff]   ;;  %v19932_v11 = vld [vmem:[%s30730_s0 + $0xa8] ss:$16 sps:$4 sm:$0xff]  }
  0x2d   : > { %v19933_v12 = vld [vmem:[%s30730_s0 + $0x84] ss:$16 sps:$4 sm:$0xff]   ;;  %v19935_v13 = vld [vmem:[%s30730_s0 + $0x8c] ss:$16 sps:$4 sm:$0xff]   ;;  %v19937_v14 = vld [vmem:[%s30730_s0 + $0x80] ss:$16 sps:$4 sm:$0xff]   ;;  %s30735_s2 = smov %s30734_s25 }
  0x2e   : > { %v19938_v15 = vld [vmem:[%s30730_s0 + $0x88] ss:$16 sps:$4 sm:$0xff]   ;;  %v19939_v16 = vld [vmem:[%s30730_s0 + $0x64] ss:$16 sps:$4 sm:$0xff]   ;;  %v19941_v17 = vld [vmem:[%s30730_s0 + $0x6c] ss:$16 sps:$4 sm:$0xff]  }
  0x2f   : > { %1158 = vmatpush1.bf16.msra.mxu0 %v19925_v6  ;;  %1209 = vmatpush1.bf16.msra.mxu1 %v19926_v7  ;;  %v19943_v18 = vld [vmem:[%s30730_s0 + $0x60] ss:$16 sps:$4 sm:$0xff]   ;;  %v19944_v19 = vld [vmem:[%s30730_s0 + $0x68] ss:$16 sps:$4 sm:$0xff]   ;;  %v19945_v20 = vld [vmem:[%s30730_s0 + $0x44] ss:$16 sps:$4 sm:$0xff]  }
  0x30   : > { %1159 = vmatprep.subr.bf16.mxu0 %v19927_v8  ;;  %1210 = vmatprep.subr.bf16.mxu1 %v19929_v9  ;;  %v19947_v21 = vld [vmem:[%s30730_s0 + $0x4c] ss:$16 sps:$4 sm:$0xff]   ;;  %v19949_v22 = vld [vmem:[%s30730_s0 + $0x40] ss:$16 sps:$4 sm:$0xff]   ;;  %v19950_v23 = vld [vmem:[%s30730_s0 + $0x48] ss:$16 sps:$4 sm:$0xff]  }
  0x31   : > { %v19951_v24 = vld [vmem:[%s30730_s0 + $0x24] ss:$16 sps:$4 sm:$0xff]   ;;  %v19953_v25 = vld [vmem:[%s30730_s0 + $0x2c] ss:$16 sps:$4 sm:$0xff]   ;;  %v19955_v26 = vld [vmem:[%s30730_s0 + $0x20] ss:$16 sps:$4 sm:$0xff]  }
  0x32   : > { %v19956_v27 = vld [vmem:[%s30730_s0 + $0x28] ss:$16 sps:$4 sm:$0xff]   ;;  %v19957_v28 = vld [vmem:[%s30730_s0 + $0x4] ss:$16 sps:$4 sm:$0xff]   ;;  %v19959_v29 = vld [vmem:[%s30730_s0 + $0xc] ss:$16 sps:$4 sm:$0xff]  }
  0x33   : > { %1160 = vmatpush1.bf16.msra.mxu0 %v19931_v10  ;;  %1211 = vmatpush1.bf16.msra.mxu1 %v19932_v11  ;;  %v19961_v30 = vld [vmem:[%s30730_s0] ss:$16 sps:$4 sm:$0xff]   ;;  %v19962_v31 = vld [vmem:[%s30730_s0 + $0x8] ss:$16 sps:$4 sm:$0xff]   ;;  %v19963_v32 = vld [vmem:[%s30730_s0 + $0x1e4] ss:$16 sps:$4 sm:$0xff]  }
  0x34   : > { %1161 = vmatprep.subr.bf16.mxu0 %v19933_v12  ;;  %1212 = vmatprep.subr.bf16.mxu1 %v19935_v13  ;;  %v19965_v33 = vld [vmem:[%s30730_s0 + $0x1ec] ss:$16 sps:$4 sm:$0xff]   ;;  %v19967_v34 = vld [vmem:[%s30730_s0 + $0x1e0] ss:$16 sps:$4 sm:$0xff]   ;;  %v19968_v35 = vld [vmem:[%s30730_s0 + $0x1e8] ss:$16 sps:$4 sm:$0xff]  }
  0x35   : > { %v19969_v36 = vld [vmem:[%s30730_s0 + $0x1c4] ss:$16 sps:$4 sm:$0xff]   ;;  %s23525_s27 = scalar_select %p719_p10, %s23385_s5, 1  ;;  %v19971_v37 = vld [vmem:[%s30730_s0 + $0x1cc] ss:$16 sps:$4 sm:$0xff]   ;;  %vm1541_vm0 = vcmask 1046528  }
  0x36   : > { %v19973_v38 = vld [vmem:[%s30730_s0 + $0x1c0] ss:$16 sps:$4 sm:$0xff]   ;;  %v19974_v39 = vld [vmem:[%s30730_s0 + $0x1c8] ss:$16 sps:$4 sm:$0xff]   ;;  %v19975_v40 = vld [vmem:[%s30730_s0 + $0x1a4] ss:$16 sps:$4 sm:$0xff]  }
  0x37   : > { %1162 = vmatpush1.bf16.msra.mxu0 %v19937_v14  ;;  %1213 = vmatpush1.bf16.msra.mxu1 %v19938_v15  ;;  %s19869_s1 = smul.u32 24, %s23525_s27  ;;  %v19977_v41 = vld [vmem:[%s30730_s0 + $0x1ac] ss:$16 sps:$4 sm:$0xff]   ;;  %v19979_v42 = vld [vmem:[%s30730_s0 + $0x1a0] ss:$16 sps:$4 sm:$0xff]   ;;  %vm3378_vm1 = vcmask 1045504  }
  0x38   : > { %1163 = vmatprep.subr.bf16.mxu0 %v19939_v16  ;;  %1214 = vmatprep.subr.bf16.mxu1 %v19941_v17  ;;  %v19980_v43 = vld [vmem:[%s30730_s0 + $0x1a8] ss:$16 sps:$4 sm:$0xff]   ;;  %v19981_v44 = vld [vmem:[%s30730_s0 + $0x184] ss:$16 sps:$4 sm:$0xff]   ;;  %v19983_v45 = vld [vmem:[%s30730_s0 + $0x18c] ss:$16 sps:$4 sm:$0xff]  }
  0x39   : > { %s23555_s7 = scalar_lea.vmem %s30731_s21, %s19869_s1  ;;  %v19985_v46 = vld [vmem:[%s30730_s0 + $0x180] ss:$16 sps:$4 sm:$0xff]   ;;  %v19986_v48 = vld [vmem:[%s30730_s0 + $0x188] ss:$16 sps:$4 sm:$0xff]   ;;  %v19987_v49 = vld [vmem:[%s30730_s0 + $0x164] ss:$16 sps:$4 sm:$0xff]  }
  0x3a   : > { %v20013_v47 = vld [vmem:[%s23555_s7 + $0x4] ss:$8 sps:$4 sm:$0xff]   ;;  %v19991_v51 = vld [vmem:[%s30730_s0 + $0x160] ss:$16 sps:$4 sm:$0xff]   ;;  %v19992_v52 = vld [vmem:[%s30730_s0 + $0x168] ss:$16 sps:$4 sm:$0xff]  }
  0x3b   : > { %1164 = vmatpush1.bf16.msra.mxu0 %v19943_v18  ;;  %1215 = vmatpush1.bf16.msra.mxu1 %v19944_v19  ;;  %v19989_v50 = vld [vmem:[%s30730_s0 + $0x16c] ss:$16 sps:$4 sm:$0xff]   ;;  %v19993_v53 = vld [vmem:[%s30730_s0 + $0x144] ss:$16 sps:$4 sm:$0xff]   ;;  %v19997_v55 = vld [vmem:[%s30730_s0 + $0x140] ss:$16 sps:$4 sm:$0xff]  }
  0x3c   : > { %1165 = vmatprep.subr.bf16.mxu0 %v19945_v20  ;;  %1216 = vmatprep.subr.bf16.mxu1 %v19947_v21  ;;  %v19995_v54 = vld [vmem:[%s30730_s0 + $0x14c] ss:$16 sps:$4 sm:$0xff]   ;;  %v19998_v56 = vld [vmem:[%s30730_s0 + $0x148] ss:$16 sps:$4 sm:$0xff]   ;;  %v19999_v57 = vld [vmem:[%s30730_s0 + $0x124] ss:$16 sps:$4 sm:$0xff]  }
  0x3d   : > { %1187 = vmatprep.mubr.bf16.mxu0 %v20013_v47  ;;  %1238 = vmatprep.mubr.bf16.mxu1 %v20013_v47  ;;  %v20001_v58 = vld [vmem:[%s30730_s0 + $0x12c] ss:$16 sps:$4 sm:$0xff]   ;;  %v20003_v59 = vld [vmem:[%s30730_s0 + $0x120] ss:$16 sps:$4 sm:$0xff]   ;;  %v20004_v60 = vld [vmem:[%s30730_s0 + $0x128] ss:$16 sps:$4 sm:$0xff]  }
  0x3e   : > { %v20005_v61 = vld [vmem:[%s30730_s0 + $0x104] ss:$16 sps:$4 sm:$0xff]   ;;  %v20007_v62 = vld [vmem:[%s30730_s0 + $0x10c] ss:$16 sps:$4 sm:$0xff]   ;;  %v20009_v63 = vld [vmem:[%s30730_s0 + $0x100] ss:$16 sps:$4 sm:$0xff]  }
  0x3f   : > { %1166 = vmatpush1.bf16.msra.mxu0 %v19949_v22  ;;  %1217 = vmatpush1.bf16.msra.mxu1 %v19950_v23  ;;  %v20010_v0 = vld [vmem:[%s30730_s0 + $0x108] ss:$16 sps:$4 sm:$0xff]   ;;  %v731_v1 = vld [vmem:[%s23555_s7 + $0x10] sm:$0xff]  ;;  %s30739_s29 = sld [smem:[#allocation21_spill]]  ;;  %vm4565_vm2 = vsmask.f32 6400 }
  0x40   : > { %1167 = vmatprep.subr.bf16.mxu0 %v19951_v24  ;;  %1218 = vmatprep.subr.bf16.mxu1 %v19953_v25  ;;  %v20018_v2 = vld [vmem:[%s30732_s26 + $0xe4] ss:$16 sps:$4 sm:$0xff]   ;;  %v20011_v4 = vld [vmem:[%s23555_s7] ss:$8 sps:$4 sm:$0xff]   ;;  %v17676_v5 = vcombine.high %v731_v1, %v731_v1  ;;  %v17675_v14 = vcombine.low %v731_v1, %v731_v1  ;;  %s30740_s28 = sld [smem:[#allocation22_spill]]  ;;  %s30603_s0 = sand.u32 1, %s23231_s30  }
  0x41   : > { %v20021_v3 = vld [vmem:[%s30732_s26 + $0x2e4] ss:$16 sps:$4 sm:$0xff]   ;;  %v20016_v6 = vld [vmem:[%s30732_s26 + $0xe0] ss:$16 sps:$4 sm:$0xff]   ;;  %s30741_s10 = sld [smem:[#allocation25_spill]]  ;;  %s706_s7 = scalar_lea.vmem [#allocation2], %s30603_s0 }
  0x42   : > { %v20019_v7 = vld [vmem:[%s30732_s26 + $0x2e0] ss:$16 sps:$4 sm:$0xff]   ;;  %v20024_v8 = vld [vmem:[%s30732_s26 + $0xc4] ss:$16 sps:$4 sm:$0xff]   ;;  %s30742_s9 = sld [smem:[#allocation24_spill]] }
  0x43   : > { %1168 = vmatpush1.bf16.msra.mxu0 %v19955_v26  ;;  %1219 = vmatpush1.bf16.msra.mxu1 %v19956_v27  ;;  %v20027_v9 = vld [vmem:[%s30732_s26 + $0x2c4] ss:$16 sps:$4 sm:$0xff]   ;;  %v20022_v10 = vld [vmem:[%s30732_s26 + $0xc0] ss:$16 sps:$4 sm:$0xff]   ;;  %s30743_s11 = sld [smem:[#allocation26_spill]] }
  0x44   : > { %1169 = vmatprep.subr.bf16.mxu0 %v19957_v28  ;;  %1220 = vmatprep.subr.bf16.mxu1 %v19959_v29  ;;  %v20025_v11 = vld [vmem:[%s30732_s26 + $0x2c0] ss:$16 sps:$4 sm:$0xff]   ;;  %v20030_v12 = vld [vmem:[%s30732_s26 + $0xa4] ss:$16 sps:$4 sm:$0xff]   ;;  %s30745_s3 = sld [smem:[#allocation27_spill]] }
  0x45   : > { %v20033_v13 = vld [vmem:[%s30732_s26 + $0x2a4] ss:$16 sps:$4 sm:$0xff]   ;;  %v20028_v15 = vld [vmem:[%s30732_s26 + $0xa0] ss:$16 sps:$4 sm:$0xff]  }
  0x46   : > { %v20031_v16 = vld [vmem:[%s30732_s26 + $0x2a0] ss:$16 sps:$4 sm:$0xff]   ;;  %v20036_v17 = vld [vmem:[%s30732_s26 + $0x84] ss:$16 sps:$4 sm:$0xff]  }
  0x47   : > { %1170 = vmatpush1.bf16.msra.mxu0 %v19961_v30  ;;  %1221 = vmatpush1.bf16.msra.mxu1 %v19962_v31  ;;  %v20039_v18 = vld [vmem:[%s30732_s26 + $0x284] ss:$16 sps:$4 sm:$0xff]   ;;  %v20034_v19 = vld [vmem:[%s30732_s26 + $0x80] ss:$16 sps:$4 sm:$0xff]  }
  0x48   : > { %1171 = vmatprep.subr.bf16.mxu0 %v19963_v32  ;;  %1222 = vmatprep.subr.bf16.mxu1 %v19965_v33  ;;  %v20037_v20 = vld [vmem:[%s30732_s26 + $0x280] ss:$16 sps:$4 sm:$0xff]   ;;  %v20042_v21 = vld [vmem:[%s30732_s26 + $0x64] ss:$16 sps:$4 sm:$0xff]  }
  0x49   : > { %v20045_v22 = vld [vmem:[%s30732_s26 + $0x264] ss:$16 sps:$4 sm:$0xff]   ;;  %v20040_v23 = vld [vmem:[%s30732_s26 + $0x60] ss:$16 sps:$4 sm:$0xff]  }
  0x4a   : > { %v20043_v24 = vld [vmem:[%s30732_s26 + $0x260] ss:$16 sps:$4 sm:$0xff]   ;;  %v20048_v25 = vld [vmem:[%s30732_s26 + $0x44] ss:$16 sps:$4 sm:$0xff]  }
  0x4b   : > { %1172 = vmatpush2.bf16.msra.mxu0 %v19967_v34  ;;  %1223 = vmatpush2.bf16.msra.mxu1 %v19968_v35  ;;  %v20051_v26 = vld [vmem:[%s30732_s26 + $0x244] ss:$16 sps:$4 sm:$0xff]   ;;  %v20046_v27 = vld [vmem:[%s30732_s26 + $0x40] ss:$16 sps:$4 sm:$0xff]  }
  0x4c   : > { %1173 = vmatprep.subr.bf16.mxu0 %v19969_v36  ;;  %1224 = vmatprep.subr.bf16.mxu1 %v19971_v37  ;;  %v20049_v28 = vld [vmem:[%s30732_s26 + $0x240] ss:$16 sps:$4 sm:$0xff]   ;;  %v20054_v29 = vld [vmem:[%s30732_s26 + $0x24] ss:$16 sps:$4 sm:$0xff]  }
  0x4d   : > { %v20057_v30 = vld [vmem:[%s30732_s26 + $0x224] ss:$16 sps:$4 sm:$0xff]   ;;  %v20052_v31 = vld [vmem:[%s30732_s26 + $0x20] ss:$16 sps:$4 sm:$0xff]  }
  0x4e   : > { %v20055_v32 = vld [vmem:[%s30732_s26 + $0x220] ss:$16 sps:$4 sm:$0xff]   ;;  %v20060_v33 = vld [vmem:[%s30732_s26 + $0x4] ss:$16 sps:$4 sm:$0xff]  }
  0x4f   : > { %1174 = vmatpush2.bf16.msra.mxu0 %v19973_v38  ;;  %1225 = vmatpush2.bf16.msra.mxu1 %v19974_v39  ;;  %v20063_v34 = vld [vmem:[%s30732_s26 + $0x204] ss:$16 sps:$4 sm:$0xff]   ;;  %v20058_v35 = vld [vmem:[%s30732_s26] ss:$16 sps:$4 sm:$0xff]  }
  0x50   : > { %1175 = vmatprep.subr.bf16.mxu0 %v19975_v40  ;;  %1226 = vmatprep.subr.bf16.mxu1 %v19977_v41  ;;  %v20061_v36 = vld [vmem:[%s30732_s26 + $0x200] ss:$16 sps:$4 sm:$0xff]   ;;  %v20066_v37 = vld [vmem:[%s30732_s26 + $0x1e4] ss:$16 sps:$4 sm:$0xff]  }
  0x51   : > { %v20069_v38 = vld [vmem:[%s30732_s26 + $0x3e4] ss:$16 sps:$4 sm:$0xff]   ;;  %v20064_v39 = vld [vmem:[%s30732_s26 + $0x1e0] ss:$16 sps:$4 sm:$0xff]  }
  0x52   : > { %v20067_v40 = vld [vmem:[%s30732_s26 + $0x3e0] ss:$16 sps:$4 sm:$0xff]   ;;  %v20072_v41 = vld [vmem:[%s30732_s26 + $0x1c4] ss:$16 sps:$4 sm:$0xff]  }
  0x53   : > { %1176 = vmatpush2.bf16.msra.mxu0 %v19979_v42  ;;  %1227 = vmatpush2.bf16.msra.mxu1 %v19980_v43  ;;  %v20075_v42 = vld [vmem:[%s30732_s26 + $0x3c4] ss:$16 sps:$4 sm:$0xff]   ;;  %v20070_v43 = vld [vmem:[%s30732_s26 + $0x1c0] ss:$16 sps:$4 sm:$0xff]  }
  0x54   : > { %1177 = vmatprep.subr.bf16.mxu0 %v19981_v44  ;;  %1228 = vmatprep.subr.bf16.mxu1 %v19983_v45  ;;  %v20073_v44 = vld [vmem:[%s30732_s26 + $0x3c0] ss:$16 sps:$4 sm:$0xff]   ;;  %v20078_v45 = vld [vmem:[%s30732_s26 + $0x1a4] ss:$16 sps:$4 sm:$0xff]  }
  0x55   : > { %v20076_v47 = vld [vmem:[%s30732_s26 + $0x1a0] ss:$16 sps:$4 sm:$0xff]   ;;  %v20108_v1 = vld [vmem:[%s30732_s26 + $0x104] ss:$16 sps:$4 sm:$0xff]  }
  0x57   : > { %1178 = vmatpush2.bf16.msra.mxu0 %v19985_v46  ;;  %1229 = vmatpush2.bf16.msra.mxu1 %v19986_v48  ;;  %v20081_v46 = vld [vmem:[%s30732_s26 + $0x3a4] ss:$16 sps:$4 sm:$0xff]   ;;  %v20079_v48 = vld [vmem:[%s30732_s26 + $0x3a0] ss:$16 sps:$4 sm:$0xff]  }
  0x58   : > { %1179 = vmatprep.subr.bf16.mxu0 %v19987_v49  ;;  %1230 = vmatprep.subr.bf16.mxu1 %v19989_v50  ;;  %v20084_v49 = vld [vmem:[%s30732_s26 + $0x184] ss:$16 sps:$4 sm:$0xff]  }
  0x59   : > { %v20087_v50 = vld [vmem:[%s30732_s26 + $0x384] ss:$16 sps:$4 sm:$0xff]  }
  0x5b   : > { %1180 = vmatpush2.bf16.msra.mxu0 %v19991_v51  ;;  %1231 = vmatpush2.bf16.msra.mxu1 %v19992_v52  ;;  %v20082_v51 = vld [vmem:[%s30732_s26 + $0x180] ss:$16 sps:$4 sm:$0xff]  }
  0x5c   : > { %1181 = vmatprep.subr.bf16.mxu0 %v19993_v53  ;;  %1232 = vmatprep.subr.bf16.mxu1 %v19995_v54  ;;  %v20085_v52 = vld [vmem:[%s30732_s26 + $0x380] ss:$16 sps:$4 sm:$0xff]   ;;  %v20090_v53 = vld [vmem:[%s30732_s26 + $0x164] ss:$16 sps:$4 sm:$0xff]  }
  0x5d   : > { %v20093_v54 = vld [vmem:[%s30732_s26 + $0x364] ss:$16 sps:$4 sm:$0xff]  }
  0x5f   : > { %1182 = vmatpush2.bf16.msra.mxu0 %v19997_v55  ;;  %1233 = vmatpush2.bf16.msra.mxu1 %v19998_v56  ;;  %v20088_v55 = vld [vmem:[%s30732_s26 + $0x160] ss:$16 sps:$4 sm:$0xff]  }
  0x60   : > { %1183 = vmatprep.subr.bf16.mxu0 %v19999_v57  ;;  %1234 = vmatprep.subr.bf16.mxu1 %v20001_v58  ;;  %v20091_v56 = vld [vmem:[%s30732_s26 + $0x360] ss:$16 sps:$4 sm:$0xff]   ;;  %v20096_v57 = vld [vmem:[%s30732_s26 + $0x144] ss:$16 sps:$4 sm:$0xff]  }
  0x61   : > { %v20099_v58 = vld [vmem:[%s30732_s26 + $0x344] ss:$16 sps:$4 sm:$0xff]  }
  0x63   : > { %1184 = vmatpush2.bf16.msra.mxu0 %v20003_v59  ;;  %1235 = vmatpush2.bf16.msra.mxu1 %v20004_v60  ;;  %v20094_v59 = vld [vmem:[%s30732_s26 + $0x140] ss:$16 sps:$4 sm:$0xff]  }
  0x64   : > { %1185 = vmatprep.subr.bf16.mxu0 %v20005_v61  ;;  %1236 = vmatprep.subr.bf16.mxu1 %v20007_v62  ;;  %v20097_v60 = vld [vmem:[%s30732_s26 + $0x340] ss:$16 sps:$4 sm:$0xff]   ;;  %v20102_v61 = vld [vmem:[%s30732_s26 + $0x124] ss:$16 sps:$4 sm:$0xff]  }
  0x65   : > { %v20105_v62 = vld [vmem:[%s30732_s26 + $0x324] ss:$16 sps:$4 sm:$0xff]  }
  0x67   : > { %1186 = vmatpush2.bf16.msra.mxu0 %v20009_v63  ;;  %1237 = vmatpush2.bf16.msra.mxu1 %v20010_v0  ;;  %v20100_v63 = vld [vmem:[%s30732_s26 + $0x120] ss:$16 sps:$4 sm:$0xff]  }
  0x68   : > { %2202 = vmatprep.subr.bf16.mxu0 %v20018_v2  ;;  %2253 = vmatprep.subr.bf16.mxu1 %v20021_v3  ;;  %v20103_v0 = vld [vmem:[%s30732_s26 + $0x320] ss:$16 sps:$4 sm:$0xff]   ;;  %v20111_v2 = vld [vmem:[%s30732_s26 + $0x304] ss:$16 sps:$4 sm:$0xff]  }
  0x69   : > { %v20106_v3 = vld [vmem:[%s30732_s26 + $0x100] ss:$16 sps:$4 sm:$0xff]  }
  0x6a   : > { %1188 = vmatmul.mubr.bf16.vlgmr.msra.gmra.mxu0 %v20011_v4  ;;  %1239 = vmatmul.mubr.bf16.vlgmr.msra.gmra.mxu1 %v20011_v4  ;;  %v20109_v4 = vld [vmem:[%s30732_s26 + $0x300] ss:$16 sps:$4 sm:$0xff]  }
  0x6b   : > { %1197 = vmatprep.mubr.bf16.mxu0 %v17676_v5  ;;  %1248 = vmatprep.mubr.bf16.mxu1 %v17676_v5  ;;  %v20114_v5 = vld [vmem:[%s30732_s26 + $0xec] ss:$16 sps:$4 sm:$0xff]  }
  0x6c   : > { %2203 = vmatpush1.bf16.msra.mxu0 %v20016_v6  ;;  %2254 = vmatpush1.bf16.msra.mxu1 %v20019_v7  ;;  %v20117_v6 = vld [vmem:[%s30732_s26 + $0x2ec] ss:$16 sps:$4 sm:$0xff]   ;;  %v798_v7 = vlaneseq }
  0x6d   : > { %2204 = vmatprep.subr.bf16.mxu0 %v20024_v8  ;;  %2255 = vmatprep.subr.bf16.mxu1 %v20027_v9 }
  0x6e   : > { %v23816_v8 = vshrl.u32 %v798_v7, 7 }
  0x70   : > { %2205 = vmatpush1.bf16.msra.mxu0 %v20022_v10  ;;  %2256 = vmatpush1.bf16.msra.mxu1 %v20025_v11  ;;  %v23819_v9 = vsub.s32 1, %v23816_v8  ;;  %v23822_v10 = vsub.s32 3, %v23816_v8  ;;  %v796_v11 = vld [vmem:[%s30733_s4] sm:$0xf]  ;;  %s30736_s4 = sld [smem:[#allocation20_spill]] }
  0x71   : > { %2206 = vmatprep.subr.bf16.mxu0 %v20030_v12  ;;  %2257 = vmatprep.subr.bf16.mxu1 %v20033_v13  ;;  %v23828_v12 = vsub.s32 0, %v23816_v8 }
  0x72   : > { %1198 = vmatmul.mubr.bf16.gmra.mxu0 %v17675_v14  ;;  %1249 = vmatmul.mubr.bf16.gmra.mxu1 %v17675_v14  ;;  %v23831_v14 = vsub.s32 2, %v23816_v8 }
  0x74   : > { %2207 = vmatpush1.bf16.msra.mxu0 %v20028_v15  ;;  %2258 = vmatpush1.bf16.msra.mxu1 %v20031_v16 }
  0x75   : > { %2208 = vmatprep.subr.bf16.mxu0 %v20036_v17  ;;  %2259 = vmatprep.subr.bf16.mxu1 %v20039_v18  ;;  %v805_v18 = vrot.slane %v796_v11, %v23819_v9 }
  0x76   : > { %s30737_s21 = smov %s30736_s4 }
  0x78   : > { %2209 = vmatpush1.bf16.msra.mxu0 %v20034_v19  ;;  %2260 = vmatpush1.bf16.msra.mxu1 %v20037_v20  ;;  %v813_v19 = vrot.slane %v796_v11, %v23822_v10  ;;  %v801_v20 = vrot.slane %v796_v11, %v23828_v12 }
  0x79   : > { %2210 = vmatprep.subr.bf16.mxu0 %v20042_v21  ;;  %2261 = vmatprep.subr.bf16.mxu1 %v20045_v22  ;;  %v809_v21 = vrot.slane %v796_v11, %v23831_v14 }
  0x7c   : > { %2211 = vmatpush1.bf16.msra.mxu0 %v20040_v23  ;;  %2262 = vmatpush1.bf16.msra.mxu1 %v20043_v24 }
  0x7d   : > { %2212 = vmatprep.subr.bf16.mxu0 %v20048_v25  ;;  %2263 = vmatprep.subr.bf16.mxu1 %v20051_v26 }
  0x80   : > { %2213 = vmatpush1.bf16.msra.mxu0 %v20046_v27  ;;  %2264 = vmatpush1.bf16.msra.mxu1 %v20049_v28 }
  0x81   : > { %2214 = vmatprep.subr.bf16.mxu0 %v20054_v29  ;;  %2265 = vmatprep.subr.bf16.mxu1 %v20057_v30 }
  0x84   : > { %2215 = vmatpush1.bf16.msra.mxu0 %v20052_v31  ;;  %2266 = vmatpush1.bf16.msra.mxu1 %v20055_v32 }
  0x85   : > { %2216 = vmatprep.subr.bf16.mxu0 %v20060_v33  ;;  %2267 = vmatprep.subr.bf16.mxu1 %v20063_v34 }
  0x88   : > { %2217 = vmatpush1.bf16.msra.mxu0 %v20058_v35  ;;  %2268 = vmatpush1.bf16.msra.mxu1 %v20061_v36 }
  0x89   : > { %2218 = vmatprep.subr.bf16.mxu0 %v20066_v37  ;;  %2269 = vmatprep.subr.bf16.mxu1 %v20069_v38 }
  0x8c   : > { %2219 = vmatpush2.bf16.msra.mxu0 %v20064_v39  ;;  %2270 = vmatpush2.bf16.msra.mxu1 %v20067_v40 }
  0x8d   : > { %2220 = vmatprep.subr.bf16.mxu0 %v20072_v41  ;;  %2271 = vmatprep.subr.bf16.mxu1 %v20075_v42 }
  0x90   : > { %2221 = vmatpush2.bf16.msra.mxu0 %v20070_v43  ;;  %2272 = vmatpush2.bf16.msra.mxu1 %v20073_v44 }
  0x91   : > { %2222 = vmatprep.subr.bf16.mxu0 %v20078_v45  ;;  %2273 = vmatprep.subr.bf16.mxu1 %v20081_v46 }
  0x94   : > { %2223 = vmatpush2.bf16.msra.mxu0 %v20076_v47  ;;  %2274 = vmatpush2.bf16.msra.mxu1 %v20079_v48 }
  0x95   : > { %2224 = vmatprep.subr.bf16.mxu0 %v20084_v49  ;;  %2275 = vmatprep.subr.bf16.mxu1 %v20087_v50 }
  0x98   : > { %2225 = vmatpush2.bf16.msra.mxu0 %v20082_v51  ;;  %2276 = vmatpush2.bf16.msra.mxu1 %v20085_v52 }
  0x99   : > { %2226 = vmatprep.subr.bf16.mxu0 %v20090_v53  ;;  %2277 = vmatprep.subr.bf16.mxu1 %v20093_v54 }
  0x9c   : > { %2227 = vmatpush2.bf16.msra.mxu0 %v20088_v55  ;;  %2278 = vmatpush2.bf16.msra.mxu1 %v20091_v56 }
  0x9d   : > { %2228 = vmatprep.subr.bf16.mxu0 %v20096_v57  ;;  %2279 = vmatprep.subr.bf16.mxu1 %v20099_v58 }
  0xa0   : > { %2229 = vmatpush2.bf16.msra.mxu0 %v20094_v59  ;;  %2280 = vmatpush2.bf16.msra.mxu1 %v20097_v60 }
  0xa1   : > { %2230 = vmatprep.subr.bf16.mxu0 %v20102_v61  ;;  %2281 = vmatprep.subr.bf16.mxu1 %v20105_v62 }
  0xa4   : > { %2231 = vmatpush2.bf16.msra.mxu0 %v20100_v63  ;;  %2282 = vmatpush2.bf16.msra.mxu1 %v20103_v0 }
  0xa5   : > { %2232 = vmatprep.subr.bf16.mxu0 %v20108_v1  ;;  %2283 = vmatprep.subr.bf16.mxu1 %v20111_v2 }
  0xa8   : > { %2233 = vmatpush2.bf16.msra.mxu0 %v20106_v3  ;;  %2284 = vmatpush2.bf16.msra.mxu1 %v20109_v4  ;;  %v20112_v4 = vld [vmem:[%s30732_s26 + $0xe8] ss:$16 sps:$4 sm:$0xff]  }
  0xa9   : > { %2304 = vmatprep.subr.bf16.mxu0 %v20114_v5  ;;  %2355 = vmatprep.subr.bf16.mxu1 %v20117_v6 }
 0x12a   : > { %v1189_v13 = vpop.f32.mrf.mxu0  ;;  %v1240_v15 = vpop.f32.mrf.mxu1 }
 0x12b   : > { %v1190_v32 = vadd.f32 %v1189_v13, %v801_v20  ;;  %v1241_v33 = vadd.f32 %v1240_v15, %v809_v21  ;;  %v20115_v15 = vld [vmem:[%s30732_s26 + $0x2e8] ss:$16 sps:$4 sm:$0xff]  }
 0x12c   : > { %v1191_v16 = vpop.f32.mrf.mxu0  ;;  %v1242_v17 = vpop.f32.mrf.mxu1 }
 0x12d   : > { %v1192_v28 = vadd.f32 %v1191_v16, %v805_v18  ;;  %v1243_v29 = vadd.f32 %v1242_v17, %v813_v19  ;;  %v1257_v48 = vmax.f32 %v1190_v32, 0.0  ;;  %v1259_v49 = vmax.f32 %v1241_v33, 0.0  ;;  %v20130_v32 = vld [vmem:[%s30732_s26 + $0x88] ss:$16 sps:$4 sm:$0xff]  }
 0x12e   : > { %v1193_v22 = vpop.f32.mrf.mxu0  ;;  %v1244_v23 = vpop.f32.mrf.mxu1  ;;  %v20133_v33 = vld [vmem:[%s30732_s26 + $0x288] ss:$16 sps:$4 sm:$0xff]  }
 0x12f   : > { %v1194_v24 = vadd.f32 %v1193_v22, %v801_v20  ;;  %v1245_v25 = vadd.f32 %v1244_v23, %v809_v21  ;;  %v1258_v44 = vmax.f32 %v1192_v28, 0.0  ;;  %v1260_v45 = vmax.f32 %v1243_v29, 0.0  ;;  %v20118_v23 = vld [vmem:[%s30732_s26 + $0xc8] ss:$16 sps:$4 sm:$0xff]  }
 0x130   : > { %v1195_v26 = vpop.f32.mrf.mxu0  ;;  %v1246_v27 = vpop.f32.mrf.mxu1  ;;  %v20124_v28 = vld [vmem:[%s30732_s26 + $0xa8] ss:$16 sps:$4 sm:$0xff]  }
 0x131   : > { %v1196_v30 = vadd.f32 %v1195_v26, %v805_v18  ;;  %v1247_v31 = vadd.f32 %v1246_v27, %v813_v19  ;;  %v1261_v38 = vmax.f32 %v1194_v24, 0.0  ;;  %v1263_v39 = vmax.f32 %v1245_v25, 0.0  ;;  %v20121_v24 = vld [vmem:[%s30732_s26 + $0x2c8] ss:$16 sps:$4 sm:$0xff]   ;;  %v20123_v25 = vld [vmem:[%s30732_s26 + $0x2cc] ss:$16 sps:$4 sm:$0xff]  }
 0x132   : > { %v1199_v34 = vpop.f32.mrf.mxu0  ;;  %v1250_v35 = vpop.f32.mrf.mxu1  ;;  %v20126_v26 = vld [vmem:[%s30732_s26 + $0xac] ss:$16 sps:$4 sm:$0xff]   ;;  %v20127_v29 = vld [vmem:[%s30732_s26 + $0x2a8] ss:$16 sps:$4 sm:$0xff]  }
 0x133   : > { %v1262_v36 = vmax.f32 %v1196_v30, 0.0  ;;  %v1264_v37 = vmax.f32 %v1247_v31, 0.0  ;;  %v1200_v40 = vadd.f32 %v1199_v34, %v801_v20  ;;  %v1251_v41 = vadd.f32 %v1250_v35, %v809_v21  ;;  %v20129_v27 = vld [vmem:[%s30732_s26 + $0x2ac] ss:$16 sps:$4 sm:$0xff]  }
 0x134   : > { %v1201_v42 = vpop.f32.mrf.mxu0  ;;  %v1252_v43 = vpop.f32.mrf.mxu1  ;;  %v23841_v58 = vpack.c.bf16 %v1261_v38, %v1257_v48  ;;  %v23843_v59 = vpack.c.bf16 %v1263_v39, %v1259_v49  ;;  %v20132_v30 = vld [vmem:[%s30732_s26 + $0x8c] ss:$16 sps:$4 sm:$0xff]   ;;  %v20154_v48 = vld [vmem:[%s30732_s26 + $0x8] ss:$16 sps:$4 sm:$0xff]  }
 0x135   : > { %v1202_v46 = vadd.f32 %v1201_v42, %v805_v18  ;;  %v1253_v47 = vadd.f32 %v1252_v43, %v813_v19  ;;  %v1265_v50 = vmax.f32 %v1200_v40, 0.0  ;;  %v1267_v51 = vmax.f32 %v1251_v41, 0.0  ;;  %v20120_v18 = vld [vmem:[%s30732_s26 + $0xcc] ss:$16 sps:$4 sm:$0xff]   ;;  %v20142_v40 = vld [vmem:[%s30732_s26 + $0x48] ss:$16 sps:$4 sm:$0xff]  }
 0x136   : > { %v1203_v52 = vpop.f32.mrf.mxu0  ;;  %v1254_v53 = vpop.f32.mrf.mxu1  ;;  %v23837_v54 = vpack.c.bf16 %v1262_v36, %v1258_v44  ;;  %v23839_v55 = vpack.c.bf16 %v1264_v37, %v1260_v45  ;;  %v1542_v16 = vrot.slane %v23841_v58, 1  ;;  %v1548_v17 = vrot.slane %v23843_v59, 1  ;;  %v20135_v31 = vld [vmem:[%s30732_s26 + $0x28c] ss:$16 sps:$4 sm:$0xff]   ;;  %v20136_v36 = vld [vmem:[%s30732_s26 + $0x68] ss:$16 sps:$4 sm:$0xff]  }
 0x137   : > { %v1266_v56 = vmax.f32 %v1202_v46, 0.0  ;;  %v1268_v57 = vmax.f32 %v1253_v47, 0.0  ;;  %v23845_v60 = vpack.c.bf16 %v1265_v50, %v1265_v50  ;;  %v23847_v61 = vpack.c.bf16 %v1267_v51, %v1267_v51  ;;  %v20138_v34 = vld [vmem:[%s30732_s26 + $0x6c] ss:$16 sps:$4 sm:$0xff]   ;;  %v20139_v37 = vld [vmem:[%s30732_s26 + $0x268] ss:$16 sps:$4 sm:$0xff]  }
 0x138   : > { %v1204_v62 = vpop.f32.mrf.mxu0  ;;  %v1255_v63 = vpop.f32.mrf.mxu1  ;;  %v1545_v5 = vrot.slane %v23837_v54, 1  ;;  %v1551_v11 = vrot.slane %v23839_v55, 1  ;;  %v20141_v35 = vld [vmem:[%s30732_s26 + $0x26c] ss:$16 sps:$4 sm:$0xff]   ;;  %v20145_v41 = vld [vmem:[%s30732_s26 + $0x248] ss:$16 sps:$4 sm:$0xff]  }
 0x139   : > { %v23849_v0 = vpack.c.bf16 %v1266_v56, %v1266_v56  ;;  %v23851_v1 = vpack.c.bf16 %v1268_v57, %v1268_v57  ;;  %v23854_v2 = vrot.slane %v23845_v60, 1  ;;  %v23857_v3 = vrot.slane %v23847_v61, 1  ;;  %v20144_v38 = vld [vmem:[%s30732_s26 + $0x4c] ss:$16 sps:$4 sm:$0xff]   ;;  %v20148_v44 = vld [vmem:[%s30732_s26 + $0x28] ss:$16 sps:$4 sm:$0xff]  }
 0x13a   : > { %v20147_v39 = vld [vmem:[%s30732_s26 + $0x24c] ss:$16 sps:$4 sm:$0xff]   ;;  %v20151_v45 = vld [vmem:[%s30732_s26 + $0x228] ss:$16 sps:$4 sm:$0xff]  }
 0x13b   : > { %v23864_v6 = vrot.slane %v23849_v0, 1  ;;  %v23868_v13 = vrot.slane %v23851_v1, 1  ;;  %v23881_v21 = vsel %vm1541_vm0, %v1542_v16, %v23854_v2  ;;  %v23884_v22 = vsel %vm1541_vm0, %v1548_v17, %v23857_v3  ;;  %v20150_v42 = vld [vmem:[%s30732_s26 + $0x2c] ss:$16 sps:$4 sm:$0xff]   ;;  %v20157_v49 = vld [vmem:[%s30732_s26 + $0x208] ss:$16 sps:$4 sm:$0xff]  }
 0x13c   : > { %v20153_v43 = vld [vmem:[%s30732_s26 + $0x22c] ss:$16 sps:$4 sm:$0xff]   ;;  %v20160_v52 = vld [vmem:[%s30732_s26 + $0x1e8] ss:$16 sps:$4 sm:$0xff]  }
 0x13d   : > { %v1547_v19 = vsel %vm1541_vm0, %v1545_v5, %v23864_v6  ;;  %v1553_v20 = vsel %vm1541_vm0, %v1551_v11, %v23868_v13  ;;  %v20156_v46 = vld [vmem:[%s30732_s26 + $0xc] ss:$16 sps:$4 sm:$0xff]   ;;  %v20163_v53 = vld [vmem:[%s30732_s26 + $0x3e8] ss:$16 sps:$4 sm:$0xff]  }
 0x13e   : > { %2234 = vmatprep.mubr.bf16.mxu0 %v1547_v19  ;;  %2285 = vmatprep.mubr.bf16.mxu1 %v1553_v20  ;;  %v20159_v47 = vld [vmem:[%s30732_s26 + $0x20c] ss:$16 sps:$4 sm:$0xff]   ;;  %v20166_v62 = vld [vmem:[%s30732_s26 + $0x1c8] ss:$16 sps:$4 sm:$0xff]  }
 0x13f   : > { %2235 = vmatmul.mubr.bf16.vlgmr.msra.gmra.mxu0 %v23881_v21  ;;  %2286 = vmatmul.mubr.bf16.vlgmr.msra.gmra.mxu1 %v23884_v22  ;;  %v20162_v50 = vld [vmem:[%s30732_s26 + $0x1ec] ss:$16 sps:$4 sm:$0xff]   ;;  %v20169_v63 = vld [vmem:[%s30732_s26 + $0x3c8] ss:$16 sps:$4 sm:$0xff]  }
 0x140   : > { %2305 = vmatpush1.bf16.msra.mxu0 %v20112_v4  ;;  %2356 = vmatpush1.bf16.msra.mxu1 %v20115_v15  ;;  %v20165_v51 = vld [vmem:[%s30732_s26 + $0x3ec] ss:$16 sps:$4 sm:$0xff]   ;;  %v20172_v11 = vld [vmem:[%s30732_s26 + $0x1a8] ss:$16 sps:$4 sm:$0xff]  }
 0x141   : > { %2244 = vmatprep.mubr.bf16.mxu0 %v23864_v6  ;;  %2295 = vmatprep.mubr.bf16.mxu1 %v23868_v13  ;;  %v20168_v56 = vld [vmem:[%s30732_s26 + $0x1cc] ss:$16 sps:$4 sm:$0xff]   ;;  %v20175_v15 = vld [vmem:[%s30732_s26 + $0x3a8] ss:$16 sps:$4 sm:$0xff]  }
 0x142   : > { %2306 = vmatprep.subr.bf16.mxu0 %v20120_v18  ;;  %2357 = vmatprep.subr.bf16.mxu1 %v20123_v25  ;;  %v20171_v57 = vld [vmem:[%s30732_s26 + $0x3cc] ss:$16 sps:$4 sm:$0xff]   ;;  %v20178_v18 = vld [vmem:[%s30732_s26 + $0x188] ss:$16 sps:$4 sm:$0xff]  }
 0x143   : > { %v20174_v4 = vld [vmem:[%s30732_s26 + $0x1ac] ss:$16 sps:$4 sm:$0xff]   ;;  %v20187_v25 = vld [vmem:[%s30732_s26 + $0x368] ss:$16 sps:$4 sm:$0xff]  }
 0x144   : > { %2307 = vmatpush1.bf16.msra.mxu0 %v20118_v23  ;;  %2358 = vmatpush1.bf16.msra.mxu1 %v20121_v24  ;;  %v20177_v5 = vld [vmem:[%s30732_s26 + $0x3ac] ss:$16 sps:$4 sm:$0xff]   ;;  %v20184_v24 = vld [vmem:[%s30732_s26 + $0x168] ss:$16 sps:$4 sm:$0xff]  }
 0x145   : > { %2308 = vmatprep.subr.bf16.mxu0 %v20126_v26  ;;  %2359 = vmatprep.subr.bf16.mxu1 %v20129_v27  ;;  %v20180_v16 = vld [vmem:[%s30732_s26 + $0x18c] ss:$16 sps:$4 sm:$0xff]  }
 0x146   : > { %v20183_v17 = vld [vmem:[%s30732_s26 + $0x38c] ss:$16 sps:$4 sm:$0xff]  }
 0x147   : > { %2245 = vmatmul.mubr.bf16.gmra.mxu0 %v23854_v2  ;;  %2296 = vmatmul.mubr.bf16.gmra.mxu1 %v23857_v3  ;;  %v20189_v23 = vld [vmem:[%s30732_s26 + $0x36c] ss:$16 sps:$4 sm:$0xff]  }
 0x148   : > { %2309 = vmatpush1.bf16.msra.mxu0 %v20124_v28  ;;  %2360 = vmatpush1.bf16.msra.mxu1 %v20127_v29  ;;  %v20192_v26 = vld [vmem:[%s30732_s26 + $0x14c] ss:$16 sps:$4 sm:$0xff]   ;;  %v20190_v28 = vld [vmem:[%s30732_s26 + $0x148] ss:$16 sps:$4 sm:$0xff]  }
 0x149   : > { %2336 = vmatprep.mubr.bf16.mxu0 %v1547_v19  ;;  %2387 = vmatprep.mubr.bf16.mxu1 %v1553_v20  ;;  %v20181_v19 = vld [vmem:[%s30732_s26 + $0x388] ss:$16 sps:$4 sm:$0xff]   ;;  %v20186_v20 = vld [vmem:[%s30732_s26 + $0x16c] ss:$16 sps:$4 sm:$0xff]  }
 0x14a   : > { %2310 = vmatprep.subr.bf16.mxu0 %v20132_v30  ;;  %2361 = vmatprep.subr.bf16.mxu1 %v20135_v31  ;;  %v20195_v27 = vld [vmem:[%s30732_s26 + $0x34c] ss:$16 sps:$4 sm:$0xff]   ;;  %v20193_v29 = vld [vmem:[%s30732_s26 + $0x348] ss:$16 sps:$4 sm:$0xff]  }
 0x14b   : > { %v20198_v30 = vld [vmem:[%s30732_s26 + $0x12c] ss:$16 sps:$4 sm:$0xff]  }
 0x14c   : > { %2311 = vmatpush1.bf16.msra.mxu0 %v20130_v32  ;;  %2362 = vmatpush1.bf16.msra.mxu1 %v20133_v33  ;;  %v20201_v31 = vld [vmem:[%s30732_s26 + $0x32c] ss:$16 sps:$4 sm:$0xff]   ;;  %v20196_v32 = vld [vmem:[%s30732_s26 + $0x128] ss:$16 sps:$4 sm:$0xff]  }
 0x14d   : > { %2312 = vmatprep.subr.bf16.mxu0 %v20138_v34  ;;  %2363 = vmatprep.subr.bf16.mxu1 %v20141_v35  ;;  %v20199_v33 = vld [vmem:[%s30732_s26 + $0x328] ss:$16 sps:$4 sm:$0xff]   ;;  %v20204_v34 = vld [vmem:[%s30732_s26 + $0x10c] ss:$16 sps:$4 sm:$0xff]  }
 0x14e   : > { %v20207_v35 = vld [vmem:[%s30732_s26 + $0x30c] ss:$16 sps:$4 sm:$0xff]  }
 0x150   : > { %2313 = vmatpush1.bf16.msra.mxu0 %v20136_v36  ;;  %2364 = vmatpush1.bf16.msra.mxu1 %v20139_v37  ;;  %v20202_v36 = vld [vmem:[%s30732_s26 + $0x108] ss:$16 sps:$4 sm:$0xff]  }
 0x151   : > { %2314 = vmatprep.subr.bf16.mxu0 %v20144_v38  ;;  %2365 = vmatprep.subr.bf16.mxu1 %v20147_v39  ;;  %v20205_v37 = vld [vmem:[%s30732_s26 + $0x308] ss:$16 sps:$4 sm:$0xff]   ;;  %v20210_v38 = vld [vmem:[%s30734_s25 + $0xe4] ss:$16 sps:$4 sm:$0xff]  }
 0x152   : > { %v20213_v39 = vld [vmem:[%s30735_s2 + $0x2e4] ss:$16 sps:$4 sm:$0xff]  }
 0x154   : > { %2315 = vmatpush1.bf16.msra.mxu0 %v20142_v40  ;;  %2366 = vmatpush1.bf16.msra.mxu1 %v20145_v41  ;;  %v20208_v40 = vld [vmem:[%s30735_s2 + $0xe0] ss:$16 sps:$4 sm:$0xff]  }
 0x155   : > { %2316 = vmatprep.subr.bf16.mxu0 %v20150_v42  ;;  %2367 = vmatprep.subr.bf16.mxu1 %v20153_v43  ;;  %v20211_v41 = vld [vmem:[%s30735_s2 + $0x2e0] ss:$16 sps:$4 sm:$0xff]   ;;  %v20216_v42 = vld [vmem:[%s30735_s2 + $0xc4] ss:$16 sps:$4 sm:$0xff]  }
 0x156   : > { %v20219_v43 = vld [vmem:[%s30735_s2 + $0x2c4] ss:$16 sps:$4 sm:$0xff]  }
 0x158   : > { %2317 = vmatpush1.bf16.msra.mxu0 %v20148_v44  ;;  %2368 = vmatpush1.bf16.msra.mxu1 %v20151_v45  ;;  %v20214_v44 = vld [vmem:[%s30735_s2 + $0xc0] ss:$16 sps:$4 sm:$0xff]  }
 0x159   : > { %2318 = vmatprep.subr.bf16.mxu0 %v20156_v46  ;;  %2369 = vmatprep.subr.bf16.mxu1 %v20159_v47  ;;  %v20217_v45 = vld [vmem:[%s30735_s2 + $0x2c0] ss:$16 sps:$4 sm:$0xff]   ;;  %v20222_v46 = vld [vmem:[%s30735_s2 + $0xa4] ss:$16 sps:$4 sm:$0xff]  }
 0x15a   : > { %v20231_v47 = vld [vmem:[%s30735_s2 + $0x284] ss:$16 sps:$4 sm:$0xff]  }
 0x15c   : > { %2319 = vmatpush1.bf16.msra.mxu0 %v20154_v48  ;;  %2370 = vmatpush1.bf16.msra.mxu1 %v20157_v49  ;;  %v20226_v48 = vld [vmem:[%s30735_s2 + $0x80] ss:$16 sps:$4 sm:$0xff]  }
 0x15d   : > { %2320 = vmatprep.subr.bf16.mxu0 %v20162_v50  ;;  %2371 = vmatprep.subr.bf16.mxu1 %v20165_v51  ;;  %v20229_v49 = vld [vmem:[%s30735_s2 + $0x280] ss:$16 sps:$4 sm:$0xff]  }
 0x15e   : > { %v20232_v50 = vld [vmem:[%s30735_s2 + $0x60] ss:$16 sps:$4 sm:$0xff]  }
 0x15f   : > { %v20235_v51 = vld [vmem:[%s30735_s2 + $0x260] ss:$16 sps:$4 sm:$0xff]  }
 0x160   : > { %2321 = vmatpush2.bf16.msra.mxu0 %v20160_v52  ;;  %2372 = vmatpush2.bf16.msra.mxu1 %v20163_v53  ;;  %v20240_v52 = vld [vmem:[%s30735_s2 + $0x44] ss:$16 sps:$4 sm:$0xff]  }
 0x161   : > { %2322 = vmatprep.subr.bf16.mxu0 %v20168_v56  ;;  %2373 = vmatprep.subr.bf16.mxu1 %v20171_v57  ;;  %v20243_v53 = vld [vmem:[%s30735_s2 + $0x244] ss:$16 sps:$4 sm:$0xff]   ;;  %v20238_v56 = vld [vmem:[%s30735_s2 + $0x40] ss:$16 sps:$4 sm:$0xff]  }
 0x162   : > { %v20241_v57 = vld [vmem:[%s30735_s2 + $0x240] ss:$16 sps:$4 sm:$0xff]  }
 0x164   : > { %2323 = vmatpush2.bf16.msra.mxu0 %v20166_v62  ;;  %2374 = vmatpush2.bf16.msra.mxu1 %v20169_v63  ;;  %v20246_v62 = vld [vmem:[%s30735_s2 + $0x24] ss:$16 sps:$4 sm:$0xff]  }
 0x165   : > { %2324 = vmatprep.subr.bf16.mxu0 %v20174_v4  ;;  %2375 = vmatprep.subr.bf16.mxu1 %v20177_v5  ;;  %v20249_v63 = vld [vmem:[%s30735_s2 + $0x224] ss:$16 sps:$4 sm:$0xff]   ;;  %v20244_v4 = vld [vmem:[%s30735_s2 + $0x20] ss:$16 sps:$4 sm:$0xff]  }
 0x166   : > { %v20247_v5 = vld [vmem:[%s30735_s2 + $0x220] ss:$16 sps:$4 sm:$0xff]  }
 0x168   : > { %2325 = vmatpush2.bf16.msra.mxu0 %v20172_v11  ;;  %2376 = vmatpush2.bf16.msra.mxu1 %v20175_v15  ;;  %v20252_v11 = vld [vmem:[%s30735_s2 + $0x4] ss:$16 sps:$4 sm:$0xff]  }
 0x169   : > { %2326 = vmatprep.subr.bf16.mxu0 %v20180_v16  ;;  %2377 = vmatprep.subr.bf16.mxu1 %v20183_v17  ;;  %v20255_v15 = vld [vmem:[%s30735_s2 + $0x204] ss:$16 sps:$4 sm:$0xff]   ;;  %v20250_v16 = vld [vmem:[%s30735_s2] ss:$16 sps:$4 sm:$0xff]  }
 0x16a   : > { %v20253_v17 = vld [vmem:[%s30735_s2 + $0x200] ss:$16 sps:$4 sm:$0xff]  }
 0x16c   : > { %2327 = vmatpush2.bf16.msra.mxu0 %v20178_v18  ;;  %2378 = vmatpush2.bf16.msra.mxu1 %v20181_v19  ;;  %v20258_v18 = vld [vmem:[%s30735_s2 + $0x1e4] ss:$16 sps:$4 sm:$0xff]  }
 0x16d   : > { %2328 = vmatprep.subr.bf16.mxu0 %v20186_v20  ;;  %2379 = vmatprep.subr.bf16.mxu1 %v20189_v23  ;;  %v20261_v19 = vld [vmem:[%s30735_s2 + $0x3e4] ss:$16 sps:$4 sm:$0xff]   ;;  %v20256_v20 = vld [vmem:[%s30735_s2 + $0x1e0] ss:$16 sps:$4 sm:$0xff]  }
 0x16e   : > { %v20259_v23 = vld [vmem:[%s30735_s2 + $0x3e0] ss:$16 sps:$4 sm:$0xff]  }
 0x170   : > { %2329 = vmatpush2.bf16.msra.mxu0 %v20184_v24  ;;  %2380 = vmatpush2.bf16.msra.mxu1 %v20187_v25  ;;  %v20264_v24 = vld [vmem:[%s30735_s2 + $0x1c4] ss:$16 sps:$4 sm:$0xff]  }
 0x171   : > { %2330 = vmatprep.subr.bf16.mxu0 %v20192_v26  ;;  %2381 = vmatprep.subr.bf16.mxu1 %v20195_v27  ;;  %v20267_v25 = vld [vmem:[%s30735_s2 + $0x3c4] ss:$16 sps:$4 sm:$0xff]   ;;  %v20262_v26 = vld [vmem:[%s30735_s2 + $0x1c0] ss:$16 sps:$4 sm:$0xff]  }
 0x172   : > { %v20265_v27 = vld [vmem:[%s30735_s2 + $0x3c0] ss:$16 sps:$4 sm:$0xff]  }
 0x174   : > { %2331 = vmatpush2.bf16.msra.mxu0 %v20190_v28  ;;  %2382 = vmatpush2.bf16.msra.mxu1 %v20193_v29  ;;  %v20270_v28 = vld [vmem:[%s30735_s2 + $0x1a4] ss:$16 sps:$4 sm:$0xff]  }
 0x175   : > { %2332 = vmatprep.subr.bf16.mxu0 %v20198_v30  ;;  %2383 = vmatprep.subr.bf16.mxu1 %v20201_v31  ;;  %v20273_v29 = vld [vmem:[%s30735_s2 + $0x3a4] ss:$16 sps:$4 sm:$0xff]   ;;  %v20268_v30 = vld [vmem:[%s30735_s2 + $0x1a0] ss:$16 sps:$4 sm:$0xff]  }
 0x176   : > { %v20271_v31 = vld [vmem:[%s30735_s2 + $0x3a0] ss:$16 sps:$4 sm:$0xff]  }
 0x178   : > { %2333 = vmatpush2.bf16.msra.mxu0 %v20196_v32  ;;  %2384 = vmatpush2.bf16.msra.mxu1 %v20199_v33  ;;  %v20276_v32 = vld [vmem:[%s30735_s2 + $0x184] ss:$16 sps:$4 sm:$0xff]  }
 0x179   : > { %2334 = vmatprep.subr.bf16.mxu0 %v20204_v34  ;;  %2385 = vmatprep.subr.bf16.mxu1 %v20207_v35  ;;  %v20279_v33 = vld [vmem:[%s30735_s2 + $0x384] ss:$16 sps:$4 sm:$0xff]   ;;  %v20274_v34 = vld [vmem:[%s30735_s2 + $0x180] ss:$16 sps:$4 sm:$0xff]  }
 0x17a   : > { %v20277_v35 = vld [vmem:[%s30735_s2 + $0x380] ss:$16 sps:$4 sm:$0xff]  }
 0x17c   : > { %2335 = vmatpush2.bf16.msra.mxu0 %v20202_v36  ;;  %2386 = vmatpush2.bf16.msra.mxu1 %v20205_v37  ;;  %v20282_v36 = vld [vmem:[%s30735_s2 + $0x164] ss:$16 sps:$4 sm:$0xff]  }
 0x17d   : > { %3046 = vmatprep.subr.bf16.mxu0 %v20210_v38  ;;  %3097 = vmatprep.subr.bf16.mxu1 %v20213_v39  ;;  %v20285_v37 = vld [vmem:[%s30735_s2 + $0x364] ss:$16 sps:$4 sm:$0xff]   ;;  %v20280_v38 = vld [vmem:[%s30735_s2 + $0x160] ss:$16 sps:$4 sm:$0xff]  }
 0x17e   : > { %v20283_v39 = vld [vmem:[%s30735_s2 + $0x360] ss:$16 sps:$4 sm:$0xff]  }
 0x17f   : > { %2337 = vmatmul.mubr.bf16.vlgmr.msra.gmra.mxu0 %v23881_v21  ;;  %2388 = vmatmul.mubr.bf16.vlgmr.msra.gmra.mxu1 %v23884_v22  ;;  %v20225_v21 = vld [vmem:[%s30735_s2 + $0x2a4] ss:$16 sps:$4 sm:$0xff]   ;;  %v20220_v22 = vld [vmem:[%s30735_s2 + $0xa0] ss:$16 sps:$4 sm:$0xff]  }
 0x180   : > { %2346 = vmatprep.mubr.bf16.mxu0 %v23864_v6  ;;  %2397 = vmatprep.mubr.bf16.mxu1 %v23868_v13  ;;  %v20223_v6 = vld [vmem:[%s30735_s2 + $0x2a0] ss:$16 sps:$4 sm:$0xff]   ;;  %v20228_v13 = vld [vmem:[%s30735_s2 + $0x84] ss:$16 sps:$4 sm:$0xff]  }
 0x181   : > { %3047 = vmatpush1.bf16.msra.mxu0 %v20208_v40  ;;  %3098 = vmatpush1.bf16.msra.mxu1 %v20211_v41  ;;  %v20288_v40 = vld [vmem:[%s30735_s2 + $0x144] ss:$16 sps:$4 sm:$0xff]  }
 0x182   : > { %3048 = vmatprep.subr.bf16.mxu0 %v20216_v42  ;;  %3099 = vmatprep.subr.bf16.mxu1 %v20219_v43  ;;  %v20291_v41 = vld [vmem:[%s30735_s2 + $0x344] ss:$16 sps:$4 sm:$0xff]   ;;  %v20286_v42 = vld [vmem:[%s30735_s2 + $0x140] ss:$16 sps:$4 sm:$0xff]  }
 0x183   : > { %v20289_v43 = vld [vmem:[%s30735_s2 + $0x340] ss:$16 sps:$4 sm:$0xff]  }
 0x185   : > { %3049 = vmatpush1.bf16.msra.mxu0 %v20214_v44  ;;  %3100 = vmatpush1.bf16.msra.mxu1 %v20217_v45  ;;  %v20294_v44 = vld [vmem:[%s30735_s2 + $0x124] ss:$16 sps:$4 sm:$0xff]  }
 0x186   : > { %3050 = vmatprep.subr.bf16.mxu0 %v20222_v46  ;;  %3101 = vmatprep.subr.bf16.mxu1 %v20225_v21  ;;  %v20297_v45 = vld [vmem:[%s30735_s2 + $0x324] ss:$16 sps:$4 sm:$0xff]   ;;  %v20292_v46 = vld [vmem:[%s30735_s2 + $0x120] ss:$16 sps:$4 sm:$0xff]  }
 0x187   : > { %2347 = vmatmul.mubr.bf16.gmra.mxu0 %v23854_v2  ;;  %2398 = vmatmul.mubr.bf16.gmra.mxu1 %v23857_v3  ;;  %v20234_v2 = vld [vmem:[%s30735_s2 + $0x64] ss:$16 sps:$4 sm:$0xff]   ;;  %v20295_v21 = vld [vmem:[%s30735_s2 + $0x320] ss:$16 sps:$4 sm:$0xff]  }
 0x188   : > { %3078 = vmatprep.mubr.bf16.mxu0 %v23837_v54  ;;  %3129 = vmatprep.mubr.bf16.mxu1 %v23839_v55  ;;  %v20237_v3 = vld [vmem:[%s30735_s2 + $0x264] ss:$16 sps:$4 sm:$0xff]  }
 0x189   : > { %3051 = vmatpush1.bf16.msra.mxu0 %v20220_v22  ;;  %3102 = vmatpush1.bf16.msra.mxu1 %v20223_v6  ;;  %v20300_v22 = vld [vmem:[%s30735_s2 + $0x104] ss:$16 sps:$4 sm:$0xff]  }
 0x18a   : > { %3052 = vmatprep.subr.bf16.mxu0 %v20228_v13  ;;  %3103 = vmatprep.subr.bf16.mxu1 %v20231_v47  ;;  %v20303_v6 = vld [vmem:[%s30735_s2 + $0x304] ss:$16 sps:$4 sm:$0xff]   ;;  %v20298_v13 = vld [vmem:[%s30735_s2 + $0x100] ss:$16 sps:$4 sm:$0xff]  }
 0x18b   : > { %v20301_v47 = vld [vmem:[%s30735_s2 + $0x300] ss:$16 sps:$4 sm:$0xff]  }
 0x18d   : > { %3053 = vmatpush1.bf16.msra.mxu0 %v20226_v48  ;;  %3104 = vmatpush1.bf16.msra.mxu1 %v20229_v49  ;;  %v20306_v48 = vld [vmem:[%s30735_s2 + $0xec] ss:$16 sps:$4 sm:$0xff]  }
 0x18e   : > { %3054 = vmatprep.subr.bf16.mxu0 %v20234_v2  ;;  %3105 = vmatprep.subr.bf16.mxu1 %v20237_v3  ;;  %v20309_v49 = vld [vmem:[%s30735_s2 + $0x2ec] ss:$16 sps:$4 sm:$0xff]   ;;  %v20304_v2 = vld [vmem:[%s30735_s2 + $0xe8] ss:$16 sps:$4 sm:$0xff]  }
 0x18f   : > { %v20307_v3 = vld [vmem:[%s30735_s2 + $0x2e8] ss:$16 sps:$4 sm:$0xff]  }
 0x191   : > { %3055 = vmatpush1.bf16.msra.mxu0 %v20232_v50  ;;  %3106 = vmatpush1.bf16.msra.mxu1 %v20235_v51  ;;  %v20312_v50 = vld [vmem:[%s30735_s2 + $0xcc] ss:$16 sps:$4 sm:$0xff]  }
 0x192   : > { %3056 = vmatprep.subr.bf16.mxu0 %v20240_v52  ;;  %3107 = vmatprep.subr.bf16.mxu1 %v20243_v53  ;;  %v20315_v51 = vld [vmem:[%s30735_s2 + $0x2cc] ss:$16 sps:$4 sm:$0xff]   ;;  %v20310_v52 = vld [vmem:[%s30735_s2 + $0xc8] ss:$16 sps:$4 sm:$0xff]  }
 0x193   : > { %v20313_v53 = vld [vmem:[%s30735_s2 + $0x2c8] ss:$16 sps:$4 sm:$0xff]  }
 0x195   : > { %3057 = vmatpush1.bf16.msra.mxu0 %v20238_v56  ;;  %3108 = vmatpush1.bf16.msra.mxu1 %v20241_v57  ;;  %v20318_v56 = vld [vmem:[%s30735_s2 + $0xac] ss:$16 sps:$4 sm:$0xff]  }
 0x196   : > { %3058 = vmatprep.subr.bf16.mxu0 %v20246_v62  ;;  %3109 = vmatprep.subr.bf16.mxu1 %v20249_v63  ;;  %v20321_v57 = vld [vmem:[%s30735_s2 + $0x2ac] ss:$16 sps:$4 sm:$0xff]   ;;  %v20316_v62 = vld [vmem:[%s30735_s2 + $0xa8] ss:$16 sps:$4 sm:$0xff]  }
 0x197   : > { %v20319_v63 = vld [vmem:[%s30735_s2 + $0x2a8] ss:$16 sps:$4 sm:$0xff]  }
 0x199   : > { %3059 = vmatpush1.bf16.msra.mxu0 %v20244_v4  ;;  %3110 = vmatpush1.bf16.msra.mxu1 %v20247_v5  ;;  %v20324_v4 = vld [vmem:[%s30735_s2 + $0x8c] ss:$16 sps:$4 sm:$0xff]  }
 0x19a   : > { %3060 = vmatprep.subr.bf16.mxu0 %v20252_v11  ;;  %3111 = vmatprep.subr.bf16.mxu1 %v20255_v15  ;;  %v20327_v5 = vld [vmem:[%s30735_s2 + $0x28c] ss:$16 sps:$4 sm:$0xff]   ;;  %v20322_v11 = vld [vmem:[%s30735_s2 + $0x88] ss:$16 sps:$4 sm:$0xff]  }
 0x19b   : > { %v20325_v15 = vld [vmem:[%s30735_s2 + $0x288] ss:$16 sps:$4 sm:$0xff]  }
 0x19d   : > { %3061 = vmatpush1.bf16.msra.mxu0 %v20250_v16  ;;  %3112 = vmatpush1.bf16.msra.mxu1 %v20253_v17  ;;  %v20330_v16 = vld [vmem:[%s30735_s2 + $0x6c] ss:$16 sps:$4 sm:$0xff]  }
 0x19e   : > { %3062 = vmatprep.subr.bf16.mxu0 %v20258_v18  ;;  %3113 = vmatprep.subr.bf16.mxu1 %v20261_v19  ;;  %v20333_v17 = vld [vmem:[%s30735_s2 + $0x26c] ss:$16 sps:$4 sm:$0xff]   ;;  %v20328_v18 = vld [vmem:[%s30735_s2 + $0x68] ss:$16 sps:$4 sm:$0xff]  }
 0x19f   : > { %v20331_v19 = vld [vmem:[%s30735_s2 + $0x268] ss:$16 sps:$4 sm:$0xff]  }
 0x1a1   : > { %3063 = vmatpush2.bf16.msra.mxu0 %v20256_v20  ;;  %3114 = vmatpush2.bf16.msra.mxu1 %v20259_v23  ;;  %v20336_v20 = vld [vmem:[%s30735_s2 + $0x4c] ss:$16 sps:$4 sm:$0xff]  }
 0x1a2   : > { %3064 = vmatprep.subr.bf16.mxu0 %v20264_v24  ;;  %3115 = vmatprep.subr.bf16.mxu1 %v20267_v25  ;;  %v20339_v23 = vld [vmem:[%s30735_s2 + $0x24c] ss:$16 sps:$4 sm:$0xff]   ;;  %v20334_v24 = vld [vmem:[%s30735_s2 + $0x48] ss:$16 sps:$4 sm:$0xff]  }
 0x1a3   : > { %v20337_v25 = vld [vmem:[%s30735_s2 + $0x248] ss:$16 sps:$4 sm:$0xff]  }
 0x1a5   : > { %3065 = vmatpush2.bf16.msra.mxu0 %v20262_v26  ;;  %3116 = vmatpush2.bf16.msra.mxu1 %v20265_v27  ;;  %v20342_v26 = vld [vmem:[%s30735_s2 + $0x2c] ss:$16 sps:$4 sm:$0xff]  }
 0x1a6   : > { %3066 = vmatprep.subr.bf16.mxu0 %v20270_v28  ;;  %3117 = vmatprep.subr.bf16.mxu1 %v20273_v29  ;;  %v20345_v27 = vld [vmem:[%s30735_s2 + $0x22c] ss:$16 sps:$4 sm:$0xff]   ;;  %v20340_v28 = vld [vmem:[%s30735_s2 + $0x28] ss:$16 sps:$4 sm:$0xff]  }
 0x1a7   : > { %v20343_v29 = vld [vmem:[%s30735_s2 + $0x228] ss:$16 sps:$4 sm:$0xff]  }
 0x1a9   : > { %3067 = vmatpush2.bf16.msra.mxu0 %v20268_v30  ;;  %3118 = vmatpush2.bf16.msra.mxu1 %v20271_v31  ;;  %v20348_v30 = vld [vmem:[%s30735_s2 + $0xc] ss:$16 sps:$4 sm:$0xff]  }
 0x1aa   : > { %3068 = vmatprep.subr.bf16.mxu0 %v20276_v32  ;;  %3119 = vmatprep.subr.bf16.mxu1 %v20279_v33  ;;  %v20351_v31 = vld [vmem:[%s30735_s2 + $0x20c] ss:$16 sps:$4 sm:$0xff]   ;;  %v20346_v32 = vld [vmem:[%s30735_s2 + $0x8] ss:$16 sps:$4 sm:$0xff]  }
 0x1ab   : > { %v20349_v33 = vld [vmem:[%s30735_s2 + $0x208] ss:$16 sps:$4 sm:$0xff]  }
 0x1ad   : > { %3069 = vmatpush2.bf16.msra.mxu0 %v20274_v34  ;;  %3120 = vmatpush2.bf16.msra.mxu1 %v20277_v35  ;;  %v20354_v34 = vld [vmem:[%s30735_s2 + $0x1ec] ss:$16 sps:$4 sm:$0xff]  }
 0x1ae   : > { %3070 = vmatprep.subr.bf16.mxu0 %v20282_v36  ;;  %3121 = vmatprep.subr.bf16.mxu1 %v20285_v37  ;;  %v20357_v35 = vld [vmem:[%s30735_s2 + $0x3ec] ss:$16 sps:$4 sm:$0xff]   ;;  %v20352_v36 = vld [vmem:[%s30735_s2 + $0x1e8] ss:$16 sps:$4 sm:$0xff]  }
 0x1af   : > { %v20355_v37 = vld [vmem:[%s30735_s2 + $0x3e8] ss:$16 sps:$4 sm:$0xff]  }
 0x1b1   : > { %3071 = vmatpush2.bf16.msra.mxu0 %v20280_v38  ;;  %3122 = vmatpush2.bf16.msra.mxu1 %v20283_v39  ;;  %v20360_v38 = vld [vmem:[%s30735_s2 + $0x1cc] ss:$16 sps:$4 sm:$0xff]  }
 0x1b2   : > { %3072 = vmatprep.subr.bf16.mxu0 %v20288_v40  ;;  %3123 = vmatprep.subr.bf16.mxu1 %v20291_v41  ;;  %v20363_v39 = vld [vmem:[%s30735_s2 + $0x3cc] ss:$16 sps:$4 sm:$0xff]   ;;  %v20358_v40 = vld [vmem:[%s30735_s2 + $0x1c8] ss:$16 sps:$4 sm:$0xff]  }
 0x1b3   : > { %v20361_v41 = vld [vmem:[%s30735_s2 + $0x3c8] ss:$16 sps:$4 sm:$0xff]  }
 0x1b5   : > { %3073 = vmatpush2.bf16.msra.mxu0 %v20286_v42  ;;  %3124 = vmatpush2.bf16.msra.mxu1 %v20289_v43  ;;  %v20366_v42 = vld [vmem:[%s30735_s2 + $0x1ac] ss:$16 sps:$4 sm:$0xff]  }
 0x1b6   : > { %3074 = vmatprep.subr.bf16.mxu0 %v20294_v44  ;;  %3125 = vmatprep.subr.bf16.mxu1 %v20297_v45  ;;  %v20369_v43 = vld [vmem:[%s30735_s2 + $0x3ac] ss:$16 sps:$4 sm:$0xff]   ;;  %v20364_v44 = vld [vmem:[%s30735_s2 + $0x1a8] ss:$16 sps:$4 sm:$0xff]  }
 0x1b7   : > { %v20367_v45 = vld [vmem:[%s30735_s2 + $0x3a8] ss:$16 sps:$4 sm:$0xff]  }
 0x1b9   : > { %3075 = vmatpush2.bf16.msra.mxu0 %v20292_v46  ;;  %3126 = vmatpush2.bf16.msra.mxu1 %v20295_v21  ;;  %v20372_v46 = vld [vmem:[%s30735_s2 + $0x18c] ss:$16 sps:$4 sm:$0xff]  }
 0x1ba   : > { %3076 = vmatprep.subr.bf16.mxu0 %v20300_v22  ;;  %3127 = vmatprep.subr.bf16.mxu1 %v20303_v6  ;;  %v20375_v21 = vld [vmem:[%s30735_s2 + $0x38c] ss:$16 sps:$4 sm:$0xff]   ;;  %v20370_v22 = vld [vmem:[%s30735_s2 + $0x188] ss:$16 sps:$4 sm:$0xff]  }
 0x1bb   : > { %v20373_v6 = vld [vmem:[%s30735_s2 + $0x388] ss:$16 sps:$4 sm:$0xff]  }
 0x1bd   : > { %3077 = vmatpush2.bf16.msra.mxu0 %v20298_v13  ;;  %3128 = vmatpush2.bf16.msra.mxu1 %v20301_v47  ;;  %v20378_v13 = vld [vmem:[%s30735_s2 + $0x16c] ss:$16 sps:$4 sm:$0xff]  }
 0x1be   : > { %3148 = vmatprep.subr.bf16.mxu0 %v20306_v48  ;;  %3199 = vmatprep.subr.bf16.mxu1 %v20309_v49  ;;  %v20381_v47 = vld [vmem:[%s30735_s2 + $0x36c] ss:$16 sps:$4 sm:$0xff]   ;;  %v20376_v48 = vld [vmem:[%s30735_s2 + $0x168] ss:$16 sps:$4 sm:$0xff]  }
 0x1bf   : > { %v20379_v49 = vld [vmem:[%s30735_s2 + $0x368] ss:$16 sps:$4 sm:$0xff]  }
 0x1c0   : > { %3079 = vmatmul.mubr.bf16.vlgmr.msra.gmra.mxu0 %v23841_v58  ;;  %3130 = vmatmul.mubr.bf16.vlgmr.msra.gmra.mxu1 %v23843_v59 }
 0x1c1   : > { %3088 = vmatprep.mubr.bf16.mxu0 %v23849_v0  ;;  %3139 = vmatprep.mubr.bf16.mxu1 %v23851_v1 }
 0x1c2   : > { %3149 = vmatpush1.bf16.msra.mxu0 %v20304_v2  ;;  %3200 = vmatpush1.bf16.msra.mxu1 %v20307_v3  ;;  %v20384_v2 = vld [vmem:[%s30735_s2 + $0x14c] ss:$16 sps:$4 sm:$0xff]  }
 0x1c3   : > { %3150 = vmatprep.subr.bf16.mxu0 %v20312_v50  ;;  %3201 = vmatprep.subr.bf16.mxu1 %v20315_v51  ;;  %v20387_v3 = vld [vmem:[%s30735_s2 + $0x34c] ss:$16 sps:$4 sm:$0xff]   ;;  %v20382_v50 = vld [vmem:[%s30735_s2 + $0x148] ss:$16 sps:$4 sm:$0xff]  }
 0x1c4   : > { %v20385_v51 = vld [vmem:[%s30735_s2 + $0x348] ss:$16 sps:$4 sm:$0xff]  }
 0x1c6   : > { %3151 = vmatpush1.bf16.msra.mxu0 %v20310_v52  ;;  %3202 = vmatpush1.bf16.msra.mxu1 %v20313_v53  ;;  %v20390_v52 = vld [vmem:[%s30735_s2 + $0x12c] ss:$16 sps:$4 sm:$0xff]  }
 0x1c7   : > { %3152 = vmatprep.subr.bf16.mxu0 %v20318_v56  ;;  %3203 = vmatprep.subr.bf16.mxu1 %v20321_v57  ;;  %v20393_v53 = vld [vmem:[%s30735_s2 + $0x32c] ss:$16 sps:$4 sm:$0xff]   ;;  %v20388_v56 = vld [vmem:[%s30735_s2 + $0x128] ss:$16 sps:$4 sm:$0xff]  }
 0x1c8   : > { %3089 = vmatmul.mubr.bf16.gmra.mxu0 %v23845_v60  ;;  %3140 = vmatmul.mubr.bf16.gmra.mxu1 %v23847_v61  ;;  %v20391_v57 = vld [vmem:[%s30735_s2 + $0x328] ss:$16 sps:$4 sm:$0xff]  }
 0x1c9   : > { %3180 = vmatprep.mubr.bf16.mxu0 %v23837_v54  ;;  %3231 = vmatprep.mubr.bf16.mxu1 %v23839_v55 }
 0x1ca   : > { %3153 = vmatpush1.bf16.msra.mxu0 %v20316_v62  ;;  %3204 = vmatpush1.bf16.msra.mxu1 %v20319_v63  ;;  %v20396_v62 = vld [vmem:[%s30735_s2 + $0x10c] ss:$16 sps:$4 sm:$0xff]  }
 0x1cb   : > { %3154 = vmatprep.subr.bf16.mxu0 %v20324_v4  ;;  %3205 = vmatprep.subr.bf16.mxu1 %v20327_v5  ;;  %v20399_v63 = vld [vmem:[%s30735_s2 + $0x30c] ss:$16 sps:$4 sm:$0xff]   ;;  %v20394_v4 = vld [vmem:[%s30735_s2 + $0x108] ss:$16 sps:$4 sm:$0xff]  }
 0x1cc   : > { %v20397_v5 = vld [vmem:[%s30735_s2 + $0x308] ss:$16 sps:$4 sm:$0xff]   ;;  %s23242_s2 = smov [#allocation2]  }
 0x1ce   : > { %3155 = vmatpush1.bf16.msra.mxu0 %v20322_v11  ;;  %3206 = vmatpush1.bf16.msra.mxu1 %v20325_v15  ;;  %v20402_v11 = vld [vmem:[%s30736_s4 + $0xe4] ss:$16 sps:$4 sm:$0xff]   ;;  %s30706_s4 = sshll.u32 %s23385_s5, 4 }
 0x1cf   : > { %3156 = vmatprep.subr.bf16.mxu0 %v20330_v16  ;;  %3207 = vmatprep.subr.bf16.mxu1 %v20333_v17  ;;  %v20405_v15 = vld [vmem:[%s30737_s21 + $0x2e4] ss:$16 sps:$4 sm:$0xff]   ;;  %v20400_v16 = vld [vmem:[%s30737_s21 + $0xe0] ss:$16 sps:$4 sm:$0xff]   ;;  %s17542_s6 = scalar_lea.hbm %s30745_s3, %s30706_s4 }
 0x1d0   : > { %v20403_v17 = vld [vmem:[%s30737_s21 + $0x2e0] ss:$16 sps:$4 sm:$0xff]  }
 0x1d2   : > { %3157 = vmatpush1.bf16.msra.mxu0 %v20328_v18  ;;  %3208 = vmatpush1.bf16.msra.mxu1 %v20331_v19  ;;  %v20408_v18 = vld [vmem:[%s30737_s21 + $0xc4] ss:$16 sps:$4 sm:$0xff]  }
 0x1d3   : > { %3158 = vmatprep.subr.bf16.mxu0 %v20336_v20  ;;  %3209 = vmatprep.subr.bf16.mxu1 %v20339_v23  ;;  %v20411_v19 = vld [vmem:[%s30737_s21 + $0x2c4] ss:$16 sps:$4 sm:$0xff]  }
 0x1d6   : > { %3159 = vmatpush1.bf16.msra.mxu0 %v20334_v24  ;;  %3210 = vmatpush1.bf16.msra.mxu1 %v20337_v25 }
 0x1d7   : > { %3160 = vmatprep.subr.bf16.mxu0 %v20342_v26  ;;  %3211 = vmatprep.subr.bf16.mxu1 %v20345_v27  ;;  %v20406_v27 = vld [vmem:[%s30737_s21 + $0xc0] ss:$16 sps:$4 sm:$0xff]  }
 0x1da   : > { %3161 = vmatpush1.bf16.msra.mxu0 %v20340_v28  ;;  %3212 = vmatpush1.bf16.msra.mxu1 %v20343_v29  ;;  %v20409_v28 = vld [vmem:[%s30737_s21 + $0x2c0] ss:$16 sps:$4 sm:$0xff]  }
 0x1db   : > { %3162 = vmatprep.subr.bf16.mxu0 %v20348_v30  ;;  %3213 = vmatprep.subr.bf16.mxu1 %v20351_v31  ;;  %v20414_v30 = vld [vmem:[%s30737_s21 + $0xa4] ss:$16 sps:$4 sm:$0xff]  }
 0x1dc   : > { %v20417_v31 = vld [vmem:[%s30737_s21 + $0x2a4] ss:$16 sps:$4 sm:$0xff]  }
 0x1de   : > { %3163 = vmatpush1.bf16.msra.mxu0 %v20346_v32  ;;  %3214 = vmatpush1.bf16.msra.mxu1 %v20349_v33 }
 0x1df   : > { %3164 = vmatprep.subr.bf16.mxu0 %v20354_v34  ;;  %3215 = vmatprep.subr.bf16.mxu1 %v20357_v35 }
 0x1e2   : > { %3165 = vmatpush2.bf16.msra.mxu0 %v20352_v36  ;;  %3216 = vmatpush2.bf16.msra.mxu1 %v20355_v37  ;;  %v20412_v37 = vld [vmem:[%s30737_s21 + $0xa0] ss:$16 sps:$4 sm:$0xff]  }
 0x1e3   : > { %3166 = vmatprep.subr.bf16.mxu0 %v20360_v38  ;;  %3217 = vmatprep.subr.bf16.mxu1 %v20363_v39  ;;  %v20415_v38 = vld [vmem:[%s30737_s21 + $0x2a0] ss:$16 sps:$4 sm:$0xff]   ;;  %v24520_v39 = vrot.slane %v23849_v0, 2 }
 0x1e6   : > { %3167 = vmatpush2.bf16.msra.mxu0 %v20358_v40  ;;  %3218 = vmatpush2.bf16.msra.mxu1 %v20361_v41  ;;  %v24523_v40 = vrot.slane %v23851_v1, 2  ;;  %v20420_v41 = vld [vmem:[%s30737_s21 + $0x84] ss:$16 sps:$4 sm:$0xff]  }
 0x1e7   : > { %3168 = vmatprep.subr.bf16.mxu0 %v20366_v42  ;;  %3219 = vmatprep.subr.bf16.mxu1 %v20369_v43  ;;  %v20423_v42 = vld [vmem:[%s30737_s21 + $0x284] ss:$16 sps:$4 sm:$0xff]  }
 0x1ea   : > { %3169 = vmatpush2.bf16.msra.mxu0 %v20364_v44  ;;  %3220 = vmatpush2.bf16.msra.mxu1 %v20367_v45  ;;  %v3382_v45 = vrot.slane %v23837_v54, 2 }
 0x1eb   : > { %3170 = vmatprep.subr.bf16.mxu0 %v20372_v46  ;;  %3221 = vmatprep.subr.bf16.mxu1 %v20375_v21 }
 0x1ec   : > { %v24539_v46 = vsel %vm3378_vm1, %v3382_v45, %v24520_v39  ;;  %v20477_v45 = vld [vmem:[%s30737_s21 + $0x364] ss:$16 sps:$4 sm:$0xff]  }
 0x1ee   : > { %3171 = vmatpush2.bf16.msra.mxu0 %v20370_v22  ;;  %3222 = vmatpush2.bf16.msra.mxu1 %v20373_v6  ;;  %v20421_v6 = vld [vmem:[%s30737_s21 + $0x280] ss:$16 sps:$4 sm:$0xff]  }
 0x1ef   : > { %3172 = vmatprep.subr.bf16.mxu0 %v20378_v13  ;;  %3223 = vmatprep.subr.bf16.mxu1 %v20381_v47  ;;  %v20426_v47 = vld [vmem:[%s30737_s21 + $0x64] ss:$16 sps:$4 sm:$0xff]  }
 0x1f2   : > { %3173 = vmatpush2.bf16.msra.mxu0 %v20376_v48  ;;  %3224 = vmatpush2.bf16.msra.mxu1 %v20379_v49  ;;  %v20429_v48 = vld [vmem:[%s30737_s21 + $0x264] ss:$16 sps:$4 sm:$0xff]  }
 0x1f3   : > { %3174 = vmatprep.subr.bf16.mxu0 %v20384_v2  ;;  %3225 = vmatprep.subr.bf16.mxu1 %v20387_v3 }
 0x1f6   : > { %3175 = vmatpush2.bf16.msra.mxu0 %v20382_v50  ;;  %3226 = vmatpush2.bf16.msra.mxu1 %v20385_v51  ;;  %v20424_v51 = vld [vmem:[%s30737_s21 + $0x60] ss:$16 sps:$4 sm:$0xff]  }
 0x1f7   : > { %3176 = vmatprep.subr.bf16.mxu0 %v20390_v52  ;;  %3227 = vmatprep.subr.bf16.mxu1 %v20393_v53  ;;  %v20427_v52 = vld [vmem:[%s30737_s21 + $0x260] ss:$16 sps:$4 sm:$0xff]   ;;  %v20432_v53 = vld [vmem:[%s30737_s21 + $0x44] ss:$16 sps:$4 sm:$0xff]  }
 0x1fa   : > { %3177 = vmatpush2.bf16.msra.mxu0 %v20388_v56  ;;  %3228 = vmatpush2.bf16.msra.mxu1 %v20391_v57  ;;  %v20435_v56 = vld [vmem:[%s30737_s21 + $0x244] ss:$16 sps:$4 sm:$0xff]   ;;  %v20430_v57 = vld [vmem:[%s30737_s21 + $0x40] ss:$16 sps:$4 sm:$0xff]  }
 0x1fb   : > { %3178 = vmatprep.subr.bf16.mxu0 %v20396_v62  ;;  %3229 = vmatprep.subr.bf16.mxu1 %v20399_v63  ;;  %v20433_v62 = vld [vmem:[%s30737_s21 + $0x240] ss:$16 sps:$4 sm:$0xff]   ;;  %v20438_v63 = vld [vmem:[%s30737_s21 + $0x24] ss:$16 sps:$4 sm:$0xff]  }
 0x1fe   : > { %3179 = vmatpush2.bf16.msra.mxu0 %v20394_v4  ;;  %3230 = vmatpush2.bf16.msra.mxu1 %v20397_v5  ;;  %v20441_v4 = vld [vmem:[%s30737_s21 + $0x224] ss:$16 sps:$4 sm:$0xff]   ;;  %v20436_v5 = vld [vmem:[%s30737_s21 + $0x20] ss:$16 sps:$4 sm:$0xff]  }
 0x1ff   : > { %4039 = vmatprep.subr.bf16.mxu0 %v20402_v11  ;;  %4090 = vmatprep.subr.bf16.mxu1 %v20405_v15  ;;  %v2236_v20 = vpop.f32.mrf.mxu0  ;;  %v2287_v23 = vpop.f32.mrf.mxu1  ;;  %v20439_v11 = vld [vmem:[%s30737_s21 + $0x220] ss:$16 sps:$4 sm:$0xff]   ;;  %v20444_v15 = vld [vmem:[%s30737_s21 + $0x4] ss:$16 sps:$4 sm:$0xff]  }
 0x200   : > { %v24487_v24 = vadd.f32 %v2287_v23, %v2236_v20  ;;  %v20453_v20 = vld [vmem:[%s30737_s21 + $0x3e4] ss:$16 sps:$4 sm:$0xff]   ;;  %v20448_v23 = vld [vmem:[%s30737_s21 + $0x1e0] ss:$16 sps:$4 sm:$0xff]  }
 0x201   : > { %3181 = vmatmul.mubr.bf16.vlgmr.msra.gmra.mxu0 %v23841_v58  ;;  %3232 = vmatmul.mubr.bf16.vlgmr.msra.gmra.mxu1 %v23843_v59  ;;  %v2238_v25 = vpop.f32.mrf.mxu0  ;;  %v2289_v26 = vpop.f32.mrf.mxu1 }
 0x202   : > { %3190 = vmatprep.mubr.bf16.mxu0 %v23849_v0  ;;  %3241 = vmatprep.mubr.bf16.mxu1 %v23851_v1  ;;  %v24499_v29 = vadd.f32 %v2289_v26, %v2238_v25  ;;  %v3388_v0 = vrot.slane %v23839_v55, 2  ;;  %v20418_v55 = vld [vmem:[%s30737_s21 + $0x80] ss:$16 sps:$4 sm:$0xff]   ;;  %v20456_v26 = vld [vmem:[%s30737_s21 + $0x1c4] ss:$16 sps:$4 sm:$0xff]  }
 0x203   : > { %4040 = vmatpush1.bf16.msra.mxu0 %v20400_v16  ;;  %4091 = vmatpush1.bf16.msra.mxu1 %v20403_v17  ;;  %v2240_v32 = vpop.f32.mrf.mxu0  ;;  %v2291_v33 = vpop.f32.mrf.mxu1  ;;  %v20447_v16 = vld [vmem:[%s30737_s21 + $0x204] ss:$16 sps:$4 sm:$0xff]   ;;  %v20442_v17 = vld [vmem:[%s30737_s21] ss:$16 sps:$4 sm:$0xff]  }
 0x204   : > { %4041 = vmatprep.subr.bf16.mxu0 %v20408_v18  ;;  %4092 = vmatprep.subr.bf16.mxu1 %v20411_v19  ;;  %v24507_v34 = vadd.f32 %v2291_v33, %v2240_v32  ;;  %v24543_v21 = vsel %vm3378_vm1, %v3388_v0, %v24523_v40  ;;  %v20445_v18 = vld [vmem:[%s30737_s21 + $0x200] ss:$16 sps:$4 sm:$0xff]   ;;  %v20450_v19 = vld [vmem:[%s30737_s21 + $0x1e4] ss:$16 sps:$4 sm:$0xff]  }
 0x205   : > { %v24509_v35 = vpop.f32.mrf.mxu0  ;;  %v24511_v36 = vpop.f32.mrf.mxu1  ;;  %v20451_v25 = vld [vmem:[%s30737_s21 + $0x3e0] ss:$16 sps:$4 sm:$0xff]   ;;  %v20465_v32 = vld [vmem:[%s30737_s21 + $0x3a4] ss:$16 sps:$4 sm:$0xff]  }
 0x206   : > { %v20460_v33 = vld [vmem:[%s30737_s21 + $0x1a0] ss:$16 sps:$4 sm:$0xff]  }
 0x207   : > { %4042 = vmatpush1.bf16.msra.mxu0 %v20406_v27  ;;  %4093 = vmatpush1.bf16.msra.mxu1 %v20409_v28  ;;  %v2246_v43 = vpop.f32.mrf.mxu0  ;;  %v2297_v44 = vpop.f32.mrf.mxu1  ;;  %v20459_v27 = vld [vmem:[%s30737_s21 + $0x3c4] ss:$16 sps:$4 sm:$0xff]   ;;  %v20454_v28 = vld [vmem:[%s30737_s21 + $0x1c0] ss:$16 sps:$4 sm:$0xff]  }
 0x208   : > { %4043 = vmatprep.subr.bf16.mxu0 %v20414_v30  ;;  %4094 = vmatprep.subr.bf16.mxu1 %v20417_v31  ;;  %v24533_v1 = vadd.f32 %v2297_v44, %v2246_v43  ;;  %v20457_v30 = vld [vmem:[%s30737_s21 + $0x3c0] ss:$16 sps:$4 sm:$0xff]   ;;  %v20462_v31 = vld [vmem:[%s30737_s21 + $0x1a4] ss:$16 sps:$4 sm:$0xff]  }
 0x209   : > { %3191 = vmatmul.mubr.bf16.gmra.mxu0 %v23845_v60  ;;  %3242 = vmatmul.mubr.bf16.gmra.mxu1 %v23847_v61  ;;  %v2248_v54 = vpop.f32.mrf.mxu0  ;;  %v2299_v22 = vpop.f32.mrf.mxu1  ;;  %v20469_v43 = vld [vmem:[%s30737_s21 + $0x380] ss:$16 sps:$4 sm:$0xff]   ;;  %v20474_v44 = vld [vmem:[%s30737_s21 + $0x164] ss:$16 sps:$4 sm:$0xff]  }
 0x20a   : > { %4071 = vmatprep.mubr.bf16.mxu0 %v24539_v46  ;;  %4122 = vmatprep.mubr.bf16.mxu1 %v24543_v21  ;;  %v24553_v13 = vadd.f32 %v2299_v22, %v2248_v54  ;;  %v20472_v0 = vld [vmem:[%s30737_s21 + $0x160] ss:$16 sps:$4 sm:$0xff]   ;;  %v20480_v22 = vld [vmem:[%s30737_s21 + $0x144] ss:$16 sps:$4 sm:$0xff]  }
 0x20b   : > { %4044 = vmatpush1.bf16.msra.mxu0 %v20412_v37  ;;  %4095 = vmatpush1.bf16.msra.mxu1 %v20415_v38  ;;  %v2250_v49 = vpop.f32.mrf.mxu0  ;;  %v2301_v2 = vpop.f32.mrf.mxu1  ;;  %v20463_v37 = vld [vmem:[%s30737_s21 + $0x3a0] ss:$16 sps:$4 sm:$0xff]   ;;  %v20468_v38 = vld [vmem:[%s30737_s21 + $0x184] ss:$16 sps:$4 sm:$0xff]  }
 0x20c   : > { %4045 = vmatprep.subr.bf16.mxu0 %v20420_v41  ;;  %4096 = vmatprep.subr.bf16.mxu1 %v20423_v42  ;;  %v20471_v41 = vld [vmem:[%s30737_s21 + $0x384] ss:$16 sps:$4 sm:$0xff]   ;;  %v20466_v42 = vld [vmem:[%s30737_s21 + $0x180] ss:$16 sps:$4 sm:$0xff]  }
 0x20d   : > { %v2251_v3 = vpop.f32.mrf.mxu0  ;;  %v2302_v50 = vpop.f32.mrf.mxu1  ;;  %v20475_v54 = vld [vmem:[%s30737_s21 + $0x360] ss:$16 sps:$4 sm:$0xff]   ;;  %v20489_v49 = vld [vmem:[%s30737_s21 + $0x324] ss:$16 sps:$4 sm:$0xff]  }
 0x20e   : > { %v20484_v2 = vld [vmem:[%s30737_s21 + $0x120] ss:$16 sps:$4 sm:$0xff]   ;;  %v20492_v50 = vld [vmem:[%s30737_s21 + $0x104] ss:$16 sps:$4 sm:$0xff]  }
 0x20f   : > { %4046 = vmatpush1.bf16.msra.mxu0 %v20418_v55  ;;  %4097 = vmatpush1.bf16.msra.mxu1 %v20421_v6  ;;  %v20483_v55 = vld [vmem:[%s30737_s21 + $0x344] ss:$16 sps:$4 sm:$0xff]   ;;  %v20478_v6 = vld [vmem:[%s30737_s21 + $0x140] ss:$16 sps:$4 sm:$0xff]  }
 0x210   : > { %4047 = vmatprep.subr.bf16.mxu0 %v20426_v47  ;;  %4098 = vmatprep.subr.bf16.mxu1 %v20429_v48  ;;  %v20481_v47 = vld [vmem:[%s30737_s21 + $0x340] ss:$16 sps:$4 sm:$0xff]   ;;  %v20486_v48 = vld [vmem:[%s30737_s21 + $0x124] ss:$16 sps:$4 sm:$0xff]  }
 0x211   : > { %v20487_v3 = vld [vmem:[%s30737_s21 + $0x320] ss:$16 sps:$4 sm:$0xff]  }
 0x213   : > { %4048 = vmatpush1.bf16.msra.mxu0 %v20424_v51  ;;  %4099 = vmatpush1.bf16.msra.mxu1 %v20427_v52  ;;  %v20495_v51 = vld [vmem:[%s30737_s21 + $0x304] ss:$16 sps:$4 sm:$0xff]   ;;  %v20490_v52 = vld [vmem:[%s30737_s21 + $0x100] ss:$16 sps:$4 sm:$0xff]  }
 0x214   : > { %4049 = vmatprep.subr.bf16.mxu0 %v20432_v53  ;;  %4100 = vmatprep.subr.bf16.mxu1 %v20435_v56  ;;  %v20493_v53 = vld [vmem:[%s30737_s21 + $0x300] ss:$16 sps:$4 sm:$0xff]   ;;  %v20498_v56 = vld [vmem:[%s30737_s21 + $0xec] ss:$16 sps:$4 sm:$0xff]  }
 0x217   : > { %4050 = vmatpush1.bf16.msra.mxu0 %v20430_v57  ;;  %4101 = vmatpush1.bf16.msra.mxu1 %v20433_v62  ;;  %v20501_v57 = vld [vmem:[%s30737_s21 + $0x2ec] ss:$16 sps:$4 sm:$0xff]   ;;  %v24706_v62 = vrot.slane %v23845_v60, 2  ;;  %v3385_v60 = vrot.slane %v23843_v59, 2 }
 0x218   : > { %4051 = vmatprep.subr.bf16.mxu0 %v20438_v63  ;;  %4102 = vmatprep.subr.bf16.mxu1 %v20441_v4  ;;  %v24709_v63 = vrot.slane %v23847_v61, 2  ;;  %v20496_v4 = vld [vmem:[%s30737_s21 + $0xe8] ss:$16 sps:$4 sm:$0xff]   ;;  %v20504_v61 = vld [vmem:[%s30737_s21 + $0xcc] ss:$16 sps:$4 sm:$0xff]  }
 0x21b   : > { %4052 = vmatpush1.bf16.msra.mxu0 %v20436_v5  ;;  %4103 = vmatpush1.bf16.msra.mxu1 %v20439_v11  ;;  %v20499_v5 = vld [vmem:[%s30737_s21 + $0x2e8] ss:$16 sps:$4 sm:$0xff]  }
 0x21c   : > { %4053 = vmatprep.subr.bf16.mxu0 %v20444_v15  ;;  %4104 = vmatprep.subr.bf16.mxu1 %v20447_v16  ;;  %v3379_v16 = vrot.slane %v23841_v58, 2  ;;  %v24733_v58 = vsel %vm3378_vm1, %v3385_v60, %v24709_v63  ;;  %v20543_v60 = vld [vmem:[%s30737_s21 + $0x20c] ss:$16 sps:$4 sm:$0xff]  }
 0x21f   : > { %4054 = vmatpush1.bf16.msra.mxu0 %v20442_v17  ;;  %4105 = vmatpush1.bf16.msra.mxu1 %v20445_v18  ;;  %v20507_v17 = vld [vmem:[%s30737_s21 + $0x2cc] ss:$16 sps:$4 sm:$0xff]  }
 0x220   : > { %4055 = vmatprep.subr.bf16.mxu0 %v20450_v19  ;;  %4106 = vmatprep.subr.bf16.mxu1 %v20453_v20  ;;  %v24729_v19 = vsel %vm3378_vm1, %v3379_v16, %v24706_v62  ;;  %v20540_v16 = vld [vmem:[%s30737_s21 + $0xc] ss:$16 sps:$4 sm:$0xff]  }
 0x223   : > { %4056 = vmatpush2.bf16.msra.mxu0 %v20448_v23  ;;  %4107 = vmatpush2.bf16.msra.mxu1 %v20451_v25  ;;  %v20502_v25 = vld [vmem:[%s30737_s21 + $0xc8] ss:$16 sps:$4 sm:$0xff]  }
 0x224   : > { %4057 = vmatprep.subr.bf16.mxu0 %v20456_v26  ;;  %4108 = vmatprep.subr.bf16.mxu1 %v20459_v27  ;;  %v20505_v26 = vld [vmem:[%s30737_s21 + $0x2c8] ss:$16 sps:$4 sm:$0xff]  }
 0x227   : > { %4058 = vmatpush2.bf16.msra.mxu0 %v20454_v28  ;;  %4109 = vmatpush2.bf16.msra.mxu1 %v20457_v30  ;;  %v20510_v30 = vld [vmem:[%s30737_s21 + $0xac] ss:$16 sps:$4 sm:$0xff]  }
 0x228   : > { %4059 = vmatprep.subr.bf16.mxu0 %v20462_v31  ;;  %4110 = vmatprep.subr.bf16.mxu1 %v20465_v32  ;;  %v20513_v31 = vld [vmem:[%s30737_s21 + $0x2ac] ss:$16 sps:$4 sm:$0xff]  }
 0x22b   : > { %4060 = vmatpush2.bf16.msra.mxu0 %v20460_v33  ;;  %4111 = vmatpush2.bf16.msra.mxu1 %v20463_v37 }
 0x22c   : > { %4061 = vmatprep.subr.bf16.mxu0 %v20468_v38  ;;  %4112 = vmatprep.subr.bf16.mxu1 %v20471_v41  ;;  %v20508_v38 = vld [vmem:[%s30737_s21 + $0xa8] ss:$16 sps:$4 sm:$0xff]  }
 0x22d   : > { %v20511_v41 = vld [vmem:[%s30737_s21 + $0x2a8] ss:$16 sps:$4 sm:$0xff]  }
 0x22f   : > { %4062 = vmatpush2.bf16.msra.mxu0 %v20466_v42  ;;  %4113 = vmatpush2.bf16.msra.mxu1 %v20469_v43 }
 0x230   : > { %4063 = vmatprep.subr.bf16.mxu0 %v20474_v44  ;;  %4114 = vmatprep.subr.bf16.mxu1 %v20477_v45  ;;  %v20516_v44 = vld [vmem:[%s30737_s21 + $0x8c] ss:$16 sps:$4 sm:$0xff]  }
 0x231   : > { %v20519_v45 = vld [vmem:[%s30737_s21 + $0x28c] ss:$16 sps:$4 sm:$0xff]  }
 0x233   : > { %4064 = vmatpush2.bf16.msra.mxu0 %v20472_v0  ;;  %4115 = vmatpush2.bf16.msra.mxu1 %v20475_v54 }
 0x234   : > { %4065 = vmatprep.subr.bf16.mxu0 %v20480_v22  ;;  %4116 = vmatprep.subr.bf16.mxu1 %v20483_v55 }
 0x237   : > { %4066 = vmatpush2.bf16.msra.mxu0 %v20478_v6  ;;  %4117 = vmatpush2.bf16.msra.mxu1 %v20481_v47  ;;  %v20514_v6 = vld [vmem:[%s30737_s21 + $0x88] ss:$16 sps:$4 sm:$0xff]  }
 0x238   : > { %4067 = vmatprep.subr.bf16.mxu0 %v20486_v48  ;;  %4118 = vmatprep.subr.bf16.mxu1 %v20489_v49  ;;  %v20517_v47 = vld [vmem:[%s30737_s21 + $0x288] ss:$16 sps:$4 sm:$0xff]  }
 0x23b   : > { %4068 = vmatpush2.bf16.msra.mxu0 %v20484_v2  ;;  %4119 = vmatpush2.bf16.msra.mxu1 %v20487_v3  ;;  %v20522_v2 = vld [vmem:[%s30737_s21 + $0x6c] ss:$16 sps:$4 sm:$0xff]  }
 0x23c   : > { %4069 = vmatprep.subr.bf16.mxu0 %v20492_v50  ;;  %4120 = vmatprep.subr.bf16.mxu1 %v20495_v51  ;;  %v20525_v3 = vld [vmem:[%s30737_s21 + $0x26c] ss:$16 sps:$4 sm:$0xff]  }
 0x23f   : > { %4070 = vmatpush2.bf16.msra.mxu0 %v20490_v52  ;;  %4121 = vmatpush2.bf16.msra.mxu1 %v20493_v53  ;;  %v2338_v11 = vpop.f32.mrf.mxu0  ;;  %v2389_v15 = vpop.f32.mrf.mxu1  ;;  %v20528_v52 = vld [vmem:[%s30737_s21 + $0x4c] ss:$16 sps:$4 sm:$0xff]  }
 0x240   : > { %v24725_v18 = vadd.f32 %v2389_v15, %v2338_v11  ;;  %4141 = vmatprep.subr.bf16.mxu0 %v20498_v56  ;;  %4192 = vmatprep.subr.bf16.mxu1 %v20501_v57  ;;  %v20531_v53 = vld [vmem:[%s30737_s21 + $0x24c] ss:$16 sps:$4 sm:$0xff]   ;;  %v20526_v56 = vld [vmem:[%s30737_s21 + $0x48] ss:$16 sps:$4 sm:$0xff]  }
 0x241   : > { %v2340_v59 = vpop.f32.mrf.mxu0  ;;  %v2391_v20 = vpop.f32.mrf.mxu1  ;;  %v20529_v57 = vld [vmem:[%s30737_s21 + $0x248] ss:$16 sps:$4 sm:$0xff]  }
 0x242   : > { %4072 = vmatmul.mubr.bf16.vlgmr.msra.gmra.mxu0 %v24729_v19  ;;  %4123 = vmatmul.mubr.bf16.vlgmr.msra.gmra.mxu1 %v24733_v58  ;;  %v24737_v23 = vadd.f32 %v2391_v20, %v2340_v59  ;;  %v20532_v11 = vld [vmem:[%s30737_s21 + $0x28] ss:$16 sps:$4 sm:$0xff]   ;;  %v20546_v59 = vld [vmem:[%s30737_s21 + $0x1ec] ss:$16 sps:$4 sm:$0xff]  }
 0x243   : > { %4081 = vmatprep.mubr.bf16.mxu0 %v24520_v39  ;;  %4132 = vmatprep.mubr.bf16.mxu1 %v24523_v40  ;;  %v2342_v27 = vpop.f32.mrf.mxu0  ;;  %v2393_v28 = vpop.f32.mrf.mxu1  ;;  %v20535_v15 = vld [vmem:[%s30737_s21 + $0x228] ss:$16 sps:$4 sm:$0xff]   ;;  %v20549_v20 = vld [vmem:[%s30737_s21 + $0x3ec] ss:$16 sps:$4 sm:$0xff]  }
 0x244   : > { %4142 = vmatpush1.bf16.msra.mxu0 %v20496_v4  ;;  %4193 = vmatpush1.bf16.msra.mxu1 %v20499_v5  ;;  %v24753_v32 = vadd.f32 %v2393_v28, %v2342_v27  ;;  %v20534_v4 = vld [vmem:[%s30737_s21 + $0x2c] ss:$16 sps:$4 sm:$0xff]  }
 0x245   : > { %4143 = vmatprep.subr.bf16.mxu0 %v20504_v61  ;;  %4194 = vmatprep.subr.bf16.mxu1 %v20507_v17  ;;  %v24755_v33 = vpop.f32.mrf.mxu0  ;;  %v24757_v37 = vpop.f32.mrf.mxu1  ;;  %v20537_v5 = vld [vmem:[%s30737_s21 + $0x22c] ss:$16 sps:$4 sm:$0xff]   ;;  %v20538_v61 = vld [vmem:[%s30737_s21 + $0x8] ss:$16 sps:$4 sm:$0xff]  }
 0x246   : > { %v20541_v17 = vld [vmem:[%s30737_s21 + $0x208] ss:$16 sps:$4 sm:$0xff]   ;;  %v20552_v27 = vld [vmem:[%s30737_s21 + $0x1cc] ss:$16 sps:$4 sm:$0xff]  }
 0x247   : > { %v2348_v42 = vpop.f32.mrf.mxu0  ;;  %v2399_v43 = vpop.f32.mrf.mxu1  ;;  %v20555_v28 = vld [vmem:[%s30737_s21 + $0x3cc] ss:$16 sps:$4 sm:$0xff]  }
 0x248   : > { %4144 = vmatpush1.bf16.msra.mxu0 %v20502_v25  ;;  %4195 = vmatpush1.bf16.msra.mxu1 %v20505_v26  ;;  %v24771_v0 = vadd.f32 %v2399_v43, %v2348_v42  ;;  %v20544_v25 = vld [vmem:[%s30737_s21 + $0x1e8] ss:$16 sps:$4 sm:$0xff]  }
 0x249   : > { %4145 = vmatprep.subr.bf16.mxu0 %v20510_v30  ;;  %4196 = vmatprep.subr.bf16.mxu1 %v20513_v31  ;;  %v2350_v54 = vpop.f32.mrf.mxu0  ;;  %v2401_v22 = vpop.f32.mrf.mxu1  ;;  %v20547_v26 = vld [vmem:[%s30737_s21 + $0x3e8] ss:$16 sps:$4 sm:$0xff]  }
 0x24a   : > { %4082 = vmatmul.mubr.bf16.gmra.mxu0 %v24706_v62  ;;  %4133 = vmatmul.mubr.bf16.gmra.mxu1 %v24709_v63  ;;  %v24775_v55 = vadd.f32 %v2401_v22, %v2350_v54  ;;  %v20550_v30 = vld [vmem:[%s30737_s21 + $0x1c8] ss:$16 sps:$4 sm:$0xff]  }
 0x24b   : > { %4173 = vmatprep.mubr.bf16.mxu0 %v24539_v46  ;;  %4224 = vmatprep.mubr.bf16.mxu1 %v24543_v21  ;;  %v2352_v48 = vpop.f32.mrf.mxu0  ;;  %v2403_v49 = vpop.f32.mrf.mxu1  ;;  %v20520_v46 = vld [vmem:[%s30737_s21 + $0x68] ss:$16 sps:$4 sm:$0xff]  }
 0x24c   : > { %4146 = vmatpush1.bf16.msra.mxu0 %v20508_v38  ;;  %4197 = vmatpush1.bf16.msra.mxu1 %v20511_v41  ;;  %v20523_v21 = vld [vmem:[%s30737_s21 + $0x268] ss:$16 sps:$4 sm:$0xff]   ;;  %v20558_v38 = vld [vmem:[%s30737_s21 + $0x1ac] ss:$16 sps:$4 sm:$0xff]  }
 0x24d   : > { %4147 = vmatprep.subr.bf16.mxu0 %v20516_v44  ;;  %4198 = vmatprep.subr.bf16.mxu1 %v20519_v45  ;;  %v2353_v50 = vpop.f32.mrf.mxu0  ;;  %v2404_v51 = vpop.f32.mrf.mxu1  ;;  %v20553_v31 = vld [vmem:[%s30737_s21 + $0x3c8] ss:$16 sps:$4 sm:$0xff]   ;;  %v20561_v41 = vld [vmem:[%s30737_s21 + $0x3ac] ss:$16 sps:$4 sm:$0xff]  }
 0x24e   : > { %v20556_v42 = vld [vmem:[%s30737_s21 + $0x1a8] ss:$16 sps:$4 sm:$0xff]   ;;  %v20564_v44 = vld [vmem:[%s30737_s21 + $0x18c] ss:$16 sps:$4 sm:$0xff]  }
 0x24f   : > { %v20559_v43 = vld [vmem:[%s30737_s21 + $0x3a8] ss:$16 sps:$4 sm:$0xff]   ;;  %v20567_v45 = vld [vmem:[%s30737_s21 + $0x38c] ss:$16 sps:$4 sm:$0xff]  }
 0x250   : > { %4148 = vmatpush1.bf16.msra.mxu0 %v20514_v6  ;;  %4199 = vmatpush1.bf16.msra.mxu1 %v20517_v47  ;;  %v20562_v54 = vld [vmem:[%s30737_s21 + $0x188] ss:$16 sps:$4 sm:$0xff]   ;;  %v20570_v6 = vld [vmem:[%s30737_s21 + $0x16c] ss:$16 sps:$4 sm:$0xff]  }
 0x251   : > { %4149 = vmatprep.subr.bf16.mxu0 %v20522_v2  ;;  %4200 = vmatprep.subr.bf16.mxu1 %v20525_v3  ;;  %v20565_v22 = vld [vmem:[%s30737_s21 + $0x388] ss:$16 sps:$4 sm:$0xff]   ;;  %v20573_v47 = vld [vmem:[%s30737_s21 + $0x36c] ss:$16 sps:$4 sm:$0xff]  }
 0x252   : > { %v20568_v48 = vld [vmem:[%s30737_s21 + $0x168] ss:$16 sps:$4 sm:$0xff]   ;;  %v20576_v2 = vld [vmem:[%s30737_s21 + $0x14c] ss:$16 sps:$4 sm:$0xff]  }
 0x253   : > { %v20571_v49 = vld [vmem:[%s30737_s21 + $0x368] ss:$16 sps:$4 sm:$0xff]   ;;  %v20579_v3 = vld [vmem:[%s30737_s21 + $0x34c] ss:$16 sps:$4 sm:$0xff]  }
 0x254   : > { %4150 = vmatpush1.bf16.msra.mxu0 %v20520_v46  ;;  %4201 = vmatpush1.bf16.msra.mxu1 %v20523_v21  ;;  %v20574_v50 = vld [vmem:[%s30737_s21 + $0x148] ss:$16 sps:$4 sm:$0xff]   ;;  %v20582_v46 = vld [vmem:[%s30737_s21 + $0x12c] ss:$16 sps:$4 sm:$0xff]  }
 0x255   : > { %4151 = vmatprep.subr.bf16.mxu0 %v20528_v52  ;;  %4202 = vmatprep.subr.bf16.mxu1 %v20531_v53  ;;  %v20577_v51 = vld [vmem:[%s30737_s21 + $0x348] ss:$16 sps:$4 sm:$0xff]   ;;  %v20585_v21 = vld [vmem:[%s30737_s21 + $0x32c] ss:$16 sps:$4 sm:$0xff]  }
 0x256   : > { %v20580_v52 = vld [vmem:[%s30737_s21 + $0x128] ss:$16 sps:$4 sm:$0xff]  }
 0x257   : > { %v20583_v53 = vld [vmem:[%s30737_s21 + $0x328] ss:$16 sps:$4 sm:$0xff]  }
 0x258   : > { %4152 = vmatpush1.bf16.msra.mxu0 %v20526_v56  ;;  %4203 = vmatpush1.bf16.msra.mxu1 %v20529_v57  ;;  %v20588_v56 = vld [vmem:[%s30737_s21 + $0x10c] ss:$16 sps:$4 sm:$0xff]  }
 0x259   : > { %4153 = vmatprep.subr.bf16.mxu0 %v20534_v4  ;;  %4204 = vmatprep.subr.bf16.mxu1 %v20537_v5  ;;  %v20591_v57 = vld [vmem:[%s30737_s21 + $0x30c] ss:$16 sps:$4 sm:$0xff]   ;;  %v20586_v4 = vld [vmem:[%s30737_s21 + $0x108] ss:$16 sps:$4 sm:$0xff]  }
 0x25a   : > { %v20589_v5 = vld [vmem:[%s30737_s21 + $0x308] ss:$16 sps:$4 sm:$0xff]  }
 0x25c   : > { %4154 = vmatpush1.bf16.msra.mxu0 %v20532_v11  ;;  %4205 = vmatpush1.bf16.msra.mxu1 %v20535_v15  ;;  %v20594_v11 = vld [vmem:[%s30738_s8 + $0xe4] ss:$16 sps:$4 sm:$0xff]  }
 0x25d   : > { %4155 = vmatprep.subr.bf16.mxu0 %v20540_v16  ;;  %4206 = vmatprep.subr.bf16.mxu1 %v20543_v60 }
 0x260   : > { %4156 = vmatpush1.bf16.msra.mxu0 %v20538_v61  ;;  %4207 = vmatpush1.bf16.msra.mxu1 %v20541_v17  ;;  %v20592_v61 = vld [vmem:[%s30738_s8 + $0xe0] ss:$16 sps:$4 sm:$0xff]  }
 0x261   : > { %4157 = vmatprep.subr.bf16.mxu0 %v20546_v59  ;;  %4208 = vmatprep.subr.bf16.mxu1 %v20549_v20  ;;  %v20597_v20 = vld [vmem:[%s30738_s8 + $0xc4] ss:$16 sps:$4 sm:$0xff]  }
 0x264   : > { %4158 = vmatpush2.bf16.msra.mxu0 %v20544_v25  ;;  %4209 = vmatpush2.bf16.msra.mxu1 %v20547_v26 }
 0x265   : > { %4159 = vmatprep.subr.bf16.mxu0 %v20552_v27  ;;  %4210 = vmatprep.subr.bf16.mxu1 %v20555_v28 }
 0x268   : > { %4160 = vmatpush2.bf16.msra.mxu0 %v20550_v30  ;;  %4211 = vmatpush2.bf16.msra.mxu1 %v20553_v31  ;;  %v20595_v31 = vld [vmem:[%s30738_s8 + $0xc0] ss:$16 sps:$4 sm:$0xff]  }
 0x269   : > { %4161 = vmatprep.subr.bf16.mxu0 %v20558_v38  ;;  %4212 = vmatprep.subr.bf16.mxu1 %v20561_v41  ;;  %v20598_v41 = vld [vmem:[%s30738_s8 + $0xa0] ss:$16 sps:$4 sm:$0xff]  }
 0x26c   : > { %4162 = vmatpush2.bf16.msra.mxu0 %v20556_v42  ;;  %4213 = vmatpush2.bf16.msra.mxu1 %v20559_v43 }
 0x26d   : > { %4163 = vmatprep.subr.bf16.mxu0 %v20564_v44  ;;  %4214 = vmatprep.subr.bf16.mxu1 %v20567_v45  ;;  %v20603_v44 = vld [vmem:[%s30738_s8 + $0x84] ss:$16 sps:$4 sm:$0xff]  }
 0x270   : > { %4164 = vmatpush2.bf16.msra.mxu0 %v20562_v54  ;;  %4215 = vmatpush2.bf16.msra.mxu1 %v20565_v22 }
 0x271   : > { %4165 = vmatprep.subr.bf16.mxu0 %v20570_v6  ;;  %4216 = vmatprep.subr.bf16.mxu1 %v20573_v47  ;;  %v20601_v47 = vld [vmem:[%s30738_s8 + $0x80] ss:$16 sps:$4 sm:$0xff]  }
 0x274   : > { %4166 = vmatpush2.bf16.msra.mxu0 %v20568_v48  ;;  %4217 = vmatpush2.bf16.msra.mxu1 %v20571_v49 }
 0x275   : > { %4167 = vmatprep.subr.bf16.mxu0 %v20576_v2  ;;  %4218 = vmatprep.subr.bf16.mxu1 %v20579_v3  ;;  %v20607_v2 = vld [vmem:[%s30738_s8 + $0x40] ss:$16 sps:$4 sm:$0xff]   ;;  %v20612_v3 = vld [vmem:[%s30738_s8 + $0x24] ss:$16 sps:$4 sm:$0xff]  }
 0x278   : > { %4168 = vmatpush2.bf16.msra.mxu0 %v20574_v50  ;;  %4219 = vmatpush2.bf16.msra.mxu1 %v20577_v51  ;;  %v20610_v50 = vld [vmem:[%s30738_s8 + $0x20] ss:$16 sps:$4 sm:$0xff]   ;;  %v20615_v51 = vld [vmem:[%s30738_s8 + $0x4] ss:$16 sps:$4 sm:$0xff]  }
 0x279   : > { %4169 = vmatprep.subr.bf16.mxu0 %v20582_v46  ;;  %4220 = vmatprep.subr.bf16.mxu1 %v20585_v21  ;;  %v20613_v46 = vld [vmem:[%s30738_s8] ss:$16 sps:$4 sm:$0xff]   ;;  %v20642_v21 = vld [vmem:[%s30738_s8 + $0x2e4] ss:$16 sps:$4 sm:$0xff]  }
 0x27c   : > { %4170 = vmatpush2.bf16.msra.mxu0 %v20580_v52  ;;  %4221 = vmatpush2.bf16.msra.mxu1 %v20583_v53  ;;  %v20618_v52 = vld [vmem:[%s30738_s8 + $0x1e4] ss:$16 sps:$4 sm:$0xff]   ;;  %v20640_v53 = vld [vmem:[%s30738_s8 + $0x2e0] ss:$16 sps:$4 sm:$0xff]  }
 0x27d   : > { %4171 = vmatprep.subr.bf16.mxu0 %v20588_v56  ;;  %4222 = vmatprep.subr.bf16.mxu1 %v20591_v57  ;;  %v20616_v56 = vld [vmem:[%s30738_s8 + $0x1e0] ss:$16 sps:$4 sm:$0xff]  }
 0x27e   : > { %v20646_v57 = vld [vmem:[%s30738_s8 + $0x2c0] ss:$16 sps:$4 sm:$0xff]  }
 0x280   : > { %4172 = vmatpush2.bf16.msra.mxu0 %v20586_v4  ;;  %4223 = vmatpush2.bf16.msra.mxu1 %v20589_v5  ;;  %v3080_v15 = vpop.f32.mrf.mxu0  ;;  %v3131_v16 = vpop.f32.mrf.mxu1  ;;  %v20648_v4 = vld [vmem:[%s30738_s8 + $0x2c4] ss:$16 sps:$4 sm:$0xff]  }
 0x281   : > { %v3081_v60 = vadd.f32 %v3080_v15, %v24487_v24  ;;  %5278 = vmatprep.subr.bf16.mxu0 %v20594_v11  ;;  %5321 = vmatprep.subr.bf16.mxu1 %v20642_v21  ;;  %v20621_v5 = vld [vmem:[%s30738_s8 + $0x1c4] ss:$16 sps:$4 sm:$0xff]   ;;  %v20619_v11 = vld [vmem:[%s30738_s8 + $0x1c0] ss:$16 sps:$4 sm:$0xff]  }
 0x282   : > { %v3082_v17 = vpop.f32.mrf.mxu0  ;;  %v3133_v59 = vpop.f32.mrf.mxu1  ;;  %v20652_v15 = vld [vmem:[%s30738_s8 + $0x2a0] ss:$16 sps:$4 sm:$0xff]  }
 0x283   : > { %v24939_v25 = vadd.f32 %v3131_v16, %v3081_v60  ;;  %4174 = vmatmul.mubr.bf16.vlgmr.msra.gmra.mxu0 %v24729_v19  ;;  %4225 = vmatmul.mubr.bf16.vlgmr.msra.gmra.mxu1 %v24733_v58  ;;  %v3083_v26 = vadd.f32 %v3082_v17, %v24499_v29  ;;  %v20600_v29 = vld [vmem:[%s30738_s8 + $0xa4] ss:$16 sps:$4 sm:$0xff]   ;;  %v20658_v17 = vld [vmem:[%s30738_s8 + $0x280] ss:$16 sps:$4 sm:$0xff]  }
 0x284   : > { %4183 = vmatprep.mubr.bf16.mxu0 %v24520_v39  ;;  %4234 = vmatprep.mubr.bf16.mxu1 %v24523_v40  ;;  %v3084_v24 = vpop.f32.mrf.mxu0  ;;  %v3135_v27 = vpop.f32.mrf.mxu1  ;;  %v20654_v16 = vld [vmem:[%s30738_s8 + $0x2a4] ss:$16 sps:$4 sm:$0xff]  }
 0x285   : > { %v24946_v28 = vadd.f32 %v3133_v59, %v3083_v26  ;;  %v3085_v30 = vadd.f32 %v3084_v24, %v24507_v34  ;;  %5279 = vmatpush1.bf16.msra.mxu0 %v20592_v61  ;;  %5322 = vmatpush1.bf16.msra.mxu1 %v20640_v53  ;;  %v20624_v60 = vld [vmem:[%s30738_s8 + $0x1a4] ss:$16 sps:$4 sm:$0xff]   ;;  %v20622_v61 = vld [vmem:[%s30738_s8 + $0x1a0] ss:$16 sps:$4 sm:$0xff]  }
 0x286   : > { %v24952_v19 = vpop.f32.mrf.mxu0  ;;  %v24954_v58 = vpop.f32.mrf.mxu1  ;;  %5280 = vmatprep.subr.bf16.mxu0 %v20597_v20  ;;  %5323 = vmatprep.subr.bf16.mxu1 %v20648_v4  ;;  %v20660_v59 = vld [vmem:[%s30738_s8 + $0x284] ss:$16 sps:$4 sm:$0xff]   ;;  %v20625_v26 = vld [vmem:[%s30738_s8 + $0x180] ss:$16 sps:$4 sm:$0xff]  }
 0x287   : > { %v24959_v39 = vadd.f32 %v3135_v27, %v3085_v30  ;;  %v20627_v20 = vld [vmem:[%s30738_s8 + $0x184] ss:$16 sps:$4 sm:$0xff]   ;;  %v20664_v24 = vld [vmem:[%s30738_s8 + $0x260] ss:$16 sps:$4 sm:$0xff]  }
 0x288   : > { %v3090_v40 = vpop.f32.mrf.mxu0  ;;  %v3141_v38 = vpop.f32.mrf.mxu1  ;;  %v20666_v27 = vld [vmem:[%s30738_s8 + $0x264] ss:$16 sps:$4 sm:$0xff]  }
 0x289   : > { %v3091_v34 = vadd.f32 %v3090_v40, %v24533_v1  ;;  %5281 = vmatpush1.bf16.msra.mxu0 %v20595_v31  ;;  %5324 = vmatpush1.bf16.msra.mxu1 %v20646_v57  ;;  %v20630_v30 = vld [vmem:[%s30738_s8 + $0x164] ss:$16 sps:$4 sm:$0xff]   ;;  %v20628_v31 = vld [vmem:[%s30738_s8 + $0x160] ss:$16 sps:$4 sm:$0xff]  }
 0x28a   : > { %v3092_v42 = vpop.f32.mrf.mxu0  ;;  %v3143_v43 = vpop.f32.mrf.mxu1  ;;  %5282 = vmatprep.subr.bf16.mxu0 %v20600_v29  ;;  %5325 = vmatprep.subr.bf16.mxu1 %v20654_v16  ;;  %v20670_v29 = vld [vmem:[%s30738_s8 + $0x240] ss:$16 sps:$4 sm:$0xff]   ;;  %v20672_v40 = vld [vmem:[%s30738_s8 + $0x244] ss:$16 sps:$4 sm:$0xff]  }
 0x28b   : > { %v24968_v45 = vadd.f32 %v3141_v38, %v3091_v34  ;;  %4184 = vmatmul.mubr.bf16.gmra.mxu0 %v24706_v62  ;;  %4235 = vmatmul.mubr.bf16.gmra.mxu1 %v24709_v63  ;;  %v3093_v1 = vadd.f32 %v3092_v42, %v24553_v13  ;;  %v20606_v62 = vld [vmem:[%s30738_s8 + $0x64] ss:$16 sps:$4 sm:$0xff]   ;;  %v20604_v13 = vld [vmem:[%s30738_s8 + $0x60] ss:$16 sps:$4 sm:$0xff]  }
 0x28c   : > { %v3094_v54 = vpop.f32.mrf.mxu0  ;;  %v3145_v22 = vpop.f32.mrf.mxu1  ;;  %v20609_v63 = vld [vmem:[%s30738_s8 + $0x44] ss:$16 sps:$4 sm:$0xff]   ;;  %v20631_v34 = vld [vmem:[%s30738_s8 + $0x140] ss:$16 sps:$4 sm:$0xff]  }
 0x28d   : > { %v24973_v6 = vadd.f32 %v3143_v43, %v3093_v1  ;;  %5283 = vmatpush1.bf16.msra.mxu0 %v20598_v41  ;;  %5326 = vmatpush1.bf16.msra.mxu1 %v20652_v15  ;;  %v20633_v38 = vld [vmem:[%s30738_s8 + $0x144] ss:$16 sps:$4 sm:$0xff]   ;;  %v20676_v41 = vld [vmem:[%s30738_s8 + $0x220] ss:$16 sps:$4 sm:$0xff]  }
 0x28e   : > { %v3095_v48 = vpop.f32.mrf.mxu0  ;;  %v3146_v49 = vpop.f32.mrf.mxu1  ;;  %5284 = vmatprep.subr.bf16.mxu0 %v20603_v44  ;;  %5327 = vmatprep.subr.bf16.mxu1 %v20660_v59  ;;  %v20678_v42 = vld [vmem:[%s30738_s8 + $0x224] ss:$16 sps:$4 sm:$0xff]   ;;  %v20634_v44 = vld [vmem:[%s30738_s8 + $0x120] ss:$16 sps:$4 sm:$0xff]  }
 0x28f   : > { %v20636_v43 = vld [vmem:[%s30738_s8 + $0x124] ss:$16 sps:$4 sm:$0xff]   ;;  %v20682_v1 = vld [vmem:[%s30738_s8 + $0x200] ss:$16 sps:$4 sm:$0xff]  }
 0x290   : > { %v20684_v54 = vld [vmem:[%s30738_s8 + $0x204] ss:$16 sps:$4 sm:$0xff]   ;;  %v20688_v48 = vld [vmem:[%s30738_s8 + $0x3e0] ss:$16 sps:$4 sm:$0xff]  }
 0x291   : > { %5285 = vmatpush1.bf16.msra.mxu0 %v20601_v47  ;;  %5328 = vmatpush1.bf16.msra.mxu1 %v20658_v17  ;;  %v20639_v22 = vld [vmem:[%s30738_s8 + $0x104] ss:$16 sps:$4 sm:$0xff]   ;;  %v20637_v47 = vld [vmem:[%s30738_s8 + $0x100] ss:$16 sps:$4 sm:$0xff]  }
 0x292   : > { %5286 = vmatprep.subr.bf16.mxu0 %v20606_v62  ;;  %5329 = vmatprep.subr.bf16.mxu1 %v20666_v27  ;;  %v20690_v49 = vld [vmem:[%s30738_s8 + $0x3e4] ss:$16 sps:$4 sm:$0xff]   ;;  %v20645_v62 = vld [vmem:[%s30738_s8 + $0xec] ss:$16 sps:$4 sm:$0xff]   ;;  %v20706_v17 = vld [vmem:[%s30738_s8 + $0x380] ss:$16 sps:$4 sm:$0xff]  }
 0x293   : > { %v20702_v57 = vld [vmem:[%s30738_s8 + $0x3a4] ss:$16 sps:$4 sm:$0xff]  }
 0x295   : > { %5287 = vmatpush1.bf16.msra.mxu0 %v20604_v13  ;;  %5330 = vmatpush1.bf16.msra.mxu1 %v20664_v24 }
 0x296   : > { %5288 = vmatprep.subr.bf16.mxu0 %v20609_v63  ;;  %5331 = vmatprep.subr.bf16.mxu1 %v20672_v40 }
 0x299   : > { %5289 = vmatpush1.bf16.msra.mxu0 %v20607_v2  ;;  %5332 = vmatpush1.bf16.msra.mxu1 %v20670_v29  ;;  %v20696_v2 = vld [vmem:[%s30738_s8 + $0x3c4] ss:$16 sps:$4 sm:$0xff]  }
 0x29a   : > { %5290 = vmatprep.subr.bf16.mxu0 %v20612_v3  ;;  %5333 = vmatprep.subr.bf16.mxu1 %v20678_v42  ;;  %v20724_v42 = vld [vmem:[%s30738_s8 + $0x320] ss:$16 sps:$4 sm:$0xff]  }
 0x29d   : > { %5291 = vmatpush1.bf16.msra.mxu0 %v20610_v50  ;;  %5334 = vmatpush1.bf16.msra.mxu1 %v20676_v41  ;;  %v20694_v50 = vld [vmem:[%s30738_s8 + $0x3c0] ss:$16 sps:$4 sm:$0xff]   ;;  %v20726_v41 = vld [vmem:[%s30738_s8 + $0x324] ss:$16 sps:$4 sm:$0xff]  }
 0x29e   : > { %5292 = vmatprep.subr.bf16.mxu0 %v20615_v51  ;;  %5335 = vmatprep.subr.bf16.mxu1 %v20684_v54  ;;  %v25174_v54 = vld [vmem:[%s30739_s29] sm:$0xf]  ;;  %s17672_s29 = sshll.u32 %s23525_s27, 2  ;;  %s17524_s27 = scalar_lea.sflag [#allocation3], %s30603_s0 }
 0x29f   : > { %s727_s25 = scalar_lea.vmem %s30688_s23, %s17672_s29 }
 0x2a1   : > { %5293 = vmatpush1.bf16.msra.mxu0 %v20613_v46  ;;  %5336 = vmatpush1.bf16.msra.mxu1 %v20682_v1  ;;  %v20738_v1 = vld [vmem:[%s30738_s8 + $0x2ec] ss:$16 sps:$4 sm:$0xff]  }
 0x2a2   : > { %5294 = vmatprep.subr.bf16.mxu0 %v20618_v52  ;;  %5337 = vmatprep.subr.bf16.mxu1 %v20690_v49 }
 0x2a5   : > { %5295 = vmatpush2.bf16.msra.mxu0 %v20616_v56  ;;  %5338 = vmatpush2.bf16.msra.mxu1 %v20688_v48  ;;  %v2294_v48 = vadd.f32 %v24511_v36, %v24509_v35 }
 0x2a6   : > { %5296 = vmatprep.subr.bf16.mxu0 %v20621_v5  ;;  %5339 = vmatprep.subr.bf16.mxu1 %v20696_v2  ;;  %v20700_v5 = vld [vmem:[%s30738_s8 + $0x3a0] ss:$16 sps:$4 sm:$0xff]  }
 0x2a7   : > { %v3087_v2 = vadd.f32 %v24952_v19, %v2294_v48 }
 0x2a9   : > { %5297 = vmatpush2.bf16.msra.mxu0 %v20619_v11  ;;  %5340 = vmatpush2.bf16.msra.mxu1 %v20694_v50 }
 0x2aa   : > { %5298 = vmatprep.subr.bf16.mxu0 %v20624_v60  ;;  %5341 = vmatprep.subr.bf16.mxu1 %v20702_v57 }
 0x2ad   : > { %5299 = vmatpush2.bf16.msra.mxu0 %v20622_v61  ;;  %5342 = vmatpush2.bf16.msra.mxu1 %v20700_v5  ;;  %v20708_v61 = vld [vmem:[%s30738_s8 + $0x384] ss:$16 sps:$4 sm:$0xff]  }
 0x2ae   : > { %5300 = vmatprep.subr.bf16.mxu0 %v20627_v20  ;;  %5343 = vmatprep.subr.bf16.mxu1 %v20708_v61 }
 0x2b1   : > { %5301 = vmatpush2.bf16.msra.mxu0 %v20625_v26  ;;  %5344 = vmatpush2.bf16.msra.mxu1 %v20706_v17 }
 0x2b2   : > { %5302 = vmatprep.subr.bf16.mxu0 %v20630_v30 }
 0x2b5   : > { %5303 = vmatpush2.bf16.msra.mxu0 %v20628_v31  ;;  %v20714_v31 = vld [vmem:[%s30738_s8 + $0x364] ss:$16 sps:$4 sm:$0xff]  }
 0x2b6   : > { %5304 = vmatprep.subr.bf16.mxu0 %v20633_v38  ;;  %5345 = vmatprep.subr.bf16.mxu1 %v20714_v31 }
 0x2b9   : > { %5305 = vmatpush2.bf16.msra.mxu0 %v20631_v34  ;;  %v20718_v34 = vld [vmem:[%s30738_s8 + $0x340] ss:$16 sps:$4 sm:$0xff]  }
 0x2ba   : > { %5306 = vmatprep.subr.bf16.mxu0 %v20636_v43  ;;  %v20732_v43 = vld [vmem:[%s30738_s8 + $0x304] ss:$16 sps:$4 sm:$0xff]  }
 0x2bd   : > { %5307 = vmatpush2.bf16.msra.mxu0 %v20634_v44  ;;  %v20730_v44 = vld [vmem:[%s30738_s8 + $0x300] ss:$16 sps:$4 sm:$0xff]  }
 0x2be   : > { %5308 = vmatprep.subr.bf16.mxu0 %v20639_v22 }
 0x2c1   : > { %v3182_v13 = vpop.f32.mrf.mxu0  ;;  %v3233_v63 = vpop.f32.mrf.mxu1  ;;  %5309 = vmatpush2.bf16.msra.mxu0 %v20637_v47 }
 0x2c2   : > { %v3183_v3 = vadd.f32 %v3182_v13, %v24725_v18  ;;  %5364 = vmatprep.subr.bf16.mxu0 %v20645_v62  ;;  %v4260_v62 = vrot.slane %v25174_v54, %v23828_v12 }
 0x2c3   : > { %v3184_v51 = vpop.f32.mrf.mxu0  ;;  %v3235_v46 = vpop.f32.mrf.mxu1 }
 0x2c4   : > { %v25114_v21 = vadd.f32 %v3233_v63, %v3183_v3  ;;  %v3185_v52 = vadd.f32 %v3184_v51, %v24737_v23  ;;  %v4264_v51 = vrot.slane %v25174_v54, %v23819_v9 }
 0x2c5   : > { %v3186_v53 = vpop.f32.mrf.mxu0  ;;  %v3237_v56 = vpop.f32.mrf.mxu1 }
 0x2c6   : > { %v25120_v18 = vadd.f32 %v3235_v46, %v3185_v52  ;;  %v3187_v4 = vadd.f32 %v3186_v53, %v24753_v32 }
 0x2c7   : > { %v25126_v11 = vpop.f32.mrf.mxu0  ;;  %v25128_v15 = vpop.f32.mrf.mxu1 }
 0x2c8   : > { %v25130_v23 = vadd.f32 %v3237_v56, %v3187_v4  ;;  %v3138_v4 = vadd.f32 %v24954_v58, %v3087_v2 }
 0x2c9   : > { %v3192_v16 = vpop.f32.mrf.mxu0  ;;  %v3243_v60 = vpop.f32.mrf.mxu1 }
 0x2ca   : > { %v3193_v32 = vadd.f32 %v3192_v16, %v24771_v0  ;;  %v20712_v0 = vld [vmem:[%s30738_s8 + $0x360] ss:$16 sps:$4 sm:$0xff]  }
 0x2cb   : > { %v3194_v59 = vpop.f32.mrf.mxu0  ;;  %v3245_v20 = vpop.f32.mrf.mxu1  ;;  %5346 = vmatpush2.bf16.msra.mxu1 %v20712_v0 }
 0x2cc   : > { %v25139_v26 = vadd.f32 %v3243_v60, %v3193_v32  ;;  %v3195_v24 = vadd.f32 %v3194_v59, %v24775_v55  ;;  %v20720_v55 = vld [vmem:[%s30738_s8 + $0x344] ss:$16 sps:$4 sm:$0xff]  }
 0x2cd   : > { %v3196_v27 = vpop.f32.mrf.mxu0  ;;  %v3247_v30 = vpop.f32.mrf.mxu1  ;;  %5347 = vmatprep.subr.bf16.mxu1 %v20720_v55 }
 0x2ce   : > { %v25145_v29 = vadd.f32 %v3245_v20, %v3195_v24 }
 0x2cf   : > { %v3197_v40 = vpop.f32.mrf.mxu0  ;;  %v3248_v38 = vpop.f32.mrf.mxu1  ;;  %5348 = vmatpush2.bf16.msra.mxu1 %v20718_v34 }
 0x2d0   : > { %5349 = vmatprep.subr.bf16.mxu1 %v20726_v41 }
 0x2d3   : > { %5350 = vmatpush2.bf16.msra.mxu1 %v20724_v42 }
 0x2d4   : > { %5351 = vmatprep.subr.bf16.mxu1 %v20732_v43 }
 0x2d7   : > { %5352 = vmatpush2.bf16.msra.mxu1 %v20730_v44 }
 0x2d8   : > { %5407 = vmatprep.subr.bf16.mxu1 %v20738_v1 }
 0x302   : > { %v4073_v22 = vpop.f32.mrf.mxu0  ;;  %v4124_v47 = vpop.f32.mrf.mxu1 }
 0x303   : > { %v4125_v49 = vadd.f32 %v4124_v47, %v4073_v22 }
 0x304   : > { %v4075_v13 = vpop.f32.mrf.mxu0  ;;  %v4126_v63 = vpop.f32.mrf.mxu1 }
 0x305   : > { %v4243_v3 = vadd.f32 %v4125_v49, %v24939_v25  ;;  %v4127_v50 = vadd.f32 %v4126_v63, %v4075_v13 }
 0x306   : > { %v4077_v46 = vpop.f32.mrf.mxu0  ;;  %v4128_v52 = vpop.f32.mrf.mxu1 }
 0x307   : > { %v4244_v53 = vadd.f32 %v4127_v50, %v24946_v28  ;;  %v4129_v56 = vadd.f32 %v4128_v52, %v4077_v46  ;;  %v4277_v35 = vadd.f32 %v4260_v62, %v4243_v3 }
 0x308   : > { %v4079_v36 = vpop.f32.mrf.mxu0  ;;  %v4130_v57 = vpop.f32.mrf.mxu1 }
 0x309   : > { %v4247_v5 = vadd.f32 %v4129_v56, %v24959_v39  ;;  %v4131_v16 = vadd.f32 %v4130_v57, %v4079_v36  ;;  %v4278_v19 = vadd.f32 %v4264_v51, %v4244_v53  ;;  %v4289_v59 = vmax.f32 %v4277_v35, 0.0 }
 0x30a   : > { %v4083_v60 = vpop.f32.mrf.mxu0  ;;  %v4134_v25 = vpop.f32.mrf.mxu1 }
 0x30b   : > { %v4281_v61 = vadd.f32 %v4260_v62, %v4247_v5  ;;  %v4248_v32 = vadd.f32 %v4131_v16, %v3138_v4  ;;  %v4135_v17 = vadd.f32 %v4134_v25, %v4083_v60  ;;  %v4290_v0 = vmax.f32 %v4278_v19, 0.0  ;;  %v20643_v4 = vld [vmem:[%s30738_s8 + $0xe8] ss:$16 sps:$4 sm:$0xff]   ;;  %v20651_v19 = vld [vmem:[%s30738_s8 + $0xcc] ss:$16 sps:$4 sm:$0xff]  }
 0x30c   : > { %v4085_v20 = vpop.f32.mrf.mxu0  ;;  %v4136_v24 = vpop.f32.mrf.mxu1 }
 0x30d   : > { %v4293_v27 = vmax.f32 %v4281_v61, 0.0  ;;  %v4282_v28 = vadd.f32 %v4264_v51, %v4248_v32  ;;  %v4251_v30 = vadd.f32 %v4135_v17, %v24968_v45  ;;  %v4137_v31 = vadd.f32 %v4136_v24, %v4085_v20  ;;  %v20649_v32 = vld [vmem:[%s30738_s8 + $0xc8] ss:$16 sps:$4 sm:$0xff]   ;;  %v20657_v17 = vld [vmem:[%s30738_s8 + $0xac] ss:$16 sps:$4 sm:$0xff]  }
 0x30e   : > { %v4087_v40 = vpop.f32.mrf.mxu0  ;;  %v4138_v58 = vpop.f32.mrf.mxu1  ;;  %v20663_v20 = vld [vmem:[%s30738_s8 + $0x8c] ss:$16 sps:$4 sm:$0xff]   ;;  %v20661_v24 = vld [vmem:[%s30738_s8 + $0x88] ss:$16 sps:$4 sm:$0xff]  }
 0x30f   : > { %v25188_v38 = vpack.c.bf16 %v4293_v27, %v4289_v59  ;;  %v4294_v39 = vmax.f32 %v4282_v28, 0.0  ;;  %v4285_v55 = vadd.f32 %v4260_v62, %v4251_v30  ;;  %v4252_v34 = vadd.f32 %v4137_v31, %v24973_v6  ;;  %v20655_v59 = vld [vmem:[%s30738_s8 + $0xa8] ss:$16 sps:$4 sm:$0xff]   ;;  %v20669_v27 = vld [vmem:[%s30738_s8 + $0x6c] ss:$16 sps:$4 sm:$0xff]  }
 0x310   : > { %v4088_v41 = vpop.f32.mrf.mxu0  ;;  %v4139_v42 = vpop.f32.mrf.mxu1  ;;  %v20667_v28 = vld [vmem:[%s30738_s8 + $0x68] ss:$16 sps:$4 sm:$0xff]   ;;  %v20675_v30 = vld [vmem:[%s30738_s8 + $0x4c] ss:$16 sps:$4 sm:$0xff]  }
 0x311   : > { %v25191_v43 = vpack.c.bf16 %v4294_v39, %v4290_v0  ;;  %v4297_v44 = vmax.f32 %v4285_v55, 0.0  ;;  %v4286_v1 = vadd.f32 %v4264_v51, %v4252_v34  ;;  %v4567_v49 = vshrl.u32 %v25188_v38, 16  ;;  %v20673_v31 = vld [vmem:[%s30738_s8 + $0x48] ss:$16 sps:$4 sm:$0xff]   ;;  %v20681_v0 = vld [vmem:[%s30738_s8 + $0x2c] ss:$16 sps:$4 sm:$0xff]  }
 0x312   : > { %v4570_v13 = vshll.u32 %v25188_v38, 16  ;;  %v20679_v40 = vld [vmem:[%s30738_s8 + $0x28] ss:$16 sps:$4 sm:$0xff]   ;;  %v20687_v58 = vld [vmem:[%s30738_s8 + $0xc] ss:$16 sps:$4 sm:$0xff]  }
 0x313   : > { %v4305_v22 = vpack.c.bf16 %v4297_v44, %v4297_v44  ;;  %v4298_v47 = vmax.f32 %v4286_v1, 0.0  ;;  %v4584_v45 = vshrl.u32 %v25191_v43, 16  ;;  %v4587_v48 = vshll.u32 %v25191_v43, 16  ;;  %v20685_v39 = vld [vmem:[%s30738_s8 + $0x8] ss:$16 sps:$4 sm:$0xff]  }
 0x314   : > { %v4569_v51 = vrot.slane %v4567_v49, 1  ;;  %v4572_v56 = vrot.slane %v4570_v13, 2  ;;  %v20693_v55 = vld [vmem:[%s30738_s8 + $0x1ec] ss:$16 sps:$4 sm:$0xff]   ;;  %v20691_v34 = vld [vmem:[%s30738_s8 + $0x1e8] ss:$16 sps:$4 sm:$0xff]   ;;  %v4268_v49 = vrot.slane %v25174_v54, %v23831_v14 }
 0x315   : > { %v4575_v63 = vshrl.u32 %v4305_v22, 16  ;;  %v4578_v62 = vshll.u32 %v4305_v22, 16  ;;  %v4306_v2 = vpack.c.bf16 %v4298_v47, %v4298_v47  ;;  %v4586_v6 = vrot.slane %v4584_v45, 1  ;;  %v20699_v41 = vld [vmem:[%s30738_s8 + $0x1cc] ss:$16 sps:$4 sm:$0xff]  }
 0x316   : > { %v4589_v3 = vrot.slane %v4587_v48, 2  ;;  %v4573_v60 = vor.u32 %v4572_v56, %v4569_v51  ;;  %v20697_v42 = vld [vmem:[%s30738_s8 + $0x1c8] ss:$16 sps:$4 sm:$0xff]   ;;  %v20705_v44 = vld [vmem:[%s30738_s8 + $0x1ac] ss:$16 sps:$4 sm:$0xff]   ;;  %v2396_v45 = vadd.f32 %v24757_v37, %v24755_v33  ;;  %v4272_v37 = vrot.slane %v25174_v54, %v23822_v10 }
 0x317   : > { %v4577_v50 = vrot.slane %v4575_v63, 1  ;;  %v4580_v46 = vrot.slane %v4578_v62, 2  ;;  %v4592_v52 = vshrl.u32 %v4306_v2, 16  ;;  %v4595_v53 = vshll.u32 %v4306_v2, 16  ;;  %v20703_v1 = vld [vmem:[%s30738_s8 + $0x1a8] ss:$16 sps:$4 sm:$0xff]  }
 0x318   : > { %v4590_v5 = vor.u32 %v4589_v3, %v4586_v6  ;;  %v20711_v62 = vld [vmem:[%s30738_s8 + $0x18c] ss:$16 sps:$4 sm:$0xff]   ;;  %v3189_v2 = vadd.f32 %v25126_v11, %v2396_v45  ;;  %v20709_v33 = vld [vmem:[%s30738_s8 + $0x188] ss:$16 sps:$4 sm:$0xff]  }
 0x319   : > { %v4594_v35 = vrot.slane %v4592_v52, 1  ;;  %v4597_v36 = vrot.slane %v4595_v53, 2  ;;  %v4581_v57 = vor.u32 %v4580_v46, %v4577_v50  ;;  %v20715_v54 = vld [vmem:[%s30738_s8 + $0x168] ss:$16 sps:$4 sm:$0xff]  }
 0x31a   : > { %v3240_v11 = vadd.f32 %v25128_v15, %v3189_v2  ;;  %v20723_v15 = vld [vmem:[%s30738_s8 + $0x14c] ss:$16 sps:$4 sm:$0xff]  }
 0x31b   : > { %v4598_v16 = vor.u32 %v4597_v36, %v4594_v35  ;;  %v25205_v61 = vsel %vm4565_vm2, %v4573_v60, %v4581_v57 }
 0x31d   : > { %v4599_v25 = vsel %vm4565_vm2, %v4590_v5, %v4598_v16 }
 0x31e   : > { %5310 = vmatprep.mubr.bf16.mxu0 %v4599_v25 }
 0x31f   : > { %5311 = vmatmul.mubr.bf16.vlgmr.msra.gmra.mxu0 %v25205_v61 }
 0x320   : > { %5365 = vmatpush1.bf16.msra.mxu0 %v20643_v4  ;;  %5396 = vmatprep.mubr.bf16.mxu0 %v4599_v25 }
 0x321   : > { %5366 = vmatprep.subr.bf16.mxu0 %v20651_v19 }
 0x324   : > { %5367 = vmatpush1.bf16.msra.mxu0 %v20649_v32 }
 0x325   : > { %5368 = vmatprep.subr.bf16.mxu0 %v20657_v17 }
 0x328   : > { %5369 = vmatpush1.bf16.msra.mxu0 %v20655_v59 }
 0x329   : > { %5370 = vmatprep.subr.bf16.mxu0 %v20663_v20 }
 0x32c   : > { %5371 = vmatpush1.bf16.msra.mxu0 %v20661_v24 }
 0x32d   : > { %5372 = vmatprep.subr.bf16.mxu0 %v20669_v27  ;;  %v20721_v27 = vld [vmem:[%s30738_s8 + $0x148] ss:$16 sps:$4 sm:$0xff]  }
 0x330   : > { %5373 = vmatpush1.bf16.msra.mxu0 %v20667_v28 }
 0x331   : > { %5374 = vmatprep.subr.bf16.mxu0 %v20675_v30 }
 0x334   : > { %5375 = vmatpush1.bf16.msra.mxu0 %v20673_v31 }
 0x335   : > { %5376 = vmatprep.subr.bf16.mxu0 %v20681_v0 }
 0x338   : > { %5377 = vmatpush1.bf16.msra.mxu0 %v20679_v40 }
 0x339   : > { %5378 = vmatprep.subr.bf16.mxu0 %v20687_v58 }
 0x33c   : > { %5379 = vmatpush1.bf16.msra.mxu0 %v20685_v39 }
 0x33d   : > { %5380 = vmatprep.subr.bf16.mxu0 %v20693_v55 }
 0x340   : > { %5381 = vmatpush2.bf16.msra.mxu0 %v20691_v34 }
 0x341   : > { %5382 = vmatprep.subr.bf16.mxu0 %v20699_v41 }
 0x343   : > { %v4175_v22 = vpop.f32.mrf.mxu0  ;;  %v4226_v47 = vpop.f32.mrf.mxu1 }
 0x344   : > { %v4227_v48 = vadd.f32 %v4226_v47, %v4175_v22  ;;  %5383 = vmatpush2.bf16.msra.mxu0 %v20697_v42 }
 0x345   : > { %v4177_v13 = vpop.f32.mrf.mxu0  ;;  %v4228_v63 = vpop.f32.mrf.mxu1  ;;  %5384 = vmatprep.subr.bf16.mxu0 %v20705_v44 }
 0x346   : > { %v4245_v6 = vadd.f32 %v4227_v48, %v25114_v21  ;;  %v4229_v3 = vadd.f32 %v4228_v63, %v4177_v13  ;;  %v20717_v21 = vld [vmem:[%s30738_s8 + $0x16c] ss:$16 sps:$4 sm:$0xff]  }
 0x347   : > { %v4179_v50 = vpop.f32.mrf.mxu0  ;;  %v4230_v46 = vpop.f32.mrf.mxu1  ;;  %v20735_v48 = vld [vmem:[%s30738_s8 + $0x10c] ss:$16 sps:$4 sm:$0xff]  }
 0x348   : > { %v4246_v52 = vadd.f32 %v4229_v3, %v25120_v18  ;;  %v4231_v53 = vadd.f32 %v4230_v46, %v4179_v50  ;;  %5385 = vmatpush2.bf16.msra.mxu0 %v20703_v1  ;;  %v4279_v51 = vadd.f32 %v4268_v49, %v4245_v6  ;;  %v20727_v1 = vld [vmem:[%s30738_s8 + $0x128] ss:$16 sps:$4 sm:$0xff]  }
 0x349   : > { %v4181_v56 = vpop.f32.mrf.mxu0  ;;  %v4232_v35 = vpop.f32.mrf.mxu1  ;;  %5386 = vmatprep.subr.bf16.mxu0 %v20711_v62  ;;  %v20733_v6 = vld [vmem:[%s30738_s8 + $0x108] ss:$16 sps:$4 sm:$0xff]  }
 0x34a   : > { %v4249_v36 = vadd.f32 %v4231_v53, %v25130_v23  ;;  %v4233_v57 = vadd.f32 %v4232_v35, %v4181_v56  ;;  %v4280_v18 = vadd.f32 %v4272_v37, %v4246_v52  ;;  %v4291_v25 = vmax.f32 %v4279_v51, 0.0  ;;  %v20741_v53 = vld [vmem:[%s30740_s28 + $0xe4] ss:$16 sps:$4 sm:$0xff]  }
 0x34b   : > { %v4185_v4 = vpop.f32.mrf.mxu0  ;;  %v4236_v5 = vpop.f32.mrf.mxu1 }
 0x34c   : > { %v4283_v16 = vadd.f32 %v4268_v49, %v4249_v36  ;;  %v4250_v19 = vadd.f32 %v4233_v57, %v3240_v11  ;;  %v4237_v60 = vadd.f32 %v4236_v5, %v4185_v4  ;;  %5387 = vmatpush2.bf16.msra.mxu0 %v20709_v33  ;;  %v4292_v28 = vmax.f32 %v4280_v18, 0.0  ;;  %v20739_v11 = vld [vmem:[%s30740_s28 + $0xe0] ss:$16 sps:$4 sm:$0xff]   ;;  %v20736_v57 = vld [vmem:[%s30738_s8 + $0x2e8] ss:$16 sps:$4 sm:$0xff]  }
 0x34d   : > { %v4187_v32 = vpop.f32.mrf.mxu0  ;;  %v4238_v17 = vpop.f32.mrf.mxu1  ;;  %5388 = vmatprep.subr.bf16.mxu0 %v20717_v21  ;;  %v20744_v4 = vld [vmem:[%s30738_s8 + $0x2cc] ss:$16 sps:$4 sm:$0xff]  }
 0x34e   : > { %v4295_v23 = vmax.f32 %v4283_v16, 0.0  ;;  %v4284_v59 = vadd.f32 %v4272_v37, %v4250_v19  ;;  %v4253_v20 = vadd.f32 %v4237_v60, %v25139_v26  ;;  %v4239_v24 = vadd.f32 %v4238_v17, %v4187_v32  ;;  %v20729_v26 = vld [vmem:[%s30738_s8 + $0x12c] ss:$16 sps:$4 sm:$0xff]   ;;  %v20742_v60 = vld [vmem:[%s30738_s8 + $0x2c8] ss:$16 sps:$4 sm:$0xff]  }
 0x34f   : > { %v4189_v30 = vpop.f32.mrf.mxu0  ;;  %v4240_v31 = vpop.f32.mrf.mxu1  ;;  %v20745_v32 = vld [vmem:[%s30740_s28 + $0xc0] ss:$16 sps:$4 sm:$0xff]   ;;  %v20753_v17 = vld [vmem:[%s30740_s28 + $0xa4] ss:$16 sps:$4 sm:$0xff]  }
 0x350   : > { %v25295_v0 = vpack.c.bf16 %v4295_v23, %v4291_v25  ;;  %v4296_v40 = vmax.f32 %v4284_v59, 0.0  ;;  %v4287_v58 = vadd.f32 %v4268_v49, %v4253_v20  ;;  %v4254_v39 = vadd.f32 %v4239_v24, %v25145_v29  ;;  %5389 = vmatpush2.bf16.msra.mxu0 %v20715_v54  ;;  %v20747_v25 = vld [vmem:[%s30740_s28 + $0xc4] ss:$16 sps:$4 sm:$0xff]   ;;  %v20748_v23 = vld [vmem:[%s30738_s8 + $0x2a8] ss:$16 sps:$4 sm:$0xff]  }
 0x351   : > { %v4190_v55 = vpop.f32.mrf.mxu0  ;;  %v4241_v34 = vpop.f32.mrf.mxu1  ;;  %5390 = vmatprep.subr.bf16.mxu0 %v20723_v15  ;;  %v20751_v15 = vld [vmem:[%s30740_s28 + $0xa0] ss:$16 sps:$4 sm:$0xff]   ;;  %v20756_v59 = vld [vmem:[%s30738_s8 + $0x28c] ss:$16 sps:$4 sm:$0xff]   ;;  %v20759_v20 = vld [vmem:[%s30740_s28 + $0x84] ss:$16 sps:$4 sm:$0xff]  }
 0x352   : > { %v25301_v41 = vpack.c.bf16 %v4296_v40, %v4292_v28  ;;  %v4299_v42 = vmax.f32 %v4287_v58, 0.0  ;;  %v4288_v44 = vadd.f32 %v4272_v37, %v4254_v39  ;;  %v4601_v49 = vshrl.u32 %v25295_v0, 16  ;;  %v20757_v24 = vld [vmem:[%s30740_s28 + $0x80] ss:$16 sps:$4 sm:$0xff]   ;;  %v20762_v28 = vld [vmem:[%s30738_s8 + $0x26c] ss:$16 sps:$4 sm:$0xff]  }
 0x353   : > { %v4604_v13 = vshll.u32 %v25295_v0, 16  ;;  %v20765_v30 = vld [vmem:[%s30740_s28 + $0x64] ss:$16 sps:$4 sm:$0xff]   ;;  %v20763_v31 = vld [vmem:[%s30740_s28 + $0x60] ss:$16 sps:$4 sm:$0xff]  }
 0x354   : > { %v4307_v22 = vpack.c.bf16 %v4299_v42, %v4299_v42  ;;  %v4300_v47 = vmax.f32 %v4288_v44, 0.0  ;;  %5391 = vmatpush2.bf16.msra.mxu0 %v20721_v27  ;;  %v4618_v29 = vshrl.u32 %v25301_v41, 16  ;;  %v4621_v45 = vshll.u32 %v25301_v41, 16  ;;  %v20754_v27 = vld [vmem:[%s30738_s8 + $0x288] ss:$16 sps:$4 sm:$0xff]  }
 0x355   : > { %5392 = vmatprep.subr.bf16.mxu0 %v20729_v26  ;;  %v4603_v51 = vrot.slane %v4601_v49, 1  ;;  %v4606_v56 = vrot.slane %v4604_v13, 2  ;;  %v20760_v40 = vld [vmem:[%s30738_s8 + $0x268] ss:$16 sps:$4 sm:$0xff]   ;;  %v20768_v58 = vld [vmem:[%s30738_s8 + $0x24c] ss:$16 sps:$4 sm:$0xff]  }
 0x356   : > { %v4609_v63 = vshrl.u32 %v4307_v22, 16  ;;  %v4612_v62 = vshll.u32 %v4307_v22, 16  ;;  %v4308_v2 = vpack.c.bf16 %v4300_v47, %v4300_v47  ;;  %v4620_v3 = vrot.slane %v4618_v29, 1  ;;  %v20771_v39 = vld [vmem:[%s30740_s28 + $0x44] ss:$16 sps:$4 sm:$0xff]  }
 0x357   : > { %v4623_v33 = vrot.slane %v4621_v45, 2  ;;  %v4607_v5 = vor.u32 %v4606_v56, %v4603_v51  ;;  %v20769_v55 = vld [vmem:[%s30740_s28 + $0x40] ss:$16 sps:$4 sm:$0xff]   ;;  %v20766_v34 = vld [vmem:[%s30738_s8 + $0x248] ss:$16 sps:$4 sm:$0xff]  }
 0x358   : > { %v4611_v37 = vrot.slane %v4609_v63, 1  ;;  %v4614_v50 = vrot.slane %v4612_v62, 2  ;;  %v4626_v46 = vshrl.u32 %v4308_v2, 16  ;;  %v4629_v52 = vshll.u32 %v4308_v2, 16  ;;  %5393 = vmatpush2.bf16.msra.mxu0 %v20727_v1  ;;  %v20774_v26 = vld [vmem:[%s30738_s8 + $0x22c] ss:$16 sps:$4 sm:$0xff]  }
 0x359   : > { %5394 = vmatprep.subr.bf16.mxu0 %v20735_v48  ;;  %v4624_v54 = vor.u32 %v4623_v33, %v4620_v3  ;;  %v20777_v42 = vld [vmem:[%s30740_s28 + $0x24] ss:$16 sps:$4 sm:$0xff]   ;;  %v20775_v44 = vld [vmem:[%s30740_s28 + $0x20] ss:$16 sps:$4 sm:$0xff]   ;;  %v20772_v1 = vld [vmem:[%s30738_s8 + $0x228] ss:$16 sps:$4 sm:$0xff]  }
 0x35a   : > { %v4628_v35 = vrot.slane %v4626_v46, 1  ;;  %v4631_v21 = vrot.slane %v4629_v52, 2  ;;  %v4615_v36 = vor.u32 %v4614_v50, %v4611_v37  ;;  %v20780_v22 = vld [vmem:[%s30738_s8 + $0x20c] ss:$16 sps:$4 sm:$0xff]   ;;  %v20783_v47 = vld [vmem:[%s30740_s28 + $0x4] ss:$16 sps:$4 sm:$0xff]  }
 0x35b   : > { %v20781_v29 = vld [vmem:[%s30740_s28] ss:$16 sps:$4 sm:$0xff]   ;;  %v20778_v45 = vld [vmem:[%s30738_s8 + $0x208] ss:$16 sps:$4 sm:$0xff]   ;;  %v20786_v48 = vld [vmem:[%s30738_s8 + $0x3ec] ss:$16 sps:$4 sm:$0xff]  }
 0x35c   : > { %5395 = vmatpush2.bf16.msra.mxu0 %v20733_v6  ;;  %v4632_v18 = vor.u32 %v4631_v21, %v4628_v35  ;;  %v25331_v19 = vsel %vm4565_vm2, %v4607_v5, %v4615_v36  ;;  %v20789_v49 = vld [vmem:[%s30740_s28 + $0x1e4] ss:$16 sps:$4 sm:$0xff]   ;;  %v20787_v13 = vld [vmem:[%s30740_s28 + $0x1e0] ss:$16 sps:$4 sm:$0xff]   ;;  %v20784_v63 = vld [vmem:[%s30738_s8 + $0x3e8] ss:$16 sps:$4 sm:$0xff]  }
 0x35d   : > { %6090 = vmatprep.subr.bf16.mxu0 %v20741_v53  ;;  %v20792_v62 = vld [vmem:[%s30738_s8 + $0x3cc] ss:$16 sps:$4 sm:$0xff]   ;;  %v20795_v2 = vld [vmem:[%s30740_s28 + $0x1c4] ss:$16 sps:$4 sm:$0xff]   ;;  %v20793_v6 = vld [vmem:[%s30740_s28 + $0x1c0] ss:$16 sps:$4 sm:$0xff]  }
 0x35e   : > { %v4633_v16 = vsel %vm4565_vm2, %v4624_v54, %v4632_v18  ;;  %v20790_v3 = vld [vmem:[%s30738_s8 + $0x3c8] ss:$16 sps:$4 sm:$0xff]   ;;  %v20798_v33 = vld [vmem:[%s30738_s8 + $0x3ac] ss:$16 sps:$4 sm:$0xff]   ;;  %v20801_v37 = vld [vmem:[%s30740_s28 + $0x1a4] ss:$16 sps:$4 sm:$0xff]  }
 0x35f   : > { %5353 = vmatprep.mubr.bf16.mxu1 %v4633_v16  ;;  %5397 = vmatmul.mubr.bf16.vlgmr.msra.gmra.mxu0 %v25205_v61  ;;  %v20750_v61 = vld [vmem:[%s30738_s8 + $0x2ac] ss:$16 sps:$4 sm:$0xff]   ;;  %v20799_v50 = vld [vmem:[%s30740_s28 + $0x1a0] ss:$16 sps:$4 sm:$0xff]   ;;  %v20796_v46 = vld [vmem:[%s30738_s8 + $0x3a8] ss:$16 sps:$4 sm:$0xff]  }
 0x360   : > { %5354 = vmatmul.mubr.bf16.vlgmr.msra.gmra.mxu1 %v25331_v19  ;;  %6091 = vmatpush1.bf16.msra.mxu0 %v20739_v11  ;;  %v20804_v52 = vld [vmem:[%s30738_s8 + $0x38c] ss:$16 sps:$4 sm:$0xff]   ;;  %v20807_v53 = vld [vmem:[%s30740_s28 + $0x184] ss:$16 sps:$4 sm:$0xff]   ;;  %v20805_v51 = vld [vmem:[%s30740_s28 + $0x180] ss:$16 sps:$4 sm:$0xff]  }
 0x361   : > { %5408 = vmatpush1.bf16.msra.mxu1 %v20736_v57  ;;  %6122 = vmatprep.mubr.bf16.mxu0 %v25191_v43  ;;  %v20802_v56 = vld [vmem:[%s30738_s8 + $0x388] ss:$16 sps:$4 sm:$0xff]   ;;  %v20810_v35 = vld [vmem:[%s30738_s8 + $0x36c] ss:$16 sps:$4 sm:$0xff]   ;;  %v20813_v21 = vld [vmem:[%s30740_s28 + $0x164] ss:$16 sps:$4 sm:$0xff]  }
 0x362   : > { %5439 = vmatprep.mubr.bf16.mxu1 %v4633_v16  ;;  %5409 = vmatprep.subr.bf16.mxu1 %v20744_v4  ;;  %v20811_v11 = vld [vmem:[%s30740_s28 + $0x160] ss:$16 sps:$4 sm:$0xff]   ;;  %v20808_v36 = vld [vmem:[%s30738_s8 + $0x368] ss:$16 sps:$4 sm:$0xff]   ;;  %v20816_v57 = vld [vmem:[%s30738_s8 + $0x34c] ss:$16 sps:$4 sm:$0xff]  }
 0x363   : > { %6092 = vmatprep.subr.bf16.mxu0 %v20747_v25  ;;  %v20819_v54 = vld [vmem:[%s30740_s28 + $0x144] ss:$16 sps:$4 sm:$0xff]   ;;  %v20817_v18 = vld [vmem:[%s30740_s28 + $0x140] ss:$16 sps:$4 sm:$0xff]   ;;  %v20814_v4 = vld [vmem:[%s30738_s8 + $0x348] ss:$16 sps:$4 sm:$0xff]  }
 0x364   : > { %6093 = vmatpush1.bf16.msra.mxu0 %v20745_v32  ;;  %v20822_v5 = vld [vmem:[%s30738_s8 + $0x32c] ss:$16 sps:$4 sm:$0xff]   ;;  %v20825_v16 = vld [vmem:[%s30740_s28 + $0x124] ss:$16 sps:$4 sm:$0xff]   ;;  %v20820_v25 = vld [vmem:[%s30738_s8 + $0x328] ss:$16 sps:$4 sm:$0xff]  }
 0x365   : > { %5410 = vmatpush1.bf16.msra.mxu1 %v20742_v60  ;;  %6094 = vmatprep.subr.bf16.mxu0 %v20753_v17  ;;  %v20823_v60 = vld [vmem:[%s30740_s28 + $0x120] ss:$16 sps:$4 sm:$0xff]   ;;  %v20828_v32 = vld [vmem:[%s30738_s8 + $0x30c] ss:$16 sps:$4 sm:$0xff]  }
 0x366   : > { %5411 = vmatprep.subr.bf16.mxu1 %v20750_v61  ;;  %v20831_v61 = vld [vmem:[%s30740_s28 + $0x104] ss:$16 sps:$4 sm:$0xff]   ;;  %v20829_v17 = vld [vmem:[%s30740_s28 + $0x100] ss:$16 sps:$4 sm:$0xff]  }
 0x368   : > { %6095 = vmatpush1.bf16.msra.mxu0 %v20751_v15  ;;  %v20826_v15 = vld [vmem:[%s30738_s8 + $0x308] ss:$16 sps:$4 sm:$0xff]   ;;  %s23153_s8 = sshll.u32 %s23242_s2, 4  ;;  %s23154_s8 = int_to_ptr.vmem [resolvable:$false] %s23153_s8 }
 0x369   : > { %5412 = vmatpush1.bf16.msra.mxu1 %v20748_v23  ;;  %6096 = vmatprep.subr.bf16.mxu0 %v20759_v20  ;;  %v20834_v23 = vld [vmem:[%s30740_s28 + $0x2e4] ss:$16 sps:$4 sm:$0xff]   ;;  %v20835_v20 = vld [vmem:[%s30740_s28 + $0xe8] ss:$16 sps:$4 sm:$0xff]  }
 0x36a   : > { %5413 = vmatprep.subr.bf16.mxu1 %v20756_v59  ;;  %v20837_v59 = vld [vmem:[%s30740_s28 + $0xec] ss:$16 sps:$4 sm:$0xff]  }
 0x36c   : > { %6097 = vmatpush1.bf16.msra.mxu0 %v20757_v24  ;;  %v20832_v24 = vld [vmem:[%s30740_s28 + $0x2e0] ss:$16 sps:$4 sm:$0xff]  }
 0x36d   : > { %5414 = vmatpush1.bf16.msra.mxu1 %v20754_v27  ;;  %6098 = vmatprep.subr.bf16.mxu0 %v20765_v30  ;;  %v20840_v27 = vld [vmem:[%s30740_s28 + $0x2c4] ss:$16 sps:$4 sm:$0xff]   ;;  %v20841_v30 = vld [vmem:[%s30740_s28 + $0xc8] ss:$16 sps:$4 sm:$0xff]  }
 0x36e   : > { %5415 = vmatprep.subr.bf16.mxu1 %v20762_v28  ;;  %v20843_v28 = vld [vmem:[%s30740_s28 + $0xcc] ss:$16 sps:$4 sm:$0xff]  }
 0x370   : > { %6099 = vmatpush1.bf16.msra.mxu0 %v20763_v31  ;;  %v20838_v31 = vld [vmem:[%s30740_s28 + $0x2c0] ss:$16 sps:$4 sm:$0xff]  }
 0x371   : > { %5416 = vmatpush1.bf16.msra.mxu1 %v20760_v40  ;;  %6100 = vmatprep.subr.bf16.mxu0 %v20771_v39  ;;  %v20849_v40 = vld [vmem:[%s30740_s28 + $0xac] ss:$16 sps:$4 sm:$0xff]   ;;  %v20847_v39 = vld [vmem:[%s30740_s28 + $0xa8] ss:$16 sps:$4 sm:$0xff]  }
 0x372   : > { %5417 = vmatprep.subr.bf16.mxu1 %v20768_v58  ;;  %v20846_v58 = vld [vmem:[%s30740_s28 + $0x2a4] ss:$16 sps:$4 sm:$0xff]  }
 0x374   : > { %6101 = vmatpush1.bf16.msra.mxu0 %v20769_v55  ;;  %v20855_v55 = vld [vmem:[%s30740_s28 + $0x8c] ss:$16 sps:$4 sm:$0xff]  }
 0x375   : > { %5418 = vmatpush1.bf16.msra.mxu1 %v20766_v34  ;;  %6102 = vmatprep.subr.bf16.mxu0 %v20777_v42  ;;  %v20852_v34 = vld [vmem:[%s30740_s28 + $0x284] ss:$16 sps:$4 sm:$0xff]   ;;  %v20861_v42 = vld [vmem:[%s30740_s28 + $0x6c] ss:$16 sps:$4 sm:$0xff]  }
 0x376   : > { %5419 = vmatprep.subr.bf16.mxu1 %v20774_v26  ;;  %v20850_v26 = vld [vmem:[%s30740_s28 + $0x280] ss:$16 sps:$4 sm:$0xff]  }
 0x378   : > { %6103 = vmatpush1.bf16.msra.mxu0 %v20775_v44  ;;  %v20858_v44 = vld [vmem:[%s30740_s28 + $0x264] ss:$16 sps:$4 sm:$0xff]  }
 0x379   : > { %5420 = vmatpush1.bf16.msra.mxu1 %v20772_v1  ;;  %6104 = vmatprep.subr.bf16.mxu0 %v20783_v47  ;;  %v20859_v1 = vld [vmem:[%s30740_s28 + $0x68] ss:$16 sps:$4 sm:$0xff]   ;;  %v20867_v47 = vld [vmem:[%s30740_s28 + $0x4c] ss:$16 sps:$4 sm:$0xff]  }
 0x37a   : > { %5421 = vmatprep.subr.bf16.mxu1 %v20780_v22  ;;  %v20856_v22 = vld [vmem:[%s30740_s28 + $0x260] ss:$16 sps:$4 sm:$0xff]  }
 0x37c   : > { %6105 = vmatpush1.bf16.msra.mxu0 %v20781_v29  ;;  %v20864_v29 = vld [vmem:[%s30740_s28 + $0x244] ss:$16 sps:$4 sm:$0xff]  }
 0x37d   : > { %5422 = vmatpush1.bf16.msra.mxu1 %v20778_v45  ;;  %6106 = vmatprep.subr.bf16.mxu0 %v20789_v49  ;;  %v20865_v45 = vld [vmem:[%s30740_s28 + $0x48] ss:$16 sps:$4 sm:$0xff]   ;;  %v20873_v49 = vld [vmem:[%s30740_s28 + $0x2c] ss:$16 sps:$4 sm:$0xff]  }
 0x37e   : > { %5423 = vmatprep.subr.bf16.mxu1 %v20786_v48  ;;  %v20862_v48 = vld [vmem:[%s30740_s28 + $0x240] ss:$16 sps:$4 sm:$0xff]  }
 0x380   : > { %6107 = vmatpush2.bf16.msra.mxu0 %v20787_v13  ;;  %v20870_v13 = vld [vmem:[%s30740_s28 + $0x224] ss:$16 sps:$4 sm:$0xff]  }
 0x381   : > { %5424 = vmatpush2.bf16.msra.mxu1 %v20784_v63  ;;  %6108 = vmatprep.subr.bf16.mxu0 %v20795_v2  ;;  %v20871_v63 = vld [vmem:[%s30740_s28 + $0x28] ss:$16 sps:$4 sm:$0xff]   ;;  %v20879_v2 = vld [vmem:[%s30740_s28 + $0xc] ss:$16 sps:$4 sm:$0xff]  }
 0x382   : > { %5425 = vmatprep.subr.bf16.mxu1 %v20792_v62  ;;  %v20868_v62 = vld [vmem:[%s30740_s28 + $0x220] ss:$16 sps:$4 sm:$0xff]  }
 0x384   : > { %6109 = vmatpush2.bf16.msra.mxu0 %v20793_v6  ;;  %v20876_v6 = vld [vmem:[%s30740_s28 + $0x204] ss:$16 sps:$4 sm:$0xff]  }
 0x385   : > { %5426 = vmatpush2.bf16.msra.mxu1 %v20790_v3  ;;  %6110 = vmatprep.subr.bf16.mxu0 %v20801_v37  ;;  %v20877_v3 = vld [vmem:[%s30740_s28 + $0x8] ss:$16 sps:$4 sm:$0xff]   ;;  %v20885_v37 = vld [vmem:[%s30740_s28 + $0x1ec] ss:$16 sps:$4 sm:$0xff]  }
 0x386   : > { %5427 = vmatprep.subr.bf16.mxu1 %v20798_v33  ;;  %v20874_v33 = vld [vmem:[%s30740_s28 + $0x200] ss:$16 sps:$4 sm:$0xff]  }
 0x388   : > { %6111 = vmatpush2.bf16.msra.mxu0 %v20799_v50  ;;  %v20882_v50 = vld [vmem:[%s30740_s28 + $0x3e4] ss:$16 sps:$4 sm:$0xff]  }
 0x389   : > { %5428 = vmatpush2.bf16.msra.mxu1 %v20796_v46  ;;  %6112 = vmatprep.subr.bf16.mxu0 %v20807_v53  ;;  %v20883_v46 = vld [vmem:[%s30740_s28 + $0x1e8] ss:$16 sps:$4 sm:$0xff]   ;;  %v20891_v53 = vld [vmem:[%s30740_s28 + $0x1cc] ss:$16 sps:$4 sm:$0xff]  }
 0x38a   : > { %5429 = vmatprep.subr.bf16.mxu1 %v20804_v52  ;;  %v20880_v52 = vld [vmem:[%s30740_s28 + $0x3e0] ss:$16 sps:$4 sm:$0xff]  }
 0x38c   : > { %6113 = vmatpush2.bf16.msra.mxu0 %v20805_v51  ;;  %v20888_v51 = vld [vmem:[%s30740_s28 + $0x3c4] ss:$16 sps:$4 sm:$0xff]  }
 0x38d   : > { %5430 = vmatpush2.bf16.msra.mxu1 %v20802_v56  ;;  %6114 = vmatprep.subr.bf16.mxu0 %v20813_v21  ;;  %v20889_v56 = vld [vmem:[%s30740_s28 + $0x1c8] ss:$16 sps:$4 sm:$0xff]   ;;  %v20897_v21 = vld [vmem:[%s30740_s28 + $0x1ac] ss:$16 sps:$4 sm:$0xff]  }
 0x38e   : > { %5431 = vmatprep.subr.bf16.mxu1 %v20810_v35  ;;  %v20886_v35 = vld [vmem:[%s30740_s28 + $0x3c0] ss:$16 sps:$4 sm:$0xff]  }
 0x390   : > { %6115 = vmatpush2.bf16.msra.mxu0 %v20811_v11  ;;  %v20894_v11 = vld [vmem:[%s30740_s28 + $0x3a4] ss:$16 sps:$4 sm:$0xff]  }
 0x391   : > { %5432 = vmatpush2.bf16.msra.mxu1 %v20808_v36  ;;  %6116 = vmatprep.subr.bf16.mxu0 %v20819_v54  ;;  %v20895_v36 = vld [vmem:[%s30740_s28 + $0x1a8] ss:$16 sps:$4 sm:$0xff]   ;;  %v20903_v54 = vld [vmem:[%s30740_s28 + $0x18c] ss:$16 sps:$4 sm:$0xff]  }
 0x392   : > { %5433 = vmatprep.subr.bf16.mxu1 %v20816_v57  ;;  %v20892_v57 = vld [vmem:[%s30740_s28 + $0x3a0] ss:$16 sps:$4 sm:$0xff]  }
 0x394   : > { %6117 = vmatpush2.bf16.msra.mxu0 %v20817_v18  ;;  %v20900_v18 = vld [vmem:[%s30740_s28 + $0x384] ss:$16 sps:$4 sm:$0xff]  }
 0x395   : > { %5434 = vmatpush2.bf16.msra.mxu1 %v20814_v4  ;;  %6118 = vmatprep.subr.bf16.mxu0 %v20825_v16  ;;  %v20901_v4 = vld [vmem:[%s30740_s28 + $0x188] ss:$16 sps:$4 sm:$0xff]   ;;  %v20909_v16 = vld [vmem:[%s30740_s28 + $0x16c] ss:$16 sps:$4 sm:$0xff]  }
 0x396   : > { %5435 = vmatprep.subr.bf16.mxu1 %v20822_v5  ;;  %v20898_v5 = vld [vmem:[%s30740_s28 + $0x380] ss:$16 sps:$4 sm:$0xff]  }
 0x398   : > { %6119 = vmatpush2.bf16.msra.mxu0 %v20823_v60  ;;  %v20906_v60 = vld [vmem:[%s30740_s28 + $0x364] ss:$16 sps:$4 sm:$0xff]  }
 0x399   : > { %5436 = vmatpush2.bf16.msra.mxu1 %v20820_v25  ;;  %6120 = vmatprep.subr.bf16.mxu0 %v20831_v61  ;;  %v20907_v25 = vld [vmem:[%s30740_s28 + $0x168] ss:$16 sps:$4 sm:$0xff]   ;;  %v20915_v61 = vld [vmem:[%s30740_s28 + $0x14c] ss:$16 sps:$4 sm:$0xff]  }
 0x39a   : > { %5437 = vmatprep.subr.bf16.mxu1 %v20828_v32  ;;  %v20904_v32 = vld [vmem:[%s30740_s28 + $0x360] ss:$16 sps:$4 sm:$0xff]  }
 0x39c   : > { %6121 = vmatpush2.bf16.msra.mxu0 %v20829_v17  ;;  %v20912_v17 = vld [vmem:[%s30740_s28 + $0x344] ss:$16 sps:$4 sm:$0xff]  }
 0x39d   : > { %5438 = vmatpush2.bf16.msra.mxu1 %v20826_v15  ;;  %6176 = vmatprep.subr.bf16.mxu0 %v20837_v59  ;;  %v20913_v15 = vld [vmem:[%s30740_s28 + $0x148] ss:$16 sps:$4 sm:$0xff]   ;;  %v20921_v59 = vld [vmem:[%s30740_s28 + $0x12c] ss:$16 sps:$4 sm:$0xff]  }
 0x39e   : > { %6133 = vmatprep.subr.bf16.mxu1 %v20834_v23  ;;  %v20910_v23 = vld [vmem:[%s30740_s28 + $0x340] ss:$16 sps:$4 sm:$0xff]  }
 0x39f   : > { %6123 = vmatmul.mubr.bf16.vlgmr.msra.gmra.mxu0 %v25188_v38 }
 0x3a0   : > { %5440 = vmatmul.mubr.bf16.vlgmr.msra.gmra.mxu1 %v25331_v19  ;;  %6177 = vmatpush1.bf16.msra.mxu0 %v20835_v20  ;;  %v20844_v19 = vld [vmem:[%s30740_s28 + $0x2a0] ss:$16 sps:$4 sm:$0xff]   ;;  %v20918_v20 = vld [vmem:[%s30740_s28 + $0x324] ss:$16 sps:$4 sm:$0xff]  }
 0x3a1   : > { %6134 = vmatpush1.bf16.msra.mxu1 %v20832_v24  ;;  %6165 = vmatprep.mubr.bf16.mxu1 %v25301_v41  ;;  %v20919_v24 = vld [vmem:[%s30740_s28 + $0x128] ss:$16 sps:$4 sm:$0xff]  }
 0x3a2   : > { %6208 = vmatprep.mubr.bf16.mxu0 %v25191_v43  ;;  %6135 = vmatprep.subr.bf16.mxu1 %v20840_v27  ;;  %v20853_v43 = vld [vmem:[%s30740_s28 + $0x88] ss:$16 sps:$4 sm:$0xff]   ;;  %v20916_v27 = vld [vmem:[%s30740_s28 + $0x320] ss:$16 sps:$4 sm:$0xff]  }
 0x3a3   : > { %6178 = vmatprep.subr.bf16.mxu0 %v20843_v28  ;;  %v20927_v28 = vld [vmem:[%s30740_s28 + $0x10c] ss:$16 sps:$4 sm:$0xff]  }
 0x3a4   : > { %6179 = vmatpush1.bf16.msra.mxu0 %v20841_v30  ;;  %v20924_v30 = vld [vmem:[%s30740_s28 + $0x304] ss:$16 sps:$4 sm:$0xff]  }
 0x3a5   : > { %6136 = vmatpush1.bf16.msra.mxu1 %v20838_v31  ;;  %6180 = vmatprep.subr.bf16.mxu0 %v20849_v40  ;;  %v20925_v31 = vld [vmem:[%s30740_s28 + $0x108] ss:$16 sps:$4 sm:$0xff]   ;;  %v20922_v40 = vld [vmem:[%s30740_s28 + $0x300] ss:$16 sps:$4 sm:$0xff]  }
 0x3a6   : > { %6137 = vmatprep.subr.bf16.mxu1 %v20846_v58  ;;  %v20930_v58 = vld [vmem:[%s30740_s28 + $0x2ec] ss:$16 sps:$4 sm:$0xff]  }
 0x3a8   : > { %6181 = vmatpush1.bf16.msra.mxu0 %v20847_v39  ;;  %v20928_v39 = vld [vmem:[%s30740_s28 + $0x2e8] ss:$16 sps:$4 sm:$0xff]  }
 0x3a9   : > { %6138 = vmatpush1.bf16.msra.mxu1 %v20844_v19  ;;  %6182 = vmatprep.subr.bf16.mxu0 %v20855_v55  ;;  %v20933_v19 = vld [vmem:[%s30740_s28 + $0x2cc] ss:$16 sps:$4 sm:$0xff]   ;;  %v20931_v55 = vld [vmem:[%s30740_s28 + $0x2c8] ss:$16 sps:$4 sm:$0xff]  }
 0x3aa   : > { %6139 = vmatprep.subr.bf16.mxu1 %v20852_v34  ;;  %v20936_v34 = vld [vmem:[%s30740_s28 + $0x2ac] ss:$16 sps:$4 sm:$0xff]  }
 0x3ac   : > { %6183 = vmatpush1.bf16.msra.mxu0 %v20853_v43  ;;  %v20934_v43 = vld [vmem:[%s30740_s28 + $0x2a8] ss:$16 sps:$4 sm:$0xff]  }
 0x3ad   : > { %6140 = vmatpush1.bf16.msra.mxu1 %v20850_v26  ;;  %6184 = vmatprep.subr.bf16.mxu0 %v20861_v42  ;;  %v20976_v26 = vld [vmem:[%s30741_s10 + $0xe0] ss:$16 sps:$4 sm:$0xff]   ;;  %v20978_v42 = vld [vmem:[%s30741_s10 + $0xe4] ss:$16 sps:$4 sm:$0xff]  }
 0x3ae   : > { %6141 = vmatprep.subr.bf16.mxu1 %v20858_v44  ;;  %v20937_v44 = vld [vmem:[%s30740_s28 + $0x288] ss:$16 sps:$4 sm:$0xff]  }
 0x3b0   : > { %6185 = vmatpush1.bf16.msra.mxu0 %v20859_v1  ;;  %v20942_v1 = vld [vmem:[%s30740_s28 + $0x26c] ss:$16 sps:$4 sm:$0xff]  }
 0x3b1   : > { %6142 = vmatpush1.bf16.msra.mxu1 %v20856_v22  ;;  %6186 = vmatprep.subr.bf16.mxu0 %v20867_v47  ;;  %v20979_v22 = vld [vmem:[%s30741_s10 + $0xc0] ss:$16 sps:$4 sm:$0xff]   ;;  %v20984_v47 = vld [vmem:[%s30741_s10 + $0xa4] ss:$16 sps:$4 sm:$0xff]  }
 0x3b2   : > { %6143 = vmatprep.subr.bf16.mxu1 %v20864_v29  ;;  %v20940_v29 = vld [vmem:[%s30740_s28 + $0x268] ss:$16 sps:$4 sm:$0xff]  }
 0x3b4   : > { %6187 = vmatpush1.bf16.msra.mxu0 %v20865_v45  ;;  %v20945_v45 = vld [vmem:[%s30740_s28 + $0x24c] ss:$16 sps:$4 sm:$0xff]  }
 0x3b5   : > { %6144 = vmatpush1.bf16.msra.mxu1 %v20862_v48  ;;  %6188 = vmatprep.subr.bf16.mxu0 %v20873_v49  ;;  %v20982_v48 = vld [vmem:[%s30741_s10 + $0xa0] ss:$16 sps:$4 sm:$0xff]   ;;  %v20943_v49 = vld [vmem:[%s30740_s28 + $0x248] ss:$16 sps:$4 sm:$0xff]  }
 0x3b6   : > { %6145 = vmatprep.subr.bf16.mxu1 %v20870_v13  ;;  %v20987_v13 = vld [vmem:[%s30741_s10 + $0x84] ss:$16 sps:$4 sm:$0xff]  }
 0x3b8   : > { %6189 = vmatpush1.bf16.msra.mxu0 %v20871_v63  ;;  %v20948_v63 = vld [vmem:[%s30740_s28 + $0x22c] ss:$16 sps:$4 sm:$0xff]  }
 0x3b9   : > { %6146 = vmatpush1.bf16.msra.mxu1 %v20868_v62  ;;  %6190 = vmatprep.subr.bf16.mxu0 %v20879_v2  ;;  %v20985_v62 = vld [vmem:[%s30741_s10 + $0x80] ss:$16 sps:$4 sm:$0xff]   ;;  %v20990_v2 = vld [vmem:[%s30741_s10 + $0x64] ss:$16 sps:$4 sm:$0xff]  }
 0x3ba   : > { %6147 = vmatprep.subr.bf16.mxu1 %v20876_v6  ;;  %v20946_v6 = vld [vmem:[%s30740_s28 + $0x228] ss:$16 sps:$4 sm:$0xff]  }
 0x3bc   : > { %6191 = vmatpush1.bf16.msra.mxu0 %v20877_v3  ;;  %v20951_v3 = vld [vmem:[%s30740_s28 + $0x20c] ss:$16 sps:$4 sm:$0xff]  }
 0x3bd   : > { %6148 = vmatpush1.bf16.msra.mxu1 %v20874_v33  ;;  %6192 = vmatprep.subr.bf16.mxu0 %v20885_v37  ;;  %v20988_v33 = vld [vmem:[%s30741_s10 + $0x60] ss:$16 sps:$4 sm:$0xff]   ;;  %v20993_v37 = vld [vmem:[%s30741_s10 + $0x44] ss:$16 sps:$4 sm:$0xff]  }
 0x3be   : > { %6149 = vmatprep.subr.bf16.mxu1 %v20882_v50  ;;  %v20949_v50 = vld [vmem:[%s30740_s28 + $0x208] ss:$16 sps:$4 sm:$0xff]  }
 0x3c0   : > { %6193 = vmatpush2.bf16.msra.mxu0 %v20883_v46  ;;  %v20954_v46 = vld [vmem:[%s30740_s28 + $0x3ec] ss:$16 sps:$4 sm:$0xff]  }
 0x3c1   : > { %6150 = vmatpush2.bf16.msra.mxu1 %v20880_v52  ;;  %6194 = vmatprep.subr.bf16.mxu0 %v20891_v53  ;;  %v20991_v52 = vld [vmem:[%s30741_s10 + $0x40] ss:$16 sps:$4 sm:$0xff]   ;;  %v20996_v53 = vld [vmem:[%s30741_s10 + $0x24] ss:$16 sps:$4 sm:$0xff]  }
 0x3c2   : > { %6151 = vmatprep.subr.bf16.mxu1 %v20888_v51  ;;  %v20952_v51 = vld [vmem:[%s30740_s28 + $0x3e8] ss:$16 sps:$4 sm:$0xff]  }
 0x3c4   : > { %6195 = vmatpush2.bf16.msra.mxu0 %v20889_v56  ;;  %v20957_v56 = vld [vmem:[%s30740_s28 + $0x3cc] ss:$16 sps:$4 sm:$0xff]  }
 0x3c5   : > { %6152 = vmatpush2.bf16.msra.mxu1 %v20886_v35  ;;  %6196 = vmatprep.subr.bf16.mxu0 %v20897_v21  ;;  %v20994_v35 = vld [vmem:[%s30741_s10 + $0x20] ss:$16 sps:$4 sm:$0xff]   ;;  %v20999_v21 = vld [vmem:[%s30741_s10 + $0x4] ss:$16 sps:$4 sm:$0xff]  }
 0x3c6   : > { %6153 = vmatprep.subr.bf16.mxu1 %v20894_v11  ;;  %v20955_v11 = vld [vmem:[%s30740_s28 + $0x3c8] ss:$16 sps:$4 sm:$0xff]  }
 0x3c8   : > { %6197 = vmatpush2.bf16.msra.mxu0 %v20895_v36  ;;  %v20960_v36 = vld [vmem:[%s30740_s28 + $0x3ac] ss:$16 sps:$4 sm:$0xff]  }
 0x3c9   : > { %6154 = vmatpush2.bf16.msra.mxu1 %v20892_v57  ;;  %6198 = vmatprep.subr.bf16.mxu0 %v20903_v54  ;;  %v20997_v57 = vld [vmem:[%s30741_s10] ss:$16 sps:$4 sm:$0xff]   ;;  %v21002_v54 = vld [vmem:[%s30741_s10 + $0x1e4] ss:$16 sps:$4 sm:$0xff]  }
 0x3ca   : > { %6155 = vmatprep.subr.bf16.mxu1 %v20900_v18  ;;  %v20958_v18 = vld [vmem:[%s30740_s28 + $0x3a8] ss:$16 sps:$4 sm:$0xff]  }
 0x3cc   : > { %6199 = vmatpush2.bf16.msra.mxu0 %v20901_v4  ;;  %v20963_v4 = vld [vmem:[%s30740_s28 + $0x38c] ss:$16 sps:$4 sm:$0xff]  }
 0x3cd   : > { %6156 = vmatpush2.bf16.msra.mxu1 %v20898_v5  ;;  %6200 = vmatprep.subr.bf16.mxu0 %v20909_v16  ;;  %v21000_v5 = vld [vmem:[%s30741_s10 + $0x1e0] ss:$16 sps:$4 sm:$0xff]   ;;  %v21005_v16 = vld [vmem:[%s30741_s10 + $0x1c4] ss:$16 sps:$4 sm:$0xff]  }
 0x3ce   : > { %6157 = vmatprep.subr.bf16.mxu1 %v20906_v60  ;;  %v20961_v60 = vld [vmem:[%s30740_s28 + $0x388] ss:$16 sps:$4 sm:$0xff]  }
 0x3d0   : > { %6201 = vmatpush2.bf16.msra.mxu0 %v20907_v25  ;;  %v20966_v25 = vld [vmem:[%s30740_s28 + $0x36c] ss:$16 sps:$4 sm:$0xff]  }
 0x3d1   : > { %6158 = vmatpush2.bf16.msra.mxu1 %v20904_v32  ;;  %6202 = vmatprep.subr.bf16.mxu0 %v20915_v61  ;;  %v21003_v32 = vld [vmem:[%s30741_s10 + $0x1c0] ss:$16 sps:$4 sm:$0xff]   ;;  %v21008_v61 = vld [vmem:[%s30741_s10 + $0x1a4] ss:$16 sps:$4 sm:$0xff]  }
 0x3d2   : > { %6159 = vmatprep.subr.bf16.mxu1 %v20912_v17  ;;  %v20964_v17 = vld [vmem:[%s30740_s28 + $0x368] ss:$16 sps:$4 sm:$0xff]  }
 0x3d4   : > { %6203 = vmatpush2.bf16.msra.mxu0 %v20913_v15  ;;  %v20969_v15 = vld [vmem:[%s30740_s28 + $0x34c] ss:$16 sps:$4 sm:$0xff]  }
 0x3d5   : > { %6160 = vmatpush2.bf16.msra.mxu1 %v20910_v23  ;;  %6204 = vmatprep.subr.bf16.mxu0 %v20921_v59  ;;  %v21006_v23 = vld [vmem:[%s30741_s10 + $0x1a0] ss:$16 sps:$4 sm:$0xff]   ;;  %v21011_v59 = vld [vmem:[%s30741_s10 + $0x184] ss:$16 sps:$4 sm:$0xff]  }
 0x3d6   : > { %6161 = vmatprep.subr.bf16.mxu1 %v20918_v20  ;;  %v20967_v20 = vld [vmem:[%s30740_s28 + $0x348] ss:$16 sps:$4 sm:$0xff]  }
 0x3d8   : > { %6205 = vmatpush2.bf16.msra.mxu0 %v20919_v24  ;;  %v20972_v24 = vld [vmem:[%s30740_s28 + $0x32c] ss:$16 sps:$4 sm:$0xff]  }
 0x3d9   : > { %6162 = vmatpush2.bf16.msra.mxu1 %v20916_v27  ;;  %6206 = vmatprep.subr.bf16.mxu0 %v20927_v28  ;;  %v21009_v27 = vld [vmem:[%s30741_s10 + $0x180] ss:$16 sps:$4 sm:$0xff]   ;;  %v21014_v28 = vld [vmem:[%s30741_s10 + $0x164] ss:$16 sps:$4 sm:$0xff]  }
 0x3da   : > { %6163 = vmatprep.subr.bf16.mxu1 %v20924_v30  ;;  %v20970_v30 = vld [vmem:[%s30740_s28 + $0x328] ss:$16 sps:$4 sm:$0xff]  }
 0x3dc   : > { %6207 = vmatpush2.bf16.msra.mxu0 %v20925_v31  ;;  %v20975_v31 = vld [vmem:[%s30740_s28 + $0x30c] ss:$16 sps:$4 sm:$0xff]  }
 0x3dd   : > { %6164 = vmatpush2.bf16.msra.mxu1 %v20922_v40  ;;  %7094 = vmatprep.subr.bf16.mxu0 %v20978_v42  ;;  %v21012_v40 = vld [vmem:[%s30741_s10 + $0x160] ss:$16 sps:$4 sm:$0xff]  }
 0x3de   : > { %6219 = vmatprep.subr.bf16.mxu1 %v20930_v58  ;;  %v20973_v58 = vld [vmem:[%s30740_s28 + $0x308] ss:$16 sps:$4 sm:$0xff]   ;;  %v21024_v42 = vld [vmem:[%s30741_s10 + $0x2e0] ss:$16 sps:$4 sm:$0xff]  }
 0x3df   : > { %6209 = vmatmul.mubr.bf16.vlgmr.msra.gmra.mxu0 %v25188_v38  ;;  %v20939_v38 = vld [vmem:[%s30740_s28 + $0x28c] ss:$16 sps:$4 sm:$0xff]  }
 0x3e0   : > { %6166 = vmatmul.mubr.bf16.vlgmr.msra.gmra.mxu1 %v25295_v0  ;;  %7095 = vmatpush1.bf16.msra.mxu0 %v20976_v26  ;;  %v21029_v26 = vld [vmem:[%s30741_s10 + $0xec] ss:$16 sps:$4 sm:$0xff]  }
 0x3e1   : > { %6220 = vmatpush1.bf16.msra.mxu1 %v20928_v39  ;;  %6251 = vmatprep.mubr.bf16.mxu1 %v25301_v41  ;;  %v20981_v41 = vld [vmem:[%s30741_s10 + $0xc4] ss:$16 sps:$4 sm:$0xff]  }
 0x3e2   : > { %6221 = vmatprep.subr.bf16.mxu1 %v20933_v19  ;;  %7096 = vmatprep.subr.bf16.mxu0 %v20981_v41  ;;  %v21017_v39 = vld [vmem:[%s30741_s10 + $0x144] ss:$16 sps:$4 sm:$0xff]   ;;  %v21015_v19 = vld [vmem:[%s30741_s10 + $0x140] ss:$16 sps:$4 sm:$0xff]  }
 0x3e3   : > { %v21030_v41 = vld [vmem:[%s30741_s10 + $0x2c0] ss:$16 sps:$4 sm:$0xff]  }
 0x3e4   : > { %7097 = vmatpush1.bf16.msra.mxu0 %v20979_v22  ;;  %v21038_v22 = vld [vmem:[%s30741_s10 + $0x2a4] ss:$16 sps:$4 sm:$0xff]  }
 0x3e5   : > { %6222 = vmatpush1.bf16.msra.mxu1 %v20931_v55  ;;  %7098 = vmatprep.subr.bf16.mxu0 %v20984_v47  ;;  %v21020_v55 = vld [vmem:[%s30741_s10 + $0x124] ss:$16 sps:$4 sm:$0xff]   ;;  %v21042_v47 = vld [vmem:[%s30741_s10 + $0x280] ss:$16 sps:$4 sm:$0xff]  }
 0x3e6   : > { %6223 = vmatprep.subr.bf16.mxu1 %v20936_v34  ;;  %v21018_v34 = vld [vmem:[%s30741_s10 + $0x120] ss:$16 sps:$4 sm:$0xff]  }
 0x3e8   : > { %7099 = vmatpush1.bf16.msra.mxu0 %v20982_v48  ;;  %v21050_v48 = vld [vmem:[%s30741_s10 + $0x264] ss:$16 sps:$4 sm:$0xff]  }
 0x3e9   : > { %6224 = vmatpush1.bf16.msra.mxu1 %v20934_v43  ;;  %7100 = vmatprep.subr.bf16.mxu0 %v20987_v13  ;;  %v21021_v43 = vld [vmem:[%s30741_s10 + $0x100] ss:$16 sps:$4 sm:$0xff]   ;;  %v21056_v13 = vld [vmem:[%s30741_s10 + $0x244] ss:$16 sps:$4 sm:$0xff]  }
 0x3ea   : > { %6225 = vmatprep.subr.bf16.mxu1 %v20939_v38  ;;  %v21026_v38 = vld [vmem:[%s30741_s10 + $0x2e4] ss:$16 sps:$4 sm:$0xff]  }
 0x3ec   : > { %7101 = vmatpush1.bf16.msra.mxu0 %v20985_v62  ;;  %v21062_v62 = vld [vmem:[%s30741_s10 + $0x224] ss:$16 sps:$4 sm:$0xff]  }
 0x3ed   : > { %6226 = vmatpush1.bf16.msra.mxu1 %v20937_v44  ;;  %7102 = vmatprep.subr.bf16.mxu0 %v20990_v2  ;;  %v21032_v44 = vld [vmem:[%s30741_s10 + $0x2c4] ss:$16 sps:$4 sm:$0xff]   ;;  %v21066_v2 = vld [vmem:[%s30741_s10 + $0x200] ss:$16 sps:$4 sm:$0xff]  }
 0x3ee   : > { %6227 = vmatprep.subr.bf16.mxu1 %v20942_v1  ;;  %v21036_v1 = vld [vmem:[%s30741_s10 + $0x2a0] ss:$16 sps:$4 sm:$0xff]  }
 0x3f0   : > { %7103 = vmatpush1.bf16.msra.mxu0 %v20988_v33  ;;  %v21072_v33 = vld [vmem:[%s30741_s10 + $0x3e0] ss:$16 sps:$4 sm:$0xff]  }
 0x3f1   : > { %6228 = vmatpush1.bf16.msra.mxu1 %v20940_v29  ;;  %7104 = vmatprep.subr.bf16.mxu0 %v20993_v37  ;;  %v21044_v29 = vld [vmem:[%s30741_s10 + $0x284] ss:$16 sps:$4 sm:$0xff]  }
 0x3f2   : > { %6229 = vmatprep.subr.bf16.mxu1 %v20945_v45  ;;  %v21048_v45 = vld [vmem:[%s30741_s10 + $0x260] ss:$16 sps:$4 sm:$0xff]   ;;  %v21074_v37 = vld [vmem:[%s30741_s10 + $0x3e4] ss:$16 sps:$4 sm:$0xff]  }
 0x3f4   : > { %7105 = vmatpush1.bf16.msra.mxu0 %v20991_v52  ;;  %v21080_v52 = vld [vmem:[%s30741_s10 + $0x3c4] ss:$16 sps:$4 sm:$0xff]  }
 0x3f5   : > { %6230 = vmatpush1.bf16.msra.mxu1 %v20943_v49  ;;  %7106 = vmatprep.subr.bf16.mxu0 %v20996_v53  ;;  %v21054_v49 = vld [vmem:[%s30741_s10 + $0x240] ss:$16 sps:$4 sm:$0xff]  }
 0x3f6   : > { %6231 = vmatprep.subr.bf16.mxu1 %v20948_v63  ;;  %v21060_v63 = vld [vmem:[%s30741_s10 + $0x220] ss:$16 sps:$4 sm:$0xff]  }
 0x3f8   : > { %7107 = vmatpush1.bf16.msra.mxu0 %v20994_v35  ;;  %v21086_v35 = vld [vmem:[%s30741_s10 + $0x3a4] ss:$16 sps:$4 sm:$0xff]  }
 0x3f9   : > { %6232 = vmatpush1.bf16.msra.mxu1 %v20946_v6  ;;  %7108 = vmatprep.subr.bf16.mxu0 %v20999_v21  ;;  %v21068_v6 = vld [vmem:[%s30741_s10 + $0x204] ss:$16 sps:$4 sm:$0xff]  }
 0x3fa   : > { %6233 = vmatprep.subr.bf16.mxu1 %v20951_v3  ;;  %v5312_v3 = vpop.f32.mrf.mxu0 }
 0x3fc   : > { %7109 = vmatpush1.bf16.msra.mxu0 %v20997_v57  ;;  %v21092_v57 = vld [vmem:[%s30741_s10 + $0x384] ss:$16 sps:$4 sm:$0xff]  }
 0x3fd   : > { %6234 = vmatpush1.bf16.msra.mxu1 %v20949_v50  ;;  %7110 = vmatprep.subr.bf16.mxu0 %v21002_v54  ;;  %v5314_v50 = vpop.f32.mrf.mxu0 }
 0x3fe   : > { %6235 = vmatprep.subr.bf16.mxu1 %v20954_v46  ;;  %v21078_v46 = vld [vmem:[%s30741_s10 + $0x3c0] ss:$16 sps:$4 sm:$0xff]  }
 0x400   : > { %7111 = vmatpush2.bf16.msra.mxu0 %v21000_v5  ;;  %v21098_v5 = vld [vmem:[%s30741_s10 + $0x364] ss:$16 sps:$4 sm:$0xff]  }
 0x401   : > { %6236 = vmatpush2.bf16.msra.mxu1 %v20952_v51  ;;  %7112 = vmatprep.subr.bf16.mxu0 %v21005_v16  ;;  %v5316_v51 = vpop.f32.mrf.mxu0 }
 0x402   : > { %6237 = vmatprep.subr.bf16.mxu1 %v20957_v56  ;;  %v21084_v56 = vld [vmem:[%s30741_s10 + $0x3a0] ss:$16 sps:$4 sm:$0xff]  }
 0x404   : > { %7113 = vmatpush2.bf16.msra.mxu0 %v21003_v32 }
 0x405   : > { %6238 = vmatpush2.bf16.msra.mxu1 %v20955_v11  ;;  %7114 = vmatprep.subr.bf16.mxu0 %v21008_v61  ;;  %v5318_v11 = vpop.f32.mrf.mxu0 }
 0x406   : > { %6239 = vmatprep.subr.bf16.mxu1 %v20960_v36  ;;  %v21090_v36 = vld [vmem:[%s30741_s10 + $0x380] ss:$16 sps:$4 sm:$0xff]  }
 0x408   : > { %7115 = vmatpush2.bf16.msra.mxu0 %v21006_v23 }
 0x409   : > { %6240 = vmatpush2.bf16.msra.mxu1 %v20958_v18  ;;  %7116 = vmatprep.subr.bf16.mxu0 %v21011_v59  ;;  %v21102_v59 = vld [vmem:[%s30741_s10 + $0x340] ss:$16 sps:$4 sm:$0xff]  }
 0x40a   : > { %6241 = vmatprep.subr.bf16.mxu1 %v20963_v4  ;;  %v21096_v4 = vld [vmem:[%s30741_s10 + $0x360] ss:$16 sps:$4 sm:$0xff]  }
 0x40c   : > { %7117 = vmatpush2.bf16.msra.mxu0 %v21009_v27 }
 0x40d   : > { %6242 = vmatpush2.bf16.msra.mxu1 %v20961_v60  ;;  %7118 = vmatprep.subr.bf16.mxu0 %v21014_v28 }
 0x40e   : > { %6243 = vmatprep.subr.bf16.mxu1 %v20966_v25 }
 0x410   : > { %7119 = vmatpush2.bf16.msra.mxu0 %v21012_v40  ;;  %v21108_v40 = vld [vmem:[%s30741_s10 + $0x320] ss:$16 sps:$4 sm:$0xff]  }
 0x411   : > { %6244 = vmatpush2.bf16.msra.mxu1 %v20964_v17  ;;  %7120 = vmatprep.subr.bf16.mxu0 %v21017_v39  ;;  %v21114_v39 = vld [vmem:[%s30741_s10 + $0x300] ss:$16 sps:$4 sm:$0xff]  }
 0x412   : > { %6245 = vmatprep.subr.bf16.mxu1 %v20969_v15  ;;  %v21104_v15 = vld [vmem:[%s30741_s10 + $0x344] ss:$16 sps:$4 sm:$0xff]  }
 0x414   : > { %7121 = vmatpush2.bf16.msra.mxu0 %v21015_v19  ;;  %v21122_v19 = vld [vmem:[%s30741_s10 + $0x2ec] ss:$16 sps:$4 sm:$0xff]  }
 0x415   : > { %6246 = vmatpush2.bf16.msra.mxu1 %v20967_v20  ;;  %7122 = vmatprep.subr.bf16.mxu0 %v21020_v55 }
 0x416   : > { %6247 = vmatprep.subr.bf16.mxu1 %v20972_v24 }
 0x418   : > { %7123 = vmatpush2.bf16.msra.mxu0 %v21018_v34 }
 0x419   : > { %6248 = vmatpush2.bf16.msra.mxu1 %v20970_v30  ;;  %v21110_v30 = vld [vmem:[%s30741_s10 + $0x324] ss:$16 sps:$4 sm:$0xff]  }
 0x41a   : > { %6249 = vmatprep.subr.bf16.mxu1 %v20975_v31 }
 0x41d   : > { %6250 = vmatpush2.bf16.msra.mxu1 %v20973_v58  ;;  %v21116_v58 = vld [vmem:[%s30741_s10 + $0x304] ss:$16 sps:$4 sm:$0xff]  }
 0x41e   : > { %7137 = vmatprep.subr.bf16.mxu1 %v21026_v38 }
 0x41f   : > { %v5398_v54 = vpop.f32.mrf.mxu0 }
 0x420   : > { %6252 = vmatmul.mubr.bf16.vlgmr.msra.gmra.mxu1 %v25295_v0  ;;  %v21023_v0 = vld [vmem:[%s30741_s10 + $0x104] ss:$16 sps:$4 sm:$0xff]   ;;  %v5355_v53 = vpop.f32.mrf.mxu1 }
 0x421   : > { %7124 = vmatprep.subr.bf16.mxu0 %v21023_v0  ;;  %7138 = vmatpush1.bf16.msra.mxu1 %v21024_v42  ;;  %v5400_v16 = vpop.f32.mrf.mxu0  ;;  %v5356_v38 = vadd.f32 %v5355_v53, %v5312_v3 }
 0x422   : > { %7125 = vmatpush2.bf16.msra.mxu0 %v21021_v43  ;;  %7139 = vmatprep.subr.bf16.mxu1 %v21032_v44  ;;  %v5357_v21 = vpop.f32.mrf.mxu1  ;;  %v26017_v44 = vld [vmem:[%s30742_s9] sm:$0xf]  ;;  %s23155_s9 = scalar_lea.vmem %s23154_s8, 32 }
 0x423   : > { %7180 = vmatprep.subr.bf16.mxu0 %v21029_v26  ;;  %v5402_v61 = vpop.f32.mrf.mxu0  ;;  %v5358_v43 = vadd.f32 %v5357_v21, %v5314_v50 }
 0x424   : > { %v5359_v18 = vpop.f32.mrf.mxu1 }
 0x425   : > { %7140 = vmatpush1.bf16.msra.mxu1 %v21030_v41  ;;  %v5404_v27 = vpop.f32.mrf.mxu0  ;;  %v5360_v42 = vadd.f32 %v5359_v18, %v5316_v51  ;;  %v21041_v18 = vld [vmem:[%s30741_s10 + $0xac] ss:$16 sps:$4 sm:$0xff]  }
 0x426   : > { %7141 = vmatprep.subr.bf16.mxu1 %v21038_v22  ;;  %v5361_v60 = vpop.f32.mrf.mxu1 }
 0x429   : > { %7142 = vmatpush1.bf16.msra.mxu1 %v21036_v1 }
 0x42a   : > { %7143 = vmatprep.subr.bf16.mxu1 %v21044_v29  ;;  %v5362_v29 = vadd.f32 %v5361_v60, %v5318_v11  ;;  %v21027_v11 = vld [vmem:[%s30741_s10 + $0xe8] ss:$16 sps:$4 sm:$0xff]   ;;  %v21053_v60 = vld [vmem:[%s30741_s10 + $0x6c] ss:$16 sps:$4 sm:$0xff]  }
 0x42d   : > { %7144 = vmatpush1.bf16.msra.mxu1 %v21042_v47 }
 0x42e   : > { %7145 = vmatprep.subr.bf16.mxu1 %v21050_v48 }
 0x431   : > { %7146 = vmatpush1.bf16.msra.mxu1 %v21048_v45 }
 0x432   : > { %7147 = vmatprep.subr.bf16.mxu1 %v21056_v13 }
 0x435   : > { %7148 = vmatpush1.bf16.msra.mxu1 %v21054_v49  ;;  %v6271_v49 = vrot.slane %v26017_v44, %v23819_v9 }
 0x436   : > { %7149 = vmatprep.subr.bf16.mxu1 %v21062_v62 }
 0x439   : > { %7150 = vmatpush1.bf16.msra.mxu1 %v21060_v63  ;;  %v6267_v63 = vrot.slane %v26017_v44, %v23828_v12 }
 0x43a   : > { %7151 = vmatprep.subr.bf16.mxu1 %v21068_v6 }
 0x43d   : > { %7152 = vmatpush1.bf16.msra.mxu1 %v21066_v2 }
 0x43e   : > { %7153 = vmatprep.subr.bf16.mxu1 %v21074_v37 }
 0x441   : > { %7154 = vmatpush2.bf16.msra.mxu1 %v21072_v33 }
 0x442   : > { %7155 = vmatprep.subr.bf16.mxu1 %v21080_v52 }
 0x445   : > { %7156 = vmatpush2.bf16.msra.mxu1 %v21078_v46 }
 0x446   : > { %7157 = vmatprep.subr.bf16.mxu1 %v21086_v35 }
 0x449   : > { %7158 = vmatpush2.bf16.msra.mxu1 %v21084_v56 }
 0x44a   : > { %7159 = vmatprep.subr.bf16.mxu1 %v21092_v57  ;;  %v21035_v57 = vld [vmem:[%s30741_s10 + $0xcc] ss:$16 sps:$4 sm:$0xff]  }
 0x44d   : > { %7160 = vmatpush2.bf16.msra.mxu1 %v21090_v36 }
 0x44e   : > { %7161 = vmatprep.subr.bf16.mxu1 %v21098_v5  ;;  %v21047_v5 = vld [vmem:[%s30741_s10 + $0x8c] ss:$16 sps:$4 sm:$0xff]  }
 0x451   : > { %7162 = vmatpush2.bf16.msra.mxu1 %v21096_v4  ;;  %v21039_v4 = vld [vmem:[%s30741_s10 + $0xa8] ss:$16 sps:$4 sm:$0xff]  }
 0x452   : > { %7163 = vmatprep.subr.bf16.mxu1 %v21104_v15  ;;  %v21065_v15 = vld [vmem:[%s30741_s10 + $0x2c] ss:$16 sps:$4 sm:$0xff]  }
 0x455   : > { %7164 = vmatpush2.bf16.msra.mxu1 %v21102_v59  ;;  %v21063_v59 = vld [vmem:[%s30741_s10 + $0x28] ss:$16 sps:$4 sm:$0xff]  }
 0x456   : > { %7165 = vmatprep.subr.bf16.mxu1 %v21110_v30  ;;  %v21075_v30 = vld [vmem:[%s30741_s10 + $0x1e8] ss:$16 sps:$4 sm:$0xff]  }
 0x459   : > { %7166 = vmatpush2.bf16.msra.mxu1 %v21108_v40  ;;  %v21083_v40 = vld [vmem:[%s30741_s10 + $0x1cc] ss:$16 sps:$4 sm:$0xff]  }
 0x45a   : > { %7167 = vmatprep.subr.bf16.mxu1 %v21116_v58  ;;  %v21081_v58 = vld [vmem:[%s30741_s10 + $0x1c8] ss:$16 sps:$4 sm:$0xff]  }
 0x45d   : > { %7168 = vmatpush2.bf16.msra.mxu1 %v21114_v39  ;;  %v21089_v39 = vld [vmem:[%s30741_s10 + $0x1ac] ss:$16 sps:$4 sm:$0xff]  }
 0x45e   : > { %7223 = vmatprep.subr.bf16.mxu1 %v21122_v19  ;;  %v21087_v19 = vld [vmem:[%s30741_s10 + $0x1a8] ss:$16 sps:$4 sm:$0xff]  }
 0x45f   : > { %v6124_v55 = vpop.f32.mrf.mxu0 }
 0x460   : > { %v5441_v25 = vpop.f32.mrf.mxu1  ;;  %v6125_v1 = vadd.f32 %v6124_v55, %v5356_v38  ;;  %v21101_v38 = vld [vmem:[%s30741_s10 + $0x16c] ss:$16 sps:$4 sm:$0xff]  }
 0x461   : > { %v25985_v32 = vadd.f32 %v5441_v25, %v5398_v54  ;;  %v6126_v34 = vpop.f32.mrf.mxu0  ;;  %v21033_v54 = vld [vmem:[%s30741_s10 + $0xc8] ss:$16 sps:$4 sm:$0xff]  }
 0x462   : > { %v5443_v17 = vpop.f32.mrf.mxu1  ;;  %v6127_v41 = vadd.f32 %v6126_v34, %v5358_v43  ;;  %v21051_v25 = vld [vmem:[%s30741_s10 + $0x68] ss:$16 sps:$4 sm:$0xff]   ;;  %v21095_v34 = vld [vmem:[%s30741_s10 + $0x18c] ss:$16 sps:$4 sm:$0xff]  }
 0x463   : > { %v25990_v23 = vadd.f32 %v5443_v17, %v5400_v16  ;;  %v6128_v0 = vpop.f32.mrf.mxu0  ;;  %v21045_v16 = vld [vmem:[%s30741_s10 + $0x88] ss:$16 sps:$4 sm:$0xff]  }
 0x464   : > { %v5445_v20 = vpop.f32.mrf.mxu1  ;;  %v6129_v45 = vadd.f32 %v6128_v0, %v5360_v42  ;;  %v21057_v17 = vld [vmem:[%s30741_s10 + $0x48] ss:$16 sps:$4 sm:$0xff]  }
 0x465   : > { %v25995_v24 = vadd.f32 %v5445_v20, %v5402_v61  ;;  %v6130_v22 = vpop.f32.mrf.mxu0  ;;  %v21059_v61 = vld [vmem:[%s30741_s10 + $0x4c] ss:$16 sps:$4 sm:$0xff]   ;;  %v21093_v0 = vld [vmem:[%s30741_s10 + $0x188] ss:$16 sps:$4 sm:$0xff]  }
 0x466   : > { %v5447_v28 = vpop.f32.mrf.mxu1  ;;  %v6131_v2 = vadd.f32 %v6130_v22, %v5362_v29  ;;  %v21071_v20 = vld [vmem:[%s30741_s10 + $0xc] ss:$16 sps:$4 sm:$0xff]  }
 0x467   : > { %v26000_v31 = vadd.f32 %v5447_v28, %v5404_v27  ;;  %v21069_v27 = vld [vmem:[%s30741_s10 + $0x8] ss:$16 sps:$4 sm:$0xff]   ;;  %v21077_v28 = vld [vmem:[%s30741_s10 + $0x1ec] ss:$16 sps:$4 sm:$0xff]  }
 0x49f   : > { %v6210_v55 = vpop.f32.mrf.mxu0 }
 0x4a0   : > { %v6167_v26 = vpop.f32.mrf.mxu1 }
 0x4a1   : > { %v6168_v13 = vadd.f32 %v6167_v26, %v6125_v1  ;;  %v6212_v43 = vpop.f32.mrf.mxu0  ;;  %v21099_v26 = vld [vmem:[%s30741_s10 + $0x168] ss:$16 sps:$4 sm:$0xff]   ;;  %v6211_v1 = vadd.f32 %v6210_v55, %v25985_v32  ;;  %v21182_v55 = vld [vmem:[%s30677_s12 + $0x124] ss:$48 sps:$4 sm:$0xff]  }
 0x4a2   : > { %v6169_v47 = vpop.f32.mrf.mxu1 }
 0x4a3   : > { %v6170_v48 = vadd.f32 %v6169_v47, %v6127_v41  ;;  %v6284_v46 = vadd.f32 %v6267_v63, %v6168_v13  ;;  %v6214_v42 = vpop.f32.mrf.mxu0  ;;  %v21107_v41 = vld [vmem:[%s30741_s10 + $0x14c] ss:$16 sps:$4 sm:$0xff]   ;;  %v6213_v47 = vadd.f32 %v6212_v43, %v25990_v23  ;;  %v6279_v23 = vrot.slane %v26017_v44, %v23822_v10  ;;  %v21180_v43 = vld [vmem:[%s30677_s12 + $0x120] ss:$48 sps:$4 sm:$0xff]  }
 0x4a4   : > { %v6171_v62 = vpop.f32.mrf.mxu1  ;;  %v6215_v32 = vadd.f32 %v6214_v42, %v25995_v24  ;;  %v21119_v24 = vld [vmem:[%s30741_s10 + $0x10c] ss:$16 sps:$4 sm:$0xff]  }
 0x4a5   : > { %v6172_v6 = vadd.f32 %v6171_v62, %v6129_v45  ;;  %v6285_v33 = vadd.f32 %v6271_v49, %v6170_v48  ;;  %v6292_v35 = vmax.f32 %v6284_v46, 0.0  ;;  %v6275_v45 = vrot.slane %v26017_v44, %v23831_v14  ;;  %v21105_v48 = vld [vmem:[%s30741_s10 + $0x148] ss:$16 sps:$4 sm:$0xff]   ;;  %v21146_v42 = vld [vmem:[%s30741_s10 + $0x3ec] ss:$16 sps:$4 sm:$0xff]  }
 0x4a6   : > { %v6173_v3 = vpop.f32.mrf.mxu1 }
 0x4a7   : > { %v6288_v37 = vadd.f32 %v6267_v63, %v6172_v6  ;;  %v6174_v50 = vadd.f32 %v6173_v3, %v6131_v2  ;;  %v6293_v51 = vmax.f32 %v6285_v33, 0.0  ;;  %v21113_v63 = vld [vmem:[%s30741_s10 + $0x12c] ss:$16 sps:$4 sm:$0xff]  }
 0x4a9   : > { %v6289_v52 = vadd.f32 %v6271_v49, %v6174_v50  ;;  %v6296_v53 = vmax.f32 %v6288_v37, 0.0  ;;  %v6216_v49 = vpop.f32.mrf.mxu0  ;;  %v21111_v37 = vld [vmem:[%s30741_s10 + $0x128] ss:$16 sps:$4 sm:$0xff]  }
 0x4aa   : > { %v6217_v6 = vadd.f32 %v6216_v49, %v26000_v31  ;;  %v21117_v31 = vld [vmem:[%s30741_s10 + $0x108] ss:$16 sps:$4 sm:$0xff]   ;;  %v21152_v49 = vld [vmem:[%s30741_s10 + $0x3ac] ss:$16 sps:$4 sm:$0xff]  }
 0x4ab   : > { %v6297_v56 = vmax.f32 %v6289_v52, 0.0  ;;  %v26026_v36 = vpack.c.bf16 %v6296_v53, %v6292_v35 }
 0x4ad   : > { %v6301_v21 = vpack.c.bf16 %v6297_v56, %v6293_v51 }
 0x4af   : > { %7126 = vmatprep.mubr.bf16.mxu0 %v6301_v21 }
 0x4b0   : > { %7127 = vmatmul.mubr.bf16.vlgmr.msra.gmra.mxu0 %v26026_v36 }
 0x4b1   : > { %7181 = vmatpush1.bf16.msra.mxu0 %v21027_v11  ;;  %7212 = vmatprep.mubr.bf16.mxu0 %v6301_v21 }
 0x4b2   : > { %7182 = vmatprep.subr.bf16.mxu0 %v21035_v57 }
 0x4b5   : > { %7183 = vmatpush1.bf16.msra.mxu0 %v21033_v54  ;;  %v21120_v54 = vld [vmem:[%s30741_s10 + $0x2e8] ss:$16 sps:$4 sm:$0xff]  }
 0x4b6   : > { %7184 = vmatprep.subr.bf16.mxu0 %v21041_v18  ;;  %v21125_v18 = vld [vmem:[%s30741_s10 + $0x2cc] ss:$16 sps:$4 sm:$0xff]  }
 0x4b9   : > { %7185 = vmatpush1.bf16.msra.mxu0 %v21039_v4  ;;  %v21123_v4 = vld [vmem:[%s30741_s10 + $0x2c8] ss:$16 sps:$4 sm:$0xff]  }
 0x4ba   : > { %7186 = vmatprep.subr.bf16.mxu0 %v21047_v5  ;;  %v21128_v5 = vld [vmem:[%s30741_s10 + $0x2ac] ss:$16 sps:$4 sm:$0xff]  }
 0x4bd   : > { %7187 = vmatpush1.bf16.msra.mxu0 %v21045_v16  ;;  %v21126_v16 = vld [vmem:[%s30741_s10 + $0x2a8] ss:$16 sps:$4 sm:$0xff]  }
 0x4be   : > { %7188 = vmatprep.subr.bf16.mxu0 %v21053_v60  ;;  %v21168_v60 = vld [vmem:[%s30677_s12 + $0x2a0] ss:$48 sps:$4 sm:$0xff]  }
 0x4c1   : > { %7189 = vmatpush1.bf16.msra.mxu0 %v21051_v25  ;;  %v21170_v25 = vld [vmem:[%s30677_s12 + $0x2a4] ss:$48 sps:$4 sm:$0xff]  }
 0x4c2   : > { %7190 = vmatprep.subr.bf16.mxu0 %v21059_v61  ;;  %v21173_v61 = vld [vmem:[%s30677_s12 + $0x244] ss:$48 sps:$4 sm:$0xff]  }
 0x4c5   : > { %7191 = vmatpush1.bf16.msra.mxu0 %v21057_v17  ;;  %v21129_v17 = vld [vmem:[%s30741_s10 + $0x288] ss:$16 sps:$4 sm:$0xff]  }
 0x4c6   : > { %7192 = vmatprep.subr.bf16.mxu0 %v21065_v15  ;;  %v21134_v15 = vld [vmem:[%s30741_s10 + $0x26c] ss:$16 sps:$4 sm:$0xff]  }
 0x4c9   : > { %7193 = vmatpush1.bf16.msra.mxu0 %v21063_v59  ;;  %v21171_v59 = vld [vmem:[%s30677_s12 + $0x240] ss:$48 sps:$4 sm:$0xff]  }
 0x4ca   : > { %7194 = vmatprep.subr.bf16.mxu0 %v21071_v20  ;;  %v21176_v20 = vld [vmem:[%s30677_s12 + $0x1e4] ss:$48 sps:$4 sm:$0xff]  }
 0x4cd   : > { %7195 = vmatpush1.bf16.msra.mxu0 %v21069_v27  ;;  %v21132_v27 = vld [vmem:[%s30741_s10 + $0x268] ss:$16 sps:$4 sm:$0xff]  }
 0x4ce   : > { %7196 = vmatprep.subr.bf16.mxu0 %v21077_v28  ;;  %v21137_v28 = vld [vmem:[%s30741_s10 + $0x24c] ss:$16 sps:$4 sm:$0xff]  }
 0x4d1   : > { %7197 = vmatpush2.bf16.msra.mxu0 %v21075_v30  ;;  %v21174_v30 = vld [vmem:[%s30677_s12 + $0x1e0] ss:$48 sps:$4 sm:$0xff]  }
 0x4d2   : > { %7198 = vmatprep.subr.bf16.mxu0 %v21083_v40  ;;  %v21179_v40 = vld [vmem:[%s30677_s12 + $0x184] ss:$48 sps:$4 sm:$0xff]  }
 0x4d5   : > { %7199 = vmatpush2.bf16.msra.mxu0 %v21081_v58  ;;  %v21135_v58 = vld [vmem:[%s30741_s10 + $0x248] ss:$16 sps:$4 sm:$0xff]  }
 0x4d6   : > { %7200 = vmatprep.subr.bf16.mxu0 %v21089_v39  ;;  %v21140_v39 = vld [vmem:[%s30741_s10 + $0x22c] ss:$16 sps:$4 sm:$0xff]  }
 0x4d9   : > { %7201 = vmatpush2.bf16.msra.mxu0 %v21087_v19  ;;  %v21177_v19 = vld [vmem:[%s30677_s12 + $0x180] ss:$48 sps:$4 sm:$0xff]  }
 0x4da   : > { %7202 = vmatprep.subr.bf16.mxu0 %v21095_v34  ;;  %v21138_v34 = vld [vmem:[%s30741_s10 + $0x228] ss:$16 sps:$4 sm:$0xff]  }
 0x4dd   : > { %7203 = vmatpush2.bf16.msra.mxu0 %v21093_v0  ;;  %v21143_v0 = vld [vmem:[%s30741_s10 + $0x20c] ss:$16 sps:$4 sm:$0xff]  }
 0x4de   : > { %7204 = vmatprep.subr.bf16.mxu0 %v21101_v38  ;;  %v21185_v38 = vld [vmem:[%s30677_s12 + $0xc4] ss:$48 sps:$4 sm:$0xff]  }
 0x4e0   : > { %v6253_v22 = vpop.f32.mrf.mxu1 }
 0x4e1   : > { %v6254_v29 = vadd.f32 %v6253_v22, %v6211_v1  ;;  %7205 = vmatpush2.bf16.msra.mxu0 %v21099_v26  ;;  %v21141_v26 = vld [vmem:[%s30741_s10 + $0x208] ss:$16 sps:$4 sm:$0xff]   ;;  %v21188_v1 = vld [vmem:[%s30677_s12 + $0x64] ss:$48 sps:$4 sm:$0xff]  }
 0x4e2   : > { %v6255_v13 = vpop.f32.mrf.mxu1  ;;  %7206 = vmatprep.subr.bf16.mxu0 %v21107_v41  ;;  %v21183_v41 = vld [vmem:[%s30677_s12 + $0xc0] ss:$48 sps:$4 sm:$0xff]   ;;  %v21144_v22 = vld [vmem:[%s30741_s10 + $0x3e8] ss:$16 sps:$4 sm:$0xff]  }
 0x4e3   : > { %v6256_v62 = vadd.f32 %v6255_v13, %v6213_v47  ;;  %v6286_v3 = vadd.f32 %v6275_v45, %v6254_v29  ;;  %v21149_v47 = vld [vmem:[%s30741_s10 + $0x3cc] ss:$16 sps:$4 sm:$0xff]   ;;  %v21186_v29 = vld [vmem:[%s30677_s12 + $0x60] ss:$48 sps:$4 sm:$0xff]  }
 0x4e4   : > { %v6257_v2 = vpop.f32.mrf.mxu1  ;;  %v21189_v13 = vld [vmem:[%s30677_s12] ss:$48 sps:$4 sm:$0xff]  }
 0x4e5   : > { %v6258_v33 = vadd.f32 %v6257_v2, %v6215_v32  ;;  %7207 = vmatpush2.bf16.msra.mxu0 %v21105_v48  ;;  %v6287_v46 = vadd.f32 %v6279_v23, %v6256_v62  ;;  %v6294_v44 = vmax.f32 %v6286_v3, 0.0  ;;  %v21147_v48 = vld [vmem:[%s30741_s10 + $0x3c8] ss:$16 sps:$4 sm:$0xff]   ;;  %v21155_v62 = vld [vmem:[%s30741_s10 + $0x38c] ss:$16 sps:$4 sm:$0xff]  }
 0x4e6   : > { %v6259_v50 = vpop.f32.mrf.mxu1  ;;  %7208 = vmatprep.subr.bf16.mxu0 %v21113_v63  ;;  %v21194_v63 = vld [vmem:[%s30677_s12 + $0x5a4] ss:$48 sps:$4 sm:$0xff]   ;;  %v21150_v32 = vld [vmem:[%s30741_s10 + $0x3a8] ss:$16 sps:$4 sm:$0xff]   ;;  %v21158_v3 = vld [vmem:[%s30741_s10 + $0x36c] ss:$16 sps:$4 sm:$0xff]  }
 0x4e7   : > { %v6290_v52 = vadd.f32 %v6275_v45, %v6258_v33  ;;  %v6260_v53 = vadd.f32 %v6259_v50, %v6217_v6  ;;  %v6295_v35 = vmax.f32 %v6287_v46, 0.0  ;;  %v21191_v45 = vld [vmem:[%s30677_s12 + $0x4] ss:$48 sps:$4 sm:$0xff]   ;;  %v21153_v6 = vld [vmem:[%s30741_s10 + $0x388] ss:$16 sps:$4 sm:$0xff]  }
 0x4e8   : > { %v21197_v2 = vld [vmem:[%s30677_s12 + $0x544] ss:$48 sps:$4 sm:$0xff]   ;;  %v21195_v33 = vld [vmem:[%s30677_s12 + $0x540] ss:$48 sps:$4 sm:$0xff]   ;;  %v21156_v50 = vld [vmem:[%s30741_s10 + $0x368] ss:$16 sps:$4 sm:$0xff]  }
 0x4e9   : > { %v6298_v51 = vmax.f32 %v6290_v52, 0.0  ;;  %v6291_v56 = vadd.f32 %v6279_v23, %v6260_v53  ;;  %7209 = vmatpush2.bf16.msra.mxu0 %v21111_v37  ;;  %v21192_v23 = vld [vmem:[%s30677_s12 + $0x5a0] ss:$48 sps:$4 sm:$0xff]   ;;  %v21200_v37 = vld [vmem:[%s30677_s12 + $0x4e4] ss:$48 sps:$4 sm:$0xff]  }
 0x4ea   : > { %7210 = vmatprep.subr.bf16.mxu0 %v21119_v24  ;;  %v21161_v24 = vld [vmem:[%s30741_s10 + $0x34c] ss:$16 sps:$4 sm:$0xff]   ;;  %v21198_v46 = vld [vmem:[%s30677_s12 + $0x4e0] ss:$48 sps:$4 sm:$0xff]   ;;  %v21203_v52 = vld [vmem:[%s30677_s12 + $0x484] ss:$48 sps:$4 sm:$0xff]  }
 0x4eb   : > { %v26127_v21 = vpack.c.bf16 %v6298_v51, %v6294_v44  ;;  %v6299_v11 = vmax.f32 %v6291_v56, 0.0  ;;  %v21159_v53 = vld [vmem:[%s30741_s10 + $0x348] ss:$16 sps:$4 sm:$0xff]   ;;  %v21164_v44 = vld [vmem:[%s30741_s10 + $0x32c] ss:$16 sps:$4 sm:$0xff]  }
 0x4ec   : > { %v21201_v51 = vld [vmem:[%s30677_s12 + $0x480] ss:$48 sps:$4 sm:$0xff]   ;;  %v21206_v56 = vld [vmem:[%s30677_s12 + $0x424] ss:$48 sps:$4 sm:$0xff]  }
 0x4ed   : > { %7211 = vmatpush2.bf16.msra.mxu0 %v21117_v31  ;;  %v6303_v57 = vpack.c.bf16 %v6299_v11, %v6295_v35  ;;  %v21162_v31 = vld [vmem:[%s30741_s10 + $0x328] ss:$16 sps:$4 sm:$0xff]   ;;  %v21167_v35 = vld [vmem:[%s30741_s10 + $0x30c] ss:$16 sps:$4 sm:$0xff]   ;;  %v21204_v11 = vld [vmem:[%s30677_s12 + $0x420] ss:$48 sps:$4 sm:$0xff]  }
 0x4ee   : > { %9646 = vmatprep.subr.bf16.mxu0 %v21170_v25  ;;  %v21221_v25 = vld [vmem:[%s30677_s12 + $0x2ac] ss:$48 sps:$4 sm:$0xff]  }
 0x4ef   : > { %7169 = vmatprep.mubr.bf16.mxu1 %v6303_v57 }
 0x4f0   : > { %7213 = vmatmul.mubr.bf16.vlgmr.msra.gmra.mxu0 %v26026_v36  ;;  %7170 = vmatmul.mubr.bf16.vlgmr.msra.gmra.mxu1 %v26127_v21  ;;  %v21131_v36 = vld [vmem:[%s30741_s10 + $0x28c] ss:$16 sps:$4 sm:$0xff]  }
 0x4f1   : > { %7224 = vmatpush1.bf16.msra.mxu1 %v21120_v54  ;;  %7255 = vmatprep.mubr.bf16.mxu1 %v6303_v57  ;;  %v21165_v57 = vld [vmem:[%s30741_s10 + $0x308] ss:$16 sps:$4 sm:$0xff]   ;;  %v21209_v54 = vld [vmem:[%s30677_s12 + $0x3c4] ss:$48 sps:$4 sm:$0xff]  }
 0x4f2   : > { %7225 = vmatprep.subr.bf16.mxu1 %v21125_v18  ;;  %9647 = vmatpush1.bf16.msra.mxu0 %v21168_v60  ;;  %v21207_v18 = vld [vmem:[%s30677_s12 + $0x3c0] ss:$48 sps:$4 sm:$0xff]   ;;  %v21218_v60 = vld [vmem:[%s30677_s12 + $0x8a4] ss:$48 sps:$4 sm:$0xff]  }
 0x4f3   : > { %9648 = vmatprep.subr.bf16.mxu0 %v21173_v61  ;;  %v21222_v61 = vld [vmem:[%s30677_s12 + $0x840] ss:$48 sps:$4 sm:$0xff]  }
 0x4f5   : > { %7226 = vmatpush1.bf16.msra.mxu1 %v21123_v4  ;;  %v21212_v4 = vld [vmem:[%s30677_s12 + $0x364] ss:$48 sps:$4 sm:$0xff]  }
 0x4f6   : > { %7227 = vmatprep.subr.bf16.mxu1 %v21128_v5  ;;  %9649 = vmatpush1.bf16.msra.mxu0 %v21171_v59  ;;  %v21210_v5 = vld [vmem:[%s30677_s12 + $0x360] ss:$48 sps:$4 sm:$0xff]   ;;  %v21230_v59 = vld [vmem:[%s30677_s12 + $0x7e4] ss:$48 sps:$4 sm:$0xff]  }
 0x4f7   : > { %9650 = vmatprep.subr.bf16.mxu0 %v21176_v20  ;;  %v21234_v20 = vld [vmem:[%s30677_s12 + $0x780] ss:$48 sps:$4 sm:$0xff]  }
 0x4f9   : > { %7228 = vmatpush1.bf16.msra.mxu1 %v21126_v16  ;;  %v21213_v16 = vld [vmem:[%s30677_s12 + $0x300] ss:$48 sps:$4 sm:$0xff]  }
 0x4fa   : > { %7229 = vmatprep.subr.bf16.mxu1 %v21131_v36  ;;  %9651 = vmatpush1.bf16.msra.mxu0 %v21174_v30  ;;  %v21216_v36 = vld [vmem:[%s30677_s12 + $0x8a0] ss:$48 sps:$4 sm:$0xff]   ;;  %v21242_v30 = vld [vmem:[%s30677_s12 + $0x724] ss:$48 sps:$4 sm:$0xff]  }
 0x4fb   : > { %9652 = vmatprep.subr.bf16.mxu0 %v21179_v40  ;;  %v21246_v40 = vld [vmem:[%s30677_s12 + $0x6c0] ss:$48 sps:$4 sm:$0xff]  }
 0x4fd   : > { %7230 = vmatpush1.bf16.msra.mxu1 %v21129_v17  ;;  %v21224_v17 = vld [vmem:[%s30677_s12 + $0x844] ss:$48 sps:$4 sm:$0xff]  }
 0x4fe   : > { %7231 = vmatprep.subr.bf16.mxu1 %v21134_v15  ;;  %9653 = vmatpush1.bf16.msra.mxu0 %v21177_v19  ;;  %v21228_v15 = vld [vmem:[%s30677_s12 + $0x7e0] ss:$48 sps:$4 sm:$0xff]   ;;  %v21254_v19 = vld [vmem:[%s30677_s12 + $0x664] ss:$48 sps:$4 sm:$0xff]  }
 0x4ff   : > { %9654 = vmatprep.subr.bf16.mxu0 %v21182_v55  ;;  %v21258_v55 = vld [vmem:[%s30677_s12 + $0x600] ss:$48 sps:$4 sm:$0xff]  }
 0x501   : > { %7232 = vmatpush1.bf16.msra.mxu1 %v21132_v27  ;;  %v21236_v27 = vld [vmem:[%s30677_s12 + $0x784] ss:$48 sps:$4 sm:$0xff]  }
 0x502   : > { %7233 = vmatprep.subr.bf16.mxu1 %v21137_v28  ;;  %9655 = vmatpush1.bf16.msra.mxu0 %v21180_v43  ;;  %v21240_v28 = vld [vmem:[%s30677_s12 + $0x720] ss:$48 sps:$4 sm:$0xff]   ;;  %v21266_v43 = vld [vmem:[%s30677_s12 + $0xba4] ss:$48 sps:$4 sm:$0xff]  }
 0x503   : > { %9656 = vmatprep.subr.bf16.mxu0 %v21185_v38  ;;  %v21270_v38 = vld [vmem:[%s30677_s12 + $0xb40] ss:$48 sps:$4 sm:$0xff]  }
 0x505   : > { %7234 = vmatpush1.bf16.msra.mxu1 %v21135_v58  ;;  %v21248_v58 = vld [vmem:[%s30677_s12 + $0x6c4] ss:$48 sps:$4 sm:$0xff]  }
 0x506   : > { %7235 = vmatprep.subr.bf16.mxu1 %v21140_v39  ;;  %9657 = vmatpush1.bf16.msra.mxu0 %v21183_v41  ;;  %v21252_v39 = vld [vmem:[%s30677_s12 + $0x660] ss:$48 sps:$4 sm:$0xff]   ;;  %v21278_v41 = vld [vmem:[%s30677_s12 + $0xae4] ss:$48 sps:$4 sm:$0xff]  }
 0x507   : > { %9658 = vmatprep.subr.bf16.mxu0 %v21188_v1  ;;  %v21282_v1 = vld [vmem:[%s30677_s12 + $0xa80] ss:$48 sps:$4 sm:$0xff]  }
 0x509   : > { %7236 = vmatpush1.bf16.msra.mxu1 %v21138_v34  ;;  %v21260_v34 = vld [vmem:[%s30677_s12 + $0x604] ss:$48 sps:$4 sm:$0xff]  }
 0x50a   : > { %7237 = vmatprep.subr.bf16.mxu1 %v21143_v0  ;;  %9659 = vmatpush1.bf16.msra.mxu0 %v21186_v29  ;;  %v21264_v0 = vld [vmem:[%s30677_s12 + $0xba0] ss:$48 sps:$4 sm:$0xff]   ;;  %v21290_v29 = vld [vmem:[%s30677_s12 + $0xa24] ss:$48 sps:$4 sm:$0xff]  }
 0x50b   : > { %9660 = vmatprep.subr.bf16.mxu0 %v21191_v45  ;;  %v21296_v45 = vld [vmem:[%s30677_s12 + $0x9c4] ss:$48 sps:$4 sm:$0xff]  }
 0x50d   : > { %7238 = vmatpush1.bf16.msra.mxu1 %v21141_v26  ;;  %v21272_v26 = vld [vmem:[%s30677_s12 + $0xb44] ss:$48 sps:$4 sm:$0xff]  }
 0x50e   : > { %7239 = vmatprep.subr.bf16.mxu1 %v21146_v42  ;;  %9661 = vmatpush1.bf16.msra.mxu0 %v21189_v13  ;;  %v21276_v42 = vld [vmem:[%s30677_s12 + $0xae0] ss:$48 sps:$4 sm:$0xff]  }
 0x50f   : > { %9662 = vmatprep.subr.bf16.mxu0 %v21194_v63  ;;  %v21300_v13 = vld [vmem:[%s30677_s12 + $0x960] ss:$48 sps:$4 sm:$0xff]   ;;  %v21308_v63 = vld [vmem:[%s30677_s12 + $0x904] ss:$48 sps:$4 sm:$0xff]  }
 0x511   : > { %7240 = vmatpush2.bf16.msra.mxu1 %v21144_v22  ;;  %v21284_v22 = vld [vmem:[%s30677_s12 + $0xa84] ss:$48 sps:$4 sm:$0xff]  }
 0x512   : > { %7241 = vmatprep.subr.bf16.mxu1 %v21149_v47  ;;  %9663 = vmatpush2.bf16.msra.mxu0 %v21192_v23  ;;  %v21288_v47 = vld [vmem:[%s30677_s12 + $0xa20] ss:$48 sps:$4 sm:$0xff]  }
 0x513   : > { %9664 = vmatprep.subr.bf16.mxu0 %v21197_v2 }
 0x515   : > { %7242 = vmatpush2.bf16.msra.mxu1 %v21147_v48  ;;  %v21294_v48 = vld [vmem:[%s30677_s12 + $0x9c0] ss:$48 sps:$4 sm:$0xff]  }
 0x516   : > { %7243 = vmatprep.subr.bf16.mxu1 %v21152_v49  ;;  %9665 = vmatpush2.bf16.msra.mxu0 %v21195_v33  ;;  %v21302_v49 = vld [vmem:[%s30677_s12 + $0x964] ss:$48 sps:$4 sm:$0xff]  }
 0x517   : > { %9666 = vmatprep.subr.bf16.mxu0 %v21200_v37 }
 0x519   : > { %7244 = vmatpush2.bf16.msra.mxu1 %v21150_v32  ;;  %v21306_v32 = vld [vmem:[%s30677_s12 + $0x900] ss:$48 sps:$4 sm:$0xff]  }
 0x51a   : > { %7245 = vmatprep.subr.bf16.mxu1 %v21155_v62  ;;  %9667 = vmatpush2.bf16.msra.mxu0 %v21198_v46  ;;  %v21314_v62 = vld [vmem:[%s30677_s12 + $0x8ac] ss:$48 sps:$4 sm:$0xff]  }
 0x51b   : > { %9668 = vmatprep.subr.bf16.mxu0 %v21203_v52 }
 0x51d   : > { %7246 = vmatpush2.bf16.msra.mxu1 %v21153_v6  ;;  %v26426_v6 = vld [vmem:[%s30743_s11] sm:$0xf] }
 0x51e   : > { %7247 = vmatprep.subr.bf16.mxu1 %v21158_v3  ;;  %9669 = vmatpush2.bf16.msra.mxu0 %v21201_v51  ;;  %v6441_v33 = vrot.slane %v26426_v6, %v23819_v9  ;;  %v6437_v37 = vrot.slane %v26426_v6, %v23828_v12 }
 0x51f   : > { %9670 = vmatprep.subr.bf16.mxu0 %v21206_v56 }
 0x521   : > { %7248 = vmatpush2.bf16.msra.mxu1 %v21156_v50 }
 0x522   : > { %7249 = vmatprep.subr.bf16.mxu1 %v21161_v24  ;;  %9671 = vmatpush2.bf16.msra.mxu0 %v21204_v11 }
 0x523   : > { %9672 = vmatprep.subr.bf16.mxu0 %v21209_v54 }
 0x525   : > { %7250 = vmatpush2.bf16.msra.mxu1 %v21159_v53 }
 0x526   : > { %7251 = vmatprep.subr.bf16.mxu1 %v21164_v44  ;;  %9673 = vmatpush2.bf16.msra.mxu0 %v21207_v18 }
 0x527   : > { %9674 = vmatprep.subr.bf16.mxu0 %v21212_v4 }
 0x529   : > { %7252 = vmatpush2.bf16.msra.mxu1 %v21162_v31 }
 0x52a   : > { %7253 = vmatprep.subr.bf16.mxu1 %v21167_v35  ;;  %9675 = vmatpush2.bf16.msra.mxu0 %v21210_v5 }
 0x52d   : > { %7254 = vmatpush2.bf16.msra.mxu1 %v21165_v57 }
 0x52e   : > { %9689 = vmatprep.subr.bf16.mxu1 %v21218_v60 }
 0x530   : > { %7256 = vmatmul.mubr.bf16.vlgmr.msra.gmra.mxu1 %v26127_v21  ;;  %v21215_v21 = vld [vmem:[%s30677_s12 + $0x304] ss:$48 sps:$4 sm:$0xff]  }
 0x531   : > { %9676 = vmatprep.subr.bf16.mxu0 %v21215_v21  ;;  %9690 = vmatpush1.bf16.msra.mxu1 %v21216_v36  ;;  %v21219_v36 = vld [vmem:[%s30677_s12 + $0x2a8] ss:$48 sps:$4 sm:$0xff]  }
 0x532   : > { %9677 = vmatpush2.bf16.msra.mxu0 %v21213_v16  ;;  %9691 = vmatprep.subr.bf16.mxu1 %v21224_v17  ;;  %v21233_v17 = vld [vmem:[%s30677_s12 + $0x1ec] ss:$48 sps:$4 sm:$0xff]  }
 0x533   : > { %9732 = vmatprep.subr.bf16.mxu0 %v21221_v25  ;;  %v21227_v25 = vld [vmem:[%s30677_s12 + $0x24c] ss:$48 sps:$4 sm:$0xff]  }
 0x535   : > { %9692 = vmatpush1.bf16.msra.mxu1 %v21222_v61  ;;  %v21225_v61 = vld [vmem:[%s30677_s12 + $0x248] ss:$48 sps:$4 sm:$0xff]  }
 0x536   : > { %9693 = vmatprep.subr.bf16.mxu1 %v21230_v59  ;;  %v21239_v59 = vld [vmem:[%s30677_s12 + $0x18c] ss:$48 sps:$4 sm:$0xff]  }
 0x539   : > { %9694 = vmatpush1.bf16.msra.mxu1 %v21228_v15  ;;  %v21231_v15 = vld [vmem:[%s30677_s12 + $0x1e8] ss:$48 sps:$4 sm:$0xff]  }
 0x53a   : > { %9695 = vmatprep.subr.bf16.mxu1 %v21236_v27  ;;  %v21245_v27 = vld [vmem:[%s30677_s12 + $0x12c] ss:$48 sps:$4 sm:$0xff]  }
 0x53d   : > { %9696 = vmatpush1.bf16.msra.mxu1 %v21234_v20  ;;  %v21237_v20 = vld [vmem:[%s30677_s12 + $0x188] ss:$48 sps:$4 sm:$0xff]  }
 0x53e   : > { %9697 = vmatprep.subr.bf16.mxu1 %v21242_v30  ;;  %v21251_v30 = vld [vmem:[%s30677_s12 + $0xcc] ss:$48 sps:$4 sm:$0xff]  }
 0x541   : > { %9698 = vmatpush1.bf16.msra.mxu1 %v21240_v28  ;;  %v21243_v28 = vld [vmem:[%s30677_s12 + $0x128] ss:$48 sps:$4 sm:$0xff]  }
 0x542   : > { %9699 = vmatprep.subr.bf16.mxu1 %v21248_v58  ;;  %v21257_v58 = vld [vmem:[%s30677_s12 + $0x6c] ss:$48 sps:$4 sm:$0xff]  }
 0x545   : > { %9700 = vmatpush1.bf16.msra.mxu1 %v21246_v40  ;;  %v21249_v40 = vld [vmem:[%s30677_s12 + $0xc8] ss:$48 sps:$4 sm:$0xff]  }
 0x546   : > { %9701 = vmatprep.subr.bf16.mxu1 %v21254_v19  ;;  %v21263_v19 = vld [vmem:[%s30677_s12 + $0xc] ss:$48 sps:$4 sm:$0xff]  }
 0x549   : > { %9702 = vmatpush1.bf16.msra.mxu1 %v21252_v39  ;;  %v21255_v39 = vld [vmem:[%s30677_s12 + $0x68] ss:$48 sps:$4 sm:$0xff]  }
 0x54a   : > { %9703 = vmatprep.subr.bf16.mxu1 %v21260_v34  ;;  %v21269_v34 = vld [vmem:[%s30677_s12 + $0x5ac] ss:$48 sps:$4 sm:$0xff]  }
 0x54d   : > { %9704 = vmatpush1.bf16.msra.mxu1 %v21258_v55  ;;  %v21261_v55 = vld [vmem:[%s30677_s12 + $0x8] ss:$48 sps:$4 sm:$0xff]  }
 0x54e   : > { %9705 = vmatprep.subr.bf16.mxu1 %v21266_v43  ;;  %v21275_v43 = vld [vmem:[%s30677_s12 + $0x54c] ss:$48 sps:$4 sm:$0xff]  }
 0x551   : > { %9706 = vmatpush2.bf16.msra.mxu1 %v21264_v0  ;;  %v21267_v0 = vld [vmem:[%s30677_s12 + $0x5a8] ss:$48 sps:$4 sm:$0xff]  }
 0x552   : > { %9707 = vmatprep.subr.bf16.mxu1 %v21272_v26  ;;  %v21281_v26 = vld [vmem:[%s30677_s12 + $0x4ec] ss:$48 sps:$4 sm:$0xff]  }
 0x555   : > { %9708 = vmatpush2.bf16.msra.mxu1 %v21270_v38  ;;  %v21273_v38 = vld [vmem:[%s30677_s12 + $0x548] ss:$48 sps:$4 sm:$0xff]  }
 0x556   : > { %9709 = vmatprep.subr.bf16.mxu1 %v21278_v41  ;;  %v21287_v41 = vld [vmem:[%s30677_s12 + $0x48c] ss:$48 sps:$4 sm:$0xff]  }
 0x559   : > { %9710 = vmatpush2.bf16.msra.mxu1 %v21276_v42  ;;  %v21279_v42 = vld [vmem:[%s30677_s12 + $0x4e8] ss:$48 sps:$4 sm:$0xff]  }
 0x55a   : > { %9711 = vmatprep.subr.bf16.mxu1 %v21284_v22  ;;  %v21285_v22 = vld [vmem:[%s30677_s12 + $0x488] ss:$48 sps:$4 sm:$0xff]  }
 0x55d   : > { %9712 = vmatpush2.bf16.msra.mxu1 %v21282_v1 }
 0x55e   : > { %9713 = vmatprep.subr.bf16.mxu1 %v21290_v29 }
 0x561   : > { %9714 = vmatpush2.bf16.msra.mxu1 %v21288_v47  ;;  %v21293_v47 = vld [vmem:[%s30677_s12 + $0x42c] ss:$48 sps:$4 sm:$0xff]  }
 0x562   : > { %9715 = vmatprep.subr.bf16.mxu1 %v21296_v45  ;;  %v21291_v45 = vld [vmem:[%s30677_s12 + $0x428] ss:$48 sps:$4 sm:$0xff]  }
 0x565   : > { %9716 = vmatpush2.bf16.msra.mxu1 %v21294_v48  ;;  %v21299_v48 = vld [vmem:[%s30677_s12 + $0x3cc] ss:$48 sps:$4 sm:$0xff]  }
 0x566   : > { %9717 = vmatprep.subr.bf16.mxu1 %v21302_v49 }
 0x569   : > { %9718 = vmatpush2.bf16.msra.mxu1 %v21300_v13  ;;  %v6449_v13 = vrot.slane %v26426_v6, %v23822_v10 }
 0x56a   : > { %9719 = vmatprep.subr.bf16.mxu1 %v21308_v63  ;;  %v21297_v63 = vld [vmem:[%s30677_s12 + $0x3c8] ss:$48 sps:$4 sm:$0xff]  }
 0x56d   : > { %9720 = vmatpush2.bf16.msra.mxu1 %v21306_v32  ;;  %v6445_v32 = vrot.slane %v26426_v6, %v23831_v14  ;;  %v21311_v6 = vld [vmem:[%s30677_s12 + $0x30c] ss:$48 sps:$4 sm:$0xff]  }
 0x56e   : > { %9775 = vmatprep.subr.bf16.mxu1 %v21314_v62 }
 0x570   : > { %v7128_v23 = vpop.f32.mrf.mxu0 }
 0x571   : > { %v7129_v44 = vadd.f32 %v7128_v23, %v6437_v37  ;;  %v21305_v23 = vld [vmem:[%s30677_s12 + $0x36c] ss:$48 sps:$4 sm:$0xff]  }
 0x572   : > { %v7130_v2 = vpop.f32.mrf.mxu0 }
 0x573   : > { %v7131_v52 = vadd.f32 %v7130_v2, %v6441_v33 }
 0x574   : > { %v7132_v3 = vpop.f32.mrf.mxu0 }
 0x575   : > { %v7133_v53 = vadd.f32 %v7132_v3, %v6437_v37 }
 0x576   : > { %v7134_v24 = vpop.f32.mrf.mxu0 }
 0x577   : > { %v7135_v56 = vadd.f32 %v7134_v24, %v6441_v33 }
 0x5b0   : > { %v7171_v50 = vpop.f32.mrf.mxu1  ;;  %v7214_v1 = vpop.f32.mrf.mxu0 }
 0x5b1   : > { %v7172_v11 = vadd.f32 %v7171_v50, %v7129_v44  ;;  %v21303_v50 = vld [vmem:[%s30677_s12 + $0x368] ss:$48 sps:$4 sm:$0xff]   ;;  %v7215_v24 = vadd.f32 %v7214_v1, %v6445_v32  ;;  %v21350_v1 = vld [vmem:[%s30677_s12 + $0x66c] ss:$48 sps:$4 sm:$0xff]  }
 0x5b2   : > { %v7173_v46 = vpop.f32.mrf.mxu1  ;;  %v7216_v29 = vpop.f32.mrf.mxu0 }
 0x5b3   : > { %v7174_v31 = vadd.f32 %v7173_v46, %v7131_v52  ;;  %v7266_v21 = vmax.f32 %v7172_v11, 0.0  ;;  %v7217_v33 = vadd.f32 %v7216_v29, %v6449_v13  ;;  %v21351_v29 = vld [vmem:[%s30677_s12 + $0x70] ss:$48 sps:$4 sm:$0xff]  }
 0x5b4   : > { %v7175_v51 = vpop.f32.mrf.mxu1  ;;  %v7218_v49 = vpop.f32.mrf.mxu0 }
 0x5b5   : > { %v7176_v35 = vadd.f32 %v7175_v51, %v7133_v53  ;;  %v7267_v4 = vmax.f32 %v7174_v31, 0.0  ;;  %v7219_v37 = vadd.f32 %v7218_v49, %v6445_v32  ;;  %v21354_v49 = vld [vmem:[%s30677_s12 + $0x608] ss:$48 sps:$4 sm:$0xff]   ;;  %v21365_v32 = vld [vmem:[%s30677_s12 + $0x5b4] ss:$48 sps:$4 sm:$0xff]  }
 0x5b6   : > { %v7177_v57 = vpop.f32.mrf.mxu1  ;;  %v7220_v2 = vpop.f32.mrf.mxu0 }
 0x5b7   : > { %v7178_v54 = vadd.f32 %v7177_v57, %v7135_v56  ;;  %v7270_v18 = vmax.f32 %v7176_v35, 0.0  ;;  %v7221_v52 = vadd.f32 %v7220_v2, %v6449_v13  ;;  %v21309_v35 = vld [vmem:[%s30677_s12 + $0x308] ss:$48 sps:$4 sm:$0xff]   ;;  %v21317_v57 = vld [vmem:[%s30677_s12 + $0x2b4] ss:$48 sps:$4 sm:$0xff]  }
 0x5b8   : > { %v21357_v13 = vld [vmem:[%s30677_s12 + $0x10] ss:$48 sps:$4 sm:$0xff]   ;;  %v21368_v2 = vld [vmem:[%s30677_s12 + $0xb4c] ss:$48 sps:$4 sm:$0xff]  }
 0x5b9   : > { %v7271_v5 = vmax.f32 %v7178_v54, 0.0  ;;  %v26437_v60 = vpack.c.bf16 %v7270_v18, %v7266_v21  ;;  %v21312_v21 = vld [vmem:[%s30677_s12 + $0x8a8] ss:$48 sps:$4 sm:$0xff]  }
 0x5bb   : > { %v26432_v16 = vpack.c.bf16 %v7271_v5, %v7267_v4 }
 0x5bd   : > { %9678 = vmatprep.mubr.bf16.mxu0 %v26432_v16 }
 0x5be   : > { %9679 = vmatmul.mubr.bf16.vlgmr.msra.gmra.mxu0 %v26437_v60 }
 0x5bf   : > { %9733 = vmatpush1.bf16.msra.mxu0 %v21219_v36  ;;  %9764 = vmatprep.mubr.bf16.mxu0 %v26432_v16 }
 0x5c0   : > { %9734 = vmatprep.subr.bf16.mxu0 %v21227_v25  ;;  %v21315_v25 = vld [vmem:[%s30677_s12 + $0x2b0] ss:$48 sps:$4 sm:$0xff]  }
 0x5c3   : > { %9735 = vmatpush1.bf16.msra.mxu0 %v21225_v61  ;;  %v21320_v61 = vld [vmem:[%s30677_s12 + $0x84c] ss:$48 sps:$4 sm:$0xff]  }
 0x5c4   : > { %9736 = vmatprep.subr.bf16.mxu0 %v21233_v17  ;;  %v21323_v17 = vld [vmem:[%s30677_s12 + $0x254] ss:$48 sps:$4 sm:$0xff]  }
 0x5c7   : > { %9737 = vmatpush1.bf16.msra.mxu0 %v21231_v15  ;;  %v21318_v15 = vld [vmem:[%s30677_s12 + $0x848] ss:$48 sps:$4 sm:$0xff]  }
 0x5c8   : > { %9738 = vmatprep.subr.bf16.mxu0 %v21239_v59  ;;  %v21321_v59 = vld [vmem:[%s30677_s12 + $0x250] ss:$48 sps:$4 sm:$0xff]  }
 0x5cb   : > { %9739 = vmatpush1.bf16.msra.mxu0 %v21237_v20  ;;  %v21326_v20 = vld [vmem:[%s30677_s12 + $0x7ec] ss:$48 sps:$4 sm:$0xff]  }
 0x5cc   : > { %9740 = vmatprep.subr.bf16.mxu0 %v21245_v27  ;;  %v21329_v27 = vld [vmem:[%s30677_s12 + $0x1f4] ss:$48 sps:$4 sm:$0xff]  }
 0x5cf   : > { %9741 = vmatpush1.bf16.msra.mxu0 %v21243_v28  ;;  %v21324_v28 = vld [vmem:[%s30677_s12 + $0x7e8] ss:$48 sps:$4 sm:$0xff]  }
 0x5d0   : > { %9742 = vmatprep.subr.bf16.mxu0 %v21251_v30  ;;  %v21327_v30 = vld [vmem:[%s30677_s12 + $0x1f0] ss:$48 sps:$4 sm:$0xff]  }
 0x5d3   : > { %9743 = vmatpush1.bf16.msra.mxu0 %v21249_v40  ;;  %v21332_v40 = vld [vmem:[%s30677_s12 + $0x78c] ss:$48 sps:$4 sm:$0xff]  }
 0x5d4   : > { %9744 = vmatprep.subr.bf16.mxu0 %v21257_v58  ;;  %v21335_v58 = vld [vmem:[%s30677_s12 + $0x194] ss:$48 sps:$4 sm:$0xff]  }
 0x5d7   : > { %9745 = vmatpush1.bf16.msra.mxu0 %v21255_v39  ;;  %v21330_v39 = vld [vmem:[%s30677_s12 + $0x788] ss:$48 sps:$4 sm:$0xff]  }
 0x5d8   : > { %9746 = vmatprep.subr.bf16.mxu0 %v21263_v19  ;;  %v21333_v19 = vld [vmem:[%s30677_s12 + $0x190] ss:$48 sps:$4 sm:$0xff]  }
 0x5db   : > { %9747 = vmatpush1.bf16.msra.mxu0 %v21261_v55  ;;  %v21338_v55 = vld [vmem:[%s30677_s12 + $0x72c] ss:$48 sps:$4 sm:$0xff]  }
 0x5dc   : > { %9748 = vmatprep.subr.bf16.mxu0 %v21269_v34  ;;  %v21341_v34 = vld [vmem:[%s30677_s12 + $0x134] ss:$48 sps:$4 sm:$0xff]  }
 0x5df   : > { %9749 = vmatpush2.bf16.msra.mxu0 %v21267_v0  ;;  %v21336_v0 = vld [vmem:[%s30677_s12 + $0x728] ss:$48 sps:$4 sm:$0xff]  }
 0x5e0   : > { %9750 = vmatprep.subr.bf16.mxu0 %v21275_v43  ;;  %v21339_v43 = vld [vmem:[%s30677_s12 + $0x130] ss:$48 sps:$4 sm:$0xff]  }
 0x5e3   : > { %9751 = vmatpush2.bf16.msra.mxu0 %v21273_v38  ;;  %v21344_v38 = vld [vmem:[%s30677_s12 + $0x6cc] ss:$48 sps:$4 sm:$0xff]  }
 0x5e4   : > { %9752 = vmatprep.subr.bf16.mxu0 %v21281_v26  ;;  %v21347_v26 = vld [vmem:[%s30677_s12 + $0xd4] ss:$48 sps:$4 sm:$0xff]  }
 0x5e7   : > { %9753 = vmatpush2.bf16.msra.mxu0 %v21279_v42  ;;  %v21342_v42 = vld [vmem:[%s30677_s12 + $0x6c8] ss:$48 sps:$4 sm:$0xff]  }
 0x5e8   : > { %9754 = vmatprep.subr.bf16.mxu0 %v21287_v41  ;;  %v21345_v41 = vld [vmem:[%s30677_s12 + $0xd0] ss:$48 sps:$4 sm:$0xff]  }
 0x5eb   : > { %9755 = vmatpush2.bf16.msra.mxu0 %v21285_v22  ;;  %v21353_v22 = vld [vmem:[%s30677_s12 + $0x74] ss:$48 sps:$4 sm:$0xff]  }
 0x5ec   : > { %9756 = vmatprep.subr.bf16.mxu0 %v21293_v47  ;;  %v21348_v47 = vld [vmem:[%s30677_s12 + $0x668] ss:$48 sps:$4 sm:$0xff]  }
 0x5ef   : > { %9757 = vmatpush2.bf16.msra.mxu0 %v21291_v45  ;;  %v21356_v45 = vld [vmem:[%s30677_s12 + $0x60c] ss:$48 sps:$4 sm:$0xff]  }
 0x5f0   : > { %v7257_v62 = vpop.f32.mrf.mxu1  ;;  %9758 = vmatprep.subr.bf16.mxu0 %v21299_v48  ;;  %v21359_v48 = vld [vmem:[%s30677_s12 + $0x14] ss:$48 sps:$4 sm:$0xff]  }
 0x5f1   : > { %v7258_v51 = vadd.f32 %v7257_v62, %v7215_v24  ;;  %v21360_v62 = vld [vmem:[%s30677_s12 + $0xba8] ss:$48 sps:$4 sm:$0xff]   ;;  %v21377_v24 = vld [vmem:[%s30677_s12 + $0x4f4] ss:$48 sps:$4 sm:$0xff]  }
 0x5f2   : > { %v7259_v3 = vpop.f32.mrf.mxu1 }
 0x5f3   : > { %9759 = vmatpush2.bf16.msra.mxu0 %v21297_v63  ;;  %v7260_v53 = vadd.f32 %v7259_v3, %v7217_v33  ;;  %v7268_v4 = vmax.f32 %v7258_v51, 0.0  ;;  %v21362_v63 = vld [vmem:[%s30677_s12 + $0xbac] ss:$48 sps:$4 sm:$0xff]   ;;  %v21371_v3 = vld [vmem:[%s30677_s12 + $0x554] ss:$48 sps:$4 sm:$0xff]  }
 0x5f4   : > { %v7261_v46 = vpop.f32.mrf.mxu1  ;;  %9760 = vmatprep.subr.bf16.mxu0 %v21305_v23  ;;  %v21363_v23 = vld [vmem:[%s30677_s12 + $0x5b0] ss:$48 sps:$4 sm:$0xff]   ;;  %v21366_v33 = vld [vmem:[%s30677_s12 + $0xb48] ss:$48 sps:$4 sm:$0xff]  }
 0x5f5   : > { %v7262_v44 = vadd.f32 %v7261_v46, %v7219_v37  ;;  %v7269_v54 = vmax.f32 %v7260_v53, 0.0  ;;  %v21369_v37 = vld [vmem:[%s30677_s12 + $0x550] ss:$48 sps:$4 sm:$0xff]   ;;  %v21372_v46 = vld [vmem:[%s30677_s12 + $0xae8] ss:$48 sps:$4 sm:$0xff]  }
 0x5f6   : > { %v7263_v56 = vpop.f32.mrf.mxu1  ;;  %v21383_v53 = vld [vmem:[%s30677_s12 + $0x494] ss:$48 sps:$4 sm:$0xff]   ;;  %v21381_v51 = vld [vmem:[%s30677_s12 + $0x490] ss:$48 sps:$4 sm:$0xff]  }
 0x5f7   : > { %v7264_v31 = vadd.f32 %v7263_v56, %v7221_v52  ;;  %9761 = vmatpush2.bf16.msra.mxu0 %v21303_v50  ;;  %v7272_v11 = vmax.f32 %v7262_v44, 0.0  ;;  %v21374_v50 = vld [vmem:[%s30677_s12 + $0xaec] ss:$48 sps:$4 sm:$0xff]   ;;  %v21378_v44 = vld [vmem:[%s30677_s12 + $0xa88] ss:$48 sps:$4 sm:$0xff]  }
 0x5f8   : > { %9762 = vmatprep.subr.bf16.mxu0 %v21311_v6  ;;  %v21375_v6 = vld [vmem:[%s30677_s12 + $0x4f0] ss:$48 sps:$4 sm:$0xff]   ;;  %v21380_v52 = vld [vmem:[%s30677_s12 + $0xa8c] ss:$48 sps:$4 sm:$0xff]  }
 0x5f9   : > { %v7273_v18 = vmax.f32 %v7264_v31, 0.0  ;;  %v26544_v36 = vpack.c.bf16 %v7272_v11, %v7268_v4  ;;  %v21386_v56 = vld [vmem:[%s30677_s12 + $0xa2c] ss:$48 sps:$4 sm:$0xff]   ;;  %v21389_v31 = vld [vmem:[%s30677_s12 + $0x434] ss:$48 sps:$4 sm:$0xff]  }
 0x5fa   : > { %v21387_v11 = vld [vmem:[%s30677_s12 + $0x430] ss:$48 sps:$4 sm:$0xff]  }
 0x5fb   : > { %v26539_v5 = vpack.c.bf16 %v7273_v18, %v7269_v54  ;;  %9763 = vmatpush2.bf16.msra.mxu0 %v21309_v35  ;;  %v21384_v35 = vld [vmem:[%s30677_s12 + $0xa28] ss:$48 sps:$4 sm:$0xff]   ;;  %v21395_v54 = vld [vmem:[%s30677_s12 + $0x3d4] ss:$48 sps:$4 sm:$0xff]   ;;  %v21393_v4 = vld [vmem:[%s30677_s12 + $0x3d0] ss:$48 sps:$4 sm:$0xff]  }
 0x5fc   : > { %9818 = vmatprep.subr.bf16.mxu0 %v21317_v57  ;;  %v21392_v57 = vld [vmem:[%s30677_s12 + $0x9cc] ss:$48 sps:$4 sm:$0xff]   ;;  %v21390_v18 = vld [vmem:[%s30677_s12 + $0x9c8] ss:$48 sps:$4 sm:$0xff]  }
 0x5fd   : > { %9721 = vmatprep.mubr.bf16.mxu1 %v26539_v5 }
 0x5fe   : > { %9722 = vmatmul.mubr.bf16.vlgmr.msra.gmra.mxu1 %v26544_v36  ;;  %9765 = vmatmul.mubr.bf16.vlgmr.msra.gmra.mxu0 %v26437_v60 }
 0x5ff   : > { %9776 = vmatpush1.bf16.msra.mxu1 %v21312_v21  ;;  %9807 = vmatprep.mubr.bf16.mxu1 %v26539_v5  ;;  %v21398_v21 = vld [vmem:[%s30677_s12 + $0x96c] ss:$48 sps:$4 sm:$0xff]  }
 0x600   : > { %9819 = vmatpush1.bf16.msra.mxu0 %v21315_v25  ;;  %9850 = vmatprep.mubr.bf16.mxu0 %v26432_v16  ;;  %v21401_v25 = vld [vmem:[%s30677_s12 + $0x374] ss:$48 sps:$4 sm:$0xff]  }
 0x601   : > { %9777 = vmatprep.subr.bf16.mxu1 %v21320_v61  ;;  %9820 = vmatprep.subr.bf16.mxu0 %v21323_v17  ;;  %v21396_v61 = vld [vmem:[%s30677_s12 + $0x968] ss:$48 sps:$4 sm:$0xff]   ;;  %v21399_v17 = vld [vmem:[%s30677_s12 + $0x370] ss:$48 sps:$4 sm:$0xff]  }
 0x603   : > { %9778 = vmatpush1.bf16.msra.mxu1 %v21318_v15  ;;  %v21404_v15 = vld [vmem:[%s30677_s12 + $0x90c] ss:$48 sps:$4 sm:$0xff]  }
 0x604   : > { %9821 = vmatpush1.bf16.msra.mxu0 %v21321_v59  ;;  %9779 = vmatprep.subr.bf16.mxu1 %v21326_v20  ;;  %v21407_v59 = vld [vmem:[%s30677_s12 + $0x314] ss:$48 sps:$4 sm:$0xff]   ;;  %v21402_v20 = vld [vmem:[%s30677_s12 + $0x908] ss:$48 sps:$4 sm:$0xff]  }
 0x605   : > { %9822 = vmatprep.subr.bf16.mxu0 %v21329_v27  ;;  %v21405_v27 = vld [vmem:[%s30677_s12 + $0x310] ss:$48 sps:$4 sm:$0xff]  }
 0x607   : > { %9780 = vmatpush1.bf16.msra.mxu1 %v21324_v28  ;;  %v21410_v28 = vld [vmem:[%s30677_s12 + $0x8b4] ss:$48 sps:$4 sm:$0xff]  }
 0x608   : > { %9823 = vmatpush1.bf16.msra.mxu0 %v21327_v30  ;;  %9781 = vmatprep.subr.bf16.mxu1 %v21332_v40  ;;  %v21413_v30 = vld [vmem:[%s30677_s12 + $0x2bc] ss:$48 sps:$4 sm:$0xff]   ;;  %v21408_v40 = vld [vmem:[%s30677_s12 + $0x8b0] ss:$48 sps:$4 sm:$0xff]  }
 0x609   : > { %9824 = vmatprep.subr.bf16.mxu0 %v21335_v58  ;;  %v21411_v58 = vld [vmem:[%s30677_s12 + $0x2b8] ss:$48 sps:$4 sm:$0xff]  }
 0x60b   : > { %9782 = vmatpush1.bf16.msra.mxu1 %v21330_v39  ;;  %v21416_v39 = vld [vmem:[%s30677_s12 + $0x854] ss:$48 sps:$4 sm:$0xff]  }
 0x60c   : > { %9825 = vmatpush1.bf16.msra.mxu0 %v21333_v19  ;;  %9783 = vmatprep.subr.bf16.mxu1 %v21338_v55  ;;  %v21419_v19 = vld [vmem:[%s30677_s12 + $0x25c] ss:$48 sps:$4 sm:$0xff]   ;;  %v21414_v55 = vld [vmem:[%s30677_s12 + $0x850] ss:$48 sps:$4 sm:$0xff]  }
 0x60d   : > { %9826 = vmatprep.subr.bf16.mxu0 %v21341_v34  ;;  %v21417_v34 = vld [vmem:[%s30677_s12 + $0x258] ss:$48 sps:$4 sm:$0xff]  }
 0x60f   : > { %9784 = vmatpush1.bf16.msra.mxu1 %v21336_v0  ;;  %v21422_v0 = vld [vmem:[%s30677_s12 + $0x7f4] ss:$48 sps:$4 sm:$0xff]  }
 0x610   : > { %9827 = vmatpush1.bf16.msra.mxu0 %v21339_v43  ;;  %9785 = vmatprep.subr.bf16.mxu1 %v21344_v38  ;;  %v21425_v43 = vld [vmem:[%s30677_s12 + $0x1fc] ss:$48 sps:$4 sm:$0xff]   ;;  %v21420_v38 = vld [vmem:[%s30677_s12 + $0x7f0] ss:$48 sps:$4 sm:$0xff]  }
 0x611   : > { %9828 = vmatprep.subr.bf16.mxu0 %v21347_v26  ;;  %v21423_v26 = vld [vmem:[%s30677_s12 + $0x1f8] ss:$48 sps:$4 sm:$0xff]  }
 0x613   : > { %9786 = vmatpush1.bf16.msra.mxu1 %v21342_v42  ;;  %v21428_v42 = vld [vmem:[%s30677_s12 + $0x794] ss:$48 sps:$4 sm:$0xff]  }
 0x614   : > { %9829 = vmatpush1.bf16.msra.mxu0 %v21345_v41  ;;  %9787 = vmatprep.subr.bf16.mxu1 %v21350_v1  ;;  %v21431_v41 = vld [vmem:[%s30677_s12 + $0x19c] ss:$48 sps:$4 sm:$0xff]   ;;  %v21426_v1 = vld [vmem:[%s30677_s12 + $0x790] ss:$48 sps:$4 sm:$0xff]  }
 0x615   : > { %9830 = vmatprep.subr.bf16.mxu0 %v21353_v22  ;;  %v21429_v22 = vld [vmem:[%s30677_s12 + $0x198] ss:$48 sps:$4 sm:$0xff]  }
 0x617   : > { %9788 = vmatpush1.bf16.msra.mxu1 %v21348_v47  ;;  %v21434_v47 = vld [vmem:[%s30677_s12 + $0x734] ss:$48 sps:$4 sm:$0xff]  }
 0x618   : > { %9831 = vmatpush1.bf16.msra.mxu0 %v21351_v29  ;;  %9789 = vmatprep.subr.bf16.mxu1 %v21356_v45  ;;  %v21437_v29 = vld [vmem:[%s30677_s12 + $0x13c] ss:$48 sps:$4 sm:$0xff]   ;;  %v21432_v45 = vld [vmem:[%s30677_s12 + $0x730] ss:$48 sps:$4 sm:$0xff]  }
 0x619   : > { %9832 = vmatprep.subr.bf16.mxu0 %v21359_v48  ;;  %v21435_v48 = vld [vmem:[%s30677_s12 + $0x138] ss:$48 sps:$4 sm:$0xff]  }
 0x61b   : > { %9790 = vmatpush1.bf16.msra.mxu1 %v21354_v49  ;;  %v21440_v49 = vld [vmem:[%s30677_s12 + $0x6d4] ss:$48 sps:$4 sm:$0xff]  }
 0x61c   : > { %9833 = vmatpush1.bf16.msra.mxu0 %v21357_v13  ;;  %9791 = vmatprep.subr.bf16.mxu1 %v21362_v63  ;;  %v21443_v13 = vld [vmem:[%s30677_s12 + $0xdc] ss:$48 sps:$4 sm:$0xff]   ;;  %v21438_v63 = vld [vmem:[%s30677_s12 + $0x6d0] ss:$48 sps:$4 sm:$0xff]  }
 0x61d   : > { %9834 = vmatprep.subr.bf16.mxu0 %v21365_v32  ;;  %v21441_v32 = vld [vmem:[%s30677_s12 + $0xd8] ss:$48 sps:$4 sm:$0xff]  }
 0x61f   : > { %9792 = vmatpush2.bf16.msra.mxu1 %v21360_v62  ;;  %v21446_v62 = vld [vmem:[%s30677_s12 + $0x674] ss:$48 sps:$4 sm:$0xff]  }
 0x620   : > { %9835 = vmatpush2.bf16.msra.mxu0 %v21363_v23  ;;  %9793 = vmatprep.subr.bf16.mxu1 %v21368_v2  ;;  %v21449_v23 = vld [vmem:[%s30677_s12 + $0x7c] ss:$48 sps:$4 sm:$0xff]   ;;  %v21444_v2 = vld [vmem:[%s30677_s12 + $0x670] ss:$48 sps:$4 sm:$0xff]  }
 0x621   : > { %9836 = vmatprep.subr.bf16.mxu0 %v21371_v3  ;;  %v21447_v3 = vld [vmem:[%s30677_s12 + $0x78] ss:$48 sps:$4 sm:$0xff]  }
 0x623   : > { %9794 = vmatpush2.bf16.msra.mxu1 %v21366_v33  ;;  %v21452_v33 = vld [vmem:[%s30677_s12 + $0x614] ss:$48 sps:$4 sm:$0xff]  }
 0x624   : > { %9837 = vmatpush2.bf16.msra.mxu0 %v21369_v37  ;;  %9795 = vmatprep.subr.bf16.mxu1 %v21374_v50  ;;  %v21455_v37 = vld [vmem:[%s30677_s12 + $0x1c] ss:$48 sps:$4 sm:$0xff]   ;;  %v21450_v50 = vld [vmem:[%s30677_s12 + $0x610] ss:$48 sps:$4 sm:$0xff]  }
 0x625   : > { %9838 = vmatprep.subr.bf16.mxu0 %v21377_v24  ;;  %v21453_v24 = vld [vmem:[%s30677_s12 + $0x18] ss:$48 sps:$4 sm:$0xff]  }
 0x627   : > { %9796 = vmatpush2.bf16.msra.mxu1 %v21372_v46  ;;  %v21458_v46 = vld [vmem:[%s30677_s12 + $0xbb4] ss:$48 sps:$4 sm:$0xff]  }
 0x628   : > { %9839 = vmatpush2.bf16.msra.mxu0 %v21375_v6  ;;  %9797 = vmatprep.subr.bf16.mxu1 %v21380_v52  ;;  %v21461_v6 = vld [vmem:[%s30677_s12 + $0x5bc] ss:$48 sps:$4 sm:$0xff]   ;;  %v21456_v52 = vld [vmem:[%s30677_s12 + $0xbb0] ss:$48 sps:$4 sm:$0xff]  }
 0x629   : > { %9840 = vmatprep.subr.bf16.mxu0 %v21383_v53  ;;  %v21459_v53 = vld [vmem:[%s30677_s12 + $0x5b8] ss:$48 sps:$4 sm:$0xff]  }
 0x62b   : > { %9798 = vmatpush2.bf16.msra.mxu1 %v21378_v44  ;;  %v21464_v44 = vld [vmem:[%s30677_s12 + $0xb54] ss:$48 sps:$4 sm:$0xff]  }
 0x62c   : > { %9841 = vmatpush2.bf16.msra.mxu0 %v21381_v51  ;;  %9799 = vmatprep.subr.bf16.mxu1 %v21386_v56  ;;  %v21467_v51 = vld [vmem:[%s30677_s12 + $0x55c] ss:$48 sps:$4 sm:$0xff]   ;;  %v21462_v56 = vld [vmem:[%s30677_s12 + $0xb50] ss:$48 sps:$4 sm:$0xff]  }
 0x62d   : > { %9842 = vmatprep.subr.bf16.mxu0 %v21389_v31  ;;  %v21465_v31 = vld [vmem:[%s30677_s12 + $0x558] ss:$48 sps:$4 sm:$0xff]  }
 0x62f   : > { %9800 = vmatpush2.bf16.msra.mxu1 %v21384_v35  ;;  %v21470_v35 = vld [vmem:[%s30677_s12 + $0xaf4] ss:$48 sps:$4 sm:$0xff]  }
 0x630   : > { %9843 = vmatpush2.bf16.msra.mxu0 %v21387_v11  ;;  %9801 = vmatprep.subr.bf16.mxu1 %v21392_v57  ;;  %v21473_v11 = vld [vmem:[%s30677_s12 + $0x4fc] ss:$48 sps:$4 sm:$0xff]   ;;  %v21468_v57 = vld [vmem:[%s30677_s12 + $0xaf0] ss:$48 sps:$4 sm:$0xff]  }
 0x631   : > { %9844 = vmatprep.subr.bf16.mxu0 %v21395_v54  ;;  %v21471_v54 = vld [vmem:[%s30677_s12 + $0x4f8] ss:$48 sps:$4 sm:$0xff]  }
 0x633   : > { %9802 = vmatpush2.bf16.msra.mxu1 %v21390_v18  ;;  %v21476_v18 = vld [vmem:[%s30677_s12 + $0xa94] ss:$48 sps:$4 sm:$0xff]  }
 0x634   : > { %9845 = vmatpush2.bf16.msra.mxu0 %v21393_v4  ;;  %9803 = vmatprep.subr.bf16.mxu1 %v21398_v21  ;;  %v21479_v4 = vld [vmem:[%s30677_s12 + $0x49c] ss:$48 sps:$4 sm:$0xff]   ;;  %v21474_v21 = vld [vmem:[%s30677_s12 + $0xa90] ss:$48 sps:$4 sm:$0xff]  }
 0x635   : > { %9846 = vmatprep.subr.bf16.mxu0 %v21401_v25  ;;  %v21477_v25 = vld [vmem:[%s30677_s12 + $0x498] ss:$48 sps:$4 sm:$0xff]  }
 0x637   : > { %9804 = vmatpush2.bf16.msra.mxu1 %v21396_v61  ;;  %v21482_v61 = vld [vmem:[%s30677_s12 + $0xa34] ss:$48 sps:$4 sm:$0xff]  }
 0x638   : > { %9847 = vmatpush2.bf16.msra.mxu0 %v21399_v17  ;;  %9805 = vmatprep.subr.bf16.mxu1 %v21404_v15  ;;  %v21485_v17 = vld [vmem:[%s30677_s12 + $0x43c] ss:$48 sps:$4 sm:$0xff]   ;;  %v21480_v15 = vld [vmem:[%s30677_s12 + $0xa30] ss:$48 sps:$4 sm:$0xff]  }
 0x639   : > { %9848 = vmatprep.subr.bf16.mxu0 %v21407_v59  ;;  %v21483_v59 = vld [vmem:[%s30677_s12 + $0x438] ss:$48 sps:$4 sm:$0xff]  }
 0x63b   : > { %9806 = vmatpush2.bf16.msra.mxu1 %v21402_v20  ;;  %v21488_v20 = vld [vmem:[%s30677_s12 + $0x9d4] ss:$48 sps:$4 sm:$0xff]  }
 0x63c   : > { %9849 = vmatpush2.bf16.msra.mxu0 %v21405_v27  ;;  %9861 = vmatprep.subr.bf16.mxu1 %v21410_v28  ;;  %v21491_v27 = vld [vmem:[%s30677_s12 + $0x3dc] ss:$48 sps:$4 sm:$0xff]   ;;  %v21486_v28 = vld [vmem:[%s30677_s12 + $0x9d0] ss:$48 sps:$4 sm:$0xff]  }
 0x63d   : > { %9904 = vmatprep.subr.bf16.mxu0 %v21413_v30  ;;  %v21489_v30 = vld [vmem:[%s30677_s12 + $0x3d8] ss:$48 sps:$4 sm:$0xff]  }
 0x63e   : > { %9808 = vmatmul.mubr.bf16.vlgmr.msra.gmra.mxu1 %v26544_v36 }
 0x63f   : > { %9851 = vmatmul.mubr.bf16.vlgmr.msra.gmra.mxu0 %v26437_v60  ;;  %9862 = vmatpush1.bf16.msra.mxu1 %v21408_v40  ;;  %v21494_v40 = vld [vmem:[%s30677_s12 + $0x974] ss:$48 sps:$4 sm:$0xff]  }
 0x640   : > { %9893 = vmatprep.mubr.bf16.mxu1 %v26539_v5  ;;  %9905 = vmatpush1.bf16.msra.mxu0 %v21411_v58  ;;  %v21497_v58 = vld [vmem:[%s30677_s12 + $0x37c] ss:$48 sps:$4 sm:$0xff]  }
 0x641   : > { %9936 = vmatprep.mubr.bf16.mxu0 %v26432_v16  ;;  %9863 = vmatprep.subr.bf16.mxu1 %v21416_v39  ;;  %v21492_v39 = vld [vmem:[%s30677_s12 + $0x970] ss:$48 sps:$4 sm:$0xff]  }
 0x642   : > { %9906 = vmatprep.subr.bf16.mxu0 %v21419_v19  ;;  %v21495_v19 = vld [vmem:[%s30677_s12 + $0x378] ss:$48 sps:$4 sm:$0xff]  }
 0x643   : > { %9864 = vmatpush1.bf16.msra.mxu1 %v21414_v55  ;;  %v21500_v55 = vld [vmem:[%s30677_s12 + $0x914] ss:$48 sps:$4 sm:$0xff]  }
 0x644   : > { %9907 = vmatpush1.bf16.msra.mxu0 %v21417_v34  ;;  %9865 = vmatprep.subr.bf16.mxu1 %v21422_v0  ;;  %v21503_v34 = vld [vmem:[%s30677_s12 + $0x31c] ss:$48 sps:$4 sm:$0xff]   ;;  %v21498_v0 = vld [vmem:[%s30677_s12 + $0x910] ss:$48 sps:$4 sm:$0xff]  }
 0x645   : > { %9908 = vmatprep.subr.bf16.mxu0 %v21425_v43  ;;  %v21501_v43 = vld [vmem:[%s30677_s12 + $0x318] ss:$48 sps:$4 sm:$0xff]  }
 0x647   : > { %9866 = vmatpush1.bf16.msra.mxu1 %v21420_v38  ;;  %v21506_v38 = vld [vmem:[%s30677_s12 + $0x8bc] ss:$48 sps:$4 sm:$0xff]  }
 0x648   : > { %9909 = vmatpush1.bf16.msra.mxu0 %v21423_v26  ;;  %9867 = vmatprep.subr.bf16.mxu1 %v21428_v42  ;;  %v21509_v26 = vld [vmem:[%s30677_s12 + $0x2c4] ss:$48 sps:$4 sm:$0xff]   ;;  %v21504_v42 = vld [vmem:[%s30677_s12 + $0x8b8] ss:$48 sps:$4 sm:$0xff]  }
 0x649   : > { %9910 = vmatprep.subr.bf16.mxu0 %v21431_v41  ;;  %v21507_v41 = vld [vmem:[%s30677_s12 + $0x2c0] ss:$48 sps:$4 sm:$0xff]  }
 0x64b   : > { %9868 = vmatpush1.bf16.msra.mxu1 %v21426_v1  ;;  %v21512_v1 = vld [vmem:[%s30677_s12 + $0x85c] ss:$48 sps:$4 sm:$0xff]  }
 0x64c   : > { %9911 = vmatpush1.bf16.msra.mxu0 %v21429_v22  ;;  %9869 = vmatprep.subr.bf16.mxu1 %v21434_v47  ;;  %v21515_v22 = vld [vmem:[%s30677_s12 + $0x264] ss:$48 sps:$4 sm:$0xff]   ;;  %v21510_v47 = vld [vmem:[%s30677_s12 + $0x858] ss:$48 sps:$4 sm:$0xff]  }
 0x64d   : > { %9912 = vmatprep.subr.bf16.mxu0 %v21437_v29  ;;  %v21513_v29 = vld [vmem:[%s30677_s12 + $0x260] ss:$48 sps:$4 sm:$0xff]  }
 0x64f   : > { %9870 = vmatpush1.bf16.msra.mxu1 %v21432_v45  ;;  %v21518_v45 = vld [vmem:[%s30677_s12 + $0x7fc] ss:$48 sps:$4 sm:$0xff]  }
 0x650   : > { %9913 = vmatpush1.bf16.msra.mxu0 %v21435_v48  ;;  %9871 = vmatprep.subr.bf16.mxu1 %v21440_v49  ;;  %v21521_v48 = vld [vmem:[%s30677_s12 + $0x204] ss:$48 sps:$4 sm:$0xff]   ;;  %v21516_v49 = vld [vmem:[%s30677_s12 + $0x7f8] ss:$48 sps:$4 sm:$0xff]  }
 0x651   : > { %9914 = vmatprep.subr.bf16.mxu0 %v21443_v13  ;;  %v21519_v13 = vld [vmem:[%s30677_s12 + $0x200] ss:$48 sps:$4 sm:$0xff]  }
 0x653   : > { %9872 = vmatpush1.bf16.msra.mxu1 %v21438_v63  ;;  %v21524_v63 = vld [vmem:[%s30677_s12 + $0x79c] ss:$48 sps:$4 sm:$0xff]  }
 0x654   : > { %9915 = vmatpush1.bf16.msra.mxu0 %v21441_v32  ;;  %9873 = vmatprep.subr.bf16.mxu1 %v21446_v62  ;;  %v21527_v32 = vld [vmem:[%s30677_s12 + $0x1a4] ss:$48 sps:$4 sm:$0xff]   ;;  %v21522_v62 = vld [vmem:[%s30677_s12 + $0x798] ss:$48 sps:$4 sm:$0xff]  }
 0x655   : > { %9916 = vmatprep.subr.bf16.mxu0 %v21449_v23  ;;  %v21525_v23 = vld [vmem:[%s30677_s12 + $0x1a0] ss:$48 sps:$4 sm:$0xff]  }
 0x657   : > { %9874 = vmatpush1.bf16.msra.mxu1 %v21444_v2  ;;  %v21530_v2 = vld [vmem:[%s30677_s12 + $0x73c] ss:$48 sps:$4 sm:$0xff]  }
 0x658   : > { %9917 = vmatpush1.bf16.msra.mxu0 %v21447_v3  ;;  %9875 = vmatprep.subr.bf16.mxu1 %v21452_v33  ;;  %v21533_v3 = vld [vmem:[%s30677_s12 + $0x144] ss:$48 sps:$4 sm:$0xff]   ;;  %v21528_v33 = vld [vmem:[%s30677_s12 + $0x738] ss:$48 sps:$4 sm:$0xff]  }
 0x659   : > { %9918 = vmatprep.subr.bf16.mxu0 %v21455_v37  ;;  %v21531_v37 = vld [vmem:[%s30677_s12 + $0x140] ss:$48 sps:$4 sm:$0xff]  }
 0x65b   : > { %9876 = vmatpush1.bf16.msra.mxu1 %v21450_v50  ;;  %v21536_v50 = vld [vmem:[%s30677_s12 + $0x6dc] ss:$48 sps:$4 sm:$0xff]  }
 0x65c   : > { %9919 = vmatpush1.bf16.msra.mxu0 %v21453_v24  ;;  %9877 = vmatprep.subr.bf16.mxu1 %v21458_v46  ;;  %v21539_v24 = vld [vmem:[%s30677_s12 + $0xe4] ss:$48 sps:$4 sm:$0xff]   ;;  %v21534_v46 = vld [vmem:[%s30677_s12 + $0x6d8] ss:$48 sps:$4 sm:$0xff]  }
 0x65d   : > { %9920 = vmatprep.subr.bf16.mxu0 %v21461_v6  ;;  %v21537_v6 = vld [vmem:[%s30677_s12 + $0xe0] ss:$48 sps:$4 sm:$0xff]  }
 0x65f   : > { %9878 = vmatpush2.bf16.msra.mxu1 %v21456_v52  ;;  %v21542_v52 = vld [vmem:[%s30677_s12 + $0x67c] ss:$48 sps:$4 sm:$0xff]  }
 0x660   : > { %9921 = vmatpush2.bf16.msra.mxu0 %v21459_v53  ;;  %9879 = vmatprep.subr.bf16.mxu1 %v21464_v44  ;;  %v21545_v53 = vld [vmem:[%s30677_s12 + $0x84] ss:$48 sps:$4 sm:$0xff]   ;;  %v21540_v44 = vld [vmem:[%s30677_s12 + $0x678] ss:$48 sps:$4 sm:$0xff]  }
 0x661   : > { %9922 = vmatprep.subr.bf16.mxu0 %v21467_v51  ;;  %v21543_v51 = vld [vmem:[%s30677_s12 + $0x80] ss:$48 sps:$4 sm:$0xff]  }
 0x663   : > { %9880 = vmatpush2.bf16.msra.mxu1 %v21462_v56  ;;  %v21548_v56 = vld [vmem:[%s30677_s12 + $0x61c] ss:$48 sps:$4 sm:$0xff]  }
 0x664   : > { %9923 = vmatpush2.bf16.msra.mxu0 %v21465_v31  ;;  %9881 = vmatprep.subr.bf16.mxu1 %v21470_v35  ;;  %v21551_v31 = vld [vmem:[%s30677_s12 + $0x24] ss:$48 sps:$4 sm:$0xff]   ;;  %v21546_v35 = vld [vmem:[%s30677_s12 + $0x618] ss:$48 sps:$4 sm:$0xff]  }
 0x665   : > { %9924 = vmatprep.subr.bf16.mxu0 %v21473_v11  ;;  %v21549_v11 = vld [vmem:[%s30677_s12 + $0x20] ss:$48 sps:$4 sm:$0xff]  }
 0x667   : > { %9882 = vmatpush2.bf16.msra.mxu1 %v21468_v57  ;;  %v21554_v57 = vld [vmem:[%s30677_s12 + $0xbbc] ss:$48 sps:$4 sm:$0xff]  }
 0x668   : > { %9925 = vmatpush2.bf16.msra.mxu0 %v21471_v54  ;;  %9883 = vmatprep.subr.bf16.mxu1 %v21476_v18  ;;  %v21557_v54 = vld [vmem:[%s30677_s12 + $0x5c4] ss:$48 sps:$4 sm:$0xff]   ;;  %v21552_v18 = vld [vmem:[%s30677_s12 + $0xbb8] ss:$48 sps:$4 sm:$0xff]  }
 0x669   : > { %9926 = vmatprep.subr.bf16.mxu0 %v21479_v4  ;;  %v21555_v4 = vld [vmem:[%s30677_s12 + $0x5c0] ss:$48 sps:$4 sm:$0xff]  }
 0x66b   : > { %9884 = vmatpush2.bf16.msra.mxu1 %v21474_v21  ;;  %v21560_v21 = vld [vmem:[%s30677_s12 + $0xb5c] ss:$48 sps:$4 sm:$0xff]  }
 0x66c   : > { %9927 = vmatpush2.bf16.msra.mxu0 %v21477_v25  ;;  %9885 = vmatprep.subr.bf16.mxu1 %v21482_v61  ;;  %v21563_v25 = vld [vmem:[%s30677_s12 + $0x564] ss:$48 sps:$4 sm:$0xff]   ;;  %v21558_v61 = vld [vmem:[%s30677_s12 + $0xb58] ss:$48 sps:$4 sm:$0xff]  }
 0x66d   : > { %9928 = vmatprep.subr.bf16.mxu0 %v21485_v17  ;;  %v21561_v17 = vld [vmem:[%s30677_s12 + $0x560] ss:$48 sps:$4 sm:$0xff]  }
 0x66f   : > { %9886 = vmatpush2.bf16.msra.mxu1 %v21480_v15  ;;  %v21566_v15 = vld [vmem:[%s30677_s12 + $0xafc] ss:$48 sps:$4 sm:$0xff]  }
 0x670   : > { %9929 = vmatpush2.bf16.msra.mxu0 %v21483_v59  ;;  %9887 = vmatprep.subr.bf16.mxu1 %v21488_v20  ;;  %v21569_v59 = vld [vmem:[%s30677_s12 + $0x504] ss:$48 sps:$4 sm:$0xff]   ;;  %v21564_v20 = vld [vmem:[%s30677_s12 + $0xaf8] ss:$48 sps:$4 sm:$0xff]  }
 0x671   : > { %9930 = vmatprep.subr.bf16.mxu0 %v21491_v27  ;;  %v21567_v27 = vld [vmem:[%s30677_s12 + $0x500] ss:$48 sps:$4 sm:$0xff]  }
 0x673   : > { %9888 = vmatpush2.bf16.msra.mxu1 %v21486_v28  ;;  %v21572_v28 = vld [vmem:[%s30677_s12 + $0xa9c] ss:$48 sps:$4 sm:$0xff]  }
 0x674   : > { %9931 = vmatpush2.bf16.msra.mxu0 %v21489_v30  ;;  %9889 = vmatprep.subr.bf16.mxu1 %v21494_v40  ;;  %v21575_v30 = vld [vmem:[%s30677_s12 + $0x4a4] ss:$48 sps:$4 sm:$0xff]   ;;  %v21570_v40 = vld [vmem:[%s30677_s12 + $0xa98] ss:$48 sps:$4 sm:$0xff]  }
 0x675   : > { %9932 = vmatprep.subr.bf16.mxu0 %v21497_v58  ;;  %v21573_v58 = vld [vmem:[%s30677_s12 + $0x4a0] ss:$48 sps:$4 sm:$0xff]  }
 0x677   : > { %9890 = vmatpush2.bf16.msra.mxu1 %v21492_v39  ;;  %v21578_v39 = vld [vmem:[%s30677_s12 + $0xa3c] ss:$48 sps:$4 sm:$0xff]  }
 0x678   : > { %9933 = vmatpush2.bf16.msra.mxu0 %v21495_v19  ;;  %9891 = vmatprep.subr.bf16.mxu1 %v21500_v55  ;;  %v21581_v19 = vld [vmem:[%s30677_s12 + $0x444] ss:$48 sps:$4 sm:$0xff]   ;;  %v21576_v55 = vld [vmem:[%s30677_s12 + $0xa38] ss:$48 sps:$4 sm:$0xff]  }
 0x679   : > { %9934 = vmatprep.subr.bf16.mxu0 %v21503_v34  ;;  %v21579_v34 = vld [vmem:[%s30677_s12 + $0x440] ss:$48 sps:$4 sm:$0xff]  }
 0x67b   : > { %9892 = vmatpush2.bf16.msra.mxu1 %v21498_v0  ;;  %v21584_v0 = vld [vmem:[%s30677_s12 + $0x9dc] ss:$48 sps:$4 sm:$0xff]  }
 0x67c   : > { %9935 = vmatpush2.bf16.msra.mxu0 %v21501_v43  ;;  %9947 = vmatprep.subr.bf16.mxu1 %v21506_v38  ;;  %v21587_v43 = vld [vmem:[%s30677_s12 + $0x3e4] ss:$48 sps:$4 sm:$0xff]   ;;  %v21582_v38 = vld [vmem:[%s30677_s12 + $0x9d8] ss:$48 sps:$4 sm:$0xff]  }
 0x67d   : > { %9990 = vmatprep.subr.bf16.mxu0 %v21509_v26  ;;  %v21585_v26 = vld [vmem:[%s30677_s12 + $0x3e0] ss:$48 sps:$4 sm:$0xff]  }
 0x67e   : > { %9894 = vmatmul.mubr.bf16.vlgmr.msra.gmra.mxu1 %v26544_v36 }
 0x67f   : > { %9937 = vmatmul.mubr.bf16.vlgmr.msra.gmra.mxu0 %v26437_v60  ;;  %9948 = vmatpush1.bf16.msra.mxu1 %v21504_v42  ;;  %v21590_v42 = vld [vmem:[%s30677_s12 + $0x97c] ss:$48 sps:$4 sm:$0xff]  }
 0x680   : > { %9979 = vmatprep.mubr.bf16.mxu1 %v26539_v5  ;;  %9991 = vmatpush1.bf16.msra.mxu0 %v21507_v41  ;;  %v21593_v41 = vld [vmem:[%s30677_s12 + $0x384] ss:$48 sps:$4 sm:$0xff]  }
 0x681   : > { %10022 = vmatprep.mubr.bf16.mxu0 %v26432_v16  ;;  %9949 = vmatprep.subr.bf16.mxu1 %v21512_v1  ;;  %v21588_v1 = vld [vmem:[%s30677_s12 + $0x978] ss:$48 sps:$4 sm:$0xff]  }
 0x682   : > { %9992 = vmatprep.subr.bf16.mxu0 %v21515_v22  ;;  %v9680_v22 = vpop.f32.mrf.mxu0 }
 0x683   : > { %9950 = vmatpush1.bf16.msra.mxu1 %v21510_v47  ;;  %v21591_v47 = vld [vmem:[%s30677_s12 + $0x380] ss:$48 sps:$4 sm:$0xff]  }
 0x684   : > { %9993 = vmatpush1.bf16.msra.mxu0 %v21513_v29  ;;  %9951 = vmatprep.subr.bf16.mxu1 %v21518_v45  ;;  %v21596_v29 = vld [vmem:[%s30677_s12 + $0x91c] ss:$48 sps:$4 sm:$0xff]   ;;  %v21599_v45 = vld [vmem:[%s30677_s12 + $0x324] ss:$48 sps:$4 sm:$0xff]  }
 0x685   : > { %9994 = vmatprep.subr.bf16.mxu0 %v21521_v48  ;;  %v27123_v48 = vld [vmem:[%s30678_s13] sm:$0xff] }
 0x687   : > { %9952 = vmatpush1.bf16.msra.mxu1 %v21516_v49  ;;  %v21594_v49 = vld [vmem:[%s30677_s12 + $0x918] ss:$48 sps:$4 sm:$0xff]  }
 0x688   : > { %9995 = vmatpush1.bf16.msra.mxu0 %v21519_v13  ;;  %9953 = vmatprep.subr.bf16.mxu1 %v21524_v63  ;;  %v9682_v13 = vpop.f32.mrf.mxu0  ;;  %v21597_v63 = vld [vmem:[%s30677_s12 + $0x320] ss:$48 sps:$4 sm:$0xff]  }
 0x689   : > { %9996 = vmatprep.subr.bf16.mxu0 %v21527_v32  ;;  %v21602_v32 = vld [vmem:[%s30677_s12 + $0x8c4] ss:$48 sps:$4 sm:$0xff]  }
 0x68b   : > { %9954 = vmatpush1.bf16.msra.mxu1 %v21522_v62  ;;  %v7669_v62 = vrot.slane %v27123_v48, %v23828_v12 }
 0x68c   : > { %9997 = vmatpush1.bf16.msra.mxu0 %v21525_v23  ;;  %9955 = vmatprep.subr.bf16.mxu1 %v21530_v2  ;;  %v21605_v23 = vld [vmem:[%s30677_s12 + $0x2cc] ss:$48 sps:$4 sm:$0xff]   ;;  %v7673_v2 = vrot.slane %v27123_v48, %v23819_v9 }
 0x68d   : > { %9998 = vmatprep.subr.bf16.mxu0 %v21533_v3  ;;  %v21600_v3 = vld [vmem:[%s30677_s12 + $0x8c0] ss:$48 sps:$4 sm:$0xff]  }
 0x68f   : > { %9956 = vmatpush1.bf16.msra.mxu1 %v21528_v33  ;;  %v9684_v33 = vpop.f32.mrf.mxu0 }
 0x690   : > { %9999 = vmatpush1.bf16.msra.mxu0 %v21531_v37  ;;  %9957 = vmatprep.subr.bf16.mxu1 %v21536_v50  ;;  %v21603_v37 = vld [vmem:[%s30677_s12 + $0x2c8] ss:$48 sps:$4 sm:$0xff]   ;;  %v9681_v50 = vadd.f32 %v9680_v22, %v7669_v62 }
 0x691   : > { %10000 = vmatprep.subr.bf16.mxu0 %v21539_v24  ;;  %v21608_v24 = vld [vmem:[%s30677_s12 + $0x864] ss:$48 sps:$4 sm:$0xff]  }
 0x693   : > { %9958 = vmatpush1.bf16.msra.mxu1 %v21534_v46 }
 0x694   : > { %10001 = vmatpush1.bf16.msra.mxu0 %v21537_v6  ;;  %9959 = vmatprep.subr.bf16.mxu1 %v21542_v52  ;;  %v21611_v6 = vld [vmem:[%s30677_s12 + $0x26c] ss:$48 sps:$4 sm:$0xff]   ;;  %v9683_v52 = vadd.f32 %v9682_v13, %v7673_v2  ;;  %v21632_v13 = vld [vmem:[%s30677_s12 + $0x6e4] ss:$48 sps:$4 sm:$0xff]  }
 0x695   : > { %10002 = vmatprep.subr.bf16.mxu0 %v21545_v53 }
 0x697   : > { %9960 = vmatpush1.bf16.msra.mxu1 %v21540_v44  ;;  %v21606_v44 = vld [vmem:[%s30677_s12 + $0x860] ss:$48 sps:$4 sm:$0xff]  }
 0x698   : > { %10003 = vmatpush1.bf16.msra.mxu0 %v21543_v51  ;;  %9961 = vmatprep.subr.bf16.mxu1 %v21548_v56  ;;  %v9686_v51 = vpop.f32.mrf.mxu0 }
 0x699   : > { %10004 = vmatprep.subr.bf16.mxu0 %v21551_v31  ;;  %v21609_v31 = vld [vmem:[%s30677_s12 + $0x268] ss:$48 sps:$4 sm:$0xff]  }
 0x69b   : > { %9962 = vmatpush1.bf16.msra.mxu1 %v21546_v35  ;;  %v21614_v35 = vld [vmem:[%s30677_s12 + $0x804] ss:$48 sps:$4 sm:$0xff]  }
 0x69c   : > { %10005 = vmatpush1.bf16.msra.mxu0 %v21549_v11  ;;  %9963 = vmatprep.subr.bf16.mxu1 %v21554_v57  ;;  %v9685_v11 = vadd.f32 %v9684_v33, %v7669_v62 }
 0x69d   : > { %10006 = vmatprep.subr.bf16.mxu0 %v21557_v54  ;;  %v21617_v54 = vld [vmem:[%s30677_s12 + $0x20c] ss:$48 sps:$4 sm:$0xff]  }
 0x69f   : > { %9964 = vmatpush2.bf16.msra.mxu1 %v21552_v18 }
 0x6a0   : > { %10007 = vmatpush2.bf16.msra.mxu0 %v21555_v4  ;;  %9965 = vmatprep.subr.bf16.mxu1 %v21560_v21  ;;  %v9687_v4 = vadd.f32 %v9686_v51, %v7673_v2  ;;  %v21635_v2 = vld [vmem:[%s30677_s12 + $0xec] ss:$48 sps:$4 sm:$0xff]  }
 0x6a1   : > { %10008 = vmatprep.subr.bf16.mxu0 %v21563_v25 }
 0x6a3   : > { %9966 = vmatpush2.bf16.msra.mxu1 %v21558_v61  ;;  %v21612_v61 = vld [vmem:[%s30677_s12 + $0x800] ss:$48 sps:$4 sm:$0xff]  }
 0x6a4   : > { %10009 = vmatpush2.bf16.msra.mxu0 %v21561_v17  ;;  %9967 = vmatprep.subr.bf16.mxu1 %v21566_v15 }
 0x6a5   : > { %10010 = vmatprep.subr.bf16.mxu0 %v21569_v59  ;;  %v21620_v59 = vld [vmem:[%s30677_s12 + $0x7a4] ss:$48 sps:$4 sm:$0xff]  }
 0x6a7   : > { %9968 = vmatpush2.bf16.msra.mxu1 %v21564_v20 }
 0x6a8   : > { %10011 = vmatpush2.bf16.msra.mxu0 %v21567_v27  ;;  %9969 = vmatprep.subr.bf16.mxu1 %v21572_v28  ;;  %v21623_v28 = vld [vmem:[%s30677_s12 + $0x1ac] ss:$48 sps:$4 sm:$0xff]  }
 0x6a9   : > { %10012 = vmatprep.subr.bf16.mxu0 %v21575_v30 }
 0x6ab   : > { %9970 = vmatpush2.bf16.msra.mxu1 %v21570_v40 }
 0x6ac   : > { %10013 = vmatpush2.bf16.msra.mxu0 %v21573_v58  ;;  %9971 = vmatprep.subr.bf16.mxu1 %v21578_v39 }
 0x6ad   : > { %10014 = vmatprep.subr.bf16.mxu0 %v21581_v19  ;;  %v21618_v19 = vld [vmem:[%s30677_s12 + $0x7a0] ss:$48 sps:$4 sm:$0xff]  }
 0x6af   : > { %9972 = vmatpush2.bf16.msra.mxu1 %v21576_v55 }
 0x6b0   : > { %10015 = vmatpush2.bf16.msra.mxu0 %v21579_v34  ;;  %9973 = vmatprep.subr.bf16.mxu1 %v21584_v0  ;;  %v21621_v34 = vld [vmem:[%s30677_s12 + $0x1a8] ss:$48 sps:$4 sm:$0xff]   ;;  %v21626_v0 = vld [vmem:[%s30677_s12 + $0x744] ss:$48 sps:$4 sm:$0xff]  }
 0x6b1   : > { %10016 = vmatprep.subr.bf16.mxu0 %v21587_v43 }
 0x6b3   : > { %9974 = vmatpush2.bf16.msra.mxu1 %v21582_v38 }
 0x6b4   : > { %10017 = vmatpush2.bf16.msra.mxu0 %v21585_v26  ;;  %9975 = vmatprep.subr.bf16.mxu1 %v21590_v42 }
 0x6b5   : > { %10018 = vmatprep.subr.bf16.mxu0 %v21593_v41  ;;  %v21629_v41 = vld [vmem:[%s30677_s12 + $0x14c] ss:$48 sps:$4 sm:$0xff]  }
 0x6b7   : > { %9976 = vmatpush2.bf16.msra.mxu1 %v21588_v1 }
 0x6b8   : > { %10019 = vmatpush2.bf16.msra.mxu0 %v21591_v47  ;;  %9977 = vmatprep.subr.bf16.mxu1 %v21596_v29 }
 0x6b9   : > { %10020 = vmatprep.subr.bf16.mxu0 %v21599_v45  ;;  %v21624_v45 = vld [vmem:[%s30677_s12 + $0x740] ss:$48 sps:$4 sm:$0xff]  }
 0x6bb   : > { %9978 = vmatpush2.bf16.msra.mxu1 %v21594_v49  ;;  %v21627_v49 = vld [vmem:[%s30677_s12 + $0x148] ss:$48 sps:$4 sm:$0xff]  }
 0x6bc   : > { %10021 = vmatpush2.bf16.msra.mxu0 %v21597_v63  ;;  %10033 = vmatprep.subr.bf16.mxu1 %v21602_v32 }
 0x6bd   : > { %10076 = vmatprep.subr.bf16.mxu0 %v21605_v23 }
 0x6be   : > { %9980 = vmatmul.mubr.bf16.vlgmr.msra.gmra.mxu1 %v26544_v36  ;;  %v9723_v46 = vpop.f32.mrf.mxu1 }
 0x6bf   : > { %v9724_v53 = vadd.f32 %v9723_v46, %v9681_v50  ;;  %10023 = vmatmul.mubr.bf16.vlgmr.msra.gmra.mxu0 %v26437_v60  ;;  %10034 = vmatpush1.bf16.msra.mxu1 %v21600_v3  ;;  %v21633_v46 = vld [vmem:[%s30677_s12 + $0xe8] ss:$48 sps:$4 sm:$0xff]  }
 0x6c0   : > { %10065 = vmatprep.mubr.bf16.mxu1 %v26539_v5  ;;  %10077 = vmatpush1.bf16.msra.mxu0 %v21603_v37  ;;  %v9725_v56 = vpop.f32.mrf.mxu1 }
 0x6c1   : > { %10108 = vmatprep.mubr.bf16.mxu0 %v26432_v16  ;;  %v9726_v57 = vadd.f32 %v9725_v56, %v9683_v52  ;;  %10035 = vmatprep.subr.bf16.mxu1 %v21608_v24  ;;  %v10162_v21 = vmax.f32 %v9724_v53, 0.0  ;;  %v21615_v16 = vld [vmem:[%s30677_s12 + $0x208] ss:$48 sps:$4 sm:$0xff]   ;;  %v21630_v24 = vld [vmem:[%s30677_s12 + $0x6e0] ss:$48 sps:$4 sm:$0xff]  }
 0x6c2   : > { %v9727_v18 = vpop.f32.mrf.mxu1  ;;  %10078 = vmatprep.subr.bf16.mxu0 %v21611_v6  ;;  %v21638_v6 = vld [vmem:[%s30677_s12 + $0x684] ss:$48 sps:$4 sm:$0xff]   ;;  %v21641_v56 = vld [vmem:[%s30677_s12 + $0x8c] ss:$48 sps:$4 sm:$0xff]  }
 0x6c3   : > { %v9728_v25 = vadd.f32 %v9727_v18, %v9685_v11  ;;  %10036 = vmatpush1.bf16.msra.mxu1 %v21606_v44  ;;  %v10163_v17 = vmax.f32 %v9726_v57, 0.0  ;;  %v10270_v30 = vmul.f32 %v10162_v21, %v10162_v21  ;;  %v21636_v57 = vld [vmem:[%s30677_s12 + $0x680] ss:$48 sps:$4 sm:$0xff]   ;;  %v21644_v18 = vld [vmem:[%s30677_s12 + $0x624] ss:$48 sps:$4 sm:$0xff]  }
 0x6c4   : > { %10079 = vmatpush1.bf16.msra.mxu0 %v21609_v31  ;;  %v9729_v15 = vpop.f32.mrf.mxu1  ;;  %10037 = vmatprep.subr.bf16.mxu1 %v21614_v35 }
 0x6c5   : > { %v10174_v20 = vmax.f32 %v9728_v25, 0.0  ;;  %v9730_v27 = vadd.f32 %v9729_v15, %v9687_v4  ;;  %10080 = vmatprep.subr.bf16.mxu0 %v21617_v54  ;;  %v10271_v55 = vmul.f32 %v10163_v17, %v10163_v17  ;;  %v21639_v54 = vld [vmem:[%s30677_s12 + $0x88] ss:$48 sps:$4 sm:$0xff]  }
 0x6c7   : > { %v10186_v40 = vadd.f32 %v10174_v20, %v10162_v21  ;;  %v10282_v58 = vmul.f32 %v10174_v20, %v10174_v20  ;;  %v10175_v39 = vmax.f32 %v9730_v27, 0.0  ;;  %10038 = vmatpush1.bf16.msra.mxu1 %v21612_v61  ;;  %v21647_v61 = vld [vmem:[%s30677_s12 + $0x2c] ss:$48 sps:$4 sm:$0xff]   ;;  %v21645_v20 = vld [vmem:[%s30677_s12 + $0x28] ss:$48 sps:$4 sm:$0xff]  }
 0x6c8   : > { %10081 = vmatpush1.bf16.msra.mxu0 %v21615_v16  ;;  %10039 = vmatprep.subr.bf16.mxu1 %v21620_v59  ;;  %v21642_v59 = vld [vmem:[%s30677_s12 + $0x620] ss:$48 sps:$4 sm:$0xff]   ;;  %v21650_v27 = vld [vmem:[%s30677_s12 + $0xbc4] ss:$48 sps:$4 sm:$0xff]  }
 0x6c9   : > { %v10187_v43 = vrot.slane %v10186_v40, 4  ;;  %v10294_v38 = vadd.f32 %v10282_v58, %v10270_v30  ;;  %v10193_v26 = vadd.f32 %v10175_v39, %v10163_v17  ;;  %v10283_v42 = vmul.f32 %v10175_v39, %v10175_v39  ;;  %10082 = vmatprep.subr.bf16.mxu0 %v21623_v28  ;;  %v21653_v58 = vld [vmem:[%s30677_s12 + $0x5cc] ss:$48 sps:$4 sm:$0xff]  }
 0x6cb   : > { %v10188_v1 = vadd.f32 %v10187_v43, %v10186_v40  ;;  %v10295_v22 = vrot.slane %v10294_v38, 4  ;;  %v10194_v47 = vrot.slane %v10193_v26, 4  ;;  %v10301_v29 = vadd.f32 %v10283_v42, %v10271_v55  ;;  %10040 = vmatpush1.bf16.msra.mxu1 %v21618_v19  ;;  %v21656_v43 = vld [vmem:[%s30677_s12 + $0xb64] ss:$48 sps:$4 sm:$0xff]  }
 0x6cc   : > { %10083 = vmatpush1.bf16.msra.mxu0 %v21621_v34  ;;  %10041 = vmatprep.subr.bf16.mxu1 %v21626_v0  ;;  %v21648_v34 = vld [vmem:[%s30677_s12 + $0xbc0] ss:$48 sps:$4 sm:$0xff]   ;;  %v21651_v0 = vld [vmem:[%s30677_s12 + $0x5c8] ss:$48 sps:$4 sm:$0xff]  }
 0x6cd   : > { %v10189_v63 = vrot.slane %v10188_v1, 2  ;;  %v10296_v32 = vadd.f32 %v10295_v22, %v10294_v38  ;;  %v10195_v62 = vadd.f32 %v10194_v47, %v10193_v26  ;;  %v10302_v23 = vrot.slane %v10301_v29, 4  ;;  %10084 = vmatprep.subr.bf16.mxu0 %v21629_v41  ;;  %v21659_v26 = vld [vmem:[%s30677_s12 + $0x56c] ss:$48 sps:$4 sm:$0xff]   ;;  %v21654_v41 = vld [vmem:[%s30677_s12 + $0xb60] ss:$48 sps:$4 sm:$0xff]  }
 0x6ce   : > { %v21662_v22 = vld [vmem:[%s30677_s12 + $0xb04] ss:$48 sps:$4 sm:$0xff]  }
 0x6cf   : > { %v10190_v3 = vadd.f32 %v10189_v63, %v10188_v1  ;;  %v10297_v33 = vrot.slane %v10296_v32, 2  ;;  %v10196_v37 = vrot.slane %v10195_v62, 2  ;;  %v10303_v50 = vadd.f32 %v10302_v23, %v10301_v29  ;;  %10042 = vmatpush1.bf16.msra.mxu1 %v21624_v45  ;;  %v21657_v1 = vld [vmem:[%s30677_s12 + $0x568] ss:$48 sps:$4 sm:$0xff]   ;;  %v21665_v29 = vld [vmem:[%s30677_s12 + $0x50c] ss:$48 sps:$4 sm:$0xff]  }
 0x6d0   : > { %10085 = vmatpush1.bf16.msra.mxu0 %v21627_v49  ;;  %10043 = vmatprep.subr.bf16.mxu1 %v21632_v13  ;;  %v21660_v45 = vld [vmem:[%s30677_s12 + $0xb00] ss:$48 sps:$4 sm:$0xff]   ;;  %v21663_v49 = vld [vmem:[%s30677_s12 + $0x508] ss:$48 sps:$4 sm:$0xff]   ;;  %v21668_v13 = vld [vmem:[%s30677_s12 + $0xaa4] ss:$48 sps:$4 sm:$0xff]  }
 0x6d1   : > { %v10191_v52 = vrot.slane %v10190_v3, 1  ;;  %v10298_v53 = vadd.f32 %v10297_v33, %v10296_v32  ;;  %v10197_v44 = vadd.f32 %v10196_v37, %v10195_v62  ;;  %v10304_v51 = vrot.slane %v10303_v50, 2  ;;  %10086 = vmatprep.subr.bf16.mxu0 %v21635_v2  ;;  %v21671_v63 = vld [vmem:[%s30677_s12 + $0x4ac] ss:$48 sps:$4 sm:$0xff]   ;;  %v21666_v32 = vld [vmem:[%s30677_s12 + $0xaa0] ss:$48 sps:$4 sm:$0xff]  }
 0x6d2   : > { %v21669_v62 = vld [vmem:[%s30677_s12 + $0x4a8] ss:$48 sps:$4 sm:$0xff]   ;;  %v21674_v23 = vld [vmem:[%s30677_s12 + $0xa44] ss:$48 sps:$4 sm:$0xff]   ;;  %v21677_v2 = vld [vmem:[%s30677_s12 + $0x44c] ss:$48 sps:$4 sm:$0xff]  }
 0x6d3   : > { %v10192_v31 = vadd.f32 %v10191_v52, %v10190_v3  ;;  %v10198_v35 = vrot.slane %v10197_v44, 1  ;;  %v10305_v11 = vadd.f32 %v10304_v51, %v10303_v50  ;;  %10044 = vmatpush1.bf16.msra.mxu1 %v21630_v24  ;;  %v10299_v4 = vrot.slane %v10298_v53, 1  ;;  %v21672_v3 = vld [vmem:[%s30677_s12 + $0xa40] ss:$48 sps:$4 sm:$0xff]   ;;  %v21675_v33 = vld [vmem:[%s30677_s12 + $0x448] ss:$48 sps:$4 sm:$0xff]   ;;  %v9766_v51 = vpop.f32.mrf.mxu0 }
 0x6d4   : > { %10087 = vmatpush1.bf16.msra.mxu0 %v21633_v46  ;;  %10045 = vmatprep.subr.bf16.mxu1 %v21638_v6  ;;  %v21680_v37 = vld [vmem:[%s30677_s12 + $0x9e4] ss:$48 sps:$4 sm:$0xff]   ;;  %v21683_v50 = vld [vmem:[%s30677_s12 + $0x3ec] ss:$48 sps:$4 sm:$0xff]   ;;  %v21678_v24 = vld [vmem:[%s30677_s12 + $0x9e0] ss:$48 sps:$4 sm:$0xff]  }
 0x6d5   : > { %v27226_v21 = vmul.f32 0.0625, %v10192_v31  ;;  %v10199_v25 = vadd.f32 %v10198_v35, %v10197_v44  ;;  %10088 = vmatprep.subr.bf16.mxu0 %v21641_v56  ;;  %v10306_v15 = vrot.slane %v10305_v11, 1  ;;  %v27243_v28 = vadd.f32 %v10299_v4, %v10298_v53  ;;  %v21681_v46 = vld [vmem:[%s30677_s12 + $0x3e8] ss:$48 sps:$4 sm:$0xff]   ;;  %v21686_v6 = vld [vmem:[%s30677_s12 + $0x984] ss:$48 sps:$4 sm:$0xff]  }
 0x6d6   : > { %v21689_v52 = vld [vmem:[%s30677_s12 + $0x38c] ss:$48 sps:$4 sm:$0xff]   ;;  %v21684_v44 = vld [vmem:[%s30677_s12 + $0x980] ss:$48 sps:$4 sm:$0xff]   ;;  %v21687_v56 = vld [vmem:[%s30677_s12 + $0x388] ss:$48 sps:$4 sm:$0xff]  }
 0x6d7   : > { %v10390_v17 = vmul.f32 16.0, %v27226_v21  ;;  %v27232_v16 = vmul.f32 0.0625, %v10199_v25  ;;  %10046 = vmatpush1.bf16.msra.mxu1 %v21636_v57  ;;  %v10307_v19 = vadd.f32 %v10306_v15, %v10305_v11  ;;  %v21692_v31 = vld [vmem:[%s30677_s12 + $0x924] ss:$48 sps:$4 sm:$0xff]   ;;  %v21695_v35 = vld [vmem:[%s30677_s12 + $0x32c] ss:$48 sps:$4 sm:$0xff]   ;;  %v7677_v25 = vrot.slane %v27123_v48, %v23831_v14 }
 0x6d8   : > { %10089 = vmatpush1.bf16.msra.mxu0 %v21639_v54  ;;  %10047 = vmatprep.subr.bf16.mxu1 %v21644_v18  ;;  %v21690_v57 = vld [vmem:[%s30677_s12 + $0x920] ss:$48 sps:$4 sm:$0xff]   ;;  %v9768_v54 = vpop.f32.mrf.mxu0  ;;  %v21693_v18 = vld [vmem:[%s30677_s12 + $0x328] ss:$48 sps:$4 sm:$0xff]   ;;  %v21698_v4 = vld [vmem:[%s30677_s12 + $0x8cc] ss:$48 sps:$4 sm:$0xff]  }
 0x6d9   : > { %v27246_v30 = vmul.f32 %v10390_v17, %v27226_v21  ;;  %v10391_v40 = vmul.f32 16.0, %v27232_v16  ;;  %10090 = vmatprep.subr.bf16.mxu0 %v21647_v61  ;;  %v21701_v61 = vld [vmem:[%s30680_s15 + $0xe4] ss:$16 sps:$4 sm:$0xff]  }
 0x6db   : > { %v10414_v39 = vsub.f32 %v27243_v28, %v27246_v30  ;;  %v10403_v55 = vmul.f32 %v10391_v40, %v27232_v16  ;;  %10048 = vmatpush1.bf16.msra.mxu1 %v21642_v59  ;;  %v7681_v59 = vrot.slane %v27123_v48, %v23822_v10  ;;  %v21699_v40 = vld [vmem:[%s30680_s15 + $0xe0] ss:$16 sps:$4 sm:$0xff]   ;;  %v21752_v28 = vld [vmem:[%s30677_s12 + $0xb6c] ss:$48 sps:$4 sm:$0xff]  }
 0x6dc   : > { %10091 = vmatpush1.bf16.msra.mxu0 %v21645_v20  ;;  %10049 = vmatprep.subr.bf16.mxu1 %v21650_v27  ;;  %v21696_v20 = vld [vmem:[%s30677_s12 + $0x8c8] ss:$48 sps:$4 sm:$0xff]   ;;  %v9770_v27 = vpop.f32.mrf.mxu0 }
 0x6dd   : > { %v10415_v38 = vsub.f32 %v10307_v19, %v10403_v55  ;;  %10092 = vmatprep.subr.bf16.mxu0 %v21653_v58  ;;  %v9767_v19 = vadd.f32 %v9766_v51, %v7677_v25  ;;  %v21704_v55 = vld [vmem:[%s30677_s12 + $0x86c] ss:$48 sps:$4 sm:$0xff]   ;;  %v21717_v51 = vld [vmem:[%s30680_s15 + $0x80] ss:$16 sps:$4 sm:$0xff]  }
 0x6df   : > { %v10427_v42 = vmul.f32 0.06666667, %v10415_v38  ;;  %10050 = vmatpush2.bf16.msra.mxu1 %v21648_v34 }
 0x6e0   : > { %10093 = vmatpush2.bf16.msra.mxu0 %v21651_v0  ;;  %10051 = vmatprep.subr.bf16.mxu1 %v21656_v43  ;;  %v21707_v0 = vld [vmem:[%s30680_s15 + $0xc4] ss:$16 sps:$4 sm:$0xff]   ;;  %v9769_v43 = vadd.f32 %v9768_v54, %v7681_v59 }
 0x6e1   : > { %v27276_v47 = vmax.f32 %v10427_v42, 0.0  ;;  %10094 = vmatprep.subr.bf16.mxu0 %v21659_v26  ;;  %v21702_v42 = vld [vmem:[%s30677_s12 + $0x868] ss:$48 sps:$4 sm:$0xff]   ;;  %v21725_v54 = vld [vmem:[%s30680_s15 + $0x64] ss:$16 sps:$4 sm:$0xff]  }
 0x6e3   : > { %10052 = vmatpush2.bf16.msra.mxu1 %v21654_v41  ;;  %23120 = vrsqrt.f32 %v27276_v47  ;;  %vm10459_vm3 = vcmp.eq.f32.partialorder %v27276_v47, inf  ;;  %v10462_v15 = vand.u32 2147483648, %v27276_v47  ;;  %vm10461_vm4 = vcmp.eq.f32.partialorder %v27276_v47, 0.0  ;;  %v9772_v41 = vpop.f32.mrf.mxu0 }
 0x6e4   : > { %10095 = vmatpush2.bf16.msra.mxu0 %v21657_v1  ;;  %10053 = vmatprep.subr.bf16.mxu1 %v21662_v22  ;;  %v21705_v22 = vld [vmem:[%s30680_s15 + $0xc0] ss:$16 sps:$4 sm:$0xff]  }
 0x6e5   : > { %10096 = vmatprep.subr.bf16.mxu0 %v21665_v29 }
 0x6e7   : > { %10054 = vmatpush2.bf16.msra.mxu1 %v21660_v45  ;;  %v21713_v45 = vld [vmem:[%s30680_s15 + $0xa4] ss:$16 sps:$4 sm:$0xff]  }
 0x6e8   : > { %10097 = vmatpush2.bf16.msra.mxu0 %v21663_v49  ;;  %10055 = vmatprep.subr.bf16.mxu1 %v21668_v13  ;;  %v9773_v49 = vadd.f32 %v9772_v41, %v7681_v59  ;;  %v21728_v59 = vld [vmem:[%s30677_s12 + $0x6ec] ss:$48 sps:$4 sm:$0xff]  }
 0x6e9   : > { %10098 = vmatprep.subr.bf16.mxu0 %v21671_v63  ;;  %v21734_v41 = vld [vmem:[%s30677_s12 + $0x68c] ss:$48 sps:$4 sm:$0xff]  }
 0x6eb   : > { %10056 = vmatpush2.bf16.msra.mxu1 %v21666_v32  ;;  %v21708_v32 = vld [vmem:[%s30677_s12 + $0x808] ss:$48 sps:$4 sm:$0xff]  }
 0x6ec   : > { %10099 = vmatpush2.bf16.msra.mxu0 %v21669_v62  ;;  %10057 = vmatprep.subr.bf16.mxu1 %v21674_v23 }
 0x6ed   : > { %10100 = vmatprep.subr.bf16.mxu0 %v21677_v2  ;;  %v21711_v2 = vld [vmem:[%s30680_s15 + $0xa0] ss:$16 sps:$4 sm:$0xff]  }
 0x6ef   : > { %10058 = vmatpush2.bf16.msra.mxu1 %v21672_v3  ;;  %v21716_v3 = vld [vmem:[%s30677_s12 + $0x7ac] ss:$48 sps:$4 sm:$0xff]  }
 0x6f0   : > { %10101 = vmatpush2.bf16.msra.mxu0 %v21675_v33  ;;  %10059 = vmatprep.subr.bf16.mxu1 %v21680_v37  ;;  %v23121_v53 = vpop.eup %23120 }
 0x6f1   : > { %10102 = vmatprep.subr.bf16.mxu0 %v21683_v50  ;;  %v10458_v11 = vmul.f32 %v23121_v53, %v27276_v47  ;;  %v21719_v50 = vld [vmem:[%s30680_s15 + $0x84] ss:$16 sps:$4 sm:$0xff]   ;;  %v21714_v53 = vld [vmem:[%s30677_s12 + $0x7a8] ss:$48 sps:$4 sm:$0xff]  }
 0x6f3   : > { %10060 = vmatpush2.bf16.msra.mxu1 %v21678_v24  ;;  %v10460_v17 = vsel %vm10459_vm3, %v27276_v47, %v10458_v11  ;;  %v9771_v47 = vadd.f32 %v9770_v27, %v7677_v25 }
 0x6f4   : > { %10103 = vmatpush2.bf16.msra.mxu0 %v21681_v46  ;;  %10061 = vmatprep.subr.bf16.mxu1 %v21686_v6  ;;  %v10463_v58 = vsel %vm10461_vm4, %v10462_v15, %v10460_v17  ;;  %v21720_v17 = vld [vmem:[%s30677_s12 + $0x748] ss:$48 sps:$4 sm:$0xff]   ;;  %v21723_v15 = vld [vmem:[%s30680_s15 + $0x60] ss:$16 sps:$4 sm:$0xff]  }
 0x6f5   : > { %10104 = vmatprep.subr.bf16.mxu0 %v21689_v52  ;;  %v27377_v26 = vpack.c.bf16 %v10463_v58, %v10463_v58 }
 0x6f7   : > { %10062 = vmatpush2.bf16.msra.mxu1 %v21684_v44 }
 0x6f8   : > { %10105 = vmatpush2.bf16.msra.mxu0 %v21687_v56  ;;  %10063 = vmatprep.subr.bf16.mxu1 %v21692_v31  ;;  %v21722_v56 = vld [vmem:[%s30677_s12 + $0x74c] ss:$48 sps:$4 sm:$0xff]  }
 0x6f9   : > { %10106 = vmatprep.subr.bf16.mxu0 %v21695_v35 }
 0x6fb   : > { %10064 = vmatpush2.bf16.msra.mxu1 %v21690_v57 }
 0x6fc   : > { %10107 = vmatpush2.bf16.msra.mxu0 %v21693_v18  ;;  %10119 = vmatprep.subr.bf16.mxu1 %v21698_v4 }
 0x6fd   : > { %13246 = vmatprep.subr.bf16.mxu0 %v21701_v61 }
 0x6fe   : > { %v9809_v34 = vpop.f32.mrf.mxu1  ;;  %10066 = vmatmul.mubr.bf16.vlgmr.msra.gmra.mxu1 %v26544_v36 }
 0x6ff   : > { %v9810_v38 = vadd.f32 %v9809_v34, %v9767_v19  ;;  %10109 = vmatmul.mubr.bf16.vlgmr.msra.gmra.mxu0 %v26437_v60  ;;  %10120 = vmatpush1.bf16.msra.mxu1 %v21696_v20  ;;  %v21710_v60 = vld [vmem:[%s30677_s12 + $0x80c] ss:$48 sps:$4 sm:$0xff]   ;;  %v21731_v19 = vld [vmem:[%s30680_s15 + $0x44] ss:$16 sps:$4 sm:$0xff]  }
 0x700   : > { %10151 = vmatprep.mubr.bf16.mxu1 %v26539_v5  ;;  %v9811_v1 = vpop.f32.mrf.mxu1  ;;  %13247 = vmatpush1.bf16.msra.mxu0 %v21699_v40 }
 0x701   : > { %v9812_v29 = vadd.f32 %v9811_v1, %v9769_v43  ;;  %13278 = vmatprep.mubr.bf16.mxu0 %v27377_v26  ;;  %10121 = vmatprep.subr.bf16.mxu1 %v21704_v55  ;;  %v10164_v13 = vmax.f32 %v9810_v38, 0.0  ;;  %v21726_v38 = vld [vmem:[%s30677_s12 + $0x6e8] ss:$48 sps:$4 sm:$0xff]  }
 0x702   : > { %v9813_v5 = vpop.f32.mrf.mxu1  ;;  %13248 = vmatprep.subr.bf16.mxu0 %v21707_v0 }
 0x703   : > { %v9814_v63 = vadd.f32 %v9813_v5, %v9771_v47  ;;  %10122 = vmatpush1.bf16.msra.mxu1 %v21702_v42  ;;  %v10165_v62 = vmax.f32 %v9812_v29, 0.0  ;;  %v10272_v24 = vmul.f32 %v10164_v13, %v10164_v13  ;;  %v21729_v42 = vld [vmem:[%s30680_s15 + $0x40] ss:$16 sps:$4 sm:$0xff]   ;;  %v21737_v29 = vld [vmem:[%s30680_s15 + $0x24] ss:$16 sps:$4 sm:$0xff]  }
 0x704   : > { %v9815_v23 = vpop.f32.mrf.mxu1  ;;  %13249 = vmatpush1.bf16.msra.mxu0 %v21705_v22  ;;  %10123 = vmatprep.subr.bf16.mxu1 %v21710_v60 }
 0x705   : > { %v10176_v33 = vmax.f32 %v9814_v63, 0.0  ;;  %v9816_v37 = vadd.f32 %v9815_v23, %v9773_v49  ;;  %13250 = vmatprep.subr.bf16.mxu0 %v21713_v45  ;;  %v10273_v44 = vmul.f32 %v10165_v62, %v10165_v62  ;;  %v21735_v63 = vld [vmem:[%s30680_s15 + $0x20] ss:$16 sps:$4 sm:$0xff]  }
 0x707   : > { %v10200_v46 = vadd.f32 %v10176_v33, %v10164_v13  ;;  %v10284_v6 = vmul.f32 %v10176_v33, %v10176_v33  ;;  %v10177_v52 = vmax.f32 %v9816_v37, 0.0  ;;  %10124 = vmatpush1.bf16.msra.mxu1 %v21708_v32  ;;  %v21732_v13 = vld [vmem:[%s30677_s12 + $0x688] ss:$48 sps:$4 sm:$0xff]   ;;  %v21740_v32 = vld [vmem:[%s30677_s12 + $0x62c] ss:$48 sps:$4 sm:$0xff]  }
 0x708   : > { %13251 = vmatpush1.bf16.msra.mxu0 %v21711_v2  ;;  %10125 = vmatprep.subr.bf16.mxu1 %v21716_v3  ;;  %v21743_v3 = vld [vmem:[%s30680_s15 + $0x4] ss:$16 sps:$4 sm:$0xff]  }
 0x709   : > { %v10201_v31 = vrot.slane %v10200_v46, 4  ;;  %v10308_v35 = vadd.f32 %v10284_v6, %v10272_v24  ;;  %v10207_v11 = vadd.f32 %v10177_v52, %v10165_v62  ;;  %v10285_v57 = vmul.f32 %v10177_v52, %v10177_v52  ;;  %13252 = vmatprep.subr.bf16.mxu0 %v21719_v50  ;;  %v21738_v24 = vld [vmem:[%s30677_s12 + $0x628] ss:$48 sps:$4 sm:$0xff]   ;;  %v21746_v6 = vld [vmem:[%s30677_s12 + $0xbcc] ss:$48 sps:$4 sm:$0xff]  }
 0x70b   : > { %v10202_v18 = vadd.f32 %v10201_v31, %v10200_v46  ;;  %v10309_v4 = vrot.slane %v10308_v35, 4  ;;  %v10208_v25 = vrot.slane %v10207_v11, 4  ;;  %v10315_v61 = vadd.f32 %v10285_v57, %v10273_v44  ;;  %10126 = vmatpush1.bf16.msra.mxu1 %v21714_v53  ;;  %v21741_v46 = vld [vmem:[%s30680_s15] ss:$16 sps:$4 sm:$0xff]   ;;  %v21744_v57 = vld [vmem:[%s30677_s12 + $0xbc8] ss:$48 sps:$4 sm:$0xff]  }
 0x70c   : > { %13253 = vmatpush1.bf16.msra.mxu0 %v21717_v51  ;;  %10127 = vmatprep.subr.bf16.mxu1 %v21722_v56  ;;  %v21749_v51 = vld [vmem:[%s30680_s15 + $0x1e4] ss:$16 sps:$4 sm:$0xff]   ;;  %v10426_v56 = vmul.f32 0.06666667, %v10414_v39 }
 0x70d   : > { %v10203_v20 = vrot.slane %v10202_v18, 2  ;;  %v10310_v27 = vadd.f32 %v10309_v4, %v10308_v35  ;;  %v10209_v40 = vadd.f32 %v10208_v25, %v10207_v11  ;;  %v10316_v58 = vrot.slane %v10315_v61, 4  ;;  %13254 = vmatprep.subr.bf16.mxu0 %v21725_v54  ;;  %v21747_v54 = vld [vmem:[%s30680_s15 + $0x1e0] ss:$16 sps:$4 sm:$0xff]   ;;  %v21755_v39 = vld [vmem:[%s30680_s15 + $0x1c4] ss:$16 sps:$4 sm:$0xff]  }
 0x70e   : > { %v21750_v25 = vld [vmem:[%s30677_s12 + $0xb68] ss:$48 sps:$4 sm:$0xff]  }
 0x70f   : > { %v10204_v55 = vadd.f32 %v10203_v20, %v10202_v18  ;;  %v10311_v34 = vrot.slane %v10310_v27, 2  ;;  %v10210_v0 = vrot.slane %v10209_v40, 2  ;;  %v10317_v43 = vadd.f32 %v10316_v58, %v10315_v61  ;;  %10128 = vmatpush1.bf16.msra.mxu1 %v21720_v17  ;;  %v21753_v61 = vld [vmem:[%s30680_s15 + $0x1c0] ss:$16 sps:$4 sm:$0xff]   ;;  %v21758_v17 = vld [vmem:[%s30677_s12 + $0xb0c] ss:$48 sps:$4 sm:$0xff]  }
 0x710   : > { %13255 = vmatpush1.bf16.msra.mxu0 %v21723_v15  ;;  %10129 = vmatprep.subr.bf16.mxu1 %v21728_v59  ;;  %v27494_v18 = vmax.f32 %v10426_v56, 0.0  ;;  %v21761_v59 = vld [vmem:[%s30680_s15 + $0x1a4] ss:$16 sps:$4 sm:$0xff]   ;;  %v21756_v20 = vld [vmem:[%s30677_s12 + $0xb08] ss:$48 sps:$4 sm:$0xff]  }
 0x711   : > { %v10205_v1 = vrot.slane %v10204_v55, 1  ;;  %v10312_v22 = vadd.f32 %v10311_v34, %v10310_v27  ;;  %v10211_v60 = vadd.f32 %v10210_v0, %v10209_v40  ;;  %v10318_v47 = vrot.slane %v10317_v43, 2  ;;  %13256 = vmatprep.subr.bf16.mxu0 %v21731_v19  ;;  %v21759_v27 = vld [vmem:[%s30680_s15 + $0x1a0] ss:$16 sps:$4 sm:$0xff]   ;;  %v21764_v40 = vld [vmem:[%s30677_s12 + $0xaac] ss:$48 sps:$4 sm:$0xff]  }
 0x712   : > { %23122 = vrsqrt.f32 %v27494_v18  ;;  %v21767_v58 = vld [vmem:[%s30680_s15 + $0x184] ss:$16 sps:$4 sm:$0xff]   ;;  %v21762_v19 = vld [vmem:[%s30677_s12 + $0xaa8] ss:$48 sps:$4 sm:$0xff]   ;;  %v21770_v34 = vld [vmem:[%s30677_s12 + $0xa4c] ss:$48 sps:$4 sm:$0xff]  }
 0x713   : > { %v10206_v45 = vadd.f32 %v10205_v1, %v10204_v55  ;;  %v10212_v5 = vrot.slane %v10211_v60, 1  ;;  %v10319_v49 = vadd.f32 %v10318_v47, %v10317_v43  ;;  %10130 = vmatpush1.bf16.msra.mxu1 %v21726_v38  ;;  %v10313_v62 = vrot.slane %v10312_v22, 1  ;;  %v21765_v55 = vld [vmem:[%s30680_s15 + $0x180] ss:$16 sps:$4 sm:$0xff]   ;;  %v21773_v0 = vld [vmem:[%s30680_s15 + $0x164] ss:$16 sps:$4 sm:$0xff]  }
 0x714   : > { %13257 = vmatpush1.bf16.msra.mxu0 %v21729_v42  ;;  %10131 = vmatprep.subr.bf16.mxu1 %v21734_v41  ;;  %v21768_v43 = vld [vmem:[%s30677_s12 + $0xa48] ss:$48 sps:$4 sm:$0xff]   ;;  %v21771_v38 = vld [vmem:[%s30680_s15 + $0x160] ss:$16 sps:$4 sm:$0xff]   ;;  %v21776_v42 = vld [vmem:[%s30677_s12 + $0x9ec] ss:$48 sps:$4 sm:$0xff]  }
 0x715   : > { %v27450_v23 = vmul.f32 0.0625, %v10206_v45  ;;  %v10213_v2 = vadd.f32 %v10212_v5, %v10211_v60  ;;  %13258 = vmatprep.subr.bf16.mxu0 %v21737_v29  ;;  %v10320_v37 = vrot.slane %v10319_v49, 1  ;;  %v27467_v52 = vadd.f32 %v10313_v62, %v10312_v22  ;;  %v21779_v41 = vld [vmem:[%s30680_s15 + $0x144] ss:$16 sps:$4 sm:$0xff]   ;;  %v21774_v1 = vld [vmem:[%s30677_s12 + $0x9e8] ss:$48 sps:$4 sm:$0xff]  }
 0x716   : > { %v21777_v60 = vld [vmem:[%s30680_s15 + $0x140] ss:$16 sps:$4 sm:$0xff]   ;;  %v21782_v47 = vld [vmem:[%s30677_s12 + $0x98c] ss:$48 sps:$4 sm:$0xff]   ;;  %v21785_v45 = vld [vmem:[%s30680_s15 + $0x124] ss:$16 sps:$4 sm:$0xff]  }
 0x717   : > { %v10392_v33 = vmul.f32 16.0, %v27450_v23  ;;  %v27456_v50 = vmul.f32 0.0625, %v10213_v2  ;;  %10132 = vmatpush1.bf16.msra.mxu1 %v21732_v13  ;;  %v10321_v35 = vadd.f32 %v10320_v37, %v10319_v49  ;;  %v21780_v5 = vld [vmem:[%s30677_s12 + $0x988] ss:$48 sps:$4 sm:$0xff]   ;;  %v9852_v13 = vpop.f32.mrf.mxu0  ;;  %v7684_v2 = vsub.s32 4, %v23816_v8 }
 0x718   : > { %13259 = vmatpush1.bf16.msra.mxu0 %v21735_v63  ;;  %10133 = vmatprep.subr.bf16.mxu1 %v21740_v32  ;;  %v21783_v63 = vld [vmem:[%s30680_s15 + $0x120] ss:$16 sps:$4 sm:$0xff]   ;;  %v21788_v32 = vld [vmem:[%s30677_s12 + $0x92c] ss:$48 sps:$4 sm:$0xff]   ;;  %vm10452_vm5 = vcmp.eq.f32.partialorder %v27494_v18, inf  ;;  %vm10454_vm7 = vcmp.eq.f32.partialorder %v27494_v18, 0.0 }
 0x719   : > { %v27470_v53 = vmul.f32 %v10392_v33, %v27450_v23  ;;  %v10393_v44 = vmul.f32 16.0, %v27456_v50  ;;  %13260 = vmatprep.subr.bf16.mxu0 %v21743_v3  ;;  %v21791_v3 = vld [vmem:[%s30680_s15 + $0x104] ss:$16 sps:$4 sm:$0xff]   ;;  %v7688_v33 = vsub.s32 5, %v23816_v8  ;;  %v21786_v37 = vld [vmem:[%s30677_s12 + $0x928] ss:$48 sps:$4 sm:$0xff]  }
 0x71b   : > { %v10416_v31 = vsub.f32 %v27467_v52, %v27470_v53  ;;  %v10405_v11 = vmul.f32 %v10393_v44, %v27456_v50  ;;  %10134 = vmatpush1.bf16.msra.mxu1 %v21738_v24  ;;  %v21794_v44 = vld [vmem:[%s30680_s15 + $0x2e4] ss:$16 sps:$4 sm:$0xff]   ;;  %v21840_v52 = vld [vmem:[%s30680_s15 + $0x3e0] ss:$16 sps:$4 sm:$0xff]  }
 0x71c   : > { %13261 = vmatpush1.bf16.msra.mxu0 %v21741_v46  ;;  %10135 = vmatprep.subr.bf16.mxu1 %v21746_v6  ;;  %v9854_v46 = vpop.f32.mrf.mxu0  ;;  %v21789_v6 = vld [vmem:[%s30680_s15 + $0x100] ss:$16 sps:$4 sm:$0xff]  }
 0x71d   : > { %v10417_v30 = vsub.f32 %v10321_v35, %v10405_v11  ;;  %13262 = vmatprep.subr.bf16.mxu0 %v21749_v51  ;;  %v10455_v51 = vand.u32 2147483648, %v27494_v18  ;;  %v7685_v35 = vrot.slane %v27123_v48, %v7684_v2  ;;  %v21843_v53 = vld [vmem:[%s30680_s15 + $0x5e0] ss:$16 sps:$4 sm:$0xff]  }
 0x71f   : > { %v10429_v4 = vmul.f32 0.06666667, %v10417_v30  ;;  %10136 = vmatpush2.bf16.msra.mxu1 %v21744_v57  ;;  %v23123_v22 = vpop.eup %23122  ;;  %v21797_v57 = vld [vmem:[%s30680_s15 + $0x4e4] ss:$16 sps:$4 sm:$0xff]   ;;  %v21792_v30 = vld [vmem:[%s30680_s15 + $0x2e0] ss:$16 sps:$4 sm:$0xff]  }
 0x720   : > { %13263 = vmatpush2.bf16.msra.mxu0 %v21747_v54  ;;  %10137 = vmatprep.subr.bf16.mxu1 %v21752_v28  ;;  %v10451_v49 = vmul.f32 %v23123_v22, %v27494_v18  ;;  %v7689_v28 = vrot.slane %v27123_v48, %v7688_v33  ;;  %v21800_v48 = vld [vmem:[%s30680_s15 + $0x2c4] ss:$16 sps:$4 sm:$0xff]   ;;  %v21804_v22 = vld [vmem:[%s30680_s15 + $0x2a0] ss:$16 sps:$4 sm:$0xff]  }
 0x721   : > { %v27505_v15 = vmax.f32 %v10429_v4, 0.0  ;;  %13264 = vmatprep.subr.bf16.mxu0 %v21755_v39  ;;  %v9856_v4 = vpop.f32.mrf.mxu0 }
 0x722   : > { %v10453_v24 = vsel %vm10452_vm5, %v27494_v18, %v10451_v49  ;;  %v21795_v18 = vld [vmem:[%s30680_s15 + $0x4e0] ss:$16 sps:$4 sm:$0xff]  }
 0x723   : > { %10138 = vmatpush2.bf16.msra.mxu1 %v21750_v25  ;;  %23124 = vrsqrt.f32 %v27505_v15  ;;  %vm10473_vm6 = vcmp.eq.f32.partialorder %v27505_v15, inf  ;;  %v10476_v11 = vand.u32 2147483648, %v27505_v15  ;;  %v10456_v54 = vsel %vm10454_vm7, %v10455_v51, %v10453_v24  ;;  %v21818_v24 = vld [vmem:[%s30680_s15 + $0x264] ss:$16 sps:$4 sm:$0xff]  }
 0x724   : > { %13265 = vmatpush2.bf16.msra.mxu0 %v21753_v61  ;;  %10139 = vmatprep.subr.bf16.mxu1 %v21758_v17  ;;  %vm10475_vm8 = vcmp.eq.f32.partialorder %v27505_v15, 0.0  ;;  %v9853_v25 = vadd.f32 %v9852_v13, %v7685_v35  ;;  %v27604_v61 = vpack.c.bf16 %v10456_v54, %v10456_v54  ;;  %v21803_v17 = vld [vmem:[%s30680_s15 + $0x4c4] ss:$16 sps:$4 sm:$0xff]  }
 0x725   : > { %13266 = vmatprep.subr.bf16.mxu0 %v21761_v59  ;;  %v21815_v13 = vld [vmem:[%s30680_s15 + $0x484] ss:$16 sps:$4 sm:$0xff]  }
 0x727   : > { %10140 = vmatpush2.bf16.msra.mxu1 %v21756_v20  ;;  %v9855_v20 = vadd.f32 %v9854_v46, %v7689_v28 }
 0x728   : > { %13267 = vmatpush2.bf16.msra.mxu0 %v21759_v27  ;;  %10141 = vmatprep.subr.bf16.mxu1 %v21764_v40  ;;  %v21798_v40 = vld [vmem:[%s30680_s15 + $0x2c0] ss:$16 sps:$4 sm:$0xff]  }
 0x729   : > { %13268 = vmatprep.subr.bf16.mxu0 %v21767_v58  ;;  %v9858_v58 = vpop.f32.mrf.mxu0 }
 0x72b   : > { %10142 = vmatpush2.bf16.msra.mxu1 %v21762_v19 }
 0x72c   : > { %13269 = vmatpush2.bf16.msra.mxu0 %v21765_v55  ;;  %10143 = vmatprep.subr.bf16.mxu1 %v21770_v34  ;;  %v21806_v55 = vld [vmem:[%s30680_s15 + $0x2a4] ss:$16 sps:$4 sm:$0xff]   ;;  %v9857_v34 = vadd.f32 %v9856_v4, %v7685_v35 }
 0x72d   : > { %13270 = vmatprep.subr.bf16.mxu0 %v21773_v0 }
 0x72f   : > { %10144 = vmatpush2.bf16.msra.mxu1 %v21768_v43  ;;  %v21809_v43 = vld [vmem:[%s30680_s15 + $0x4a4] ss:$16 sps:$4 sm:$0xff]  }
 0x730   : > { %13271 = vmatpush2.bf16.msra.mxu0 %v21771_v38  ;;  %10145 = vmatprep.subr.bf16.mxu1 %v21776_v42  ;;  %v23125_v29 = vpop.eup %23124  ;;  %v9859_v42 = vadd.f32 %v9858_v58, %v7689_v28  ;;  %v21816_v28 = vld [vmem:[%s30680_s15 + $0x260] ss:$16 sps:$4 sm:$0xff]  }
 0x731   : > { %13272 = vmatprep.subr.bf16.mxu0 %v21779_v41  ;;  %v10472_v62 = vmul.f32 %v23125_v29, %v27505_v15  ;;  %v21807_v29 = vld [vmem:[%s30680_s15 + $0x4a0] ss:$16 sps:$4 sm:$0xff]  }
 0x732   : > { %v21822_v58 = vld [vmem:[%s30680_s15 + $0x240] ss:$16 sps:$4 sm:$0xff]  }
 0x733   : > { %10146 = vmatpush2.bf16.msra.mxu1 %v21774_v1  ;;  %v10474_v56 = vsel %vm10473_vm6, %v27505_v15, %v10472_v62 }
 0x734   : > { %13273 = vmatpush2.bf16.msra.mxu0 %v21777_v60  ;;  %10147 = vmatprep.subr.bf16.mxu1 %v21782_v47  ;;  %v10477_v39 = vsel %vm10475_vm8, %v10476_v11, %v10474_v56  ;;  %v21821_v56 = vld [vmem:[%s30680_s15 + $0x464] ss:$16 sps:$4 sm:$0xff]  }
 0x735   : > { %13274 = vmatprep.subr.bf16.mxu0 %v21785_v45  ;;  %v27613_v59 = vpack.c.bf16 %v10477_v39, %v10477_v39  ;;  %v21812_v45 = vld [vmem:[%s30680_s15 + $0x284] ss:$16 sps:$4 sm:$0xff]  }
 0x736   : > { %v21824_v39 = vld [vmem:[%s30680_s15 + $0x244] ss:$16 sps:$4 sm:$0xff]  }
 0x737   : > { %10148 = vmatpush2.bf16.msra.mxu1 %v21780_v5 }
 0x738   : > { %13275 = vmatpush2.bf16.msra.mxu0 %v21783_v63  ;;  %10149 = vmatprep.subr.bf16.mxu1 %v21788_v32 }
 0x739   : > { %13276 = vmatprep.subr.bf16.mxu0 %v21791_v3  ;;  %v21810_v3 = vld [vmem:[%s30680_s15 + $0x280] ss:$16 sps:$4 sm:$0xff]  }
 0x73b   : > { %10150 = vmatpush2.bf16.msra.mxu1 %v21786_v37  ;;  %v21813_v37 = vld [vmem:[%s30680_s15 + $0x480] ss:$16 sps:$4 sm:$0xff]  }
 0x73c   : > { %13277 = vmatpush2.bf16.msra.mxu0 %v21789_v6  ;;  %13287 = vmatprep.subr.bf16.mxu1 %v21794_v44 }
 0x73d   : > { %13328 = vmatprep.subr.bf16.mxu0 %v21797_v57 }
 0x73e   : > { %v9895_v15 = vpop.f32.mrf.mxu1  ;;  %10152 = vmatmul.mubr.bf16.vlgmr.msra.gmra.mxu1 %v26544_v36  ;;  %v21801_v36 = vld [vmem:[%s30680_s15 + $0x4c0] ss:$16 sps:$4 sm:$0xff]  }
 0x73f   : > { %v9896_v27 = vadd.f32 %v9895_v15, %v9853_v25  ;;  %13279 = vmatmul.mubr.bf16.vlgmr.msra.gmra.mxu0 %v27604_v61  ;;  %13288 = vmatpush1.bf16.msra.mxu1 %v21792_v30  ;;  %v21819_v30 = vld [vmem:[%s30680_s15 + $0x460] ss:$16 sps:$4 sm:$0xff]  }
 0x740   : > { %13319 = vmatprep.mubr.bf16.mxu1 %v27613_v59  ;;  %v9897_v19 = vpop.f32.mrf.mxu1  ;;  %13329 = vmatpush1.bf16.msra.mxu0 %v21795_v18 }
 0x741   : > { %v9898_v0 = vadd.f32 %v9897_v19, %v9855_v20  ;;  %13289 = vmatprep.subr.bf16.mxu1 %v21800_v48  ;;  %13330 = vmatprep.subr.bf16.mxu0 %v21803_v17  ;;  %v10166_v41 = vmax.f32 %v9896_v27, 0.0  ;;  %v21827_v17 = vld [vmem:[%s30680_s15 + $0x444] ss:$16 sps:$4 sm:$0xff]   ;;  %v21825_v19 = vld [vmem:[%s30680_s15 + $0x440] ss:$16 sps:$4 sm:$0xff]  }
 0x742   : > { %v9899_v38 = vpop.f32.mrf.mxu1 }
 0x743   : > { %v9900_v1 = vadd.f32 %v9899_v38, %v9857_v34  ;;  %13290 = vmatpush1.bf16.msra.mxu1 %v21798_v40  ;;  %v10167_v60 = vmax.f32 %v9898_v0, 0.0  ;;  %v10274_v63 = vmul.f32 %v10166_v41, %v10166_v41  ;;  %v21833_v38 = vld [vmem:[%s30680_s15 + $0x424] ss:$16 sps:$4 sm:$0xff]  }
 0x744   : > { %v9901_v47 = vpop.f32.mrf.mxu1  ;;  %13331 = vmatpush1.bf16.msra.mxu0 %v21801_v36  ;;  %13291 = vmatprep.subr.bf16.mxu1 %v21806_v55  ;;  %v21830_v36 = vld [vmem:[%s30680_s15 + $0x224] ss:$16 sps:$4 sm:$0xff]  }
 0x745   : > { %v10178_v5 = vmax.f32 %v9900_v1, 0.0  ;;  %v9902_v49 = vadd.f32 %v9901_v47, %v9859_v42  ;;  %13332 = vmatprep.subr.bf16.mxu0 %v21809_v43  ;;  %v10275_v33 = vmul.f32 %v10167_v60, %v10167_v60  ;;  %v21836_v47 = vld [vmem:[%s30680_s15 + $0x204] ss:$16 sps:$4 sm:$0xff]  }
 0x747   : > { %v10214_v32 = vadd.f32 %v10178_v5, %v10166_v41  ;;  %v10286_v62 = vmul.f32 %v10178_v5, %v10178_v5  ;;  %v10179_v2 = vmax.f32 %v9902_v49, 0.0  ;;  %13292 = vmatpush1.bf16.msra.mxu1 %v21804_v22  ;;  %v21828_v22 = vld [vmem:[%s30680_s15 + $0x220] ss:$16 sps:$4 sm:$0xff]   ;;  %v21839_v49 = vld [vmem:[%s30680_s15 + $0x404] ss:$16 sps:$4 sm:$0xff]  }
 0x748   : > { %13333 = vmatpush1.bf16.msra.mxu0 %v21807_v29  ;;  %13293 = vmatprep.subr.bf16.mxu1 %v21812_v45 }
 0x749   : > { %v10215_v46 = vrot.slane %v10214_v32, 4  ;;  %v10322_v6 = vadd.f32 %v10286_v62, %v10274_v63  ;;  %v10221_v44 = vadd.f32 %v10179_v2, %v10167_v60  ;;  %v10287_v51 = vmul.f32 %v10179_v2, %v10179_v2  ;;  %13334 = vmatprep.subr.bf16.mxu0 %v21815_v13  ;;  %v21831_v60 = vld [vmem:[%s30680_s15 + $0x420] ss:$16 sps:$4 sm:$0xff]  }
 0x74a   : > { %v21834_v62 = vld [vmem:[%s30680_s15 + $0x200] ss:$16 sps:$4 sm:$0xff]  }
 0x74b   : > { %v10216_v35 = vadd.f32 %v10215_v46, %v10214_v32  ;;  %v10323_v11 = vrot.slane %v10322_v6, 4  ;;  %v10222_v57 = vrot.slane %v10221_v44, 4  ;;  %v10329_v54 = vadd.f32 %v10287_v51, %v10275_v33  ;;  %13294 = vmatpush1.bf16.msra.mxu1 %v21810_v3  ;;  %v21837_v2 = vld [vmem:[%s30680_s15 + $0x400] ss:$16 sps:$4 sm:$0xff]   ;;  %v21842_v3 = vld [vmem:[%s30680_s15 + $0x3e4] ss:$16 sps:$4 sm:$0xff]  }
 0x74c   : > { %13335 = vmatpush1.bf16.msra.mxu0 %v21813_v37  ;;  %13295 = vmatprep.subr.bf16.mxu1 %v21818_v24  ;;  %v10428_v33 = vmul.f32 0.06666667, %v10416_v31  ;;  %v21848_v31 = vld [vmem:[%s30680_s15 + $0x3c4] ss:$16 sps:$4 sm:$0xff]  }
 0x74d   : > { %v10217_v4 = vrot.slane %v10216_v35, 2  ;;  %v10324_v18 = vadd.f32 %v10323_v11, %v10322_v6  ;;  %v10223_v25 = vadd.f32 %v10222_v57, %v10221_v44  ;;  %v10330_v48 = vrot.slane %v10329_v54, 4  ;;  %13336 = vmatprep.subr.bf16.mxu0 %v21821_v56  ;;  %v21845_v6 = vld [vmem:[%s30680_s15 + $0x5e4] ss:$16 sps:$4 sm:$0xff]  }
 0x74f   : > { %v10218_v15 = vadd.f32 %v10217_v4, %v10216_v35  ;;  %v10325_v20 = vrot.slane %v10324_v18, 2  ;;  %v10224_v27 = vrot.slane %v10223_v25, 2  ;;  %v10331_v40 = vadd.f32 %v10330_v48, %v10329_v54  ;;  %13296 = vmatpush1.bf16.msra.mxu1 %v21816_v28  ;;  %v21851_v54 = vld [vmem:[%s30680_s15 + $0x5c4] ss:$16 sps:$4 sm:$0xff]   ;;  %v21849_v4 = vld [vmem:[%s30680_s15 + $0x5c0] ss:$16 sps:$4 sm:$0xff]  }
 0x750   : > { %13337 = vmatpush1.bf16.msra.mxu0 %v21819_v30  ;;  %13297 = vmatprep.subr.bf16.mxu1 %v21824_v39  ;;  %v27721_v35 = vmax.f32 %v10428_v33, 0.0  ;;  %v21846_v39 = vld [vmem:[%s30680_s15 + $0x3c0] ss:$16 sps:$4 sm:$0xff]   ;;  %v21857_v48 = vld [vmem:[%s30680_s15 + $0x5a4] ss:$16 sps:$4 sm:$0xff]  }
 0x751   : > { %v10219_v55 = vrot.slane %v10218_v15, 1  ;;  %v10326_v34 = vadd.f32 %v10325_v20, %v10324_v18  ;;  %v10225_v0 = vadd.f32 %v10224_v27, %v10223_v25  ;;  %v10332_v43 = vrot.slane %v10331_v40, 2  ;;  %13338 = vmatprep.subr.bf16.mxu0 %v21827_v17  ;;  %v21854_v18 = vld [vmem:[%s30680_s15 + $0x3a4] ss:$16 sps:$4 sm:$0xff]   ;;  %v21852_v17 = vld [vmem:[%s30680_s15 + $0x3a0] ss:$16 sps:$4 sm:$0xff]  }
 0x752   : > { %23126 = vrsqrt.f32 %v27721_v35  ;;  %v21860_v20 = vld [vmem:[%s30680_s15 + $0x384] ss:$16 sps:$4 sm:$0xff]   ;;  %vm10466_vm11 = vcmp.eq.f32.partialorder %v27721_v35, inf  ;;  %vm10468_vm13 = vcmp.eq.f32.partialorder %v27721_v35, 0.0 }
 0x753   : > { %v10220_v42 = vadd.f32 %v10219_v55, %v10218_v15  ;;  %v10226_v41 = vrot.slane %v10225_v0, 1  ;;  %v10333_v1 = vadd.f32 %v10332_v43, %v10331_v40  ;;  %13298 = vmatpush1.bf16.msra.mxu1 %v21822_v58  ;;  %v10327_v29 = vrot.slane %v10326_v34, 1  ;;  %v21855_v15 = vld [vmem:[%s30680_s15 + $0x5a0] ss:$16 sps:$4 sm:$0xff]   ;;  %v21863_v27 = vld [vmem:[%s30680_s15 + $0x584] ss:$16 sps:$4 sm:$0xff]  }
 0x754   : > { %13339 = vmatpush1.bf16.msra.mxu0 %v21825_v19  ;;  %13299 = vmatprep.subr.bf16.mxu1 %v21830_v36  ;;  %v21858_v40 = vld [vmem:[%s30680_s15 + $0x380] ss:$16 sps:$4 sm:$0xff]   ;;  %v21866_v19 = vld [vmem:[%s30680_s15 + $0x364] ss:$16 sps:$4 sm:$0xff]  }
 0x755   : > { %v27686_v45 = vmul.f32 0.0625, %v10220_v42  ;;  %v10227_v5 = vadd.f32 %v10226_v41, %v10225_v0  ;;  %13340 = vmatprep.subr.bf16.mxu0 %v21833_v38  ;;  %v10334_v63 = vrot.slane %v10333_v1, 1  ;;  %v10328_v37 = vadd.f32 %v10327_v29, %v10326_v34  ;;  %v21861_v58 = vld [vmem:[%s30680_s15 + $0x580] ss:$16 sps:$4 sm:$0xff]   ;;  %v21869_v36 = vld [vmem:[%s30680_s15 + $0x564] ss:$16 sps:$4 sm:$0xff]  }
 0x756   : > { %v21864_v55 = vld [vmem:[%s30680_s15 + $0x360] ss:$16 sps:$4 sm:$0xff]   ;;  %v21872_v0 = vld [vmem:[%s30680_s15 + $0x344] ss:$16 sps:$4 sm:$0xff]  }
 0x757   : > { %v10394_v13 = vmul.f32 16.0, %v27686_v45  ;;  %v27692_v32 = vmul.f32 0.0625, %v10227_v5  ;;  %13300 = vmatpush1.bf16.msra.mxu1 %v21828_v22  ;;  %v10335_v51 = vadd.f32 %v10334_v63, %v10333_v1  ;;  %v21867_v34 = vld [vmem:[%s30680_s15 + $0x560] ss:$16 sps:$4 sm:$0xff]   ;;  %v21875_v43 = vld [vmem:[%s30680_s15 + $0x544] ss:$16 sps:$4 sm:$0xff]  }
 0x758   : > { %13341 = vmatpush1.bf16.msra.mxu0 %v21831_v60  ;;  %13301 = vmatprep.subr.bf16.mxu1 %v21836_v47  ;;  %v21870_v41 = vld [vmem:[%s30680_s15 + $0x340] ss:$16 sps:$4 sm:$0xff]   ;;  %v21878_v60 = vld [vmem:[%s30680_s15 + $0x324] ss:$16 sps:$4 sm:$0xff]  }
 0x759   : > { %v10406_v24 = vmul.f32 %v10394_v13, %v27686_v45  ;;  %v10395_v46 = vmul.f32 16.0, %v27692_v32  ;;  %13342 = vmatprep.subr.bf16.mxu0 %v21839_v49  ;;  %v21873_v22 = vld [vmem:[%s30680_s15 + $0x540] ss:$16 sps:$4 sm:$0xff]   ;;  %v21881_v47 = vld [vmem:[%s30680_s15 + $0x524] ss:$16 sps:$4 sm:$0xff]  }
 0x75a   : > { %v21876_v13 = vld [vmem:[%s30680_s15 + $0x320] ss:$16 sps:$4 sm:$0xff]  }
 0x75b   : > { %v10418_v44 = vsub.f32 %v10328_v37, %v10406_v24  ;;  %v10407_v56 = vmul.f32 %v10395_v46, %v27692_v32  ;;  %13302 = vmatpush1.bf16.msra.mxu1 %v21834_v62  ;;  %v21884_v37 = vld [vmem:[%s30680_s15 + $0x304] ss:$16 sps:$4 sm:$0xff]   ;;  %v7692_v24 = vsub.s32 6, %v23816_v8 }
 0x75c   : > { %13343 = vmatpush1.bf16.msra.mxu0 %v21837_v2  ;;  %13303 = vmatprep.subr.bf16.mxu1 %v21842_v3  ;;  %v9938_v2 = vpop.f32.mrf.mxu0  ;;  %v21879_v3 = vld [vmem:[%s30680_s15 + $0x520] ss:$16 sps:$4 sm:$0xff]  }
 0x75d   : > { %v10430_v11 = vmul.f32 0.06666667, %v10418_v44  ;;  %v10419_v57 = vsub.f32 %v10335_v51, %v10407_v56  ;;  %13344 = vmatprep.subr.bf16.mxu0 %v21845_v6  ;;  %v21887_v6 = vld [vmem:[%s30680_s15 + $0x504] ss:$16 sps:$4 sm:$0xff]   ;;  %v7696_v51 = vsub.s32 7, %v23816_v8 }
 0x75e   : > { %v21882_v56 = vld [vmem:[%s30680_s15 + $0x300] ss:$16 sps:$4 sm:$0xff]  }
 0x75f   : > { %v27726_v28 = vmax.f32 %v10430_v11, 0.0  ;;  %v10431_v30 = vmul.f32 0.06666667, %v10419_v57  ;;  %13304 = vmatpush2.bf16.msra.mxu1 %v21840_v52  ;;  %v23127_v38 = vpop.eup %23126  ;;  %v10469_v52 = vand.u32 2147483648, %v27721_v35  ;;  %v21885_v11 = vld [vmem:[%s30680_s15 + $0x500] ss:$16 sps:$4 sm:$0xff]  }
 0x760   : > { %13345 = vmatpush2.bf16.msra.mxu0 %v21843_v53  ;;  %13305 = vmatprep.subr.bf16.mxu1 %v21848_v31  ;;  %v10465_v49 = vmul.f32 %v23127_v38, %v27721_v35  ;;  %v9940_v31 = vpop.f32.mrf.mxu0  ;;  %v21890_v57 = vld [vmem:[%s30680_s15 + $0x6e4] ss:$16 sps:$4 sm:$0xff]  }
 0x761   : > { %v10443_v25 = vmax.f32 %v10431_v30, 0.0  ;;  %13346 = vmatprep.subr.bf16.mxu0 %v21851_v54  ;;  %23128 = vrsqrt.f32 %v27726_v28  ;;  %vm10480_vm12 = vcmp.eq.f32.partialorder %v27726_v28, inf  ;;  %v10483_v54 = vand.u32 2147483648, %v27726_v28  ;;  %v23148_v30 = vld [vmem:[%s30678_s13] sm:$0xff] }
 0x762   : > { %v10467_v44 = vsel %vm10466_vm11, %v27721_v35, %v10465_v49  ;;  %vm10482_vm14 = vcmp.eq.f32.partialorder %v27726_v28, 0.0  ;;  %v21896_v38 = vld [vmem:[%s30680_s15 + $0x6a4] ss:$16 sps:$4 sm:$0xff]   ;;  %v21894_v49 = vld [vmem:[%s30680_s15 + $0x6a0] ss:$16 sps:$4 sm:$0xff]   ;;  %vm17520_vm11 = vcmp.lt.s32.totalorder %v798_v7, 512 }
 0x763   : > { %13306 = vmatpush2.bf16.msra.mxu1 %v21846_v39  ;;  %23130 = vrsqrt.f32 %v10443_v25  ;;  %vm10487_vm9 = vcmp.eq.f32.partialorder %v10443_v25, inf  ;;  %v10490_v5 = vand.u32 2147483648, %v10443_v25  ;;  %vm10489_vm10 = vcmp.eq.f32.partialorder %v10443_v25, 0.0 }
 0x764   : > { %13347 = vmatpush2.bf16.msra.mxu0 %v21849_v4  ;;  %13307 = vmatprep.subr.bf16.mxu1 %v21854_v18  ;;  %v7693_v39 = vrot.slane %v23148_v30, %v7692_v24  ;;  %v10470_v4 = vsel %vm10468_vm13, %v10469_v52, %v10467_v44  ;;  %v21935_v18 = vld [vmem:[%s30680_s15 + $0x8e4] ss:$16 sps:$4 sm:$0xff]  }
 0x765   : > { %13348 = vmatprep.subr.bf16.mxu0 %v21857_v48  ;;  %v21888_v48 = vld [vmem:[%s30680_s15 + $0x6e0] ss:$16 sps:$4 sm:$0xff]  }
 0x767   : > { %13308 = vmatpush2.bf16.msra.mxu1 %v21852_v17  ;;  %v9942_v17 = vpop.f32.mrf.mxu0 }
 0x768   : > { %13349 = vmatpush2.bf16.msra.mxu0 %v21855_v15  ;;  %13309 = vmatprep.subr.bf16.mxu1 %v21860_v20  ;;  %v27835_v15 = vpack.c.bf16 %v10470_v4, %v10470_v4  ;;  %v21933_v20 = vld [vmem:[%s30680_s15 + $0x8e0] ss:$16 sps:$4 sm:$0xff]  }
 0x769   : > { %13350 = vmatprep.subr.bf16.mxu0 %v21863_v27  ;;  %v9939_v27 = vadd.f32 %v9938_v2, %v7693_v39  ;;  %v21942_v2 = vld [vmem:[%s30680_s15 + $0x8a0] ss:$16 sps:$4 sm:$0xff]  }
 0x76b   : > { %13310 = vmatpush2.bf16.msra.mxu1 %v21858_v40 }
 0x76c   : > { %13351 = vmatpush2.bf16.msra.mxu0 %v21861_v58  ;;  %13311 = vmatprep.subr.bf16.mxu1 %v21866_v19  ;;  %v21941_v58 = vld [vmem:[%s30680_s15 + $0x8c4] ss:$16 sps:$4 sm:$0xff]  }
 0x76d   : > { %13352 = vmatprep.subr.bf16.mxu0 %v21869_v36 }
 0x76e   : > { %v23129_v42 = vpop.eup %23128 }
 0x76f   : > { %13312 = vmatpush2.bf16.msra.mxu1 %v21864_v55  ;;  %v10479_v62 = vmul.f32 %v23129_v42, %v27726_v28  ;;  %v21939_v42 = vld [vmem:[%s30680_s15 + $0x8c0] ss:$16 sps:$4 sm:$0xff]  }
 0x770   : > { %v23131_v1 = vpop.eup %23130  ;;  %13353 = vmatpush2.bf16.msra.mxu0 %v21867_v34  ;;  %13313 = vmatprep.subr.bf16.mxu1 %v21872_v0  ;;  %v21891_v34 = vld [vmem:[%s30680_s15 + $0x6c0] ss:$16 sps:$4 sm:$0xff]   ;;  %v9944_v0 = vpop.f32.mrf.mxu0 }
 0x771   : > { %13354 = vmatprep.subr.bf16.mxu0 %v21875_v43  ;;  %v10486_v29 = vmul.f32 %v23131_v1, %v10443_v25  ;;  %v10481_v53 = vsel %vm10480_vm12, %v27726_v28, %v10479_v62  ;;  %v21893_v28 = vld [vmem:[%s30680_s15 + $0x6c4] ss:$16 sps:$4 sm:$0xff]   ;;  %vm17475_vm12 = vcmask 57344  }
 0x772   : > { %v10484_v35 = vsel %vm10482_vm14, %v10483_v54, %v10481_v53  ;;  %v21899_v62 = vld [vmem:[%s30680_s15 + $0x684] ss:$16 sps:$4 sm:$0xff]  }
 0x773   : > { %13314 = vmatpush2.bf16.msra.mxu1 %v21870_v41  ;;  %v10488_v63 = vsel %vm10487_vm9, %v10443_v25, %v10486_v29  ;;  %v7697_v25 = vrot.slane %v23148_v30, %v7696_v51  ;;  %v27843_v40 = vpack.c.bf16 %v10484_v35, %v10484_v35  ;;  %v9943_v41 = vadd.f32 %v9942_v17, %v7693_v39  ;;  %v21902_v53 = vld [vmem:[%s30680_s15 + $0x664] ss:$16 sps:$4 sm:$0xff]  }
 0x774   : > { %13355 = vmatpush2.bf16.msra.mxu0 %v21873_v22  ;;  %13315 = vmatprep.subr.bf16.mxu1 %v21878_v60  ;;  %v10491_v33 = vsel %vm10489_vm10, %v10490_v5, %v10488_v63  ;;  %v21944_v22 = vld [vmem:[%s30680_s15 + $0x8a4] ss:$16 sps:$4 sm:$0xff]  }
 0x775   : > { %13356 = vmatprep.subr.bf16.mxu0 %v21881_v47  ;;  %v27802_v46 = vpack.c.bf16 %v10491_v33, %v10491_v33  ;;  %v9941_v36 = vadd.f32 %v9940_v31, %v7697_v25  ;;  %v9945_v47 = vadd.f32 %v9944_v0, %v7697_v25  ;;  %v21945_v31 = vld [vmem:[%s30680_s15 + $0x880] ss:$16 sps:$4 sm:$0xff]   ;;  %v21950_v39 = vld [vmem:[%s30680_s15 + $0x864] ss:$16 sps:$4 sm:$0xff]  }
 0x776   : > { %v21905_v17 = vld [vmem:[%s30680_s15 + $0x644] ss:$16 sps:$4 sm:$0xff]  }
 0x777   : > { %13316 = vmatpush2.bf16.msra.mxu1 %v21876_v13  ;;  %13360 = vmatprep.mubr.bf16.mxu0 %v27802_v46 }
 0x778   : > { %13357 = vmatpush2.bf16.msra.mxu0 %v21879_v3  ;;  %13317 = vmatprep.subr.bf16.mxu1 %v21884_v37  ;;  %v21947_v37 = vld [vmem:[%s30680_s15 + $0x884] ss:$16 sps:$4 sm:$0xff]  }
 0x779   : > { %13358 = vmatprep.subr.bf16.mxu0 %v21887_v6 }
 0x77b   : > { %13318 = vmatpush2.bf16.msra.mxu1 %v21882_v56  ;;  %v21897_v56 = vld [vmem:[%s30680_s15 + $0x680] ss:$16 sps:$4 sm:$0xff]  }
 0x77c   : > { %13359 = vmatpush2.bf16.msra.mxu0 %v21885_v11  ;;  %13369 = vmatprep.subr.bf16.mxu1 %v21890_v57 }
 0x77d   : > { %13410 = vmatprep.subr.bf16.mxu0 %v21935_v18 }
 0x77e   : > { %v9981_v19 = vpop.f32.mrf.mxu1  ;;  %13320 = vmatmul.mubr.bf16.vlgmr.msra.gmra.mxu1 %v27835_v15 }
 0x77f   : > { %v9982_v55 = vadd.f32 %v9981_v19, %v9939_v27  ;;  %13361 = vmatmul.mubr.bf16.vlgmr.msra.gmra.mxu0 %v27843_v40  ;;  %13370 = vmatpush1.bf16.msra.mxu1 %v21888_v48  ;;  %v21900_v48 = vld [vmem:[%s30680_s15 + $0x660] ss:$16 sps:$4 sm:$0xff]  }
 0x780   : > { %v9983_v43 = vpop.f32.mrf.mxu1  ;;  %13371 = vmatprep.subr.bf16.mxu1 %v21893_v28  ;;  %13411 = vmatpush1.bf16.msra.mxu0 %v21933_v20  ;;  %v21948_v28 = vld [vmem:[%s30680_s15 + $0x860] ss:$16 sps:$4 sm:$0xff]  }
 0x781   : > { %v9984_v1 = vadd.f32 %v9983_v43, %v9941_v36  ;;  %13412 = vmatprep.subr.bf16.mxu0 %v21941_v58  ;;  %v10168_v29 = vmax.f32 %v9982_v55, 0.0  ;;  %v21953_v36 = vld [vmem:[%s30680_s15 + $0x844] ss:$16 sps:$4 sm:$0xff]  }
 0x782   : > { %v9985_v60 = vpop.f32.mrf.mxu1 }
 0x783   : > { %v9986_v5 = vadd.f32 %v9985_v60, %v9943_v41  ;;  %13372 = vmatpush1.bf16.msra.mxu1 %v21891_v34  ;;  %v10169_v13 = vmax.f32 %v9984_v1, 0.0  ;;  %v10276_v24 = vmul.f32 %v10168_v29, %v10168_v29  ;;  %v21951_v41 = vld [vmem:[%s30680_s15 + $0x840] ss:$16 sps:$4 sm:$0xff]  }
 0x784   : > { %v9987_v63 = vpop.f32.mrf.mxu1  ;;  %13373 = vmatprep.subr.bf16.mxu1 %v21896_v38  ;;  %13413 = vmatpush1.bf16.msra.mxu0 %v21939_v42  ;;  %v21903_v38 = vld [vmem:[%s30680_s15 + $0x640] ss:$16 sps:$4 sm:$0xff]   ;;  %v21908_v42 = vld [vmem:[%s30680_s15 + $0x624] ss:$16 sps:$4 sm:$0xff]  }
 0x785   : > { %v10180_v3 = vmax.f32 %v9986_v5, 0.0  ;;  %v9988_v33 = vadd.f32 %v9987_v63, %v9945_v47  ;;  %13414 = vmatprep.subr.bf16.mxu0 %v21944_v22  ;;  %v10277_v52 = vmul.f32 %v10169_v13, %v10169_v13  ;;  %v21906_v63 = vld [vmem:[%s30680_s15 + $0x620] ss:$16 sps:$4 sm:$0xff]  }
 0x787   : > { %v10228_v6 = vadd.f32 %v10180_v3, %v10168_v29  ;;  %v10288_v44 = vmul.f32 %v10180_v3, %v10180_v3  ;;  %v10181_v51 = vmax.f32 %v9988_v33, 0.0  ;;  %13374 = vmatpush1.bf16.msra.mxu1 %v21894_v49  ;;  %v21956_v29 = vld [vmem:[%s30680_s15 + $0x824] ss:$16 sps:$4 sm:$0xff]  }
 0x788   : > { %13375 = vmatprep.subr.bf16.mxu1 %v21899_v62  ;;  %13415 = vmatpush1.bf16.msra.mxu0 %v21942_v2  ;;  %v21911_v62 = vld [vmem:[%s30680_s15 + $0x604] ss:$16 sps:$4 sm:$0xff]   ;;  %v21954_v2 = vld [vmem:[%s30680_s15 + $0x820] ss:$16 sps:$4 sm:$0xff]  }
 0x789   : > { %v10229_v11 = vrot.slane %v10228_v6, 4  ;;  %v10336_v57 = vadd.f32 %v10288_v44, %v10276_v24  ;;  %v10235_v54 = vadd.f32 %v10181_v51, %v10169_v13  ;;  %v10289_v30 = vmul.f32 %v10181_v51, %v10181_v51  ;;  %13416 = vmatprep.subr.bf16.mxu0 %v21947_v37  ;;  %v21959_v24 = vld [vmem:[%s30680_s15 + $0x804] ss:$16 sps:$4 sm:$0xff]  }
 0x78b   : > { %v10230_v4 = vadd.f32 %v10229_v11, %v10228_v6  ;;  %v10337_v18 = vrot.slane %v10336_v57, 4  ;;  %v10236_v35 = vrot.slane %v10235_v54, 4  ;;  %v10343_v25 = vadd.f32 %v10289_v30, %v10277_v52  ;;  %13376 = vmatpush1.bf16.msra.mxu1 %v21897_v56  ;;  %v21909_v56 = vld [vmem:[%s30680_s15 + $0x600] ss:$16 sps:$4 sm:$0xff]   ;;  %v21914_v52 = vld [vmem:[%s30680_s15 + $0x7e4] ss:$16 sps:$4 sm:$0xff]  }
 0x78c   : > { %13377 = vmatprep.subr.bf16.mxu1 %v21902_v53  ;;  %13417 = vmatpush1.bf16.msra.mxu0 %v21945_v31  ;;  %v21957_v53 = vld [vmem:[%s30680_s15 + $0x800] ss:$16 sps:$4 sm:$0xff]  }
 0x78d   : > { %v10231_v20 = vrot.slane %v10230_v4, 2  ;;  %v10338_v27 = vadd.f32 %v10337_v18, %v10336_v57  ;;  %v10237_v58 = vadd.f32 %v10236_v35, %v10235_v54  ;;  %v10344_v19 = vrot.slane %v10343_v25, 4  ;;  %13418 = vmatprep.subr.bf16.mxu0 %v21950_v39  ;;  %v21962_v54 = vld [vmem:[%s30680_s15 + $0x9e4] ss:$16 sps:$4 sm:$0xff]   ;;  %v21912_v18 = vld [vmem:[%s30680_s15 + $0x7e0] ss:$16 sps:$4 sm:$0xff]  }
 0x78e   : > { %v21917_v35 = vld [vmem:[%s30680_s15 + $0x7c4] ss:$16 sps:$4 sm:$0xff]  }
 0x78f   : > { %v10232_v55 = vadd.f32 %v10231_v20, %v10230_v4  ;;  %v10339_v34 = vrot.slane %v10338_v27, 2  ;;  %v10238_v0 = vrot.slane %v10237_v58, 2  ;;  %v10345_v43 = vadd.f32 %v10344_v19, %v10343_v25  ;;  %13378 = vmatpush1.bf16.msra.mxu1 %v21900_v48  ;;  %v21960_v25 = vld [vmem:[%s30680_s15 + $0x9e0] ss:$16 sps:$4 sm:$0xff]   ;;  %v21920_v19 = vld [vmem:[%s30680_s15 + $0x7a4] ss:$16 sps:$4 sm:$0xff]  }
 0x790   : > { %13379 = vmatprep.subr.bf16.mxu1 %v21905_v17  ;;  %13419 = vmatpush1.bf16.msra.mxu0 %v21948_v28  ;;  %v21965_v28 = vld [vmem:[%s30680_s15 + $0x9c4] ss:$16 sps:$4 sm:$0xff]  }
 0x791   : > { %v10233_v1 = vrot.slane %v10232_v55, 1  ;;  %v10340_v22 = vadd.f32 %v10339_v34, %v10338_v27  ;;  %v10239_v60 = vadd.f32 %v10238_v0, %v10237_v58  ;;  %v10346_v47 = vrot.slane %v10345_v43, 2  ;;  %13420 = vmatprep.subr.bf16.mxu0 %v21953_v36  ;;  %v21915_v58 = vld [vmem:[%s30680_s15 + $0x7c0] ss:$16 sps:$4 sm:$0xff]   ;;  %v21968_v34 = vld [vmem:[%s30680_s15 + $0x9a4] ss:$16 sps:$4 sm:$0xff]  }
 0x792   : > { %v21963_v36 = vld [vmem:[%s30680_s15 + $0x9c0] ss:$16 sps:$4 sm:$0xff]  }
 0x793   : > { %v10234_v5 = vadd.f32 %v10233_v1, %v10232_v55  ;;  %v10240_v49 = vrot.slane %v10239_v60, 1  ;;  %v10347_v13 = vadd.f32 %v10346_v47, %v10345_v43  ;;  %13380 = vmatpush1.bf16.msra.mxu1 %v21903_v38  ;;  %v10341_v3 = vrot.slane %v10340_v22, 1  ;;  %v21918_v0 = vld [vmem:[%s30680_s15 + $0x7a0] ss:$16 sps:$4 sm:$0xff]   ;;  %v21923_v43 = vld [vmem:[%s30680_s15 + $0x784] ss:$16 sps:$4 sm:$0xff]  }
 0x794   : > { %13381 = vmatprep.subr.bf16.mxu1 %v21908_v42  ;;  %13421 = vmatpush1.bf16.msra.mxu0 %v21951_v41  ;;  %v21966_v38 = vld [vmem:[%s30680_s15 + $0x9a0] ss:$16 sps:$4 sm:$0xff]   ;;  %v21971_v42 = vld [vmem:[%s30680_s15 + $0x984] ss:$16 sps:$4 sm:$0xff]  }
 0x795   : > { %v27919_v33 = vmul.f32 0.0625, %v10234_v5  ;;  %v10241_v37 = vadd.f32 %v10240_v49, %v10239_v60  ;;  %13422 = vmatprep.subr.bf16.mxu0 %v21956_v29  ;;  %v10348_v44 = vrot.slane %v10347_v13, 1  ;;  %v10342_v31 = vadd.f32 %v10341_v3, %v10340_v22  ;;  %v21921_v41 = vld [vmem:[%s30680_s15 + $0x780] ss:$16 sps:$4 sm:$0xff]   ;;  %v21926_v1 = vld [vmem:[%s30680_s15 + $0x764] ss:$16 sps:$4 sm:$0xff]  }
 0x796   : > { %v21969_v22 = vld [vmem:[%s30680_s15 + $0x980] ss:$16 sps:$4 sm:$0xff]   ;;  %v21974_v60 = vld [vmem:[%s30680_s15 + $0x964] ss:$16 sps:$4 sm:$0xff]  }
 0x797   : > { %v10396_v6 = vmul.f32 16.0, %v27919_v33  ;;  %v27925_v51 = vmul.f32 0.0625, %v10241_v37  ;;  %13382 = vmatpush1.bf16.msra.mxu1 %v21906_v63  ;;  %v10349_v39 = vadd.f32 %v10348_v44, %v10347_v13  ;;  %v21924_v47 = vld [vmem:[%s30680_s15 + $0x760] ss:$16 sps:$4 sm:$0xff]   ;;  %v21929_v29 = vld [vmem:[%s30680_s15 + $0x744] ss:$16 sps:$4 sm:$0xff]  }
 0x798   : > { %13383 = vmatprep.subr.bf16.mxu1 %v21911_v62  ;;  %13423 = vmatpush1.bf16.msra.mxu0 %v21954_v2  ;;  %v21972_v5 = vld [vmem:[%s30680_s15 + $0x960] ss:$16 sps:$4 sm:$0xff]   ;;  %v21977_v49 = vld [vmem:[%s30680_s15 + $0x944] ss:$16 sps:$4 sm:$0xff]  }
 0x799   : > { %v10408_v11 = vmul.f32 %v10396_v6, %v27919_v33  ;;  %v10397_v57 = vmul.f32 16.0, %v27925_v51  ;;  %13424 = vmatprep.subr.bf16.mxu0 %v21959_v24  ;;  %v21927_v63 = vld [vmem:[%s30680_s15 + $0x740] ss:$16 sps:$4 sm:$0xff]   ;;  %v21932_v2 = vld [vmem:[%s30680_s15 + $0x724] ss:$16 sps:$4 sm:$0xff]  }
 0x79a   : > { %v21975_v3 = vld [vmem:[%s30680_s15 + $0x940] ss:$16 sps:$4 sm:$0xff]   ;;  %v21980_v24 = vld [vmem:[%s30680_s15 + $0x924] ss:$16 sps:$4 sm:$0xff]  }
 0x79b   : > { %v10420_v30 = vsub.f32 %v10342_v31, %v10408_v11  ;;  %v10409_v4 = vmul.f32 %v10397_v57, %v27925_v51  ;;  %13384 = vmatpush1.bf16.msra.mxu1 %v21909_v56  ;;  %v21930_v56 = vld [vmem:[%s30680_s15 + $0x720] ss:$16 sps:$4 sm:$0xff]   ;;  %v21938_v11 = vld [vmem:[%s30680_s15 + $0x704] ss:$16 sps:$4 sm:$0xff]  }
 0x79c   : > { %13385 = vmatprep.subr.bf16.mxu1 %v21914_v52  ;;  %13425 = vmatpush1.bf16.msra.mxu0 %v21957_v53  ;;  %v10024_v53 = vpop.f32.mrf.mxu0  ;;  %v21978_v57 = vld [vmem:[%s30680_s15 + $0x920] ss:$16 sps:$4 sm:$0xff]  }
 0x79d   : > { %v10432_v48 = vmul.f32 0.06666667, %v10420_v30  ;;  %v10421_v17 = vsub.f32 %v10349_v39, %v10409_v4  ;;  %13426 = vmatprep.subr.bf16.mxu0 %v21962_v54  ;;  %v21983_v30 = vld [vmem:[%s30680_s15 + $0x904] ss:$16 sps:$4 sm:$0xff]   ;;  %v28036_v39 = vld [vmem:[%s30678_s13 + $0x8] sm:$0xf] }
 0x79f   : > { %v27954_v20 = vmax.f32 %v10432_v48, 0.0  ;;  %v10433_v27 = vmul.f32 0.06666667, %v10421_v17  ;;  %13386 = vmatpush2.bf16.msra.mxu1 %v21912_v18  ;;  %v21936_v18 = vld [vmem:[%s30680_s15 + $0x700] ss:$16 sps:$4 sm:$0xff]  }
 0x7a0   : > { %13387 = vmatprep.subr.bf16.mxu1 %v21917_v35  ;;  %13427 = vmatpush2.bf16.msra.mxu0 %v21960_v25  ;;  %v10026_v25 = vpop.f32.mrf.mxu0  ;;  %v21981_v48 = vld [vmem:[%s30680_s15 + $0x900] ss:$16 sps:$4 sm:$0xff]   ;;  %v21986_v17 = vld [vmem:[%s30680_s15 + $0xae4] ss:$16 sps:$4 sm:$0xff]  }
 0x7a1   : > { %v10445_v55 = vmax.f32 %v10433_v27, 0.0  ;;  %13428 = vmatprep.subr.bf16.mxu0 %v21965_v28  ;;  %23132 = vrsqrt.f32 %v27954_v20  ;;  %vm10494_vm1 = vcmp.eq.f32.partialorder %v27954_v20, inf  ;;  %v10497_v35 = vand.u32 2147483648, %v27954_v20 }
 0x7a2   : > { %vm10496_vm2 = vcmp.eq.f32.partialorder %v27954_v20, 0.0  ;;  %v7701_v28 = vrot.slane %v28036_v39, %v23828_v12 }
 0x7a3   : > { %13388 = vmatpush2.bf16.msra.mxu1 %v21915_v58  ;;  %23134 = vrsqrt.f32 %v10445_v55  ;;  %vm10501_vm15 = vcmp.eq.f32.partialorder %v10445_v55, inf  ;;  %v10504_v6 = vand.u32 2147483648, %v10445_v55  ;;  %vm10503_vm0 = vcmp.eq.f32.partialorder %v10445_v55, 0.0  ;;  %v21989_v58 = vld [vmem:[%s30680_s15 + $0xec] ss:$16 sps:$4 sm:$0xff]  }
 0x7a4   : > { %13389 = vmatprep.subr.bf16.mxu1 %v21920_v19  ;;  %13429 = vmatpush2.bf16.msra.mxu0 %v21963_v36  ;;  %v21984_v19 = vld [vmem:[%s30680_s15 + $0xae0] ss:$16 sps:$4 sm:$0xff]   ;;  %v10028_v36 = vpop.f32.mrf.mxu0 }
 0x7a5   : > { %13430 = vmatprep.subr.bf16.mxu0 %v21968_v34  ;;  %v21992_v34 = vld [vmem:[%s30680_s15 + $0xac4] ss:$16 sps:$4 sm:$0xff]  }
 0x7a7   : > { %13390 = vmatpush2.bf16.msra.mxu1 %v21918_v0  ;;  %v10025_v0 = vadd.f32 %v10024_v53, %v7701_v28 }
 0x7a8   : > { %13391 = vmatprep.subr.bf16.mxu1 %v21923_v43  ;;  %13431 = vmatpush2.bf16.msra.mxu0 %v21966_v38 }
 0x7a9   : > { %13432 = vmatprep.subr.bf16.mxu0 %v21971_v42 }
 0x7ab   : > { %13392 = vmatpush2.bf16.msra.mxu1 %v21921_v41  ;;  %v21990_v41 = vld [vmem:[%s30680_s15 + $0xac0] ss:$16 sps:$4 sm:$0xff]  }
 0x7ac   : > { %13393 = vmatprep.subr.bf16.mxu1 %v21926_v1  ;;  %13433 = vmatpush2.bf16.msra.mxu0 %v21969_v22  ;;  %v10030_v1 = vpop.f32.mrf.mxu0 }
 0x7ad   : > { %13434 = vmatprep.subr.bf16.mxu0 %v21974_v60  ;;  %v21998_v60 = vld [vmem:[%s30680_s15 + $0xaa4] ss:$16 sps:$4 sm:$0xff]  }
 0x7ae   : > { %v23133_v13 = vpop.eup %23132 }
 0x7af   : > { %13394 = vmatpush2.bf16.msra.mxu1 %v21924_v47  ;;  %v10493_v44 = vmul.f32 %v23133_v13, %v27954_v20  ;;  %v10029_v47 = vadd.f32 %v10028_v36, %v7701_v28 }
 0x7b0   : > { %v23135_v62 = vpop.eup %23134  ;;  %13395 = vmatprep.subr.bf16.mxu1 %v21929_v29  ;;  %13435 = vmatpush2.bf16.msra.mxu0 %v21972_v5 }
 0x7b1   : > { %v10500_v37 = vmul.f32 %v23135_v62, %v10445_v55  ;;  %13436 = vmatprep.subr.bf16.mxu0 %v21977_v49  ;;  %v10495_v4 = vsel %vm10494_vm1, %v27954_v20, %v10493_v44  ;;  %v7705_v20 = vrot.slane %v28036_v39, %v23819_v9  ;;  %v21996_v62 = vld [vmem:[%s30680_s15 + $0xaa0] ss:$16 sps:$4 sm:$0xff]  }
 0x7b2   : > { %v10498_v27 = vsel %vm10496_vm2, %v10497_v35, %v10495_v4 }
 0x7b3   : > { %13396 = vmatpush2.bf16.msra.mxu1 %v21927_v63  ;;  %v10502_v52 = vsel %vm10501_vm15, %v10445_v55, %v10500_v37  ;;  %v28061_v55 = vpack.c.bf16 %v10498_v27, %v10498_v27  ;;  %v10027_v38 = vadd.f32 %v10026_v25, %v7705_v20  ;;  %v10031_v49 = vadd.f32 %v10030_v1, %v7705_v20  ;;  %v22004_v37 = vld [vmem:[%s30680_s15 + $0xa84] ss:$16 sps:$4 sm:$0xff]   ;;  %v22008_v27 = vld [vmem:[%s30680_s15 + $0xa60] ss:$16 sps:$4 sm:$0xff]  }
 0x7b4   : > { %13397 = vmatprep.subr.bf16.mxu1 %v21932_v2  ;;  %v10505_v31 = vsel %vm10503_vm0, %v10504_v6, %v10502_v52  ;;  %13437 = vmatpush2.bf16.msra.mxu0 %v21975_v3  ;;  %v22022_v1 = vld [vmem:[%s30680_s15 + $0xa24] ss:$16 sps:$4 sm:$0xff]  }
 0x7b5   : > { %v28027_v54 = vpack.c.bf16 %v10505_v31, %v10505_v31  ;;  %13438 = vmatprep.subr.bf16.mxu0 %v21980_v24  ;;  %v22002_v31 = vld [vmem:[%s30680_s15 + $0xa80] ss:$16 sps:$4 sm:$0xff]  }
 0x7b7   : > { %13398 = vmatpush2.bf16.msra.mxu1 %v21930_v56  ;;  %13401 = vmatprep.mubr.bf16.mxu1 %v28027_v54 }
 0x7b8   : > { %13399 = vmatprep.subr.bf16.mxu1 %v21938_v11  ;;  %13439 = vmatpush2.bf16.msra.mxu0 %v21978_v57  ;;  %v22010_v57 = vld [vmem:[%s30680_s15 + $0xa64] ss:$16 sps:$4 sm:$0xff]  }
 0x7b9   : > { %13440 = vmatprep.subr.bf16.mxu0 %v21983_v30 }
 0x7bb   : > { %13400 = vmatpush2.bf16.msra.mxu1 %v21936_v18 }
 0x7bc   : > { %13441 = vmatpush2.bf16.msra.mxu0 %v21981_v48  ;;  %13451 = vmatprep.subr.bf16.mxu1 %v21986_v17 }
 0x7bd   : > { %13492 = vmatprep.subr.bf16.mxu0 %v21989_v58  ;;  %v22016_v58 = vld [vmem:[%s30680_s15 + $0xa44] ss:$16 sps:$4 sm:$0xff]  }
 0x7be   : > { %v10067_v43 = vpop.f32.mrf.mxu1  ;;  %13402 = vmatmul.mubr.bf16.vlgmr.msra.gmra.mxu1 %v28061_v55 }
 0x7bf   : > { %v10068_v42 = vadd.f32 %v10067_v43, %v10025_v0  ;;  %13452 = vmatpush1.bf16.msra.mxu1 %v21984_v19 }
 0x7c0   : > { %v10069_v22 = vpop.f32.mrf.mxu1  ;;  %13453 = vmatprep.subr.bf16.mxu1 %v21992_v34 }
 0x7c1   : > { %v10070_v29 = vadd.f32 %v10069_v22, %v10027_v38  ;;  %v10170_v13 = vmax.f32 %v10068_v42, 0.0 }
 0x7c2   : > { %v10071_v5 = vpop.f32.mrf.mxu1 }
 0x7c3   : > { %v10072_v63 = vadd.f32 %v10071_v5, %v10029_v47  ;;  %13454 = vmatpush1.bf16.msra.mxu1 %v21990_v41  ;;  %v10171_v2 = vmax.f32 %v10070_v29, 0.0  ;;  %v10278_v44 = vmul.f32 %v10170_v13, %v10170_v13  ;;  %v22014_v41 = vld [vmem:[%s30680_s15 + $0xa40] ss:$16 sps:$4 sm:$0xff]  }
 0x7c4   : > { %v10073_v3 = vpop.f32.mrf.mxu1  ;;  %13455 = vmatprep.subr.bf16.mxu1 %v21998_v60 }
 0x7c5   : > { %v10182_v24 = vmax.f32 %v10072_v63, 0.0  ;;  %v10074_v6 = vadd.f32 %v10073_v3, %v10031_v49  ;;  %v10279_v11 = vmul.f32 %v10171_v2, %v10171_v2  ;;  %v22020_v63 = vld [vmem:[%s30680_s15 + $0xa20] ss:$16 sps:$4 sm:$0xff]  }
 0x7c7   : > { %v10242_v56 = vadd.f32 %v10182_v24, %v10170_v13  ;;  %v10290_v52 = vmul.f32 %v10182_v24, %v10182_v24  ;;  %v10183_v53 = vmax.f32 %v10074_v6, 0.0  ;;  %13456 = vmatpush1.bf16.msra.mxu1 %v21996_v62  ;;  %v22028_v62 = vld [vmem:[%s30680_s15 + $0xa04] ss:$16 sps:$4 sm:$0xff]  }
 0x7c8   : > { %13457 = vmatprep.subr.bf16.mxu1 %v22004_v37 }
 0x7c9   : > { %v10243_v30 = vrot.slane %v10242_v56, 4  ;;  %v10350_v4 = vadd.f32 %v10290_v52, %v10278_v44  ;;  %v10249_v18 = vadd.f32 %v10183_v53, %v10171_v2  ;;  %v10291_v35 = vmul.f32 %v10183_v53, %v10183_v53  ;;  %v22034_v52 = vld [vmem:[%s30680_s15 + $0xbe4] ss:$16 sps:$4 sm:$0xff]  }
 0x7cb   : > { %v10244_v25 = vadd.f32 %v10243_v30, %v10242_v56  ;;  %v10351_v48 = vrot.slane %v10350_v4, 4  ;;  %v10250_v17 = vrot.slane %v10249_v18, 4  ;;  %v10357_v28 = vadd.f32 %v10291_v35, %v10279_v11  ;;  %13458 = vmatpush1.bf16.msra.mxu1 %v22002_v31  ;;  %v22026_v56 = vld [vmem:[%s30680_s15 + $0xa00] ss:$16 sps:$4 sm:$0xff]   ;;  %v22040_v35 = vld [vmem:[%s30680_s15 + $0xbc4] ss:$16 sps:$4 sm:$0xff]  }
 0x7cc   : > { %13459 = vmatprep.subr.bf16.mxu1 %v22010_v57 }
 0x7cd   : > { %v10245_v20 = vrot.slane %v10244_v25, 2  ;;  %v10352_v19 = vadd.f32 %v10351_v48, %v10350_v4  ;;  %v10251_v36 = vadd.f32 %v10250_v17, %v10249_v18  ;;  %v10358_v34 = vrot.slane %v10357_v28, 4  ;;  %v22032_v18 = vld [vmem:[%s30680_s15 + $0xbe0] ss:$16 sps:$4 sm:$0xff]  }
 0x7cf   : > { %v10246_v0 = vadd.f32 %v10245_v20, %v10244_v25  ;;  %v10353_v43 = vrot.slane %v10352_v19, 2  ;;  %v10252_v38 = vrot.slane %v10251_v36, 2  ;;  %v10359_v42 = vadd.f32 %v10358_v34, %v10357_v28  ;;  %13460 = vmatpush1.bf16.msra.mxu1 %v22008_v27  ;;  %v22038_v27 = vld [vmem:[%s30680_s15 + $0xbc0] ss:$16 sps:$4 sm:$0xff]  }
 0x7d0   : > { %13461 = vmatprep.subr.bf16.mxu1 %v22016_v58  ;;  %v22046_v58 = vld [vmem:[%s30680_s15 + $0xba4] ss:$16 sps:$4 sm:$0xff]   ;;  %v22050_v34 = vld [vmem:[%s30680_s15 + $0xb80] ss:$16 sps:$4 sm:$0xff]  }
 0x7d1   : > { %v10247_v22 = vrot.slane %v10246_v0, 1  ;;  %v10354_v60 = vadd.f32 %v10353_v43, %v10352_v19  ;;  %v10253_v47 = vadd.f32 %v10252_v38, %v10251_v36  ;;  %v10360_v29 = vrot.slane %v10359_v42, 2  ;;  %v22044_v19 = vld [vmem:[%s30680_s15 + $0xba0] ss:$16 sps:$4 sm:$0xff]   ;;  %v22052_v36 = vld [vmem:[%s30680_s15 + $0xb84] ss:$16 sps:$4 sm:$0xff]  }
 0x7d2   : > { %v22056_v43 = vld [vmem:[%s30680_s15 + $0xb60] ss:$16 sps:$4 sm:$0xff]   ;;  %v22064_v38 = vld [vmem:[%s30680_s15 + $0xb44] ss:$16 sps:$4 sm:$0xff]  }
 0x7d3   : > { %v10248_v5 = vadd.f32 %v10247_v22, %v10246_v0  ;;  %v10254_v49 = vrot.slane %v10253_v47, 1  ;;  %v10361_v13 = vadd.f32 %v10360_v29, %v10359_v42  ;;  %13462 = vmatpush1.bf16.msra.mxu1 %v22014_v41  ;;  %v10355_v2 = vrot.slane %v10354_v60, 1  ;;  %v22058_v0 = vld [vmem:[%s30680_s15 + $0xb64] ss:$16 sps:$4 sm:$0xff]  }
 0x7d4   : > { %13463 = vmatprep.subr.bf16.mxu1 %v22022_v1  ;;  %v22062_v1 = vld [vmem:[%s30680_s15 + $0xb40] ss:$16 sps:$4 sm:$0xff]  }
 0x7d5   : > { %v28103_v3 = vmul.f32 0.0625, %v10248_v5  ;;  %v10255_v37 = vadd.f32 %v10254_v49, %v10253_v47  ;;  %v10362_v6 = vrot.slane %v10361_v13, 1  ;;  %v10356_v53 = vadd.f32 %v10355_v2, %v10354_v60  ;;  %v22070_v60 = vld [vmem:[%s30680_s15 + $0xb24] ss:$16 sps:$4 sm:$0xff]   ;;  %v10110_v47 = vpop.f32.mrf.mxu0  ;;  %v22068_v2 = vld [vmem:[%s30680_s15 + $0xb20] ss:$16 sps:$4 sm:$0xff]  }
 0x7d7   : > { %v10398_v24 = vmul.f32 16.0, %v28103_v3  ;;  %v28106_v44 = vmul.f32 0.0625, %v10255_v37  ;;  %13464 = vmatpush1.bf16.msra.mxu1 %v22020_v63  ;;  %v10363_v30 = vadd.f32 %v10362_v6, %v10361_v13  ;;  %v10112_v6 = vpop.f32.mrf.mxu0 }
 0x7d8   : > { %13465 = vmatprep.subr.bf16.mxu1 %v22028_v62 }
 0x7d9   : > { %v10410_v31 = vmul.f32 %v10398_v24, %v28103_v3  ;;  %v10399_v11 = vmul.f32 16.0, %v28106_v44  ;;  %v22076_v24 = vld [vmem:[%s30680_s15 + $0xb04] ss:$16 sps:$4 sm:$0xff]  }
 0x7db   : > { %v10422_v57 = vsub.f32 %v10356_v53, %v10410_v31  ;;  %v10411_v4 = vmul.f32 %v10399_v11, %v28106_v44  ;;  %13466 = vmatpush1.bf16.msra.mxu1 %v22026_v56  ;;  %v21995_v31 = vld [vmem:[%s30680_s15 + $0xcc] ss:$16 sps:$4 sm:$0xff]   ;;  %v22074_v11 = vld [vmem:[%s30680_s15 + $0xb00] ss:$16 sps:$4 sm:$0xff]  }
 0x7dc   : > { %13467 = vmatprep.subr.bf16.mxu1 %v22034_v52  ;;  %v21987_v52 = vld [vmem:[%s30680_s15 + $0xe8] ss:$16 sps:$4 sm:$0xff]  }
 0x7dd   : > { %v10434_v25 = vmul.f32 0.06666667, %v10422_v57  ;;  %v10423_v48 = vsub.f32 %v10363_v30, %v10411_v4  ;;  %v22082_v57 = vld [vmem:[%s30680_s15 + $0x2ec] ss:$16 sps:$4 sm:$0xff]   ;;  %v7709_v30 = vrot.slane %v28036_v39, %v23831_v14  ;;  %v10114_v4 = vpop.f32.mrf.mxu0 }
 0x7df   : > { %v10446_v17 = vmax.f32 %v10434_v25, 0.0  ;;  %v10435_v28 = vmul.f32 0.06666667, %v10423_v48  ;;  %13468 = vmatpush2.bf16.msra.mxu1 %v22032_v18  ;;  %v21993_v18 = vld [vmem:[%s30680_s15 + $0xc8] ss:$16 sps:$4 sm:$0xff]   ;;  %v7713_v25 = vrot.slane %v28036_v39, %v23822_v10  ;;  %v10111_v48 = vadd.f32 %v10110_v47, %v7709_v30 }
 0x7e0   : > { %13469 = vmatprep.subr.bf16.mxu1 %v22040_v35  ;;  %v22001_v35 = vld [vmem:[%s30680_s15 + $0xac] ss:$16 sps:$4 sm:$0xff]  }
 0x7e1   : > { %23136 = vrsqrt.f32 %v10446_v17  ;;  %v10447_v20 = vmax.f32 %v10435_v28, 0.0  ;;  %vm10508_vm3 = vcmp.eq.f32.partialorder %v10446_v17, inf  ;;  %v10511_v49 = vand.u32 2147483648, %v10446_v17 }
 0x7e2   : > { %vm10510_vm5 = vcmp.eq.f32.partialorder %v10446_v17, 0.0 }
 0x7e3   : > { %23138 = vrsqrt.f32 %v10447_v20  ;;  %13470 = vmatpush2.bf16.msra.mxu1 %v22038_v27  ;;  %vm10515_vm4 = vcmp.eq.f32.partialorder %v10447_v20, inf  ;;  %v10518_v13 = vand.u32 2147483648, %v10447_v20  ;;  %vm10517_vm6 = vcmp.eq.f32.partialorder %v10447_v20, 0.0  ;;  %v22007_v27 = vld [vmem:[%s30680_s15 + $0x8c] ss:$16 sps:$4 sm:$0xff]  }
 0x7e4   : > { %13471 = vmatprep.subr.bf16.mxu1 %v22046_v58  ;;  %v10113_v58 = vadd.f32 %v10112_v6, %v7713_v25 }
 0x7e7   : > { %13472 = vmatpush2.bf16.msra.mxu1 %v22044_v19 }
 0x7e8   : > { %13473 = vmatprep.subr.bf16.mxu1 %v22052_v36  ;;  %v10115_v36 = vadd.f32 %v10114_v4, %v7709_v30  ;;  %v22017_v4 = vld [vmem:[%s30680_s15 + $0x48] ss:$16 sps:$4 sm:$0xff]  }
 0x7eb   : > { %13474 = vmatpush2.bf16.msra.mxu1 %v22050_v34 }
 0x7ec   : > { %13475 = vmatprep.subr.bf16.mxu1 %v22058_v0 }
 0x7ee   : > { %v23137_v42 = vpop.eup %23136 }
 0x7ef   : > { %v10507_v41 = vmul.f32 %v23137_v42, %v10446_v17  ;;  %13476 = vmatpush2.bf16.msra.mxu1 %v22056_v43  ;;  %v22005_v43 = vld [vmem:[%s30680_s15 + $0x88] ss:$16 sps:$4 sm:$0xff]   ;;  %v22013_v42 = vld [vmem:[%s30680_s15 + $0x6c] ss:$16 sps:$4 sm:$0xff]  }
 0x7f0   : > { %v23139_v22 = vpop.eup %23138  ;;  %13477 = vmatprep.subr.bf16.mxu1 %v22064_v38 }
 0x7f1   : > { %v10514_v29 = vmul.f32 %v23139_v22, %v10447_v20  ;;  %v10509_v5 = vsel %vm10508_vm3, %v10446_v17, %v10507_v41  ;;  %v10116_v17 = vpop.f32.mrf.mxu0 }
 0x7f2   : > { %v10512_v62 = vsel %vm10510_vm5, %v10511_v49, %v10509_v5  ;;  %v10117_v41 = vadd.f32 %v10116_v17, %v7713_v25 }
 0x7f3   : > { %v10516_v63 = vsel %vm10515_vm4, %v10447_v20, %v10514_v29  ;;  %13478 = vmatpush2.bf16.msra.mxu1 %v22062_v1  ;;  %v28164_v53 = vpack.c.bf16 %v10512_v62, %v10512_v62  ;;  %v22019_v62 = vld [vmem:[%s30680_s15 + $0x4c] ss:$16 sps:$4 sm:$0xff]  }
 0x7f4   : > { %v10519_v37 = vsel %vm10517_vm6, %v10518_v13, %v10516_v63  ;;  %13479 = vmatprep.subr.bf16.mxu1 %v22070_v60  ;;  %v22011_v63 = vld [vmem:[%s30680_s15 + $0x68] ss:$16 sps:$4 sm:$0xff]  }
 0x7f5   : > { %v28159_v56 = vpack.c.bf16 %v10519_v37, %v10519_v37 }
 0x7f7   : > { %13442 = vmatprep.mubr.bf16.mxu0 %v28159_v56  ;;  %13480 = vmatpush2.bf16.msra.mxu1 %v22068_v2 }
 0x7f8   : > { %13443 = vmatmul.mubr.bf16.vlgmr.msra.gmra.mxu0 %v28164_v53  ;;  %13481 = vmatprep.subr.bf16.mxu1 %v22076_v24 }
 0x7f9   : > { %13493 = vmatpush1.bf16.msra.mxu0 %v21987_v52  ;;  %13524 = vmatprep.mubr.bf16.mxu0 %v27377_v26  ;;  %v21999_v26 = vld [vmem:[%s30680_s15 + $0xa8] ss:$16 sps:$4 sm:$0xff]  }
 0x7fa   : > { %13494 = vmatprep.subr.bf16.mxu0 %v21995_v31 }
 0x7fb   : > { %13482 = vmatpush2.bf16.msra.mxu1 %v22074_v11 }
 0x7fc   : > { %13533 = vmatprep.subr.bf16.mxu1 %v22082_v57 }
 0x7fd   : > { %13495 = vmatpush1.bf16.msra.mxu0 %v21993_v18  ;;  %v22025_v18 = vld [vmem:[%s30680_s15 + $0x2c] ss:$16 sps:$4 sm:$0xff]  }
 0x7fe   : > { %v10153_v28 = vpop.f32.mrf.mxu1  ;;  %13496 = vmatprep.subr.bf16.mxu0 %v22001_v35 }
 0x7ff   : > { %v10154_v20 = vadd.f32 %v10153_v28, %v10111_v48  ;;  %v28194_v19 = vpop.f32.mrf.mxu0 }
 0x800   : > { %v10155_v39 = vpop.f32.mrf.mxu1 }
 0x801   : > { %v10156_v34 = vadd.f32 %v10155_v39, %v10113_v58  ;;  %13497 = vmatpush1.bf16.msra.mxu0 %v21999_v26  ;;  %v28196_v0 = vpop.f32.mrf.mxu0  ;;  %v10172_v1 = vmax.f32 %v10154_v20, 0.0  ;;  %v22023_v20 = vld [vmem:[%s30680_s15 + $0x28] ss:$16 sps:$4 sm:$0xff]   ;;  %v22031_v39 = vld [vmem:[%s30680_s15 + $0xc] ss:$16 sps:$4 sm:$0xff]  }
 0x802   : > { %v10157_v38 = vpop.f32.mrf.mxu1  ;;  %13498 = vmatprep.subr.bf16.mxu0 %v22007_v27 }
 0x803   : > { %v10158_v22 = vadd.f32 %v10157_v38, %v10115_v36  ;;  %v13284_v60 = vpop.f32.mrf.mxu0  ;;  %v10173_v47 = vmax.f32 %v10156_v34, 0.0  ;;  %v10280_v2 = vmul.f32 %v10172_v1, %v10172_v1 }
 0x804   : > { %v10159_v29 = vpop.f32.mrf.mxu1  ;;  %v22029_v60 = vld [vmem:[%s30680_s15 + $0x8] ss:$16 sps:$4 sm:$0xff]  }
 0x805   : > { %v10184_v5 = vmax.f32 %v10158_v22, 0.0  ;;  %v10160_v49 = vadd.f32 %v10159_v29, %v10117_v41  ;;  %13499 = vmatpush1.bf16.msra.mxu0 %v22005_v43  ;;  %v13285_v13 = vpop.f32.mrf.mxu0  ;;  %v10281_v52 = vmul.f32 %v10173_v47, %v10173_v47 }
 0x806   : > { %13500 = vmatprep.subr.bf16.mxu0 %v22013_v42 }
 0x807   : > { %v10256_v37 = vadd.f32 %v10184_v5, %v10172_v1  ;;  %v10292_v24 = vmul.f32 %v10184_v5, %v10184_v5  ;;  %v10185_v6 = vmax.f32 %v10160_v49, 0.0 }
 0x809   : > { %v10257_v31 = vrot.slane %v10256_v37, 4  ;;  %v10364_v11 = vadd.f32 %v10292_v24, %v10280_v2  ;;  %v10263_v57 = vadd.f32 %v10185_v6, %v10173_v47  ;;  %v10293_v30 = vmul.f32 %v10185_v6, %v10185_v6  ;;  %13501 = vmatpush1.bf16.msra.mxu0 %v22011_v63  ;;  %v22037_v47 = vld [vmem:[%s30680_s15 + $0x1ec] ss:$16 sps:$4 sm:$0xff]   ;;  %v22035_v2 = vld [vmem:[%s30680_s15 + $0x1e8] ss:$16 sps:$4 sm:$0xff]  }
 0x80a   : > { %13502 = vmatprep.subr.bf16.mxu0 %v22019_v62 }
 0x80b   : > { %v10258_v35 = vadd.f32 %v10257_v31, %v10256_v37  ;;  %v10365_v25 = vrot.slane %v10364_v11, 4  ;;  %v10264_v48 = vrot.slane %v10263_v57, 4  ;;  %v10371_v17 = vadd.f32 %v10293_v30, %v10281_v52  ;;  %v22043_v37 = vld [vmem:[%s30680_s15 + $0x1cc] ss:$16 sps:$4 sm:$0xff]   ;;  %v22041_v30 = vld [vmem:[%s30680_s15 + $0x1c8] ss:$16 sps:$4 sm:$0xff]  }
 0x80d   : > { %v10259_v26 = vrot.slane %v10258_v35, 2  ;;  %v10366_v28 = vadd.f32 %v10365_v25, %v10364_v11  ;;  %v10265_v27 = vadd.f32 %v10264_v48, %v10263_v57  ;;  %v10372_v58 = vrot.slane %v10371_v17, 4  ;;  %13503 = vmatpush1.bf16.msra.mxu0 %v22017_v4  ;;  %v22049_v4 = vld [vmem:[%s30680_s15 + $0x1ac] ss:$16 sps:$4 sm:$0xff]  }
 0x80e   : > { %13504 = vmatprep.subr.bf16.mxu0 %v22025_v18 }
 0x80f   : > { %v10260_v36 = vadd.f32 %v10259_v26, %v10258_v35  ;;  %v10367_v34 = vrot.slane %v10366_v28, 2  ;;  %v10266_v43 = vrot.slane %v10265_v27, 2  ;;  %v10373_v38 = vadd.f32 %v10372_v58, %v10371_v17  ;;  %v22047_v26 = vld [vmem:[%s30680_s15 + $0x1a8] ss:$16 sps:$4 sm:$0xff]  }
 0x811   : > { %v10261_v42 = vrot.slane %v10260_v36, 1  ;;  %v10368_v41 = vadd.f32 %v10367_v34, %v10366_v28  ;;  %v10267_v1 = vadd.f32 %v10266_v43, %v10265_v27  ;;  %v10374_v22 = vrot.slane %v10373_v38, 2  ;;  %13505 = vmatpush1.bf16.msra.mxu0 %v22023_v20  ;;  %v22055_v28 = vld [vmem:[%s30680_s15 + $0x18c] ss:$16 sps:$4 sm:$0xff]   ;;  %v22059_v34 = vld [vmem:[%s30680_s15 + $0x168] ss:$16 sps:$4 sm:$0xff]  }
 0x812   : > { %13506 = vmatprep.subr.bf16.mxu0 %v22031_v39  ;;  %v22053_v39 = vld [vmem:[%s30680_s15 + $0x188] ss:$16 sps:$4 sm:$0xff]   ;;  %v22067_v43 = vld [vmem:[%s30680_s15 + $0x14c] ss:$16 sps:$4 sm:$0xff]  }
 0x813   : > { %v10262_v29 = vadd.f32 %v10261_v42, %v10260_v36  ;;  %v10268_v5 = vrot.slane %v10267_v1, 1  ;;  %v10375_v49 = vadd.f32 %v10374_v22, %v10373_v38  ;;  %v10369_v13 = vrot.slane %v10368_v41, 1  ;;  %v22061_v36 = vld [vmem:[%s30680_s15 + $0x16c] ss:$16 sps:$4 sm:$0xff]   ;;  %v22065_v38 = vld [vmem:[%s30680_s15 + $0x148] ss:$16 sps:$4 sm:$0xff]  }
 0x814   : > { %v22073_v42 = vld [vmem:[%s30680_s15 + $0x12c] ss:$16 sps:$4 sm:$0xff]  }
 0x815   : > { %v28228_v63 = vmul.f32 0.0625, %v10262_v29  ;;  %v10269_v62 = vadd.f32 %v10268_v5, %v10267_v1  ;;  %13507 = vmatpush1.bf16.msra.mxu0 %v22029_v60  ;;  %v10376_v6 = vrot.slane %v10375_v49, 1  ;;  %v10370_v31 = vadd.f32 %v10369_v13, %v10368_v41  ;;  %v22071_v41 = vld [vmem:[%s30680_s15 + $0x128] ss:$16 sps:$4 sm:$0xff]   ;;  %v22079_v22 = vld [vmem:[%s30680_s15 + $0x10c] ss:$16 sps:$4 sm:$0xff]  }
 0x816   : > { %13508 = vmatprep.subr.bf16.mxu0 %v22037_v47  ;;  %v22077_v29 = vld [vmem:[%s30680_s15 + $0x108] ss:$16 sps:$4 sm:$0xff]  }
 0x817   : > { %v10400_v24 = vmul.f32 16.0, %v28228_v63  ;;  %v28237_v52 = vmul.f32 0.0625, %v10269_v62  ;;  %v10377_v35 = vadd.f32 %v10376_v6, %v10375_v49 }
 0x819   : > { %v10412_v11 = vmul.f32 %v10400_v24, %v28228_v63  ;;  %v10401_v57 = vmul.f32 16.0, %v28237_v52  ;;  %13509 = vmatpush2.bf16.msra.mxu0 %v22035_v2  ;;  %v22085_v2 = vld [vmem:[%s30680_s15 + $0x4ec] ss:$16 sps:$4 sm:$0xff]  }
 0x81a   : > { %13510 = vmatprep.subr.bf16.mxu0 %v22043_v37 }
 0x81b   : > { %v10424_v18 = vsub.f32 %v10370_v31, %v10412_v11  ;;  %v10413_v25 = vmul.f32 %v10401_v57, %v28237_v52  ;;  %v22080_v11 = vld [vmem:[%s30680_s15 + $0x2e8] ss:$16 sps:$4 sm:$0xff]  }
 0x81c   : > { %v22083_v57 = vld [vmem:[%s30680_s15 + $0x4e8] ss:$16 sps:$4 sm:$0xff]  }
 0x81d   : > { %v10436_v48 = vmul.f32 0.06666667, %v10424_v18  ;;  %v10425_v17 = vsub.f32 %v10377_v35, %v10413_v25  ;;  %13511 = vmatpush2.bf16.msra.mxu0 %v22041_v30  ;;  %v22091_v18 = vld [vmem:[%s30680_s15 + $0x4cc] ss:$16 sps:$4 sm:$0xff]   ;;  %v22086_v35 = vld [vmem:[%s30680_s15 + $0x2c8] ss:$16 sps:$4 sm:$0xff]  }
 0x81e   : > { %13512 = vmatprep.subr.bf16.mxu0 %v22049_v4  ;;  %v22088_v4 = vld [vmem:[%s30680_s15 + $0x2cc] ss:$16 sps:$4 sm:$0xff]   ;;  %v22089_v25 = vld [vmem:[%s30680_s15 + $0x4c8] ss:$16 sps:$4 sm:$0xff]  }
 0x81f   : > { %v10448_v27 = vmax.f32 %v10436_v48, 0.0  ;;  %v10437_v58 = vmul.f32 0.06666667, %v10425_v17  ;;  %v22097_v48 = vld [vmem:[%s30680_s15 + $0x4ac] ss:$16 sps:$4 sm:$0xff]  }
 0x820   : > { %v22092_v17 = vld [vmem:[%s30680_s15 + $0x2a8] ss:$16 sps:$4 sm:$0xff]  }
 0x821   : > { %23140 = vrsqrt.f32 %v10448_v27  ;;  %v10449_v20 = vmax.f32 %v10437_v58, 0.0  ;;  %13513 = vmatpush2.bf16.msra.mxu0 %v22047_v26  ;;  %vm10522_vm7 = vcmp.eq.f32.partialorder %v10448_v27, inf  ;;  %v10525_v13 = vand.u32 2147483648, %v10448_v27  ;;  %v22100_v26 = vld [vmem:[%s30680_s15 + $0x28c] ss:$16 sps:$4 sm:$0xff]  }
 0x822   : > { %13514 = vmatprep.subr.bf16.mxu0 %v22055_v28  ;;  %vm10524_vm9 = vcmp.eq.f32.partialorder %v10448_v27, 0.0  ;;  %v22103_v28 = vld [vmem:[%s30680_s15 + $0x48c] ss:$16 sps:$4 sm:$0xff]  }
 0x823   : > { %23142 = vrsqrt.f32 %v10449_v20  ;;  %vm10529_vm8 = vcmp.eq.f32.partialorder %v10449_v20, inf  ;;  %v10532_v62 = vand.u32 2147483648, %v10449_v20  ;;  %vm10531_vm10 = vcmp.eq.f32.partialorder %v10449_v20, 0.0 }
 0x825   : > { %13515 = vmatpush2.bf16.msra.mxu0 %v22053_v39 }
 0x826   : > { %13516 = vmatprep.subr.bf16.mxu0 %v22061_v36 }
 0x829   : > { %13517 = vmatpush2.bf16.msra.mxu0 %v22059_v34 }
 0x82a   : > { %13518 = vmatprep.subr.bf16.mxu0 %v22067_v43  ;;  %v22098_v43 = vld [vmem:[%s30680_s15 + $0x288] ss:$16 sps:$4 sm:$0xff]  }
 0x82d   : > { %13519 = vmatpush2.bf16.msra.mxu0 %v22065_v38  ;;  %v22101_v38 = vld [vmem:[%s30680_s15 + $0x488] ss:$16 sps:$4 sm:$0xff]  }
 0x82e   : > { %v23141_v1 = vpop.eup %23140  ;;  %13520 = vmatprep.subr.bf16.mxu0 %v22073_v42 }
 0x82f   : > { %v10521_v60 = vmul.f32 %v23141_v1, %v10448_v27 }
 0x830   : > { %v23143_v47 = vpop.eup %23142 }
 0x831   : > { %13521 = vmatpush2.bf16.msra.mxu0 %v22071_v41  ;;  %v10528_v5 = vmul.f32 %v23143_v47, %v10449_v20  ;;  %v10523_v49 = vsel %vm10522_vm7, %v10448_v27, %v10521_v60  ;;  %v22104_v47 = vld [vmem:[%s30680_s15 + $0x268] ss:$16 sps:$4 sm:$0xff]  }
 0x832   : > { %13522 = vmatprep.subr.bf16.mxu0 %v22079_v22  ;;  %v10526_v24 = vsel %vm10524_vm9, %v10525_v13, %v10523_v49  ;;  %v22115_v49 = vld [vmem:[%s30680_s15 + $0x44c] ss:$16 sps:$4 sm:$0xff]   ;;  %v22110_v13 = vld [vmem:[%s30680_s15 + $0x248] ss:$16 sps:$4 sm:$0xff]  }
 0x833   : > { %v10530_v37 = vsel %vm10529_vm8, %v10449_v20, %v10528_v5  ;;  %v28292_v30 = vpack.c.bf16 %v10526_v24, %v10526_v24  ;;  %v22112_v5 = vld [vmem:[%s30680_s15 + $0x24c] ss:$16 sps:$4 sm:$0xff]   ;;  %v22116_v24 = vld [vmem:[%s30680_s15 + $0x228] ss:$16 sps:$4 sm:$0xff]  }
 0x834   : > { %v10533_v6 = vsel %vm10531_vm10, %v10532_v62, %v10530_v37  ;;  %v22113_v62 = vld [vmem:[%s30680_s15 + $0x448] ss:$16 sps:$4 sm:$0xff]   ;;  %v22121_v37 = vld [vmem:[%s30680_s15 + $0x42c] ss:$16 sps:$4 sm:$0xff]  }
 0x835   : > { %13523 = vmatpush2.bf16.msra.mxu0 %v22077_v29  ;;  %v28284_v31 = vpack.c.bf16 %v10533_v6, %v10533_v6  ;;  %v22107_v29 = vld [vmem:[%s30680_s15 + $0x468] ss:$16 sps:$4 sm:$0xff]  }
 0x836   : > { %13574 = vmatprep.subr.bf16.mxu0 %v22085_v2  ;;  %v22118_v2 = vld [vmem:[%s30680_s15 + $0x22c] ss:$16 sps:$4 sm:$0xff]   ;;  %v22119_v6 = vld [vmem:[%s30680_s15 + $0x428] ss:$16 sps:$4 sm:$0xff]  }
 0x837   : > { %13483 = vmatprep.mubr.bf16.mxu1 %v28284_v31 }
 0x838   : > { %13525 = vmatmul.mubr.bf16.vlgmr.msra.gmra.mxu0 %v27604_v61  ;;  %13484 = vmatmul.mubr.bf16.vlgmr.msra.gmra.mxu1 %v28292_v30  ;;  %v22094_v61 = vld [vmem:[%s30680_s15 + $0x2ac] ss:$16 sps:$4 sm:$0xff]  }
 0x839   : > { %13534 = vmatpush1.bf16.msra.mxu1 %v22080_v11  ;;  %13575 = vmatpush1.bf16.msra.mxu0 %v22083_v57  ;;  %v22124_v11 = vld [vmem:[%s30680_s15 + $0x20c] ss:$16 sps:$4 sm:$0xff]  }
 0x83a   : > { %13606 = vmatprep.mubr.bf16.mxu0 %v27802_v46  ;;  %13565 = vmatprep.mubr.bf16.mxu1 %v27613_v59  ;;  %v22095_v59 = vld [vmem:[%s30680_s15 + $0x4a8] ss:$16 sps:$4 sm:$0xff]   ;;  %v22127_v57 = vld [vmem:[%s30680_s15 + $0x40c] ss:$16 sps:$4 sm:$0xff]  }
 0x83b   : > { %13535 = vmatprep.subr.bf16.mxu1 %v22088_v4  ;;  %13576 = vmatprep.subr.bf16.mxu0 %v22091_v18  ;;  %v22122_v4 = vld [vmem:[%s30680_s15 + $0x208] ss:$16 sps:$4 sm:$0xff]  }
 0x83c   : > { %v22125_v18 = vld [vmem:[%s30680_s15 + $0x408] ss:$16 sps:$4 sm:$0xff]  }
 0x83d   : > { %13536 = vmatpush1.bf16.msra.mxu1 %v22086_v35  ;;  %13577 = vmatpush1.bf16.msra.mxu0 %v22089_v25  ;;  %v22130_v35 = vld [vmem:[%s30680_s15 + $0x3ec] ss:$16 sps:$4 sm:$0xff]  }
 0x83e   : > { %v13321_v46 = vpop.f32.mrf.mxu1  ;;  %13537 = vmatprep.subr.bf16.mxu1 %v22094_v61  ;;  %13578 = vmatprep.subr.bf16.mxu0 %v22097_v48  ;;  %v22133_v25 = vld [vmem:[%s30680_s15 + $0x5ec] ss:$16 sps:$4 sm:$0xff]   ;;  %v22128_v61 = vld [vmem:[%s30680_s15 + $0x3e8] ss:$16 sps:$4 sm:$0xff]  }
 0x83f   : > { %v13322_v27 = vadd.f32 %v13321_v46, %v28194_v19  ;;  %v13362_v58 = vpop.f32.mrf.mxu0  ;;  %v22106_v19 = vld [vmem:[%s30680_s15 + $0x26c] ss:$16 sps:$4 sm:$0xff]   ;;  %v22131_v48 = vld [vmem:[%s30680_s15 + $0x5e8] ss:$16 sps:$4 sm:$0xff]  }
 0x840   : > { %v13323_v20 = vpop.f32.mrf.mxu1  ;;  %v22134_v46 = vld [vmem:[%s30680_s15 + $0x3c8] ss:$16 sps:$4 sm:$0xff]  }
 0x841   : > { %v28330_v39 = vadd.f32 %v13362_v58, %v13322_v27  ;;  %v13324_v36 = vadd.f32 %v13323_v20, %v28196_v0  ;;  %13538 = vmatpush1.bf16.msra.mxu1 %v22092_v17  ;;  %13579 = vmatpush1.bf16.msra.mxu0 %v22095_v59  ;;  %v13364_v34 = vpop.f32.mrf.mxu0  ;;  %v22109_v0 = vld [vmem:[%s30680_s15 + $0x46c] ss:$16 sps:$4 sm:$0xff]   ;;  %v22140_v58 = vld [vmem:[%s30680_s15 + $0x3a8] ss:$16 sps:$4 sm:$0xff]  }
 0x842   : > { %v13325_v42 = vpop.f32.mrf.mxu1  ;;  %13539 = vmatprep.subr.bf16.mxu1 %v22100_v26  ;;  %13580 = vmatprep.subr.bf16.mxu0 %v22103_v28  ;;  %v22136_v17 = vld [vmem:[%s30680_s15 + $0x3cc] ss:$16 sps:$4 sm:$0xff]   ;;  %v22137_v26 = vld [vmem:[%s30680_s15 + $0x5c8] ss:$16 sps:$4 sm:$0xff]  }
 0x843   : > { %v28345_v41 = vadd.f32 %v13364_v34, %v13324_v36  ;;  %v13366_v1 = vpop.f32.mrf.mxu0  ;;  %v22139_v59 = vld [vmem:[%s30680_s15 + $0x5cc] ss:$16 sps:$4 sm:$0xff]   ;;  %v22143_v20 = vld [vmem:[%s30680_s15 + $0x5a8] ss:$16 sps:$4 sm:$0xff]  }
 0x844   : > { %v13326_v22 = vpop.f32.mrf.mxu1  ;;  %v22142_v28 = vld [vmem:[%s30680_s15 + $0x3ac] ss:$16 sps:$4 sm:$0xff]   ;;  %v22155_v1 = vld [vmem:[%s30680_s15 + $0x568] ss:$16 sps:$4 sm:$0xff]  }
 0x845   : > { %13540 = vmatpush1.bf16.msra.mxu1 %v22098_v43  ;;  %13581 = vmatpush1.bf16.msra.mxu0 %v22101_v38  ;;  %v13367_v60 = vpop.f32.mrf.mxu0  ;;  %v22145_v27 = vld [vmem:[%s30680_s15 + $0x5ac] ss:$16 sps:$4 sm:$0xff]   ;;  %v22146_v43 = vld [vmem:[%s30680_s15 + $0x388] ss:$16 sps:$4 sm:$0xff]  }
 0x846   : > { %13541 = vmatprep.subr.bf16.mxu1 %v22106_v19  ;;  %13582 = vmatprep.subr.bf16.mxu0 %v22109_v0  ;;  %v22148_v36 = vld [vmem:[%s30680_s15 + $0x38c] ss:$16 sps:$4 sm:$0xff]   ;;  %v22149_v38 = vld [vmem:[%s30680_s15 + $0x588] ss:$16 sps:$4 sm:$0xff]  }
 0x847   : > { %v22151_v34 = vld [vmem:[%s30680_s15 + $0x58c] ss:$16 sps:$4 sm:$0xff]   ;;  %v22152_v0 = vld [vmem:[%s30680_s15 + $0x368] ss:$16 sps:$4 sm:$0xff]  }
 0x848   : > { %v22154_v42 = vld [vmem:[%s30680_s15 + $0x36c] ss:$16 sps:$4 sm:$0xff]  }
 0x849   : > { %13542 = vmatpush1.bf16.msra.mxu1 %v22104_v47  ;;  %13583 = vmatpush1.bf16.msra.mxu0 %v22107_v29  ;;  %v22157_v19 = vld [vmem:[%s30680_s15 + $0x56c] ss:$16 sps:$4 sm:$0xff]   ;;  %v22158_v47 = vld [vmem:[%s30680_s15 + $0x348] ss:$16 sps:$4 sm:$0xff]  }
 0x84a   : > { %13543 = vmatprep.subr.bf16.mxu1 %v22112_v5  ;;  %13584 = vmatprep.subr.bf16.mxu0 %v22115_v49  ;;  %v22160_v22 = vld [vmem:[%s30680_s15 + $0x34c] ss:$16 sps:$4 sm:$0xff]   ;;  %v22161_v29 = vld [vmem:[%s30680_s15 + $0x548] ss:$16 sps:$4 sm:$0xff]  }
 0x84b   : > { %v22163_v60 = vld [vmem:[%s30680_s15 + $0x54c] ss:$16 sps:$4 sm:$0xff]  }
 0x84c   : > { %v22166_v5 = vld [vmem:[%s30680_s15 + $0x32c] ss:$16 sps:$4 sm:$0xff]  }
 0x84d   : > { %13544 = vmatpush1.bf16.msra.mxu1 %v22110_v13  ;;  %13585 = vmatpush1.bf16.msra.mxu0 %v22113_v62  ;;  %v22169_v49 = vld [vmem:[%s30680_s15 + $0x52c] ss:$16 sps:$4 sm:$0xff]   ;;  %v22164_v13 = vld [vmem:[%s30680_s15 + $0x328] ss:$16 sps:$4 sm:$0xff]  }
 0x84e   : > { %13545 = vmatprep.subr.bf16.mxu1 %v22118_v2  ;;  %13586 = vmatprep.subr.bf16.mxu0 %v22121_v37  ;;  %v22167_v62 = vld [vmem:[%s30680_s15 + $0x528] ss:$16 sps:$4 sm:$0xff]   ;;  %v22172_v2 = vld [vmem:[%s30680_s15 + $0x30c] ss:$16 sps:$4 sm:$0xff]  }
 0x84f   : > { %v22175_v37 = vld [vmem:[%s30680_s15 + $0x50c] ss:$16 sps:$4 sm:$0xff]  }
 0x851   : > { %13546 = vmatpush1.bf16.msra.mxu1 %v22116_v24  ;;  %13587 = vmatpush1.bf16.msra.mxu0 %v22119_v6  ;;  %v22170_v24 = vld [vmem:[%s30680_s15 + $0x308] ss:$16 sps:$4 sm:$0xff]  }
 0x852   : > { %13547 = vmatprep.subr.bf16.mxu1 %v22124_v11  ;;  %13588 = vmatprep.subr.bf16.mxu0 %v22127_v57  ;;  %v22173_v6 = vld [vmem:[%s30680_s15 + $0x508] ss:$16 sps:$4 sm:$0xff]   ;;  %v22178_v11 = vld [vmem:[%s30680_s15 + $0x6ec] ss:$16 sps:$4 sm:$0xff]  }
 0x853   : > { %v22181_v57 = vld [vmem:[%s30680_s15 + $0x8ec] ss:$16 sps:$4 sm:$0xff]  }
 0x855   : > { %13548 = vmatpush1.bf16.msra.mxu1 %v22122_v4  ;;  %13589 = vmatpush1.bf16.msra.mxu0 %v22125_v18  ;;  %v22176_v4 = vld [vmem:[%s30680_s15 + $0x6e8] ss:$16 sps:$4 sm:$0xff]  }
 0x856   : > { %13549 = vmatprep.subr.bf16.mxu1 %v22130_v35  ;;  %13590 = vmatprep.subr.bf16.mxu0 %v22133_v25  ;;  %v22179_v18 = vld [vmem:[%s30680_s15 + $0x8e8] ss:$16 sps:$4 sm:$0xff]   ;;  %v22184_v35 = vld [vmem:[%s30680_s15 + $0x6cc] ss:$16 sps:$4 sm:$0xff]  }
 0x857   : > { %v22187_v25 = vld [vmem:[%s30680_s15 + $0x8cc] ss:$16 sps:$4 sm:$0xff]  }
 0x859   : > { %13550 = vmatpush2.bf16.msra.mxu1 %v22128_v61  ;;  %13591 = vmatpush2.bf16.msra.mxu0 %v22131_v48  ;;  %v22182_v61 = vld [vmem:[%s30680_s15 + $0x6c8] ss:$16 sps:$4 sm:$0xff]  }
 0x85a   : > { %13551 = vmatprep.subr.bf16.mxu1 %v22136_v17  ;;  %13592 = vmatprep.subr.bf16.mxu0 %v22139_v59  ;;  %v22185_v48 = vld [vmem:[%s30680_s15 + $0x8c8] ss:$16 sps:$4 sm:$0xff]   ;;  %v22196_v59 = vld [vmem:[%s30680_s15 + $0x68c] ss:$16 sps:$4 sm:$0xff]  }
 0x85b   : > { %v22191_v17 = vld [vmem:[%s30680_s15 + $0x8a8] ss:$16 sps:$4 sm:$0xff]  }
 0x85d   : > { %13552 = vmatpush2.bf16.msra.mxu1 %v22134_v46  ;;  %13593 = vmatpush2.bf16.msra.mxu0 %v22137_v26  ;;  %v22199_v26 = vld [vmem:[%s30680_s15 + $0x88c] ss:$16 sps:$4 sm:$0xff]  }
 0x85e   : > { %13553 = vmatprep.subr.bf16.mxu1 %v22142_v28  ;;  %13594 = vmatprep.subr.bf16.mxu0 %v22145_v27 }
 0x861   : > { %13554 = vmatpush2.bf16.msra.mxu1 %v22140_v58  ;;  %13595 = vmatpush2.bf16.msra.mxu0 %v22143_v20  ;;  %v22194_v58 = vld [vmem:[%s30680_s15 + $0x688] ss:$16 sps:$4 sm:$0xff]  }
 0x862   : > { %13555 = vmatprep.subr.bf16.mxu1 %v22148_v36  ;;  %13596 = vmatprep.subr.bf16.mxu0 %v22151_v34  ;;  %v22202_v36 = vld [vmem:[%s30680_s15 + $0x66c] ss:$16 sps:$4 sm:$0xff]  }
 0x865   : > { %13556 = vmatpush2.bf16.msra.mxu1 %v22146_v43  ;;  %13597 = vmatpush2.bf16.msra.mxu0 %v22149_v38  ;;  %v22200_v43 = vld [vmem:[%s30680_s15 + $0x668] ss:$16 sps:$4 sm:$0xff]  }
 0x866   : > { %13557 = vmatprep.subr.bf16.mxu1 %v22154_v42  ;;  %13598 = vmatprep.subr.bf16.mxu0 %v22157_v19  ;;  %v22203_v38 = vld [vmem:[%s30680_s15 + $0x868] ss:$16 sps:$4 sm:$0xff]   ;;  %v22208_v42 = vld [vmem:[%s30680_s15 + $0x64c] ss:$16 sps:$4 sm:$0xff]  }
 0x867   : > { %v22211_v19 = vld [vmem:[%s30680_s15 + $0x84c] ss:$16 sps:$4 sm:$0xff]  }
 0x869   : > { %13558 = vmatpush2.bf16.msra.mxu1 %v22152_v0  ;;  %13599 = vmatpush2.bf16.msra.mxu0 %v22155_v1  ;;  %v22206_v0 = vld [vmem:[%s30680_s15 + $0x648] ss:$16 sps:$4 sm:$0xff]  }
 0x86a   : > { %13559 = vmatprep.subr.bf16.mxu1 %v22160_v22  ;;  %13600 = vmatprep.subr.bf16.mxu0 %v22163_v60  ;;  %v22209_v1 = vld [vmem:[%s30680_s15 + $0x848] ss:$16 sps:$4 sm:$0xff]   ;;  %v22214_v22 = vld [vmem:[%s30680_s15 + $0x62c] ss:$16 sps:$4 sm:$0xff]  }
 0x86b   : > { %v22217_v60 = vld [vmem:[%s30680_s15 + $0x82c] ss:$16 sps:$4 sm:$0xff]  }
 0x86d   : > { %13560 = vmatpush2.bf16.msra.mxu1 %v22158_v47  ;;  %13601 = vmatpush2.bf16.msra.mxu0 %v22161_v29  ;;  %v22212_v47 = vld [vmem:[%s30680_s15 + $0x628] ss:$16 sps:$4 sm:$0xff]  }
 0x86e   : > { %13561 = vmatprep.subr.bf16.mxu1 %v22166_v5  ;;  %13602 = vmatprep.subr.bf16.mxu0 %v22169_v49  ;;  %v22215_v29 = vld [vmem:[%s30680_s15 + $0x828] ss:$16 sps:$4 sm:$0xff]   ;;  %v22220_v5 = vld [vmem:[%s30680_s15 + $0x60c] ss:$16 sps:$4 sm:$0xff]  }
 0x86f   : > { %v22223_v49 = vld [vmem:[%s30680_s15 + $0x80c] ss:$16 sps:$4 sm:$0xff]  }
 0x871   : > { %13562 = vmatpush2.bf16.msra.mxu1 %v22164_v13  ;;  %13603 = vmatpush2.bf16.msra.mxu0 %v22167_v62  ;;  %v22218_v13 = vld [vmem:[%s30680_s15 + $0x608] ss:$16 sps:$4 sm:$0xff]  }
 0x872   : > { %13563 = vmatprep.subr.bf16.mxu1 %v22172_v2  ;;  %13604 = vmatprep.subr.bf16.mxu0 %v22175_v37  ;;  %v22221_v62 = vld [vmem:[%s30680_s15 + $0x808] ss:$16 sps:$4 sm:$0xff]   ;;  %v22226_v2 = vld [vmem:[%s30680_s15 + $0x7ec] ss:$16 sps:$4 sm:$0xff]  }
 0x873   : > { %v22229_v37 = vld [vmem:[%s30680_s15 + $0x9ec] ss:$16 sps:$4 sm:$0xff]  }
 0x875   : > { %13564 = vmatpush2.bf16.msra.mxu1 %v22170_v24  ;;  %13605 = vmatpush2.bf16.msra.mxu0 %v22173_v6  ;;  %v22224_v24 = vld [vmem:[%s30680_s15 + $0x7e8] ss:$16 sps:$4 sm:$0xff]  }
 0x876   : > { %13615 = vmatprep.subr.bf16.mxu1 %v22178_v11  ;;  %13656 = vmatprep.subr.bf16.mxu0 %v22181_v57  ;;  %v22227_v6 = vld [vmem:[%s30680_s15 + $0x9e8] ss:$16 sps:$4 sm:$0xff]   ;;  %v22232_v11 = vld [vmem:[%s30680_s15 + $0x7cc] ss:$16 sps:$4 sm:$0xff]  }
 0x877   : > { %v22235_v57 = vld [vmem:[%s30680_s15 + $0x9cc] ss:$16 sps:$4 sm:$0xff]  }
 0x878   : > { %13566 = vmatmul.mubr.bf16.vlgmr.msra.gmra.mxu1 %v27835_v15  ;;  %13607 = vmatmul.mubr.bf16.vlgmr.msra.gmra.mxu0 %v27843_v40  ;;  %v22190_v15 = vld [vmem:[%s30680_s15 + $0x6ac] ss:$16 sps:$4 sm:$0xff]  }
 0x879   : > { %13616 = vmatpush1.bf16.msra.mxu1 %v22176_v4  ;;  %13647 = vmatprep.mubr.bf16.mxu1 %v28027_v54  ;;  %v22193_v40 = vld [vmem:[%s30680_s15 + $0x8ac] ss:$16 sps:$4 sm:$0xff]   ;;  %v22188_v54 = vld [vmem:[%s30680_s15 + $0x6a8] ss:$16 sps:$4 sm:$0xff]  }
 0x87a   : > { %13657 = vmatpush1.bf16.msra.mxu0 %v22179_v18  ;;  %13688 = vmatprep.mubr.bf16.mxu0 %v28159_v56  ;;  %v22230_v4 = vld [vmem:[%s30680_s15 + $0x7c8] ss:$16 sps:$4 sm:$0xff]  }
 0x87b   : > { %13617 = vmatprep.subr.bf16.mxu1 %v22184_v35  ;;  %13658 = vmatprep.subr.bf16.mxu0 %v22187_v25  ;;  %v22233_v18 = vld [vmem:[%s30680_s15 + $0x9c8] ss:$16 sps:$4 sm:$0xff]   ;;  %v22238_v35 = vld [vmem:[%s30680_s15 + $0x7ac] ss:$16 sps:$4 sm:$0xff]  }
 0x87c   : > { %v22241_v25 = vld [vmem:[%s30680_s15 + $0x9ac] ss:$16 sps:$4 sm:$0xff]  }
 0x87d   : > { %13618 = vmatpush1.bf16.msra.mxu1 %v22182_v61  ;;  %v22236_v61 = vld [vmem:[%s30680_s15 + $0x7a8] ss:$16 sps:$4 sm:$0xff]  }
 0x87e   : > { %13659 = vmatpush1.bf16.msra.mxu0 %v22185_v48  ;;  %v13403_v56 = vpop.f32.mrf.mxu1  ;;  %13619 = vmatprep.subr.bf16.mxu1 %v22190_v15  ;;  %v22239_v48 = vld [vmem:[%s30680_s15 + $0x9a8] ss:$16 sps:$4 sm:$0xff]   ;;  %v22244_v15 = vld [vmem:[%s30680_s15 + $0x78c] ss:$16 sps:$4 sm:$0xff]  }
 0x87f   : > { %v28529_v46 = vadd.f32 %v13403_v56, %v28330_v39  ;;  %13660 = vmatprep.subr.bf16.mxu0 %v22193_v40  ;;  %v22197_v39 = vld [vmem:[%s30680_s15 + $0x888] ss:$16 sps:$4 sm:$0xff]   ;;  %v22247_v40 = vld [vmem:[%s30680_s15 + $0x98c] ss:$16 sps:$4 sm:$0xff]  }
 0x880   : > { %v13405_v28 = vpop.f32.mrf.mxu1  ;;  %v22245_v56 = vld [vmem:[%s30680_s15 + $0x988] ss:$16 sps:$4 sm:$0xff]  }
 0x881   : > { %v28535_v27 = vadd.f32 %v13405_v28, %v28345_v41  ;;  %13620 = vmatpush1.bf16.msra.mxu1 %v22188_v54  ;;  %v22205_v41 = vld [vmem:[%s30680_s15 + $0x86c] ss:$16 sps:$4 sm:$0xff]   ;;  %v22242_v54 = vld [vmem:[%s30680_s15 + $0x788] ss:$16 sps:$4 sm:$0xff]  }
 0x882   : > { %13661 = vmatpush1.bf16.msra.mxu0 %v22191_v17  ;;  %v13407_v20 = vpop.f32.mrf.mxu1  ;;  %13621 = vmatprep.subr.bf16.mxu1 %v22196_v59  ;;  %v22250_v17 = vld [vmem:[%s30680_s15 + $0x76c] ss:$16 sps:$4 sm:$0xff]   ;;  %v22251_v28 = vld [vmem:[%s30680_s15 + $0x968] ss:$16 sps:$4 sm:$0xff]  }
 0x883   : > { %13662 = vmatprep.subr.bf16.mxu0 %v22199_v26  ;;  %v22253_v59 = vld [vmem:[%s30680_s15 + $0x96c] ss:$16 sps:$4 sm:$0xff]   ;;  %v22248_v26 = vld [vmem:[%s30680_s15 + $0x768] ss:$16 sps:$4 sm:$0xff]  }
 0x884   : > { %v13408_v34 = vpop.f32.mrf.mxu1  ;;  %v22259_v20 = vld [vmem:[%s30680_s15 + $0x94c] ss:$16 sps:$4 sm:$0xff]  }
 0x885   : > { %13622 = vmatpush1.bf16.msra.mxu1 %v22194_v58  ;;  %v22256_v58 = vld [vmem:[%s30680_s15 + $0x74c] ss:$16 sps:$4 sm:$0xff]  }
 0x886   : > { %13663 = vmatpush1.bf16.msra.mxu0 %v22197_v39  ;;  %13623 = vmatprep.subr.bf16.mxu1 %v22202_v36  ;;  %v22254_v39 = vld [vmem:[%s30680_s15 + $0x748] ss:$16 sps:$4 sm:$0xff]   ;;  %v22265_v34 = vld [vmem:[%s30680_s15 + $0x92c] ss:$16 sps:$4 sm:$0xff]  }
 0x887   : > { %13664 = vmatprep.subr.bf16.mxu0 %v22205_v41  ;;  %v22257_v36 = vld [vmem:[%s30680_s15 + $0x948] ss:$16 sps:$4 sm:$0xff]   ;;  %v22262_v41 = vld [vmem:[%s30680_s15 + $0x72c] ss:$16 sps:$4 sm:$0xff]  }
 0x889   : > { %13624 = vmatpush1.bf16.msra.mxu1 %v22200_v43  ;;  %v22260_v43 = vld [vmem:[%s30680_s15 + $0x728] ss:$16 sps:$4 sm:$0xff]  }
 0x88a   : > { %13665 = vmatpush1.bf16.msra.mxu0 %v22203_v38  ;;  %13625 = vmatprep.subr.bf16.mxu1 %v22208_v42  ;;  %v22263_v38 = vld [vmem:[%s30680_s15 + $0x928] ss:$16 sps:$4 sm:$0xff]   ;;  %v22268_v42 = vld [vmem:[%s30680_s15 + $0x70c] ss:$16 sps:$4 sm:$0xff]  }
 0x88b   : > { %13666 = vmatprep.subr.bf16.mxu0 %v22211_v19  ;;  %v22271_v19 = vld [vmem:[%s30680_s15 + $0x90c] ss:$16 sps:$4 sm:$0xff]  }
 0x88d   : > { %13626 = vmatpush1.bf16.msra.mxu1 %v22206_v0  ;;  %v22266_v0 = vld [vmem:[%s30680_s15 + $0x708] ss:$16 sps:$4 sm:$0xff]  }
 0x88e   : > { %13667 = vmatpush1.bf16.msra.mxu0 %v22209_v1  ;;  %13627 = vmatprep.subr.bf16.mxu1 %v22214_v22  ;;  %v22269_v1 = vld [vmem:[%s30680_s15 + $0x908] ss:$16 sps:$4 sm:$0xff]   ;;  %v22274_v22 = vld [vmem:[%s30680_s15 + $0xaec] ss:$16 sps:$4 sm:$0xff]  }
 0x88f   : > { %13668 = vmatprep.subr.bf16.mxu0 %v22217_v60  ;;  %v22277_v60 = vld [vmem:[%s30679_s14 + $0xe4] ss:$16 sps:$4 sm:$0xff]  }
 0x891   : > { %13628 = vmatpush1.bf16.msra.mxu1 %v22212_v47  ;;  %v22272_v47 = vld [vmem:[%s30680_s15 + $0xae8] ss:$16 sps:$4 sm:$0xff]  }
 0x892   : > { %13669 = vmatpush1.bf16.msra.mxu0 %v22215_v29  ;;  %13629 = vmatprep.subr.bf16.mxu1 %v22220_v5  ;;  %v22275_v29 = vld [vmem:[%s30679_s14 + $0xe0] ss:$16 sps:$4 sm:$0xff]   ;;  %v22280_v5 = vld [vmem:[%s30680_s15 + $0xacc] ss:$16 sps:$4 sm:$0xff]  }
 0x893   : > { %13670 = vmatprep.subr.bf16.mxu0 %v22223_v49 }
 0x895   : > { %13630 = vmatpush1.bf16.msra.mxu1 %v22218_v13  ;;  %v22283_v13 = vld [vmem:[%s30679_s14 + $0xc4] ss:$16 sps:$4 sm:$0xff]  }
 0x896   : > { %13671 = vmatpush1.bf16.msra.mxu0 %v22221_v62  ;;  %13631 = vmatprep.subr.bf16.mxu1 %v22226_v2  ;;  %v28712_v2 = vpack.c.bf16 %v27232_v16, %v27232_v16 }
 0x897   : > { %13672 = vmatprep.subr.bf16.mxu0 %v22229_v37  ;;  %v22278_v37 = vld [vmem:[%s30680_s15 + $0xac8] ss:$16 sps:$4 sm:$0xff]  }
 0x899   : > { %13632 = vmatpush2.bf16.msra.mxu1 %v22224_v24 }
 0x89a   : > { %13673 = vmatpush2.bf16.msra.mxu0 %v22227_v6  ;;  %13633 = vmatprep.subr.bf16.mxu1 %v22232_v11  ;;  %v22284_v6 = vld [vmem:[%s30680_s15 + $0xaa8] ss:$16 sps:$4 sm:$0xff]  }
 0x89b   : > { %13674 = vmatprep.subr.bf16.mxu0 %v22235_v57  ;;  %v22292_v57 = vld [vmem:[%s30680_s15 + $0xa8c] ss:$16 sps:$4 sm:$0xff]  }
 0x89d   : > { %13634 = vmatpush2.bf16.msra.mxu1 %v22230_v4  ;;  %v22295_v4 = vld [vmem:[%s30679_s14 + $0x84] ss:$16 sps:$4 sm:$0xff]  }
 0x89e   : > { %13675 = vmatpush2.bf16.msra.mxu0 %v22233_v18  ;;  %13635 = vmatprep.subr.bf16.mxu1 %v22238_v35  ;;  %v22290_v18 = vld [vmem:[%s30680_s15 + $0xa88] ss:$16 sps:$4 sm:$0xff]   ;;  %v22293_v35 = vld [vmem:[%s30679_s14 + $0x80] ss:$16 sps:$4 sm:$0xff]  }
 0x89f   : > { %13676 = vmatprep.subr.bf16.mxu0 %v22241_v25  ;;  %v22298_v25 = vld [vmem:[%s30680_s15 + $0xa6c] ss:$16 sps:$4 sm:$0xff]  }
 0x8a1   : > { %13636 = vmatpush2.bf16.msra.mxu1 %v22236_v61  ;;  %v22301_v61 = vld [vmem:[%s30679_s14 + $0x64] ss:$16 sps:$4 sm:$0xff]  }
 0x8a2   : > { %13677 = vmatpush2.bf16.msra.mxu0 %v22239_v48  ;;  %13637 = vmatprep.subr.bf16.mxu1 %v22244_v15  ;;  %v22296_v48 = vld [vmem:[%s30680_s15 + $0xa68] ss:$16 sps:$4 sm:$0xff]   ;;  %v22299_v15 = vld [vmem:[%s30679_s14 + $0x60] ss:$16 sps:$4 sm:$0xff]  }
 0x8a3   : > { %13678 = vmatprep.subr.bf16.mxu0 %v22247_v40  ;;  %v22304_v40 = vld [vmem:[%s30680_s15 + $0xa4c] ss:$16 sps:$4 sm:$0xff]  }
 0x8a5   : > { %13638 = vmatpush2.bf16.msra.mxu1 %v22242_v54  ;;  %v22307_v54 = vld [vmem:[%s30679_s14 + $0x44] ss:$16 sps:$4 sm:$0xff]  }
 0x8a6   : > { %13679 = vmatpush2.bf16.msra.mxu0 %v22245_v56  ;;  %13639 = vmatprep.subr.bf16.mxu1 %v22250_v17  ;;  %v22302_v56 = vld [vmem:[%s30680_s15 + $0xa48] ss:$16 sps:$4 sm:$0xff]   ;;  %v22305_v17 = vld [vmem:[%s30679_s14 + $0x40] ss:$16 sps:$4 sm:$0xff]  }
 0x8a7   : > { %13680 = vmatprep.subr.bf16.mxu0 %v22253_v59  ;;  %v22310_v59 = vld [vmem:[%s30680_s15 + $0xa2c] ss:$16 sps:$4 sm:$0xff]  }
 0x8a9   : > { %13640 = vmatpush2.bf16.msra.mxu1 %v22248_v26  ;;  %v22313_v26 = vld [vmem:[%s30679_s14 + $0x24] ss:$16 sps:$4 sm:$0xff]  }
 0x8aa   : > { %13681 = vmatpush2.bf16.msra.mxu0 %v22251_v28  ;;  %13641 = vmatprep.subr.bf16.mxu1 %v22256_v58  ;;  %v22308_v28 = vld [vmem:[%s30680_s15 + $0xa28] ss:$16 sps:$4 sm:$0xff]   ;;  %v22311_v58 = vld [vmem:[%s30679_s14 + $0x20] ss:$16 sps:$4 sm:$0xff]  }
 0x8ab   : > { %13682 = vmatprep.subr.bf16.mxu0 %v22259_v20  ;;  %v22316_v20 = vld [vmem:[%s30680_s15 + $0xa0c] ss:$16 sps:$4 sm:$0xff]  }
 0x8ad   : > { %13642 = vmatpush2.bf16.msra.mxu1 %v22254_v39  ;;  %v22319_v39 = vld [vmem:[%s30679_s14 + $0x4] ss:$16 sps:$4 sm:$0xff]  }
 0x8ae   : > { %13683 = vmatpush2.bf16.msra.mxu0 %v22257_v36  ;;  %13643 = vmatprep.subr.bf16.mxu1 %v22262_v41  ;;  %v22314_v36 = vld [vmem:[%s30680_s15 + $0xa08] ss:$16 sps:$4 sm:$0xff]   ;;  %v22317_v41 = vld [vmem:[%s30679_s14] ss:$16 sps:$4 sm:$0xff]  }
 0x8af   : > { %13684 = vmatprep.subr.bf16.mxu0 %v22265_v34  ;;  %v22322_v34 = vld [vmem:[%s30680_s15 + $0xbec] ss:$16 sps:$4 sm:$0xff]  }
 0x8b1   : > { %13644 = vmatpush2.bf16.msra.mxu1 %v22260_v43  ;;  %v22325_v43 = vld [vmem:[%s30679_s14 + $0x1e4] ss:$16 sps:$4 sm:$0xff]  }
 0x8b2   : > { %13685 = vmatpush2.bf16.msra.mxu0 %v22263_v38  ;;  %13645 = vmatprep.subr.bf16.mxu1 %v22268_v42  ;;  %v22320_v38 = vld [vmem:[%s30680_s15 + $0xbe8] ss:$16 sps:$4 sm:$0xff]   ;;  %v22323_v42 = vld [vmem:[%s30679_s14 + $0x1e0] ss:$16 sps:$4 sm:$0xff]  }
 0x8b3   : > { %13686 = vmatprep.subr.bf16.mxu0 %v22271_v19  ;;  %v22328_v19 = vld [vmem:[%s30680_s15 + $0xbcc] ss:$16 sps:$4 sm:$0xff]  }
 0x8b5   : > { %13646 = vmatpush2.bf16.msra.mxu1 %v22266_v0  ;;  %v22331_v0 = vld [vmem:[%s30679_s14 + $0x1c4] ss:$16 sps:$4 sm:$0xff]  }
 0x8b6   : > { %13687 = vmatpush2.bf16.msra.mxu0 %v22269_v1  ;;  %13697 = vmatprep.subr.bf16.mxu1 %v22274_v22  ;;  %v22326_v1 = vld [vmem:[%s30680_s15 + $0xbc8] ss:$16 sps:$4 sm:$0xff]   ;;  %v22329_v22 = vld [vmem:[%s30679_s14 + $0x1c0] ss:$16 sps:$4 sm:$0xff]  }
 0x8b7   : > { %15658 = vmatprep.subr.bf16.mxu0 %v22277_v60  ;;  %v22334_v60 = vld [vmem:[%s30680_s15 + $0xbac] ss:$16 sps:$4 sm:$0xff]  }
 0x8b8   : > { %13648 = vmatmul.mubr.bf16.vlgmr.msra.gmra.mxu1 %v28061_v55  ;;  %v13444_v49 = vpop.f32.mrf.mxu0 }
 0x8b9   : > { %13689 = vmatmul.mubr.bf16.vlgmr.msra.gmra.mxu0 %v28164_v53  ;;  %v28708_v62 = vadd.f32 %v13444_v49, %v28529_v46  ;;  %13698 = vmatpush1.bf16.msra.mxu1 %v22272_v47  ;;  %v22281_v53 = vld [vmem:[%s30679_s14 + $0xc0] ss:$16 sps:$4 sm:$0xff]   ;;  %v22286_v46 = vld [vmem:[%s30680_s15 + $0xaac] ss:$16 sps:$4 sm:$0xff]   ;;  %v22337_v47 = vld [vmem:[%s30679_s14 + $0x1a4] ss:$16 sps:$4 sm:$0xff]  }
 0x8ba   : > { %13729 = vmatprep.mubr.bf16.mxu1 %v28284_v31  ;;  %15659 = vmatpush1.bf16.msra.mxu0 %v22275_v29  ;;  %v13446_v55 = vpop.f32.mrf.mxu0  ;;  %v22289_v31 = vld [vmem:[%s30679_s14 + $0xa4] ss:$16 sps:$4 sm:$0xff]   ;;  %v22332_v29 = vld [vmem:[%s30680_s15 + $0xba8] ss:$16 sps:$4 sm:$0xff]   ;;  %v22340_v49 = vld [vmem:[%s30680_s15 + $0xb8c] ss:$16 sps:$4 sm:$0xff]  }
 0x8bb   : > { %15690 = vmatprep.mubr.bf16.mxu0 %v28712_v2  ;;  %v28726_v16 = vadd.f32 %v13446_v55, %v28535_v27  ;;  %13699 = vmatprep.subr.bf16.mxu1 %v22280_v5  ;;  %v22287_v27 = vld [vmem:[%s30679_s14 + $0xa0] ss:$16 sps:$4 sm:$0xff]  }
 0x8bc   : > { %15660 = vmatprep.subr.bf16.mxu0 %v22283_v13  ;;  %v13448_v24 = vpop.f32.mrf.mxu0  ;;  %v22335_v5 = vld [vmem:[%s30679_s14 + $0x1a0] ss:$16 sps:$4 sm:$0xff]   ;;  %v22343_v13 = vld [vmem:[%s30679_s14 + $0x184] ss:$16 sps:$4 sm:$0xff]  }
 0x8bd   : > { %13700 = vmatpush1.bf16.msra.mxu1 %v22278_v37  ;;  %v22338_v37 = vld [vmem:[%s30680_s15 + $0xb88] ss:$16 sps:$4 sm:$0xff]   ;;  %v22341_v55 = vld [vmem:[%s30679_s14 + $0x180] ss:$16 sps:$4 sm:$0xff]  }
 0x8be   : > { %15661 = vmatpush1.bf16.msra.mxu0 %v22281_v53  ;;  %v13449_v11 = vpop.f32.mrf.mxu0  ;;  %13701 = vmatprep.subr.bf16.mxu1 %v22286_v46  ;;  %v22346_v53 = vld [vmem:[%s30680_s15 + $0xb6c] ss:$16 sps:$4 sm:$0xff]   ;;  %v22349_v46 = vld [vmem:[%s30679_s14 + $0x164] ss:$16 sps:$4 sm:$0xff]   ;;  %v22347_v24 = vld [vmem:[%s30679_s14 + $0x160] ss:$16 sps:$4 sm:$0xff]  }
 0x8bf   : > { %15662 = vmatprep.subr.bf16.mxu0 %v22289_v31  ;;  %v22344_v31 = vld [vmem:[%s30680_s15 + $0xb68] ss:$16 sps:$4 sm:$0xff]   ;;  %v22355_v11 = vld [vmem:[%s30679_s14 + $0x144] ss:$16 sps:$4 sm:$0xff]  }
 0x8c1   : > { %13702 = vmatpush1.bf16.msra.mxu1 %v22284_v6  ;;  %v22352_v6 = vld [vmem:[%s30680_s15 + $0xb4c] ss:$16 sps:$4 sm:$0xff]  }
 0x8c2   : > { %15663 = vmatpush1.bf16.msra.mxu0 %v22287_v27  ;;  %13703 = vmatprep.subr.bf16.mxu1 %v22292_v57  ;;  %v22350_v27 = vld [vmem:[%s30680_s15 + $0xb48] ss:$16 sps:$4 sm:$0xff]   ;;  %v22353_v57 = vld [vmem:[%s30679_s14 + $0x140] ss:$16 sps:$4 sm:$0xff]  }
 0x8c3   : > { %15664 = vmatprep.subr.bf16.mxu0 %v22295_v4  ;;  %v22358_v4 = vld [vmem:[%s30680_s15 + $0xb2c] ss:$16 sps:$4 sm:$0xff]  }
 0x8c5   : > { %13704 = vmatpush1.bf16.msra.mxu1 %v22290_v18  ;;  %v22361_v18 = vld [vmem:[%s30679_s14 + $0x124] ss:$16 sps:$4 sm:$0xff]  }
 0x8c6   : > { %15665 = vmatpush1.bf16.msra.mxu0 %v22293_v35  ;;  %13705 = vmatprep.subr.bf16.mxu1 %v22298_v25  ;;  %v22356_v35 = vld [vmem:[%s30680_s15 + $0xb28] ss:$16 sps:$4 sm:$0xff]   ;;  %v22359_v25 = vld [vmem:[%s30679_s14 + $0x120] ss:$16 sps:$4 sm:$0xff]  }
 0x8c7   : > { %15666 = vmatprep.subr.bf16.mxu0 %v22301_v61  ;;  %v22364_v61 = vld [vmem:[%s30680_s15 + $0xb0c] ss:$16 sps:$4 sm:$0xff]  }
 0x8c9   : > { %13706 = vmatpush1.bf16.msra.mxu1 %v22296_v48  ;;  %v22367_v48 = vld [vmem:[%s30679_s14 + $0x104] ss:$16 sps:$4 sm:$0xff]  }
 0x8ca   : > { %15667 = vmatpush1.bf16.msra.mxu0 %v22299_v15  ;;  %13707 = vmatprep.subr.bf16.mxu1 %v22304_v40  ;;  %v22362_v15 = vld [vmem:[%s30680_s15 + $0xb08] ss:$16 sps:$4 sm:$0xff]   ;;  %v22365_v40 = vld [vmem:[%s30679_s14 + $0x100] ss:$16 sps:$4 sm:$0xff]  }
 0x8cb   : > { %15668 = vmatprep.subr.bf16.mxu0 %v22307_v54  ;;  %v22370_v54 = vld [vmem:[%s30679_s14 + $0x2e4] ss:$16 sps:$4 sm:$0xff]  }
 0x8cd   : > { %13708 = vmatpush1.bf16.msra.mxu1 %v22302_v56  ;;  %v22373_v56 = vld [vmem:[%s30679_s14 + $0x4e4] ss:$16 sps:$4 sm:$0xff]  }
 0x8ce   : > { %15669 = vmatpush1.bf16.msra.mxu0 %v22305_v17  ;;  %13709 = vmatprep.subr.bf16.mxu1 %v22310_v59  ;;  %v22368_v17 = vld [vmem:[%s30679_s14 + $0x2e0] ss:$16 sps:$4 sm:$0xff]  }
 0x8cf   : > { %15670 = vmatprep.subr.bf16.mxu0 %v22313_v26  ;;  %v22371_v59 = vld [vmem:[%s30679_s14 + $0x4e0] ss:$16 sps:$4 sm:$0xff]   ;;  %v28907_v26 = vpack.c.bf16 %v27226_v21, %v27226_v21 }
 0x8d1   : > { %13710 = vmatpush1.bf16.msra.mxu1 %v22308_v28  ;;  %v22376_v28 = vld [vmem:[%s30679_s14 + $0x2c4] ss:$16 sps:$4 sm:$0xff]  }
 0x8d2   : > { %15671 = vmatpush1.bf16.msra.mxu0 %v22311_v58  ;;  %13711 = vmatprep.subr.bf16.mxu1 %v22316_v20 }
 0x8d3   : > { %15672 = vmatprep.subr.bf16.mxu0 %v22319_v39  ;;  %v28917_v39 = vpack.c.bf16 %v27456_v50, %v27456_v50 }
 0x8d5   : > { %13712 = vmatpush1.bf16.msra.mxu1 %v22314_v36  ;;  %v22379_v36 = vld [vmem:[%s30679_s14 + $0x4c4] ss:$16 sps:$4 sm:$0xff]  }
 0x8d6   : > { %15673 = vmatpush1.bf16.msra.mxu0 %v22317_v41  ;;  %13713 = vmatprep.subr.bf16.mxu1 %v22322_v34  ;;  %v28928_v41 = vpack.c.bf16 %v27692_v32, %v27692_v32 }
 0x8d7   : > { %15674 = vmatprep.subr.bf16.mxu0 %v22325_v43  ;;  %v22382_v43 = vld [vmem:[%s30679_s14 + $0x2a4] ss:$16 sps:$4 sm:$0xff]  }
 0x8d9   : > { %13714 = vmatpush2.bf16.msra.mxu1 %v22320_v38  ;;  %v22385_v38 = vld [vmem:[%s30679_s14 + $0x4a4] ss:$16 sps:$4 sm:$0xff]  }
 0x8da   : > { %15675 = vmatpush2.bf16.msra.mxu0 %v22323_v42  ;;  %13715 = vmatprep.subr.bf16.mxu1 %v22328_v19 }
 0x8db   : > { %15676 = vmatprep.subr.bf16.mxu0 %v22331_v0  ;;  %v22380_v0 = vld [vmem:[%s30679_s14 + $0x2a0] ss:$16 sps:$4 sm:$0xff]  }
 0x8dd   : > { %13716 = vmatpush2.bf16.msra.mxu1 %v22326_v1 }
 0x8de   : > { %15677 = vmatpush2.bf16.msra.mxu0 %v22329_v22  ;;  %13717 = vmatprep.subr.bf16.mxu1 %v22334_v60  ;;  %v22388_v60 = vld [vmem:[%s30679_s14 + $0x284] ss:$16 sps:$4 sm:$0xff]  }
 0x8df   : > { %15678 = vmatprep.subr.bf16.mxu0 %v22337_v47  ;;  %v22391_v47 = vld [vmem:[%s30679_s14 + $0x484] ss:$16 sps:$4 sm:$0xff]  }
 0x8e1   : > { %13718 = vmatpush2.bf16.msra.mxu1 %v22332_v29  ;;  %v22386_v29 = vld [vmem:[%s30679_s14 + $0x280] ss:$16 sps:$4 sm:$0xff]  }
 0x8e2   : > { %15679 = vmatpush2.bf16.msra.mxu0 %v22335_v5  ;;  %13719 = vmatprep.subr.bf16.mxu1 %v22340_v49  ;;  %v22389_v5 = vld [vmem:[%s30679_s14 + $0x480] ss:$16 sps:$4 sm:$0xff]   ;;  %v22394_v49 = vld [vmem:[%s30679_s14 + $0x264] ss:$16 sps:$4 sm:$0xff]  }
 0x8e3   : > { %15680 = vmatprep.subr.bf16.mxu0 %v22343_v13  ;;  %v22397_v13 = vld [vmem:[%s30679_s14 + $0x464] ss:$16 sps:$4 sm:$0xff]  }
 0x8e5   : > { %13720 = vmatpush2.bf16.msra.mxu1 %v22338_v37  ;;  %v22392_v37 = vld [vmem:[%s30679_s14 + $0x260] ss:$16 sps:$4 sm:$0xff]  }
 0x8e6   : > { %15681 = vmatpush2.bf16.msra.mxu0 %v22341_v55  ;;  %13721 = vmatprep.subr.bf16.mxu1 %v22346_v53  ;;  %v22395_v55 = vld [vmem:[%s30679_s14 + $0x460] ss:$16 sps:$4 sm:$0xff]   ;;  %v22400_v53 = vld [vmem:[%s30679_s14 + $0x244] ss:$16 sps:$4 sm:$0xff]  }
 0x8e7   : > { %15682 = vmatprep.subr.bf16.mxu0 %v22349_v46  ;;  %v22403_v46 = vld [vmem:[%s30679_s14 + $0x444] ss:$16 sps:$4 sm:$0xff]  }
 0x8e9   : > { %13722 = vmatpush2.bf16.msra.mxu1 %v22344_v31  ;;  %v22398_v31 = vld [vmem:[%s30679_s14 + $0x240] ss:$16 sps:$4 sm:$0xff]  }
 0x8ea   : > { %15683 = vmatpush2.bf16.msra.mxu0 %v22347_v24  ;;  %13723 = vmatprep.subr.bf16.mxu1 %v22352_v6  ;;  %v22401_v24 = vld [vmem:[%s30679_s14 + $0x440] ss:$16 sps:$4 sm:$0xff]   ;;  %v22406_v6 = vld [vmem:[%s30679_s14 + $0x224] ss:$16 sps:$4 sm:$0xff]  }
 0x8eb   : > { %15684 = vmatprep.subr.bf16.mxu0 %v22355_v11  ;;  %v22409_v11 = vld [vmem:[%s30679_s14 + $0x424] ss:$16 sps:$4 sm:$0xff]  }
 0x8ed   : > { %13724 = vmatpush2.bf16.msra.mxu1 %v22350_v27  ;;  %v22404_v27 = vld [vmem:[%s30679_s14 + $0x220] ss:$16 sps:$4 sm:$0xff]  }
 0x8ee   : > { %15685 = vmatpush2.bf16.msra.mxu0 %v22353_v57  ;;  %13725 = vmatprep.subr.bf16.mxu1 %v22358_v4  ;;  %v22407_v57 = vld [vmem:[%s30679_s14 + $0x420] ss:$16 sps:$4 sm:$0xff]   ;;  %v22412_v4 = vld [vmem:[%s30679_s14 + $0x204] ss:$16 sps:$4 sm:$0xff]  }
 0x8ef   : > { %15686 = vmatprep.subr.bf16.mxu0 %v22361_v18  ;;  %v22415_v18 = vld [vmem:[%s30679_s14 + $0x404] ss:$16 sps:$4 sm:$0xff]  }
 0x8f1   : > { %13726 = vmatpush2.bf16.msra.mxu1 %v22356_v35  ;;  %v22410_v35 = vld [vmem:[%s30679_s14 + $0x200] ss:$16 sps:$4 sm:$0xff]  }
 0x8f2   : > { %15687 = vmatpush2.bf16.msra.mxu0 %v22359_v25  ;;  %13727 = vmatprep.subr.bf16.mxu1 %v22364_v61  ;;  %v22413_v25 = vld [vmem:[%s30679_s14 + $0x400] ss:$16 sps:$4 sm:$0xff]   ;;  %v22418_v61 = vld [vmem:[%s30679_s14 + $0x3e4] ss:$16 sps:$4 sm:$0xff]  }
 0x8f3   : > { %15688 = vmatprep.subr.bf16.mxu0 %v22367_v48  ;;  %v22421_v48 = vld [vmem:[%s30679_s14 + $0x5e4] ss:$16 sps:$4 sm:$0xff]  }
 0x8f5   : > { %13728 = vmatpush2.bf16.msra.mxu1 %v22362_v15  ;;  %v22416_v15 = vld [vmem:[%s30679_s14 + $0x3e0] ss:$16 sps:$4 sm:$0xff]  }
 0x8f6   : > { %15689 = vmatpush2.bf16.msra.mxu0 %v22365_v40  ;;  %15699 = vmatprep.subr.bf16.mxu1 %v22370_v54  ;;  %v22419_v40 = vld [vmem:[%s30679_s14 + $0x5e0] ss:$16 sps:$4 sm:$0xff]   ;;  %v22424_v54 = vld [vmem:[%s30679_s14 + $0x3c4] ss:$16 sps:$4 sm:$0xff]  }
 0x8f7   : > { %15740 = vmatprep.subr.bf16.mxu0 %v22373_v56  ;;  %v22427_v56 = vld [vmem:[%s30679_s14 + $0x5c4] ss:$16 sps:$4 sm:$0xff]  }
 0x8f8   : > { %v28912_v58 = vpop.f32.mrf.mxu0  ;;  %13730 = vmatmul.mubr.bf16.vlgmr.msra.gmra.mxu1 %v28292_v30  ;;  %v13485_v20 = vpop.f32.mrf.mxu1  ;;  %v22374_v30 = vld [vmem:[%s30679_s14 + $0x2c0] ss:$16 sps:$4 sm:$0xff]  }
 0x8f9   : > { %15691 = vmatmul.mubr.bf16.vlgmr.msra.gmra.mxu0 %v28907_v26  ;;  %v28924_v21 = vadd.f32 %v13485_v20, %v28708_v62  ;;  %15700 = vmatpush1.bf16.msra.mxu1 %v22368_v17  ;;  %v22377_v62 = vld [vmem:[%s30679_s14 + $0x4c0] ss:$16 sps:$4 sm:$0xff]   ;;  %v22433_v20 = vld [vmem:[%s30679_s14 + $0x5a4] ss:$16 sps:$4 sm:$0xff]  }
 0x8fa   : > { %15731 = vmatprep.mubr.bf16.mxu1 %v28917_v39  ;;  %15741 = vmatpush1.bf16.msra.mxu0 %v22371_v59  ;;  %v28934_v50 = vpop.f32.mrf.mxu0  ;;  %v13487_v34 = vpop.f32.mrf.mxu1  ;;  %v22422_v17 = vld [vmem:[%s30679_s14 + $0x3c0] ss:$16 sps:$4 sm:$0xff]  }
 0x8fb   : > { %15772 = vmatprep.mubr.bf16.mxu0 %v28928_v41  ;;  %v28944_v32 = vadd.f32 %v13487_v34, %v28726_v16  ;;  %15701 = vmatprep.subr.bf16.mxu1 %v22376_v28  ;;  %v22383_v16 = vld [vmem:[%s30679_s14 + $0x4a0] ss:$16 sps:$4 sm:$0xff]   ;;  %v22430_v28 = vld [vmem:[%s30679_s14 + $0x3a4] ss:$16 sps:$4 sm:$0xff]  }
 0x8fc   : > { %v13530_v42 = vpop.f32.mrf.mxu0  ;;  %15742 = vmatprep.subr.bf16.mxu0 %v22379_v36  ;;  %v13489_v19 = vpop.f32.mrf.mxu1  ;;  %v22425_v59 = vld [vmem:[%s30679_s14 + $0x5c0] ss:$16 sps:$4 sm:$0xff]   ;;  %v22436_v34 = vld [vmem:[%s30679_s14 + $0x384] ss:$16 sps:$4 sm:$0xff]  }
 0x8fd   : > { %15702 = vmatpush1.bf16.msra.mxu1 %v22374_v30  ;;  %v22428_v36 = vld [vmem:[%s30679_s14 + $0x3a0] ss:$16 sps:$4 sm:$0xff]   ;;  %v22442_v42 = vld [vmem:[%s30679_s14 + $0x364] ss:$16 sps:$4 sm:$0xff]  }
 0x8fe   : > { %15743 = vmatpush1.bf16.msra.mxu0 %v22377_v62  ;;  %v13531_v1 = vpop.f32.mrf.mxu0  ;;  %v13490_v22 = vpop.f32.mrf.mxu1  ;;  %15703 = vmatprep.subr.bf16.mxu1 %v22382_v43  ;;  %v22431_v30 = vld [vmem:[%s30679_s14 + $0x5a0] ss:$16 sps:$4 sm:$0xff]   ;;  %v22439_v62 = vld [vmem:[%s30679_s14 + $0x584] ss:$16 sps:$4 sm:$0xff]  }
 0x8ff   : > { %15744 = vmatprep.subr.bf16.mxu0 %v22385_v38  ;;  %v22434_v43 = vld [vmem:[%s30679_s14 + $0x380] ss:$16 sps:$4 sm:$0xff]   ;;  %v22445_v19 = vld [vmem:[%s30679_s14 + $0x564] ss:$16 sps:$4 sm:$0xff]  }
 0x900   : > { %v22437_v38 = vld [vmem:[%s30679_s14 + $0x580] ss:$16 sps:$4 sm:$0xff]   ;;  %v22448_v22 = vld [vmem:[%s30679_s14 + $0x344] ss:$16 sps:$4 sm:$0xff]  }
 0x901   : > { %15704 = vmatpush1.bf16.msra.mxu1 %v22380_v0  ;;  %v22440_v0 = vld [vmem:[%s30679_s14 + $0x360] ss:$16 sps:$4 sm:$0xff]  }
 0x902   : > { %15745 = vmatpush1.bf16.msra.mxu0 %v22383_v16  ;;  %15705 = vmatprep.subr.bf16.mxu1 %v22388_v60  ;;  %v22443_v1 = vld [vmem:[%s30679_s14 + $0x560] ss:$16 sps:$4 sm:$0xff]   ;;  %v22451_v16 = vld [vmem:[%s30679_s14 + $0x544] ss:$16 sps:$4 sm:$0xff]  }
 0x903   : > { %15746 = vmatprep.subr.bf16.mxu0 %v22391_v47  ;;  %v22446_v60 = vld [vmem:[%s30679_s14 + $0x340] ss:$16 sps:$4 sm:$0xff]  }
 0x904   : > { %v22449_v47 = vld [vmem:[%s30679_s14 + $0x540] ss:$16 sps:$4 sm:$0xff]  }
 0x905   : > { %15706 = vmatpush1.bf16.msra.mxu1 %v22386_v29  ;;  %v22454_v29 = vld [vmem:[%s30679_s14 + $0x324] ss:$16 sps:$4 sm:$0xff]  }
 0x906   : > { %15747 = vmatpush1.bf16.msra.mxu0 %v22389_v5  ;;  %15707 = vmatprep.subr.bf16.mxu1 %v22394_v49  ;;  %v22457_v5 = vld [vmem:[%s30679_s14 + $0x524] ss:$16 sps:$4 sm:$0xff]   ;;  %v22452_v49 = vld [vmem:[%s30679_s14 + $0x320] ss:$16 sps:$4 sm:$0xff]  }
 0x907   : > { %15748 = vmatprep.subr.bf16.mxu0 %v22397_v13  ;;  %v22455_v13 = vld [vmem:[%s30679_s14 + $0x520] ss:$16 sps:$4 sm:$0xff]  }
 0x909   : > { %15708 = vmatpush1.bf16.msra.mxu1 %v22392_v37  ;;  %v22460_v37 = vld [vmem:[%s30679_s14 + $0x304] ss:$16 sps:$4 sm:$0xff]  }
 0x90a   : > { %15749 = vmatpush1.bf16.msra.mxu0 %v22395_v55  ;;  %15709 = vmatprep.subr.bf16.mxu1 %v22400_v53  ;;  %v22463_v55 = vld [vmem:[%s30679_s14 + $0x504] ss:$16 sps:$4 sm:$0xff]   ;;  %v22458_v53 = vld [vmem:[%s30679_s14 + $0x300] ss:$16 sps:$4 sm:$0xff]  }
 0x90b   : > { %15750 = vmatprep.subr.bf16.mxu0 %v22403_v46  ;;  %v22461_v46 = vld [vmem:[%s30679_s14 + $0x500] ss:$16 sps:$4 sm:$0xff]  }
 0x90d   : > { %15710 = vmatpush1.bf16.msra.mxu1 %v22398_v31  ;;  %v22466_v31 = vld [vmem:[%s30679_s14 + $0x6e4] ss:$16 sps:$4 sm:$0xff]  }
 0x90e   : > { %15751 = vmatpush1.bf16.msra.mxu0 %v22401_v24  ;;  %15711 = vmatprep.subr.bf16.mxu1 %v22406_v6  ;;  %v22469_v24 = vld [vmem:[%s30679_s14 + $0x8e4] ss:$16 sps:$4 sm:$0xff]   ;;  %v22464_v6 = vld [vmem:[%s30679_s14 + $0x6e0] ss:$16 sps:$4 sm:$0xff]  }
 0x90f   : > { %15752 = vmatprep.subr.bf16.mxu0 %v22409_v11  ;;  %v29122_v11 = vpack.c.bf16 %v27450_v23, %v27450_v23  ;;  %v29137_v23 = vpack.c.bf16 %v27925_v51, %v27925_v51 }
 0x911   : > { %15712 = vmatpush1.bf16.msra.mxu1 %v22404_v27  ;;  %v22467_v27 = vld [vmem:[%s30679_s14 + $0x8e0] ss:$16 sps:$4 sm:$0xff]  }
 0x912   : > { %15753 = vmatpush1.bf16.msra.mxu0 %v22407_v57  ;;  %15713 = vmatprep.subr.bf16.mxu1 %v22412_v4  ;;  %v29129_v57 = vpack.c.bf16 %v27686_v45, %v27686_v45  ;;  %v22472_v4 = vld [vmem:[%s30679_s14 + $0x6c4] ss:$16 sps:$4 sm:$0xff]  }
 0x913   : > { %15754 = vmatprep.subr.bf16.mxu0 %v22415_v18 }
 0x915   : > { %15714 = vmatpush1.bf16.msra.mxu1 %v22410_v35 }
 0x916   : > { %15755 = vmatpush1.bf16.msra.mxu0 %v22413_v25  ;;  %15715 = vmatprep.subr.bf16.mxu1 %v22418_v61  ;;  %v22475_v25 = vld [vmem:[%s30679_s14 + $0x8c4] ss:$16 sps:$4 sm:$0xff]   ;;  %v29146_v61 = vpack.c.bf16 %v28106_v44, %v28106_v44 }
 0x917   : > { %15756 = vmatprep.subr.bf16.mxu0 %v22421_v48  ;;  %v22470_v48 = vld [vmem:[%s30679_s14 + $0x6c0] ss:$16 sps:$4 sm:$0xff]  }
 0x919   : > { %15716 = vmatpush2.bf16.msra.mxu1 %v22416_v15 }
 0x91a   : > { %15757 = vmatpush2.bf16.msra.mxu0 %v22419_v40  ;;  %15717 = vmatprep.subr.bf16.mxu1 %v22424_v54  ;;  %v22478_v40 = vld [vmem:[%s30679_s14 + $0x6a4] ss:$16 sps:$4 sm:$0xff]  }
 0x91b   : > { %15758 = vmatprep.subr.bf16.mxu0 %v22427_v56  ;;  %v22481_v56 = vld [vmem:[%s30679_s14 + $0x8a4] ss:$16 sps:$4 sm:$0xff]  }
 0x91d   : > { %15718 = vmatpush2.bf16.msra.mxu1 %v22422_v17 }
 0x91e   : > { %15759 = vmatpush2.bf16.msra.mxu0 %v22425_v59  ;;  %15719 = vmatprep.subr.bf16.mxu1 %v22430_v28 }
 0x91f   : > { %15760 = vmatprep.subr.bf16.mxu0 %v22433_v20  ;;  %v22476_v20 = vld [vmem:[%s30679_s14 + $0x6a0] ss:$16 sps:$4 sm:$0xff]  }
 0x921   : > { %15720 = vmatpush2.bf16.msra.mxu1 %v22428_v36 }
 0x922   : > { %15761 = vmatpush2.bf16.msra.mxu0 %v22431_v30  ;;  %15721 = vmatprep.subr.bf16.mxu1 %v22436_v34  ;;  %v22484_v34 = vld [vmem:[%s30679_s14 + $0x684] ss:$16 sps:$4 sm:$0xff]  }
 0x923   : > { %15762 = vmatprep.subr.bf16.mxu0 %v22439_v62  ;;  %v22487_v62 = vld [vmem:[%s30679_s14 + $0x884] ss:$16 sps:$4 sm:$0xff]  }
 0x925   : > { %15722 = vmatpush2.bf16.msra.mxu1 %v22434_v43  ;;  %v22482_v43 = vld [vmem:[%s30679_s14 + $0x680] ss:$16 sps:$4 sm:$0xff]  }
 0x926   : > { %15763 = vmatpush2.bf16.msra.mxu0 %v22437_v38  ;;  %15723 = vmatprep.subr.bf16.mxu1 %v22442_v42  ;;  %v22485_v38 = vld [vmem:[%s30679_s14 + $0x880] ss:$16 sps:$4 sm:$0xff]   ;;  %v22490_v42 = vld [vmem:[%s30679_s14 + $0x664] ss:$16 sps:$4 sm:$0xff]  }
 0x927   : > { %15764 = vmatprep.subr.bf16.mxu0 %v22445_v19  ;;  %v22493_v19 = vld [vmem:[%s30679_s14 + $0x864] ss:$16 sps:$4 sm:$0xff]  }
 0x929   : > { %15724 = vmatpush2.bf16.msra.mxu1 %v22440_v0  ;;  %v22488_v0 = vld [vmem:[%s30679_s14 + $0x660] ss:$16 sps:$4 sm:$0xff]  }
 0x92a   : > { %15765 = vmatpush2.bf16.msra.mxu0 %v22443_v1  ;;  %15725 = vmatprep.subr.bf16.mxu1 %v22448_v22  ;;  %v22491_v1 = vld [vmem:[%s30679_s14 + $0x860] ss:$16 sps:$4 sm:$0xff]   ;;  %v22496_v22 = vld [vmem:[%s30679_s14 + $0x644] ss:$16 sps:$4 sm:$0xff]  }
 0x92b   : > { %15766 = vmatprep.subr.bf16.mxu0 %v22451_v16  ;;  %v22499_v16 = vld [vmem:[%s30679_s14 + $0x844] ss:$16 sps:$4 sm:$0xff]  }
 0x92d   : > { %15726 = vmatpush2.bf16.msra.mxu1 %v22446_v60  ;;  %v22494_v60 = vld [vmem:[%s30679_s14 + $0x640] ss:$16 sps:$4 sm:$0xff]  }
 0x92e   : > { %15767 = vmatpush2.bf16.msra.mxu0 %v22449_v47  ;;  %15727 = vmatprep.subr.bf16.mxu1 %v22454_v29  ;;  %v22497_v47 = vld [vmem:[%s30679_s14 + $0x840] ss:$16 sps:$4 sm:$0xff]   ;;  %v22502_v29 = vld [vmem:[%s30679_s14 + $0x624] ss:$16 sps:$4 sm:$0xff]  }
 0x92f   : > { %15768 = vmatprep.subr.bf16.mxu0 %v22457_v5  ;;  %v22505_v5 = vld [vmem:[%s30679_s14 + $0x824] ss:$16 sps:$4 sm:$0xff]  }
 0x931   : > { %15728 = vmatpush2.bf16.msra.mxu1 %v22452_v49  ;;  %v22500_v49 = vld [vmem:[%s30679_s14 + $0x620] ss:$16 sps:$4 sm:$0xff]  }
 0x932   : > { %15769 = vmatpush2.bf16.msra.mxu0 %v22455_v13  ;;  %15729 = vmatprep.subr.bf16.mxu1 %v22460_v37  ;;  %v22503_v13 = vld [vmem:[%s30679_s14 + $0x820] ss:$16 sps:$4 sm:$0xff]   ;;  %v22508_v37 = vld [vmem:[%s30679_s14 + $0x604] ss:$16 sps:$4 sm:$0xff]  }
 0x933   : > { %15770 = vmatprep.subr.bf16.mxu0 %v22463_v55  ;;  %v22511_v55 = vld [vmem:[%s30679_s14 + $0x804] ss:$16 sps:$4 sm:$0xff]  }
 0x935   : > { %15730 = vmatpush2.bf16.msra.mxu1 %v22458_v53  ;;  %v22506_v53 = vld [vmem:[%s30679_s14 + $0x600] ss:$16 sps:$4 sm:$0xff]  }
 0x936   : > { %15771 = vmatpush2.bf16.msra.mxu0 %v22461_v46  ;;  %15781 = vmatprep.subr.bf16.mxu1 %v22466_v31  ;;  %v22509_v46 = vld [vmem:[%s30679_s14 + $0x800] ss:$16 sps:$4 sm:$0xff]   ;;  %v22514_v31 = vld [vmem:[%s30679_s14 + $0x7e4] ss:$16 sps:$4 sm:$0xff]  }
 0x937   : > { %15822 = vmatprep.subr.bf16.mxu0 %v22469_v24  ;;  %v22517_v24 = vld [vmem:[%s30679_s14 + $0x9e4] ss:$16 sps:$4 sm:$0xff]  }
 0x938   : > { %v13567_v18 = vpop.f32.mrf.mxu1  ;;  %v13608_v35 = vpop.f32.mrf.mxu0  ;;  %15732 = vmatmul.mubr.bf16.vlgmr.msra.gmra.mxu1 %v29122_v11 }
 0x939   : > { %v13568_v45 = vadd.f32 %v13567_v18, %v28912_v58  ;;  %15773 = vmatmul.mubr.bf16.vlgmr.msra.gmra.mxu0 %v29129_v57  ;;  %15782 = vmatpush1.bf16.msra.mxu1 %v22464_v6  ;;  %v22473_v58 = vld [vmem:[%s30679_s14 + $0x8c0] ss:$16 sps:$4 sm:$0xff]   ;;  %v22523_v18 = vld [vmem:[%s30679_s14 + $0x9c4] ss:$16 sps:$4 sm:$0xff]  }
 0x93a   : > { %15813 = vmatprep.mubr.bf16.mxu1 %v29137_v23  ;;  %15823 = vmatpush1.bf16.msra.mxu0 %v22467_v27  ;;  %v13569_v51 = vpop.f32.mrf.mxu1  ;;  %v13610_v15 = vpop.f32.mrf.mxu0  ;;  %v22512_v6 = vld [vmem:[%s30679_s14 + $0x7e0] ss:$16 sps:$4 sm:$0xff]  }
 0x93b   : > { %v29158_v54 = vadd.f32 %v13608_v35, %v13568_v45  ;;  %15854 = vmatprep.mubr.bf16.mxu0 %v29146_v61  ;;  %v13570_v44 = vadd.f32 %v13569_v51, %v28934_v50  ;;  %15783 = vmatprep.subr.bf16.mxu1 %v22472_v4  ;;  %v22479_v50 = vld [vmem:[%s30679_s14 + $0x8a0] ss:$16 sps:$4 sm:$0xff]   ;;  %v22520_v4 = vld [vmem:[%s30679_s14 + $0x7c4] ss:$16 sps:$4 sm:$0xff]  }
 0x93c   : > { %v13571_v17 = vpop.f32.mrf.mxu1  ;;  %v13612_v59 = vpop.f32.mrf.mxu0  ;;  %15824 = vmatprep.subr.bf16.mxu0 %v22475_v25  ;;  %v22515_v27 = vld [vmem:[%s30679_s14 + $0x9e0] ss:$16 sps:$4 sm:$0xff]   ;;  %v22526_v45 = vld [vmem:[%s30679_s14 + $0x7a4] ss:$16 sps:$4 sm:$0xff]  }
 0x93d   : > { %v29165_v28 = vadd.f32 %v13610_v15, %v13570_v44  ;;  %15784 = vmatpush1.bf16.msra.mxu1 %v22470_v48  ;;  %v22518_v35 = vld [vmem:[%s30679_s14 + $0x7c0] ss:$16 sps:$4 sm:$0xff]   ;;  %v22529_v48 = vld [vmem:[%s30679_s14 + $0x9a4] ss:$16 sps:$4 sm:$0xff]  }
 0x93e   : > { %15825 = vmatpush1.bf16.msra.mxu0 %v22473_v58  ;;  %v13572_v36 = vpop.f32.mrf.mxu1  ;;  %v13613_v30 = vpop.f32.mrf.mxu0  ;;  %15785 = vmatprep.subr.bf16.mxu1 %v22478_v40  ;;  %v22521_v25 = vld [vmem:[%s30679_s14 + $0x9c0] ss:$16 sps:$4 sm:$0xff]   ;;  %v22532_v58 = vld [vmem:[%s30679_s14 + $0x784] ss:$16 sps:$4 sm:$0xff]  }
 0x93f   : > { %15826 = vmatprep.subr.bf16.mxu0 %v22481_v56  ;;  %v22524_v51 = vld [vmem:[%s30679_s14 + $0x7a0] ss:$16 sps:$4 sm:$0xff]   ;;  %v22535_v40 = vld [vmem:[%s30679_s14 + $0x984] ss:$16 sps:$4 sm:$0xff]  }
 0x940   : > { %v22527_v15 = vld [vmem:[%s30679_s14 + $0x9a0] ss:$16 sps:$4 sm:$0xff]   ;;  %v22538_v17 = vld [vmem:[%s30679_s14 + $0x764] ss:$16 sps:$4 sm:$0xff]  }
 0x941   : > { %15786 = vmatpush1.bf16.msra.mxu1 %v22476_v20  ;;  %v22530_v44 = vld [vmem:[%s30679_s14 + $0x780] ss:$16 sps:$4 sm:$0xff]   ;;  %v22541_v59 = vld [vmem:[%s30679_s14 + $0x964] ss:$16 sps:$4 sm:$0xff]  }
 0x942   : > { %15827 = vmatpush1.bf16.msra.mxu0 %v22479_v50  ;;  %15787 = vmatprep.subr.bf16.mxu1 %v22484_v34  ;;  %v22533_v56 = vld [vmem:[%s30679_s14 + $0x980] ss:$16 sps:$4 sm:$0xff]   ;;  %v22544_v30 = vld [vmem:[%s30679_s14 + $0x744] ss:$16 sps:$4 sm:$0xff]  }
 0x943   : > { %15828 = vmatprep.subr.bf16.mxu0 %v22487_v62  ;;  %v22536_v20 = vld [vmem:[%s30679_s14 + $0x760] ss:$16 sps:$4 sm:$0xff]   ;;  %v22547_v50 = vld [vmem:[%s30679_s14 + $0x944] ss:$16 sps:$4 sm:$0xff]  }
 0x944   : > { %v22539_v36 = vld [vmem:[%s30679_s14 + $0x960] ss:$16 sps:$4 sm:$0xff]  }
 0x945   : > { %15788 = vmatpush1.bf16.msra.mxu1 %v22482_v43  ;;  %v22542_v34 = vld [vmem:[%s30679_s14 + $0x740] ss:$16 sps:$4 sm:$0xff]   ;;  %v22550_v43 = vld [vmem:[%s30679_s14 + $0x724] ss:$16 sps:$4 sm:$0xff]  }
 0x946   : > { %15829 = vmatpush1.bf16.msra.mxu0 %v22485_v38  ;;  %15789 = vmatprep.subr.bf16.mxu1 %v22490_v42  ;;  %v22545_v62 = vld [vmem:[%s30679_s14 + $0x940] ss:$16 sps:$4 sm:$0xff]   ;;  %v22553_v38 = vld [vmem:[%s30679_s14 + $0x924] ss:$16 sps:$4 sm:$0xff]  }
 0x947   : > { %15830 = vmatprep.subr.bf16.mxu0 %v22493_v19  ;;  %v22548_v42 = vld [vmem:[%s30679_s14 + $0x720] ss:$16 sps:$4 sm:$0xff]  }
 0x948   : > { %v22551_v19 = vld [vmem:[%s30679_s14 + $0x920] ss:$16 sps:$4 sm:$0xff]  }
 0x949   : > { %15790 = vmatpush1.bf16.msra.mxu1 %v22488_v0  ;;  %v22556_v0 = vld [vmem:[%s30679_s14 + $0x704] ss:$16 sps:$4 sm:$0xff]  }
 0x94a   : > { %15831 = vmatpush1.bf16.msra.mxu0 %v22491_v1  ;;  %15791 = vmatprep.subr.bf16.mxu1 %v22496_v22  ;;  %v22559_v1 = vld [vmem:[%s30679_s14 + $0x904] ss:$16 sps:$4 sm:$0xff]   ;;  %v22554_v22 = vld [vmem:[%s30679_s14 + $0x700] ss:$16 sps:$4 sm:$0xff]  }
 0x94b   : > { %15832 = vmatprep.subr.bf16.mxu0 %v22499_v16  ;;  %v22557_v16 = vld [vmem:[%s30679_s14 + $0x900] ss:$16 sps:$4 sm:$0xff]  }
 0x94d   : > { %15792 = vmatpush1.bf16.msra.mxu1 %v22494_v60  ;;  %v22562_v60 = vld [vmem:[%s30679_s14 + $0xae4] ss:$16 sps:$4 sm:$0xff]  }
 0x94e   : > { %15833 = vmatpush1.bf16.msra.mxu0 %v22497_v47  ;;  %15793 = vmatprep.subr.bf16.mxu1 %v22502_v29  ;;  %v22565_v47 = vld [vmem:[%s30679_s14 + $0xec] ss:$16 sps:$4 sm:$0xff]   ;;  %v22560_v29 = vld [vmem:[%s30679_s14 + $0xae0] ss:$16 sps:$4 sm:$0xff]  }
 0x94f   : > { %15834 = vmatprep.subr.bf16.mxu0 %v22505_v5  ;;  %v29340_v5 = vpack.c.bf16 %v27919_v33, %v27919_v33  ;;  %v29355_v33 = vpack.c.bf16 %v28237_v52, %v28237_v52  ;;  %v22569_v52 = vld [vmem:[%s30679_s14 + $0xc8] ss:$16 sps:$4 sm:$0xff]  }
 0x951   : > { %15794 = vmatpush1.bf16.msra.mxu1 %v22500_v49  ;;  %v22563_v49 = vld [vmem:[%s30679_s14 + $0xe8] ss:$16 sps:$4 sm:$0xff]  }
 0x952   : > { %15835 = vmatpush1.bf16.msra.mxu0 %v22503_v13  ;;  %15795 = vmatprep.subr.bf16.mxu1 %v22508_v37  ;;  %v29347_v13 = vpack.c.bf16 %v28103_v3, %v28103_v3  ;;  %v22568_v37 = vld [vmem:[%s30679_s14 + $0xac4] ss:$16 sps:$4 sm:$0xff]  }
 0x953   : > { %15836 = vmatprep.subr.bf16.mxu0 %v22511_v55 }
 0x955   : > { %15796 = vmatpush1.bf16.msra.mxu1 %v22506_v53  ;;  %v22571_v53 = vld [vmem:[%s30679_s14 + $0xcc] ss:$16 sps:$4 sm:$0xff]  }
 0x956   : > { %15837 = vmatpush1.bf16.msra.mxu0 %v22509_v46  ;;  %15797 = vmatprep.subr.bf16.mxu1 %v22514_v31  ;;  %v22566_v31 = vld [vmem:[%s30679_s14 + $0xac0] ss:$16 sps:$4 sm:$0xff]  }
 0x957   : > { %15838 = vmatprep.subr.bf16.mxu0 %v22517_v24 }
 0x959   : > { %15798 = vmatpush2.bf16.msra.mxu1 %v22512_v6 }
 0x95a   : > { %15839 = vmatpush2.bf16.msra.mxu0 %v22515_v27  ;;  %15799 = vmatprep.subr.bf16.mxu1 %v22520_v4 }
 0x95b   : > { %15840 = vmatprep.subr.bf16.mxu0 %v22523_v18  ;;  %v22577_v18 = vld [vmem:[%s30679_s14 + $0xac] ss:$16 sps:$4 sm:$0xff]  }
 0x95d   : > { %15800 = vmatpush2.bf16.msra.mxu1 %v22518_v35 }
 0x95e   : > { %15841 = vmatpush2.bf16.msra.mxu0 %v22521_v25  ;;  %15801 = vmatprep.subr.bf16.mxu1 %v22526_v45 }
 0x95f   : > { %15842 = vmatprep.subr.bf16.mxu0 %v22529_v48  ;;  %v22572_v48 = vld [vmem:[%s30679_s14 + $0xaa0] ss:$16 sps:$4 sm:$0xff]  }
 0x961   : > { %15802 = vmatpush2.bf16.msra.mxu1 %v22524_v51  ;;  %v22580_v51 = vld [vmem:[%s30679_s14 + $0xa84] ss:$16 sps:$4 sm:$0xff]  }
 0x962   : > { %15843 = vmatpush2.bf16.msra.mxu0 %v22527_v15  ;;  %15803 = vmatprep.subr.bf16.mxu1 %v22532_v58  ;;  %v22583_v58 = vld [vmem:[%s30679_s14 + $0x8c] ss:$16 sps:$4 sm:$0xff]  }
 0x963   : > { %15844 = vmatprep.subr.bf16.mxu0 %v22535_v40  ;;  %v22578_v40 = vld [vmem:[%s30679_s14 + $0xa80] ss:$16 sps:$4 sm:$0xff]  }
 0x965   : > { %15804 = vmatpush2.bf16.msra.mxu1 %v22530_v44  ;;  %v22581_v44 = vld [vmem:[%s30679_s14 + $0x88] ss:$16 sps:$4 sm:$0xff]  }
 0x966   : > { %15845 = vmatpush2.bf16.msra.mxu0 %v22533_v56  ;;  %15805 = vmatprep.subr.bf16.mxu1 %v22538_v17  ;;  %v22586_v56 = vld [vmem:[%s30679_s14 + $0xa64] ss:$16 sps:$4 sm:$0xff]   ;;  %v22589_v17 = vld [vmem:[%s30679_s14 + $0x6c] ss:$16 sps:$4 sm:$0xff]  }
 0x967   : > { %15846 = vmatprep.subr.bf16.mxu0 %v22541_v59  ;;  %v22584_v59 = vld [vmem:[%s30679_s14 + $0xa60] ss:$16 sps:$4 sm:$0xff]  }
 0x969   : > { %15806 = vmatpush2.bf16.msra.mxu1 %v22536_v20  ;;  %v22587_v20 = vld [vmem:[%s30679_s14 + $0x68] ss:$16 sps:$4 sm:$0xff]  }
 0x96a   : > { %15847 = vmatpush2.bf16.msra.mxu0 %v22539_v36  ;;  %15807 = vmatprep.subr.bf16.mxu1 %v22544_v30  ;;  %v22592_v36 = vld [vmem:[%s30679_s14 + $0xa44] ss:$16 sps:$4 sm:$0xff]   ;;  %v22595_v30 = vld [vmem:[%s30679_s14 + $0x4c] ss:$16 sps:$4 sm:$0xff]  }
 0x96b   : > { %15848 = vmatprep.subr.bf16.mxu0 %v22547_v50  ;;  %v22590_v50 = vld [vmem:[%s30679_s14 + $0xa40] ss:$16 sps:$4 sm:$0xff]  }
 0x96d   : > { %15808 = vmatpush2.bf16.msra.mxu1 %v22542_v34  ;;  %v22593_v34 = vld [vmem:[%s30679_s14 + $0x48] ss:$16 sps:$4 sm:$0xff]  }
 0x96e   : > { %15849 = vmatpush2.bf16.msra.mxu0 %v22545_v62  ;;  %15809 = vmatprep.subr.bf16.mxu1 %v22550_v43  ;;  %v22598_v62 = vld [vmem:[%s30679_s14 + $0xa24] ss:$16 sps:$4 sm:$0xff]   ;;  %v22601_v43 = vld [vmem:[%s30679_s14 + $0x2c] ss:$16 sps:$4 sm:$0xff]  }
 0x96f   : > { %15850 = vmatprep.subr.bf16.mxu0 %v22553_v38  ;;  %v22596_v38 = vld [vmem:[%s30679_s14 + $0xa20] ss:$16 sps:$4 sm:$0xff]  }
 0x971   : > { %15810 = vmatpush2.bf16.msra.mxu1 %v22548_v42  ;;  %v22599_v42 = vld [vmem:[%s30679_s14 + $0x28] ss:$16 sps:$4 sm:$0xff]  }
 0x972   : > { %15851 = vmatpush2.bf16.msra.mxu0 %v22551_v19  ;;  %15811 = vmatprep.subr.bf16.mxu1 %v22556_v0  ;;  %v22604_v19 = vld [vmem:[%s30679_s14 + $0xa04] ss:$16 sps:$4 sm:$0xff]   ;;  %v22607_v0 = vld [vmem:[%s30679_s14 + $0xc] ss:$16 sps:$4 sm:$0xff]  }
 0x973   : > { %15852 = vmatprep.subr.bf16.mxu0 %v22559_v1  ;;  %v22602_v1 = vld [vmem:[%s30679_s14 + $0xa00] ss:$16 sps:$4 sm:$0xff]  }
 0x975   : > { %15812 = vmatpush2.bf16.msra.mxu1 %v22554_v22  ;;  %v22605_v22 = vld [vmem:[%s30679_s14 + $0x8] ss:$16 sps:$4 sm:$0xff]  }
 0x976   : > { %15853 = vmatpush2.bf16.msra.mxu0 %v22557_v16  ;;  %15863 = vmatprep.subr.bf16.mxu1 %v22562_v60  ;;  %v22610_v16 = vld [vmem:[%s30679_s14 + $0xbe4] ss:$16 sps:$4 sm:$0xff]   ;;  %v22613_v60 = vld [vmem:[%s30679_s14 + $0x1ec] ss:$16 sps:$4 sm:$0xff]  }
 0x977   : > { %15904 = vmatprep.subr.bf16.mxu0 %v22565_v47  ;;  %v22608_v47 = vld [vmem:[%s30679_s14 + $0xbe0] ss:$16 sps:$4 sm:$0xff]  }
 0x978   : > { %v13649_v55 = vpop.f32.mrf.mxu1  ;;  %15814 = vmatmul.mubr.bf16.vlgmr.msra.gmra.mxu1 %v29340_v5 }
 0x979   : > { %v13650_v46 = vadd.f32 %v13649_v55, %v29158_v54  ;;  %v13690_v3 = vpop.f32.mrf.mxu0  ;;  %15855 = vmatmul.mubr.bf16.vlgmr.msra.gmra.mxu0 %v29347_v13  ;;  %15864 = vmatpush1.bf16.msra.mxu1 %v22560_v29  ;;  %v22574_v54 = vld [vmem:[%s30679_s14 + $0xaa4] ss:$16 sps:$4 sm:$0xff]   ;;  %v22611_v29 = vld [vmem:[%s30679_s14 + $0x1e8] ss:$16 sps:$4 sm:$0xff]   ;;  %v22614_v55 = vld [vmem:[%s30679_s14 + $0xbc0] ss:$16 sps:$4 sm:$0xff]  }
 0x97a   : > { %15895 = vmatprep.mubr.bf16.mxu1 %v29355_v33  ;;  %15905 = vmatpush1.bf16.msra.mxu0 %v22563_v49  ;;  %v13651_v24 = vpop.f32.mrf.mxu1  ;;  %v22616_v49 = vld [vmem:[%s30679_s14 + $0xbc4] ss:$16 sps:$4 sm:$0xff]  }
 0x97b   : > { %v29372_v6 = vadd.f32 %v13690_v3, %v13650_v46  ;;  %15936 = vmatprep.mubr.bf16.mxu0 %v28712_v2  ;;  %v13652_v27 = vadd.f32 %v13651_v24, %v29165_v28  ;;  %v13692_v4 = vpop.f32.mrf.mxu0  ;;  %15865 = vmatprep.subr.bf16.mxu1 %v22568_v37  ;;  %v22575_v28 = vld [vmem:[%s30679_s14 + $0xa8] ss:$16 sps:$4 sm:$0xff]   ;;  %v22619_v37 = vld [vmem:[%s30679_s14 + $0x1cc] ss:$16 sps:$4 sm:$0xff]   ;;  %v22622_v46 = vld [vmem:[%s30679_s14 + $0xba4] ss:$16 sps:$4 sm:$0xff]  }
 0x97c   : > { %v13653_v35 = vpop.f32.mrf.mxu1  ;;  %15906 = vmatprep.subr.bf16.mxu0 %v22571_v53  ;;  %v22617_v53 = vld [vmem:[%s30679_s14 + $0x1c8] ss:$16 sps:$4 sm:$0xff]   ;;  %v22625_v3 = vld [vmem:[%s30679_s14 + $0x1ac] ss:$16 sps:$4 sm:$0xff]  }
 0x97d   : > { %v29379_v25 = vadd.f32 %v13692_v4, %v13652_v27  ;;  %v13694_v45 = vpop.f32.mrf.mxu0  ;;  %15866 = vmatpush1.bf16.msra.mxu1 %v22566_v31  ;;  %v22620_v31 = vld [vmem:[%s30679_s14 + $0xba0] ss:$16 sps:$4 sm:$0xff]   ;;  %v22623_v24 = vld [vmem:[%s30679_s14 + $0x1a8] ss:$16 sps:$4 sm:$0xff]   ;;  %v22637_v35 = vld [vmem:[%s30679_s14 + $0x16c] ss:$16 sps:$4 sm:$0xff]  }
 0x97e   : > { %15907 = vmatpush1.bf16.msra.mxu0 %v22569_v52  ;;  %v13654_v2 = vpop.f32.mrf.mxu1  ;;  %15867 = vmatprep.subr.bf16.mxu1 %v22574_v54  ;;  %v22628_v52 = vld [vmem:[%s30679_s14 + $0xb84] ss:$16 sps:$4 sm:$0xff]   ;;  %v22631_v54 = vld [vmem:[%s30679_s14 + $0x18c] ss:$16 sps:$4 sm:$0xff]   ;;  %v22626_v27 = vld [vmem:[%s30679_s14 + $0xb80] ss:$16 sps:$4 sm:$0xff]  }
 0x97f   : > { %v13695_v15 = vpop.f32.mrf.mxu0  ;;  %15908 = vmatprep.subr.bf16.mxu0 %v22577_v18  ;;  %v22629_v4 = vld [vmem:[%s30679_s14 + $0x188] ss:$16 sps:$4 sm:$0xff]   ;;  %v22634_v18 = vld [vmem:[%s30679_s14 + $0xb64] ss:$16 sps:$4 sm:$0xff]   ;;  %v22632_v45 = vld [vmem:[%s30679_s14 + $0xb60] ss:$16 sps:$4 sm:$0xff]  }
 0x980   : > { %v22640_v2 = vld [vmem:[%s30679_s14 + $0xb44] ss:$16 sps:$4 sm:$0xff]   ;;  %v22641_v15 = vld [vmem:[%s30679_s14 + $0x148] ss:$16 sps:$4 sm:$0xff]  }
 0x981   : > { %15868 = vmatpush1.bf16.msra.mxu1 %v22572_v48  ;;  %v22635_v48 = vld [vmem:[%s30679_s14 + $0x168] ss:$16 sps:$4 sm:$0xff]  }
 0x982   : > { %15909 = vmatpush1.bf16.msra.mxu0 %v22575_v28  ;;  %15869 = vmatprep.subr.bf16.mxu1 %v22580_v51  ;;  %v22643_v28 = vld [vmem:[%s30679_s14 + $0x14c] ss:$16 sps:$4 sm:$0xff]   ;;  %v22638_v51 = vld [vmem:[%s30679_s14 + $0xb40] ss:$16 sps:$4 sm:$0xff]  }
 0x983   : > { %15910 = vmatprep.subr.bf16.mxu0 %v22583_v58  ;;  %v22646_v58 = vld [vmem:[%s30679_s14 + $0xb24] ss:$16 sps:$4 sm:$0xff]  }
 0x985   : > { %15870 = vmatpush1.bf16.msra.mxu1 %v22578_v40  ;;  %v22649_v40 = vld [vmem:[%s30679_s14 + $0x12c] ss:$16 sps:$4 sm:$0xff]  }
 0x986   : > { %15911 = vmatpush1.bf16.msra.mxu0 %v22581_v44  ;;  %15871 = vmatprep.subr.bf16.mxu1 %v22586_v56  ;;  %v22644_v44 = vld [vmem:[%s30679_s14 + $0xb20] ss:$16 sps:$4 sm:$0xff]   ;;  %v22647_v56 = vld [vmem:[%s30679_s14 + $0x128] ss:$16 sps:$4 sm:$0xff]  }
 0x987   : > { %15912 = vmatprep.subr.bf16.mxu0 %v22589_v17  ;;  %v22652_v17 = vld [vmem:[%s30679_s14 + $0xb04] ss:$16 sps:$4 sm:$0xff]  }
 0x989   : > { %15872 = vmatpush1.bf16.msra.mxu1 %v22584_v59  ;;  %v22655_v59 = vld [vmem:[%s30679_s14 + $0x10c] ss:$16 sps:$4 sm:$0xff]  }
 0x98a   : > { %15913 = vmatpush1.bf16.msra.mxu0 %v22587_v20  ;;  %15873 = vmatprep.subr.bf16.mxu1 %v22592_v36  ;;  %v22650_v20 = vld [vmem:[%s30679_s14 + $0xb00] ss:$16 sps:$4 sm:$0xff]   ;;  %v22653_v36 = vld [vmem:[%s30679_s14 + $0x108] ss:$16 sps:$4 sm:$0xff]  }
 0x98b   : > { %15914 = vmatprep.subr.bf16.mxu0 %v22595_v30  ;;  %v22658_v30 = vld [vmem:[%s30679_s14 + $0x2ec] ss:$16 sps:$4 sm:$0xff]  }
 0x98d   : > { %15874 = vmatpush1.bf16.msra.mxu1 %v22590_v50  ;;  %v22661_v50 = vld [vmem:[%s30679_s14 + $0x4ec] ss:$16 sps:$4 sm:$0xff]  }
 0x98e   : > { %15915 = vmatpush1.bf16.msra.mxu0 %v22593_v34  ;;  %15875 = vmatprep.subr.bf16.mxu1 %v22598_v62  ;;  %v22656_v34 = vld [vmem:[%s30679_s14 + $0x2e8] ss:$16 sps:$4 sm:$0xff]   ;;  %v29554_v62 = vpack.c.bf16 %v28228_v63, %v28228_v63 }
 0x98f   : > { %15916 = vmatprep.subr.bf16.mxu0 %v22601_v43  ;;  %v22659_v43 = vld [vmem:[%s30679_s14 + $0x4e8] ss:$16 sps:$4 sm:$0xff]  }
 0x991   : > { %15876 = vmatpush1.bf16.msra.mxu1 %v22596_v38  ;;  %v22664_v38 = vld [vmem:[%s30679_s14 + $0x2cc] ss:$16 sps:$4 sm:$0xff]  }
 0x992   : > { %15917 = vmatpush1.bf16.msra.mxu0 %v22599_v42  ;;  %15877 = vmatprep.subr.bf16.mxu1 %v22604_v19  ;;  %v22667_v19 = vld [vmem:[%s30679_s14 + $0x4cc] ss:$16 sps:$4 sm:$0xff]  }
 0x993   : > { %15918 = vmatprep.subr.bf16.mxu0 %v22607_v0 }
 0x995   : > { %15878 = vmatpush1.bf16.msra.mxu1 %v22602_v1  ;;  %v22662_v1 = vld [vmem:[%s30679_s14 + $0x2c8] ss:$16 sps:$4 sm:$0xff]  }
 0x996   : > { %15919 = vmatpush1.bf16.msra.mxu0 %v22605_v22  ;;  %15879 = vmatprep.subr.bf16.mxu1 %v22610_v16 }
 0x997   : > { %15920 = vmatprep.subr.bf16.mxu0 %v22613_v60 }
 0x999   : > { %15880 = vmatpush2.bf16.msra.mxu1 %v22608_v47 }
 0x99a   : > { %15921 = vmatpush2.bf16.msra.mxu0 %v22611_v29  ;;  %15881 = vmatprep.subr.bf16.mxu1 %v22616_v49 }
 0x99b   : > { %15922 = vmatprep.subr.bf16.mxu0 %v22619_v37  ;;  %v22671_v37 = vld [vmem:[%s30679_s14 + $0x4a8] ss:$16 sps:$4 sm:$0xff]  }
 0x99d   : > { %15882 = vmatpush2.bf16.msra.mxu1 %v22614_v55 }
 0x99e   : > { %15923 = vmatpush2.bf16.msra.mxu0 %v22617_v53  ;;  %15883 = vmatprep.subr.bf16.mxu1 %v22622_v46  ;;  %v22679_v53 = vld [vmem:[%s30679_s14 + $0x48c] ss:$16 sps:$4 sm:$0xff]   ;;  %v22674_v46 = vld [vmem:[%s30679_s14 + $0x288] ss:$16 sps:$4 sm:$0xff]  }
 0x99f   : > { %15924 = vmatprep.subr.bf16.mxu0 %v22625_v3  ;;  %v22677_v3 = vld [vmem:[%s30679_s14 + $0x488] ss:$16 sps:$4 sm:$0xff]  }
 0x9a1   : > { %15884 = vmatpush2.bf16.msra.mxu1 %v22620_v31  ;;  %v22682_v31 = vld [vmem:[%s30679_s14 + $0x26c] ss:$16 sps:$4 sm:$0xff]  }
 0x9a2   : > { %15925 = vmatpush2.bf16.msra.mxu0 %v22623_v24  ;;  %15885 = vmatprep.subr.bf16.mxu1 %v22628_v52  ;;  %v22685_v24 = vld [vmem:[%s30679_s14 + $0x46c] ss:$16 sps:$4 sm:$0xff]   ;;  %v22680_v52 = vld [vmem:[%s30679_s14 + $0x268] ss:$16 sps:$4 sm:$0xff]  }
 0x9a3   : > { %15926 = vmatprep.subr.bf16.mxu0 %v22631_v54  ;;  %v22683_v54 = vld [vmem:[%s30679_s14 + $0x468] ss:$16 sps:$4 sm:$0xff]  }
 0x9a5   : > { %15886 = vmatpush2.bf16.msra.mxu1 %v22626_v27  ;;  %v22688_v27 = vld [vmem:[%s30679_s14 + $0x24c] ss:$16 sps:$4 sm:$0xff]  }
 0x9a6   : > { %15927 = vmatpush2.bf16.msra.mxu0 %v22629_v4  ;;  %15887 = vmatprep.subr.bf16.mxu1 %v22634_v18  ;;  %v22691_v4 = vld [vmem:[%s30679_s14 + $0x44c] ss:$16 sps:$4 sm:$0xff]   ;;  %v22686_v18 = vld [vmem:[%s30679_s14 + $0x248] ss:$16 sps:$4 sm:$0xff]  }
 0x9a7   : > { %15928 = vmatprep.subr.bf16.mxu0 %v22637_v35  ;;  %v22689_v35 = vld [vmem:[%s30679_s14 + $0x448] ss:$16 sps:$4 sm:$0xff]  }
 0x9a9   : > { %15888 = vmatpush2.bf16.msra.mxu1 %v22632_v45  ;;  %v22694_v45 = vld [vmem:[%s30679_s14 + $0x22c] ss:$16 sps:$4 sm:$0xff]  }
 0x9aa   : > { %15929 = vmatpush2.bf16.msra.mxu0 %v22635_v48  ;;  %15889 = vmatprep.subr.bf16.mxu1 %v22640_v2  ;;  %v22697_v48 = vld [vmem:[%s30679_s14 + $0x42c] ss:$16 sps:$4 sm:$0xff]   ;;  %v22692_v2 = vld [vmem:[%s30679_s14 + $0x228] ss:$16 sps:$4 sm:$0xff]  }
 0x9ab   : > { %15930 = vmatprep.subr.bf16.mxu0 %v22643_v28  ;;  %v22695_v28 = vld [vmem:[%s30679_s14 + $0x428] ss:$16 sps:$4 sm:$0xff]  }
 0x9ad   : > { %15890 = vmatpush2.bf16.msra.mxu1 %v22638_v51  ;;  %v22700_v51 = vld [vmem:[%s30679_s14 + $0x20c] ss:$16 sps:$4 sm:$0xff]  }
 0x9ae   : > { %15931 = vmatpush2.bf16.msra.mxu0 %v22641_v15  ;;  %15891 = vmatprep.subr.bf16.mxu1 %v22646_v58  ;;  %v22703_v15 = vld [vmem:[%s30679_s14 + $0x40c] ss:$16 sps:$4 sm:$0xff]   ;;  %v22698_v58 = vld [vmem:[%s30679_s14 + $0x208] ss:$16 sps:$4 sm:$0xff]  }
 0x9af   : > { %15932 = vmatprep.subr.bf16.mxu0 %v22649_v40  ;;  %v22701_v40 = vld [vmem:[%s30679_s14 + $0x408] ss:$16 sps:$4 sm:$0xff]  }
 0x9b1   : > { %15892 = vmatpush2.bf16.msra.mxu1 %v22644_v44  ;;  %v22706_v44 = vld [vmem:[%s30679_s14 + $0x3ec] ss:$16 sps:$4 sm:$0xff]  }
 0x9b2   : > { %15933 = vmatpush2.bf16.msra.mxu0 %v22647_v56  ;;  %15893 = vmatprep.subr.bf16.mxu1 %v22652_v17  ;;  %v22709_v56 = vld [vmem:[%s30679_s14 + $0x5ec] ss:$16 sps:$4 sm:$0xff]   ;;  %v22704_v17 = vld [vmem:[%s30679_s14 + $0x3e8] ss:$16 sps:$4 sm:$0xff]  }
 0x9b3   : > { %15934 = vmatprep.subr.bf16.mxu0 %v22655_v59  ;;  %v22707_v59 = vld [vmem:[%s30679_s14 + $0x5e8] ss:$16 sps:$4 sm:$0xff]  }
 0x9b5   : > { %15894 = vmatpush2.bf16.msra.mxu1 %v22650_v20  ;;  %v22712_v20 = vld [vmem:[%s30679_s14 + $0x3cc] ss:$16 sps:$4 sm:$0xff]  }
 0x9b6   : > { %15935 = vmatpush2.bf16.msra.mxu0 %v22653_v36  ;;  %15945 = vmatprep.subr.bf16.mxu1 %v22658_v30  ;;  %v22715_v36 = vld [vmem:[%s30679_s14 + $0x5cc] ss:$16 sps:$4 sm:$0xff]   ;;  %v22710_v30 = vld [vmem:[%s30679_s14 + $0x3c8] ss:$16 sps:$4 sm:$0xff]  }
 0x9b7   : > { %15986 = vmatprep.subr.bf16.mxu0 %v22661_v50  ;;  %v22713_v50 = vld [vmem:[%s30679_s14 + $0x5c8] ss:$16 sps:$4 sm:$0xff]  }
 0x9b8   : > { %v13731_v42 = vpop.f32.mrf.mxu1  ;;  %15896 = vmatmul.mubr.bf16.vlgmr.msra.gmra.mxu1 %v29554_v62 }
 0x9b9   : > { %v29567_v63 = vadd.f32 %v13731_v42, %v29372_v6  ;;  %v15692_v0 = vpop.f32.mrf.mxu0  ;;  %15937 = vmatmul.mubr.bf16.vlgmr.msra.gmra.mxu0 %v28907_v26  ;;  %15946 = vmatpush1.bf16.msra.mxu1 %v22656_v34  ;;  %v22665_v6 = vld [vmem:[%s30679_s14 + $0x4c8] ss:$16 sps:$4 sm:$0xff]   ;;  %v22670_v26 = vld [vmem:[%s30679_s14 + $0x2ac] ss:$16 sps:$4 sm:$0xff]  }
 0x9ba   : > { %v29574_v22 = vadd.f32 %v15692_v0, %v28924_v21  ;;  %15977 = vmatprep.mubr.bf16.mxu1 %v28917_v39  ;;  %15987 = vmatpush1.bf16.msra.mxu0 %v22659_v43  ;;  %v13733_v16 = vpop.f32.mrf.mxu1  ;;  %v22673_v39 = vld [vmem:[%s30679_s14 + $0x4ac] ss:$16 sps:$4 sm:$0xff]   ;;  %v22719_v42 = vld [vmem:[%s30679_s14 + $0x5a8] ss:$16 sps:$4 sm:$0xff]  }
 0x9bb   : > { %16018 = vmatprep.mubr.bf16.mxu0 %v28928_v41  ;;  %v29585_v60 = vadd.f32 %v13733_v16, %v29379_v25  ;;  %v15694_v47 = vpop.f32.mrf.mxu0  ;;  %15947 = vmatprep.subr.bf16.mxu1 %v22664_v38  ;;  %v22668_v41 = vld [vmem:[%s30679_s14 + $0x2a8] ss:$16 sps:$4 sm:$0xff]   ;;  %v22718_v34 = vld [vmem:[%s30679_s14 + $0x3ac] ss:$16 sps:$4 sm:$0xff]  }
 0x9bc   : > { %v29591_v21 = vadd.f32 %v15694_v47, %v28944_v32  ;;  %v13735_v29 = vpop.f32.mrf.mxu1  ;;  %15988 = vmatprep.subr.bf16.mxu0 %v22667_v19  ;;  %v22676_v32 = vld [vmem:[%s30679_s14 + $0x28c] ss:$16 sps:$4 sm:$0xff]   ;;  %v22716_v38 = vld [vmem:[%s30679_s14 + $0x3a8] ss:$16 sps:$4 sm:$0xff]  }
 0x9bd   : > { %v15696_v49 = vpop.f32.mrf.mxu0  ;;  %15948 = vmatpush1.bf16.msra.mxu1 %v22662_v1  ;;  %v22721_v43 = vld [vmem:[%s30679_s14 + $0x5ac] ss:$16 sps:$4 sm:$0xff]   ;;  %v22722_v1 = vld [vmem:[%s30679_s14 + $0x388] ss:$16 sps:$4 sm:$0xff]  }
 0x9be   : > { %15989 = vmatpush1.bf16.msra.mxu0 %v22665_v6  ;;  %v13736_v25 = vpop.f32.mrf.mxu1  ;;  %15949 = vmatprep.subr.bf16.mxu1 %v22670_v26  ;;  %v22724_v19 = vld [vmem:[%s30679_s14 + $0x38c] ss:$16 sps:$4 sm:$0xff]   ;;  %v22725_v16 = vld [vmem:[%s30679_s14 + $0x588] ss:$16 sps:$4 sm:$0xff]  }
 0x9bf   : > { %v15697_v55 = vpop.f32.mrf.mxu0  ;;  %15990 = vmatprep.subr.bf16.mxu0 %v22673_v39  ;;  %v22727_v0 = vld [vmem:[%s30679_s14 + $0x58c] ss:$16 sps:$4 sm:$0xff]   ;;  %v22728_v47 = vld [vmem:[%s30679_s14 + $0x368] ss:$16 sps:$4 sm:$0xff]  }
 0x9c0   : > { %v22730_v6 = vld [vmem:[%s30679_s14 + $0x36c] ss:$16 sps:$4 sm:$0xff]   ;;  %v22731_v39 = vld [vmem:[%s30679_s14 + $0x568] ss:$16 sps:$4 sm:$0xff]  }
 0x9c1   : > { %15950 = vmatpush1.bf16.msra.mxu1 %v22668_v41  ;;  %v22733_v26 = vld [vmem:[%s30679_s14 + $0x56c] ss:$16 sps:$4 sm:$0xff]   ;;  %v22734_v41 = vld [vmem:[%s30679_s14 + $0x348] ss:$16 sps:$4 sm:$0xff]  }
 0x9c2   : > { %15991 = vmatpush1.bf16.msra.mxu0 %v22671_v37  ;;  %15951 = vmatprep.subr.bf16.mxu1 %v22676_v32  ;;  %v22736_v29 = vld [vmem:[%s30679_s14 + $0x34c] ss:$16 sps:$4 sm:$0xff]   ;;  %v22737_v25 = vld [vmem:[%s30679_s14 + $0x548] ss:$16 sps:$4 sm:$0xff]  }
 0x9c3   : > { %15992 = vmatprep.subr.bf16.mxu0 %v22679_v53  ;;  %v22739_v49 = vld [vmem:[%s30679_s14 + $0x54c] ss:$16 sps:$4 sm:$0xff]   ;;  %v22740_v55 = vld [vmem:[%s30679_s14 + $0x328] ss:$16 sps:$4 sm:$0xff]  }
 0x9c4   : > { %v22742_v37 = vld [vmem:[%s30679_s14 + $0x32c] ss:$16 sps:$4 sm:$0xff]   ;;  %v22743_v53 = vld [vmem:[%s30679_s14 + $0x528] ss:$16 sps:$4 sm:$0xff]  }
 0x9c5   : > { %15952 = vmatpush1.bf16.msra.mxu1 %v22674_v46  ;;  %v22745_v32 = vld [vmem:[%s30679_s14 + $0x52c] ss:$16 sps:$4 sm:$0xff]  }
 0x9c6   : > { %15993 = vmatpush1.bf16.msra.mxu0 %v22677_v3  ;;  %15953 = vmatprep.subr.bf16.mxu1 %v22682_v31  ;;  %v22748_v46 = vld [vmem:[%s30679_s14 + $0x30c] ss:$16 sps:$4 sm:$0xff]   ;;  %v22746_v31 = vld [vmem:[%s30679_s14 + $0x308] ss:$16 sps:$4 sm:$0xff]  }
 0x9c7   : > { %15994 = vmatprep.subr.bf16.mxu0 %v22685_v24  ;;  %v22751_v3 = vld [vmem:[%s30679_s14 + $0x50c] ss:$16 sps:$4 sm:$0xff]   ;;  %v22749_v24 = vld [vmem:[%s30679_s14 + $0x508] ss:$16 sps:$4 sm:$0xff]  }
 0x9c9   : > { %15954 = vmatpush1.bf16.msra.mxu1 %v22680_v52  ;;  %v22754_v52 = vld [vmem:[%s30679_s14 + $0x6ec] ss:$16 sps:$4 sm:$0xff]  }
 0x9ca   : > { %15995 = vmatpush1.bf16.msra.mxu0 %v22683_v54  ;;  %15955 = vmatprep.subr.bf16.mxu1 %v22688_v27  ;;  %v22757_v54 = vld [vmem:[%s30679_s14 + $0x8ec] ss:$16 sps:$4 sm:$0xff]   ;;  %v22752_v27 = vld [vmem:[%s30679_s14 + $0x6e8] ss:$16 sps:$4 sm:$0xff]  }
 0x9cb   : > { %15996 = vmatprep.subr.bf16.mxu0 %v22691_v4  ;;  %v22755_v4 = vld [vmem:[%s30679_s14 + $0x8e8] ss:$16 sps:$4 sm:$0xff]  }
 0x9cd   : > { %15956 = vmatpush1.bf16.msra.mxu1 %v22686_v18  ;;  %v22760_v18 = vld [vmem:[%s30679_s14 + $0x6cc] ss:$16 sps:$4 sm:$0xff]  }
 0x9ce   : > { %15997 = vmatpush1.bf16.msra.mxu0 %v22689_v35  ;;  %15957 = vmatprep.subr.bf16.mxu1 %v22694_v45  ;;  %v22763_v45 = vld [vmem:[%s30679_s14 + $0x8cc] ss:$16 sps:$4 sm:$0xff]  }
 0x9cf   : > { %15998 = vmatprep.subr.bf16.mxu0 %v22697_v48 }
 0x9d1   : > { %15958 = vmatpush1.bf16.msra.mxu1 %v22692_v2 }
 0x9d2   : > { %15999 = vmatpush1.bf16.msra.mxu0 %v22695_v28  ;;  %15959 = vmatprep.subr.bf16.mxu1 %v22700_v51  ;;  %v22758_v28 = vld [vmem:[%s30679_s14 + $0x6c8] ss:$16 sps:$4 sm:$0xff]  }
 0x9d3   : > { %16000 = vmatprep.subr.bf16.mxu0 %v22703_v15 }
 0x9d5   : > { %15960 = vmatpush1.bf16.msra.mxu1 %v22698_v58 }
 0x9d6   : > { %16001 = vmatpush1.bf16.msra.mxu0 %v22701_v40  ;;  %15961 = vmatprep.subr.bf16.mxu1 %v22706_v44 }
 0x9d7   : > { %16002 = vmatprep.subr.bf16.mxu0 %v22709_v56 }
 0x9d9   : > { %15962 = vmatpush2.bf16.msra.mxu1 %v22704_v17  ;;  %v22764_v17 = vld [vmem:[%s30679_s14 + $0x6a8] ss:$16 sps:$4 sm:$0xff]  }
 0x9da   : > { %16003 = vmatpush2.bf16.msra.mxu0 %v22707_v59  ;;  %15963 = vmatprep.subr.bf16.mxu1 %v22712_v20  ;;  %v22772_v59 = vld [vmem:[%s30679_s14 + $0x68c] ss:$16 sps:$4 sm:$0xff]  }
 0x9db   : > { %16004 = vmatprep.subr.bf16.mxu0 %v22715_v36  ;;  %v22775_v36 = vld [vmem:[%s30679_s14 + $0x88c] ss:$16 sps:$4 sm:$0xff]  }
 0x9dd   : > { %15964 = vmatpush2.bf16.msra.mxu1 %v22710_v30  ;;  %v22770_v30 = vld [vmem:[%s30679_s14 + $0x688] ss:$16 sps:$4 sm:$0xff]  }
 0x9de   : > { %16005 = vmatpush2.bf16.msra.mxu0 %v22713_v50  ;;  %15965 = vmatprep.subr.bf16.mxu1 %v22718_v34  ;;  %v22773_v50 = vld [vmem:[%s30679_s14 + $0x888] ss:$16 sps:$4 sm:$0xff]   ;;  %v22778_v34 = vld [vmem:[%s30679_s14 + $0x66c] ss:$16 sps:$4 sm:$0xff]  }
 0x9df   : > { %16006 = vmatprep.subr.bf16.mxu0 %v22721_v43  ;;  %v22781_v43 = vld [vmem:[%s30679_s14 + $0x86c] ss:$16 sps:$4 sm:$0xff]  }
 0x9e1   : > { %15966 = vmatpush2.bf16.msra.mxu1 %v22716_v38  ;;  %v22776_v38 = vld [vmem:[%s30679_s14 + $0x668] ss:$16 sps:$4 sm:$0xff]  }
 0x9e2   : > { %16007 = vmatpush2.bf16.msra.mxu0 %v22719_v42  ;;  %15967 = vmatprep.subr.bf16.mxu1 %v22724_v19  ;;  %v22779_v42 = vld [vmem:[%s30679_s14 + $0x868] ss:$16 sps:$4 sm:$0xff]   ;;  %v22784_v19 = vld [vmem:[%s30679_s14 + $0x64c] ss:$16 sps:$4 sm:$0xff]  }
 0x9e3   : > { %16008 = vmatprep.subr.bf16.mxu0 %v22727_v0  ;;  %v22787_v0 = vld [vmem:[%s30679_s14 + $0x84c] ss:$16 sps:$4 sm:$0xff]  }
 0x9e5   : > { %15968 = vmatpush2.bf16.msra.mxu1 %v22722_v1  ;;  %v22782_v1 = vld [vmem:[%s30679_s14 + $0x648] ss:$16 sps:$4 sm:$0xff]  }
 0x9e6   : > { %16009 = vmatpush2.bf16.msra.mxu0 %v22725_v16  ;;  %15969 = vmatprep.subr.bf16.mxu1 %v22730_v6  ;;  %v22785_v16 = vld [vmem:[%s30679_s14 + $0x848] ss:$16 sps:$4 sm:$0xff]   ;;  %v22790_v6 = vld [vmem:[%s30679_s14 + $0x62c] ss:$16 sps:$4 sm:$0xff]  }
 0x9e7   : > { %16010 = vmatprep.subr.bf16.mxu0 %v22733_v26  ;;  %v22793_v26 = vld [vmem:[%s30679_s14 + $0x82c] ss:$16 sps:$4 sm:$0xff]  }
 0x9e9   : > { %15970 = vmatpush2.bf16.msra.mxu1 %v22728_v47  ;;  %v22788_v47 = vld [vmem:[%s30679_s14 + $0x628] ss:$16 sps:$4 sm:$0xff]  }
 0x9ea   : > { %16011 = vmatpush2.bf16.msra.mxu0 %v22731_v39  ;;  %15971 = vmatprep.subr.bf16.mxu1 %v22736_v29  ;;  %v22791_v39 = vld [vmem:[%s30679_s14 + $0x828] ss:$16 sps:$4 sm:$0xff]   ;;  %v22796_v29 = vld [vmem:[%s30679_s14 + $0x60c] ss:$16 sps:$4 sm:$0xff]  }
 0x9eb   : > { %16012 = vmatprep.subr.bf16.mxu0 %v22739_v49  ;;  %v22799_v49 = vld [vmem:[%s30679_s14 + $0x80c] ss:$16 sps:$4 sm:$0xff]  }
 0x9ed   : > { %15972 = vmatpush2.bf16.msra.mxu1 %v22734_v41  ;;  %v22794_v41 = vld [vmem:[%s30679_s14 + $0x608] ss:$16 sps:$4 sm:$0xff]  }
 0x9ee   : > { %16013 = vmatpush2.bf16.msra.mxu0 %v22737_v25  ;;  %15973 = vmatprep.subr.bf16.mxu1 %v22742_v37  ;;  %v22797_v25 = vld [vmem:[%s30679_s14 + $0x808] ss:$16 sps:$4 sm:$0xff]   ;;  %v22802_v37 = vld [vmem:[%s30679_s14 + $0x7ec] ss:$16 sps:$4 sm:$0xff]  }
 0x9ef   : > { %16014 = vmatprep.subr.bf16.mxu0 %v22745_v32  ;;  %v22805_v32 = vld [vmem:[%s30679_s14 + $0x9ec] ss:$16 sps:$4 sm:$0xff]  }
 0x9f1   : > { %15974 = vmatpush2.bf16.msra.mxu1 %v22740_v55  ;;  %v22800_v55 = vld [vmem:[%s30679_s14 + $0x7e8] ss:$16 sps:$4 sm:$0xff]  }
 0x9f2   : > { %16015 = vmatpush2.bf16.msra.mxu0 %v22743_v53  ;;  %15975 = vmatprep.subr.bf16.mxu1 %v22748_v46  ;;  %v22803_v53 = vld [vmem:[%s30679_s14 + $0x9e8] ss:$16 sps:$4 sm:$0xff]   ;;  %v22808_v46 = vld [vmem:[%s30679_s14 + $0x7cc] ss:$16 sps:$4 sm:$0xff]  }
 0x9f3   : > { %16016 = vmatprep.subr.bf16.mxu0 %v22751_v3  ;;  %v22811_v3 = vld [vmem:[%s30679_s14 + $0x9cc] ss:$16 sps:$4 sm:$0xff]  }
 0x9f5   : > { %15976 = vmatpush2.bf16.msra.mxu1 %v22746_v31  ;;  %v22806_v31 = vld [vmem:[%s30679_s14 + $0x7c8] ss:$16 sps:$4 sm:$0xff]  }
 0x9f6   : > { %16017 = vmatpush2.bf16.msra.mxu0 %v22749_v24  ;;  %16027 = vmatprep.subr.bf16.mxu1 %v22754_v52  ;;  %v22809_v24 = vld [vmem:[%s30679_s14 + $0x9c8] ss:$16 sps:$4 sm:$0xff]   ;;  %v22814_v52 = vld [vmem:[%s30679_s14 + $0x7ac] ss:$16 sps:$4 sm:$0xff]  }
 0x9f7   : > { %16068 = vmatprep.subr.bf16.mxu0 %v22757_v54  ;;  %v22817_v54 = vld [vmem:[%s30679_s14 + $0x9ac] ss:$16 sps:$4 sm:$0xff]  }
 0x9f8   : > { %v15733_v35 = vpop.f32.mrf.mxu1  ;;  %15978 = vmatmul.mubr.bf16.vlgmr.msra.gmra.mxu1 %v29122_v11  ;;  %v22761_v11 = vld [vmem:[%s30679_s14 + $0x8c8] ss:$16 sps:$4 sm:$0xff]  }
 0x9f9   : > { %v15734_v48 = vadd.f32 %v15733_v35, %v29574_v22  ;;  %v15774_v2 = vpop.f32.mrf.mxu0  ;;  %16019 = vmatmul.mubr.bf16.vlgmr.msra.gmra.mxu0 %v29129_v57  ;;  %16028 = vmatpush1.bf16.msra.mxu1 %v22752_v27  ;;  %v22766_v22 = vld [vmem:[%s30679_s14 + $0x6ac] ss:$16 sps:$4 sm:$0xff]   ;;  %v22812_v27 = vld [vmem:[%s30679_s14 + $0x7a8] ss:$16 sps:$4 sm:$0xff]  }
 0x9fa   : > { %16059 = vmatprep.mubr.bf16.mxu1 %v29137_v23  ;;  %16069 = vmatpush1.bf16.msra.mxu0 %v22755_v4  ;;  %v15735_v51 = vpop.f32.mrf.mxu1  ;;  %v22769_v23 = vld [vmem:[%s30679_s14 + $0x8ac] ss:$16 sps:$4 sm:$0xff]   ;;  %v22815_v4 = vld [vmem:[%s30679_s14 + $0x9a8] ss:$16 sps:$4 sm:$0xff]  }
 0x9fb   : > { %v29786_v15 = vadd.f32 %v15774_v2, %v15734_v48  ;;  %16100 = vmatprep.mubr.bf16.mxu0 %v29146_v61  ;;  %v15736_v57 = vadd.f32 %v15735_v51, %v29591_v21  ;;  %v15776_v58 = vpop.f32.mrf.mxu0  ;;  %16029 = vmatprep.subr.bf16.mxu1 %v22760_v18  ;;  %v22767_v21 = vld [vmem:[%s30679_s14 + $0x8a8] ss:$16 sps:$4 sm:$0xff]   ;;  %v22820_v18 = vld [vmem:[%s30679_s14 + $0x78c] ss:$16 sps:$4 sm:$0xff]  }
 0x9fc   : > { %v15737_v40 = vpop.f32.mrf.mxu1  ;;  %16070 = vmatprep.subr.bf16.mxu0 %v22763_v45  ;;  %v22823_v35 = vld [vmem:[%s30679_s14 + $0x98c] ss:$16 sps:$4 sm:$0xff]   ;;  %v22818_v45 = vld [vmem:[%s30679_s14 + $0x788] ss:$16 sps:$4 sm:$0xff]  }
 0x9fd   : > { %v29793_v44 = vadd.f32 %v15776_v58, %v15736_v57  ;;  %v15778_v56 = vpop.f32.mrf.mxu0  ;;  %16030 = vmatpush1.bf16.msra.mxu1 %v22758_v28  ;;  %v22821_v48 = vld [vmem:[%s30679_s14 + $0x988] ss:$16 sps:$4 sm:$0xff]   ;;  %v22826_v2 = vld [vmem:[%s30679_s14 + $0x76c] ss:$16 sps:$4 sm:$0xff]  }
 0x9fe   : > { %16071 = vmatpush1.bf16.msra.mxu0 %v22761_v11  ;;  %v15738_v61 = vpop.f32.mrf.mxu1  ;;  %16031 = vmatprep.subr.bf16.mxu1 %v22766_v22  ;;  %v22829_v28 = vld [vmem:[%s30679_s14 + $0x96c] ss:$16 sps:$4 sm:$0xff]   ;;  %v22824_v51 = vld [vmem:[%s30679_s14 + $0x768] ss:$16 sps:$4 sm:$0xff]  }
 0x9ff   : > { %v15779_v20 = vpop.f32.mrf.mxu0  ;;  %16072 = vmatprep.subr.bf16.mxu0 %v22769_v23  ;;  %v22827_v11 = vld [vmem:[%s30679_s14 + $0x968] ss:$16 sps:$4 sm:$0xff]   ;;  %v22832_v22 = vld [vmem:[%s30679_s14 + $0x74c] ss:$16 sps:$4 sm:$0xff]  }
 0xa00   : > { %v22835_v57 = vld [vmem:[%s30679_s14 + $0x94c] ss:$16 sps:$4 sm:$0xff]   ;;  %v22830_v58 = vld [vmem:[%s30679_s14 + $0x748] ss:$16 sps:$4 sm:$0xff]  }
 0xa01   : > { %16032 = vmatpush1.bf16.msra.mxu1 %v22764_v17  ;;  %v22833_v23 = vld [vmem:[%s30679_s14 + $0x948] ss:$16 sps:$4 sm:$0xff]   ;;  %v22838_v40 = vld [vmem:[%s30679_s14 + $0x72c] ss:$16 sps:$4 sm:$0xff]  }
 0xa02   : > { %16073 = vmatpush1.bf16.msra.mxu0 %v22767_v21  ;;  %16033 = vmatprep.subr.bf16.mxu1 %v22772_v59  ;;  %v22841_v56 = vld [vmem:[%s30679_s14 + $0x92c] ss:$16 sps:$4 sm:$0xff]   ;;  %v22836_v17 = vld [vmem:[%s30679_s14 + $0x728] ss:$16 sps:$4 sm:$0xff]  }
 0xa03   : > { %16074 = vmatprep.subr.bf16.mxu0 %v22775_v36  ;;  %v22839_v61 = vld [vmem:[%s30679_s14 + $0x928] ss:$16 sps:$4 sm:$0xff]   ;;  %v22844_v21 = vld [vmem:[%s30679_s14 + $0x70c] ss:$16 sps:$4 sm:$0xff]  }
 0xa04   : > { %v22847_v59 = vld [vmem:[%s30679_s14 + $0x90c] ss:$16 sps:$4 sm:$0xff]   ;;  %v22842_v20 = vld [vmem:[%s30679_s14 + $0x708] ss:$16 sps:$4 sm:$0xff]  }
 0xa05   : > { %16034 = vmatpush1.bf16.msra.mxu1 %v22770_v30  ;;  %v22845_v36 = vld [vmem:[%s30679_s14 + $0x908] ss:$16 sps:$4 sm:$0xff]   ;;  %v22850_v30 = vld [vmem:[%s30679_s14 + $0xaec] ss:$16 sps:$4 sm:$0xff]  }
 0xa06   : > { %16075 = vmatpush1.bf16.msra.mxu0 %v22773_v50  ;;  %16035 = vmatprep.subr.bf16.mxu1 %v22778_v34  ;;  %v22859_v50 = vld [vmem:[%s30682_s17 + $0xe4] ss:$16 sps:$4 sm:$0xff]   ;;  %v22848_v34 = vld [vmem:[%s30679_s14 + $0xae8] ss:$16 sps:$4 sm:$0xff]  }
 0xa07   : > { %16076 = vmatprep.subr.bf16.mxu0 %v22781_v43  ;;  %v22853_v43 = vld [vmem:[%s30679_s14 + $0xacc] ss:$16 sps:$4 sm:$0xff]  }
 0xa09   : > { %16036 = vmatpush1.bf16.msra.mxu1 %v22776_v38  ;;  %v22857_v38 = vld [vmem:[%s30682_s17 + $0xe0] ss:$16 sps:$4 sm:$0xff]  }
 0xa0a   : > { %16077 = vmatpush1.bf16.msra.mxu0 %v22779_v42  ;;  %16037 = vmatprep.subr.bf16.mxu1 %v22784_v19  ;;  %v22865_v19 = vld [vmem:[%s30682_s17 + $0xc4] ss:$16 sps:$4 sm:$0xff]  }
 0xa0b   : > { %16078 = vmatprep.subr.bf16.mxu0 %v22787_v0 }
 0xa0d   : > { %16038 = vmatpush1.bf16.msra.mxu1 %v22782_v1 }
 0xa0e   : > { %16079 = vmatpush1.bf16.msra.mxu0 %v22785_v16  ;;  %16039 = vmatprep.subr.bf16.mxu1 %v22790_v6  ;;  %v22851_v16 = vld [vmem:[%s30679_s14 + $0xac8] ss:$16 sps:$4 sm:$0xff]  }
 0xa0f   : > { %16080 = vmatprep.subr.bf16.mxu0 %v22793_v26 }
 0xa11   : > { %16040 = vmatpush1.bf16.msra.mxu1 %v22788_v47 }
 0xa12   : > { %16081 = vmatpush1.bf16.msra.mxu0 %v22791_v39  ;;  %16041 = vmatprep.subr.bf16.mxu1 %v22796_v29  ;;  %v22854_v29 = vld [vmem:[%s30679_s14 + $0xaa8] ss:$16 sps:$4 sm:$0xff]  }
 0xa13   : > { %16082 = vmatprep.subr.bf16.mxu0 %v22799_v49 }
 0xa15   : > { %16042 = vmatpush1.bf16.msra.mxu1 %v22794_v41  ;;  %v22862_v41 = vld [vmem:[%s30679_s14 + $0xa8c] ss:$16 sps:$4 sm:$0xff]  }
 0xa16   : > { %16083 = vmatpush1.bf16.msra.mxu0 %v22797_v25  ;;  %16043 = vmatprep.subr.bf16.mxu1 %v22802_v37  ;;  %v22869_v37 = vld [vmem:[%s30682_s17 + $0xa0] ss:$16 sps:$4 sm:$0xff]  }
 0xa17   : > { %16084 = vmatprep.subr.bf16.mxu0 %v22805_v32  ;;  %v22877_v32 = vld [vmem:[%s30682_s17 + $0x84] ss:$16 sps:$4 sm:$0xff]  }
 0xa19   : > { %16044 = vmatpush2.bf16.msra.mxu1 %v22800_v55  ;;  %v22860_v55 = vld [vmem:[%s30679_s14 + $0xa88] ss:$16 sps:$4 sm:$0xff]  }
 0xa1a   : > { %16085 = vmatpush2.bf16.msra.mxu0 %v22803_v53  ;;  %16045 = vmatprep.subr.bf16.mxu1 %v22808_v46  ;;  %v22868_v53 = vld [vmem:[%s30679_s14 + $0xa6c] ss:$16 sps:$4 sm:$0xff]   ;;  %v22875_v46 = vld [vmem:[%s30682_s17 + $0x80] ss:$16 sps:$4 sm:$0xff]  }
 0xa1b   : > { %16086 = vmatprep.subr.bf16.mxu0 %v22811_v3  ;;  %v22883_v3 = vld [vmem:[%s30682_s17 + $0x64] ss:$16 sps:$4 sm:$0xff]  }
 0xa1d   : > { %16046 = vmatpush2.bf16.msra.mxu1 %v22806_v31  ;;  %v22866_v31 = vld [vmem:[%s30679_s14 + $0xa68] ss:$16 sps:$4 sm:$0xff]  }
 0xa1e   : > { %16087 = vmatpush2.bf16.msra.mxu0 %v22809_v24  ;;  %16047 = vmatprep.subr.bf16.mxu1 %v22814_v52  ;;  %v22874_v24 = vld [vmem:[%s30679_s14 + $0xa4c] ss:$16 sps:$4 sm:$0xff]   ;;  %v22881_v52 = vld [vmem:[%s30682_s17 + $0x60] ss:$16 sps:$4 sm:$0xff]  }
 0xa1f   : > { %16088 = vmatprep.subr.bf16.mxu0 %v22817_v54  ;;  %v22889_v54 = vld [vmem:[%s30682_s17 + $0x44] ss:$16 sps:$4 sm:$0xff]  }
 0xa21   : > { %16048 = vmatpush2.bf16.msra.mxu1 %v22812_v27  ;;  %v22872_v27 = vld [vmem:[%s30679_s14 + $0xa48] ss:$16 sps:$4 sm:$0xff]  }
 0xa22   : > { %16089 = vmatpush2.bf16.msra.mxu0 %v22815_v4  ;;  %16049 = vmatprep.subr.bf16.mxu1 %v22820_v18  ;;  %v22880_v4 = vld [vmem:[%s30679_s14 + $0xa2c] ss:$16 sps:$4 sm:$0xff]   ;;  %v22887_v18 = vld [vmem:[%s30682_s17 + $0x40] ss:$16 sps:$4 sm:$0xff]  }
 0xa23   : > { %16090 = vmatprep.subr.bf16.mxu0 %v22823_v35  ;;  %v22895_v35 = vld [vmem:[%s30682_s17 + $0x24] ss:$16 sps:$4 sm:$0xff]  }
 0xa25   : > { %16050 = vmatpush2.bf16.msra.mxu1 %v22818_v45  ;;  %v22878_v45 = vld [vmem:[%s30679_s14 + $0xa28] ss:$16 sps:$4 sm:$0xff]  }
 0xa26   : > { %16091 = vmatpush2.bf16.msra.mxu0 %v22821_v48  ;;  %16051 = vmatprep.subr.bf16.mxu1 %v22826_v2  ;;  %v22886_v48 = vld [vmem:[%s30679_s14 + $0xa0c] ss:$16 sps:$4 sm:$0xff]   ;;  %v22893_v2 = vld [vmem:[%s30682_s17 + $0x20] ss:$16 sps:$4 sm:$0xff]  }
 0xa27   : > { %16092 = vmatprep.subr.bf16.mxu0 %v22829_v28  ;;  %v22901_v28 = vld [vmem:[%s30682_s17 + $0x4] ss:$16 sps:$4 sm:$0xff]  }
 0xa29   : > { %16052 = vmatpush2.bf16.msra.mxu1 %v22824_v51  ;;  %v22884_v51 = vld [vmem:[%s30679_s14 + $0xa08] ss:$16 sps:$4 sm:$0xff]  }
 0xa2a   : > { %16093 = vmatpush2.bf16.msra.mxu0 %v22827_v11  ;;  %16053 = vmatprep.subr.bf16.mxu1 %v22832_v22  ;;  %v22892_v11 = vld [vmem:[%s30679_s14 + $0xbec] ss:$16 sps:$4 sm:$0xff]   ;;  %v22899_v22 = vld [vmem:[%s30682_s17] ss:$16 sps:$4 sm:$0xff]  }
 0xa2b   : > { %16094 = vmatprep.subr.bf16.mxu0 %v22835_v57  ;;  %v22907_v57 = vld [vmem:[%s30682_s17 + $0x1e4] ss:$16 sps:$4 sm:$0xff]  }
 0xa2d   : > { %16054 = vmatpush2.bf16.msra.mxu1 %v22830_v58  ;;  %v22890_v58 = vld [vmem:[%s30679_s14 + $0xbe8] ss:$16 sps:$4 sm:$0xff]  }
 0xa2e   : > { %16095 = vmatpush2.bf16.msra.mxu0 %v22833_v23  ;;  %16055 = vmatprep.subr.bf16.mxu1 %v22838_v40  ;;  %v22898_v23 = vld [vmem:[%s30679_s14 + $0xbcc] ss:$16 sps:$4 sm:$0xff]   ;;  %v22905_v40 = vld [vmem:[%s30682_s17 + $0x1e0] ss:$16 sps:$4 sm:$0xff]  }
 0xa2f   : > { %16096 = vmatprep.subr.bf16.mxu0 %v22841_v56  ;;  %v22913_v56 = vld [vmem:[%s30682_s17 + $0x1c4] ss:$16 sps:$4 sm:$0xff]  }
 0xa31   : > { %16056 = vmatpush2.bf16.msra.mxu1 %v22836_v17  ;;  %v22896_v17 = vld [vmem:[%s30679_s14 + $0xbc8] ss:$16 sps:$4 sm:$0xff]  }
 0xa32   : > { %16097 = vmatpush2.bf16.msra.mxu0 %v22839_v61  ;;  %16057 = vmatprep.subr.bf16.mxu1 %v22844_v21  ;;  %v22904_v61 = vld [vmem:[%s30679_s14 + $0xbac] ss:$16 sps:$4 sm:$0xff]   ;;  %v22911_v21 = vld [vmem:[%s30682_s17 + $0x1c0] ss:$16 sps:$4 sm:$0xff]  }
 0xa33   : > { %16098 = vmatprep.subr.bf16.mxu0 %v22847_v59  ;;  %v22919_v59 = vld [vmem:[%s30682_s17 + $0x1a4] ss:$16 sps:$4 sm:$0xff]  }
 0xa35   : > { %16058 = vmatpush2.bf16.msra.mxu1 %v22842_v20  ;;  %v22902_v20 = vld [vmem:[%s30679_s14 + $0xba8] ss:$16 sps:$4 sm:$0xff]  }
 0xa36   : > { %16099 = vmatpush2.bf16.msra.mxu0 %v22845_v36  ;;  %16109 = vmatprep.subr.bf16.mxu1 %v22850_v30  ;;  %v22910_v36 = vld [vmem:[%s30679_s14 + $0xb8c] ss:$16 sps:$4 sm:$0xff]   ;;  %v22917_v30 = vld [vmem:[%s30682_s17 + $0x1a0] ss:$16 sps:$4 sm:$0xff]  }
 0xa37   : > { %16970 = vmatprep.subr.bf16.mxu0 %v22859_v50  ;;  %v22925_v50 = vld [vmem:[%s30682_s17 + $0x184] ss:$16 sps:$4 sm:$0xff]  }
 0xa38   : > { %v15815_v42 = vpop.f32.mrf.mxu1  ;;  %16060 = vmatmul.mubr.bf16.vlgmr.msra.gmra.mxu1 %v29340_v5  ;;  %v22856_v5 = vld [vmem:[%s30679_s14 + $0xaac] ss:$16 sps:$4 sm:$0xff]  }
 0xa39   : > { %v15816_v0 = vadd.f32 %v15815_v42, %v29786_v15  ;;  %v15856_v1 = vpop.f32.mrf.mxu0  ;;  %16101 = vmatmul.mubr.bf16.vlgmr.msra.gmra.mxu0 %v29347_v13  ;;  %16110 = vmatpush1.bf16.msra.mxu1 %v22848_v34  ;;  %v22863_v13 = vld [vmem:[%s30682_s17 + $0xc0] ss:$16 sps:$4 sm:$0xff]   ;;  %v22908_v34 = vld [vmem:[%s30679_s14 + $0xb88] ss:$16 sps:$4 sm:$0xff]   ;;  %v22931_v42 = vld [vmem:[%s30682_s17 + $0x164] ss:$16 sps:$4 sm:$0xff]  }
 0xa3a   : > { %16141 = vmatprep.mubr.bf16.mxu1 %v29355_v33  ;;  %v29982_v6 = vpop.f32.mrf.mxu1  ;;  %16111 = vmatprep.subr.bf16.mxu1 %v22853_v43  ;;  %v22871_v33 = vld [vmem:[%s30682_s17 + $0xa4] ss:$16 sps:$4 sm:$0xff]   ;;  %v22916_v43 = vld [vmem:[%s30679_s14 + $0xb6c] ss:$16 sps:$4 sm:$0xff]  }
 0xa3b   : > { %v29987_v26 = vadd.f32 %v15856_v1, %v15816_v0  ;;  %v29989_v15 = vpop.f32.mrf.mxu0  ;;  %16971 = vmatpush1.bf16.msra.mxu0 %v22857_v38  ;;  %v22923_v38 = vld [vmem:[%s30682_s17 + $0x180] ss:$16 sps:$4 sm:$0xff]   ;;  %v22922_v0 = vld [vmem:[%s30679_s14 + $0xb4c] ss:$16 sps:$4 sm:$0xff]  }
 0xa3c   : > { %v15819_v47 = vpop.f32.mrf.mxu1  ;;  %16972 = vmatprep.subr.bf16.mxu0 %v22865_v19  ;;  %v22914_v19 = vld [vmem:[%s30679_s14 + $0xb68] ss:$16 sps:$4 sm:$0xff]   ;;  %v22929_v1 = vld [vmem:[%s30682_s17 + $0x160] ss:$16 sps:$4 sm:$0xff]  }
 0xa3d   : > { %v15860_v39 = vpop.f32.mrf.mxu0  ;;  %16112 = vmatpush1.bf16.msra.mxu1 %v22851_v16  ;;  %v22937_v16 = vld [vmem:[%s30682_s17 + $0x144] ss:$16 sps:$4 sm:$0xff]   ;;  %v22935_v47 = vld [vmem:[%s30682_s17 + $0x140] ss:$16 sps:$4 sm:$0xff]  }
 0xa3e   : > { %v15820_v49 = vpop.f32.mrf.mxu1  ;;  %16113 = vmatprep.subr.bf16.mxu1 %v22856_v5  ;;  %v22920_v5 = vld [vmem:[%s30679_s14 + $0xb48] ss:$16 sps:$4 sm:$0xff]  }
 0xa3f   : > { %v15861_v25 = vpop.f32.mrf.mxu0  ;;  %16973 = vmatpush1.bf16.msra.mxu0 %v22863_v13  ;;  %v22928_v13 = vld [vmem:[%s30679_s14 + $0xb2c] ss:$16 sps:$4 sm:$0xff]   ;;  %v22926_v39 = vld [vmem:[%s30679_s14 + $0xb28] ss:$16 sps:$4 sm:$0xff]   ;;  %v22938_v49 = vld [vmem:[%s30682_s17 + $0x120] ss:$16 sps:$4 sm:$0xff]  }
 0xa40   : > { %16974 = vmatprep.subr.bf16.mxu0 %v22871_v33  ;;  %v22940_v33 = vld [vmem:[%s30682_s17 + $0x124] ss:$16 sps:$4 sm:$0xff]   ;;  %v22932_v25 = vld [vmem:[%s30679_s14 + $0xb08] ss:$16 sps:$4 sm:$0xff]  }
 0xa41   : > { %16114 = vmatpush1.bf16.msra.mxu1 %v22854_v29  ;;  %v22934_v29 = vld [vmem:[%s30679_s14 + $0xb0c] ss:$16 sps:$4 sm:$0xff]  }
 0xa42   : > { %16115 = vmatprep.subr.bf16.mxu1 %v22862_v41  ;;  %v22943_v41 = vld [vmem:[%s30682_s17 + $0x104] ss:$16 sps:$4 sm:$0xff]  }
 0xa43   : > { %16975 = vmatpush1.bf16.msra.mxu0 %v22869_v37  ;;  %v22941_v37 = vld [vmem:[%s30682_s17 + $0x100] ss:$16 sps:$4 sm:$0xff]  }
 0xa44   : > { %16976 = vmatprep.subr.bf16.mxu0 %v22877_v32  ;;  %v22946_v32 = vld [vmem:[%s30682_s17 + $0xec] ss:$16 sps:$4 sm:$0xff]  }
 0xa45   : > { %16116 = vmatpush1.bf16.msra.mxu1 %v22860_v55  ;;  %v15818_v55 = vadd.f32 %v29982_v6, %v29793_v44 }
 0xa46   : > { %16117 = vmatprep.subr.bf16.mxu1 %v22868_v53  ;;  %v30167_v53 = vld [vmem:[%s30681_s16] sm:$0xf] }
 0xa47   : > { %16977 = vmatpush1.bf16.msra.mxu0 %v22875_v46  ;;  %v16159_v44 = vrot.slane %v30167_v53, %v23819_v9 }
 0xa48   : > { %16978 = vmatprep.subr.bf16.mxu0 %v22883_v3  ;;  %v16155_v3 = vrot.slane %v30167_v53, %v23828_v12 }
 0xa49   : > { %16118 = vmatpush1.bf16.msra.mxu1 %v22866_v31  ;;  %v15859_v31 = vadd.f32 %v29989_v15, %v15818_v55  ;;  %v23019_v55 = vld [vmem:[%s30682_s17 + $0x3c0] ss:$16 sps:$4 sm:$0xff]  }
 0xa4a   : > { %16119 = vmatprep.subr.bf16.mxu1 %v22874_v24 }
 0xa4b   : > { %16979 = vmatpush1.bf16.msra.mxu0 %v22881_v52 }
 0xa4c   : > { %16980 = vmatprep.subr.bf16.mxu0 %v22889_v54 }
 0xa4d   : > { %16120 = vmatpush1.bf16.msra.mxu1 %v22872_v27 }
 0xa4e   : > { %16121 = vmatprep.subr.bf16.mxu1 %v22880_v4 }
 0xa4f   : > { %16981 = vmatpush1.bf16.msra.mxu0 %v22887_v18 }
 0xa50   : > { %16982 = vmatprep.subr.bf16.mxu0 %v22895_v35 }
 0xa51   : > { %16122 = vmatpush1.bf16.msra.mxu1 %v22878_v45 }
 0xa52   : > { %16123 = vmatprep.subr.bf16.mxu1 %v22886_v48 }
 0xa53   : > { %16983 = vmatpush1.bf16.msra.mxu0 %v22893_v2 }
 0xa54   : > { %16984 = vmatprep.subr.bf16.mxu0 %v22901_v28  ;;  %v22944_v28 = vld [vmem:[%s30682_s17 + $0xe8] ss:$16 sps:$4 sm:$0xff]  }
 0xa55   : > { %16124 = vmatpush1.bf16.msra.mxu1 %v22884_v51  ;;  %v22994_v51 = vld [vmem:[%s30682_s17 + $0x2e4] ss:$16 sps:$4 sm:$0xff]  }
 0xa56   : > { %16125 = vmatprep.subr.bf16.mxu1 %v22892_v11  ;;  %v22949_v11 = vld [vmem:[%s30682_s17 + $0xcc] ss:$16 sps:$4 sm:$0xff]  }
 0xa57   : > { %16985 = vmatpush1.bf16.msra.mxu0 %v22899_v22  ;;  %v22997_v22 = vld [vmem:[%s30682_s17 + $0x2c4] ss:$16 sps:$4 sm:$0xff]  }
 0xa58   : > { %16986 = vmatprep.subr.bf16.mxu0 %v22907_v57  ;;  %v22995_v57 = vld [vmem:[%s30682_s17 + $0x2c0] ss:$16 sps:$4 sm:$0xff]  }
 0xa59   : > { %16126 = vmatpush2.bf16.msra.mxu1 %v22890_v58  ;;  %v22947_v58 = vld [vmem:[%s30682_s17 + $0xc8] ss:$16 sps:$4 sm:$0xff]  }
 0xa5a   : > { %16127 = vmatprep.subr.bf16.mxu1 %v22898_v23  ;;  %v23000_v23 = vld [vmem:[%s30682_s17 + $0x2a4] ss:$16 sps:$4 sm:$0xff]  }
 0xa5b   : > { %16987 = vmatpush2.bf16.msra.mxu0 %v22905_v40  ;;  %v22952_v40 = vld [vmem:[%s30682_s17 + $0xac] ss:$16 sps:$4 sm:$0xff]  }
 0xa5c   : > { %16988 = vmatprep.subr.bf16.mxu0 %v22913_v56  ;;  %v22998_v56 = vld [vmem:[%s30682_s17 + $0x2a0] ss:$16 sps:$4 sm:$0xff]  }
 0xa5d   : > { %16128 = vmatpush2.bf16.msra.mxu1 %v22896_v17  ;;  %v22950_v17 = vld [vmem:[%s30682_s17 + $0xa8] ss:$16 sps:$4 sm:$0xff]  }
 0xa5e   : > { %16129 = vmatprep.subr.bf16.mxu1 %v22904_v61  ;;  %v23003_v61 = vld [vmem:[%s30682_s17 + $0x284] ss:$16 sps:$4 sm:$0xff]  }
 0xa5f   : > { %16989 = vmatpush2.bf16.msra.mxu0 %v22911_v21  ;;  %v22955_v21 = vld [vmem:[%s30682_s17 + $0x8c] ss:$16 sps:$4 sm:$0xff]  }
 0xa60   : > { %16990 = vmatprep.subr.bf16.mxu0 %v22919_v59  ;;  %v23001_v59 = vld [vmem:[%s30682_s17 + $0x280] ss:$16 sps:$4 sm:$0xff]  }
 0xa61   : > { %16130 = vmatpush2.bf16.msra.mxu1 %v22902_v20  ;;  %v22953_v20 = vld [vmem:[%s30682_s17 + $0x88] ss:$16 sps:$4 sm:$0xff]  }
 0xa62   : > { %16131 = vmatprep.subr.bf16.mxu1 %v22910_v36  ;;  %v23006_v36 = vld [vmem:[%s30682_s17 + $0x264] ss:$16 sps:$4 sm:$0xff]  }
 0xa63   : > { %16991 = vmatpush2.bf16.msra.mxu0 %v22917_v30  ;;  %v22958_v30 = vld [vmem:[%s30682_s17 + $0x6c] ss:$16 sps:$4 sm:$0xff]  }
 0xa64   : > { %16992 = vmatprep.subr.bf16.mxu0 %v22925_v50  ;;  %v23004_v50 = vld [vmem:[%s30682_s17 + $0x260] ss:$16 sps:$4 sm:$0xff]  }
 0xa65   : > { %16132 = vmatpush2.bf16.msra.mxu1 %v22908_v34  ;;  %v22956_v34 = vld [vmem:[%s30682_s17 + $0x68] ss:$16 sps:$4 sm:$0xff]  }
 0xa66   : > { %16133 = vmatprep.subr.bf16.mxu1 %v22916_v43  ;;  %v23009_v43 = vld [vmem:[%s30682_s17 + $0x244] ss:$16 sps:$4 sm:$0xff]  }
 0xa67   : > { %16993 = vmatpush2.bf16.msra.mxu0 %v22923_v38  ;;  %v22961_v38 = vld [vmem:[%s30682_s17 + $0x4c] ss:$16 sps:$4 sm:$0xff]  }
 0xa68   : > { %16994 = vmatprep.subr.bf16.mxu0 %v22931_v42  ;;  %v23007_v42 = vld [vmem:[%s30682_s17 + $0x240] ss:$16 sps:$4 sm:$0xff]  }
 0xa69   : > { %16134 = vmatpush2.bf16.msra.mxu1 %v22914_v19  ;;  %v22959_v19 = vld [vmem:[%s30682_s17 + $0x48] ss:$16 sps:$4 sm:$0xff]  }
 0xa6a   : > { %16135 = vmatprep.subr.bf16.mxu1 %v22922_v0  ;;  %v23012_v0 = vld [vmem:[%s30682_s17 + $0x224] ss:$16 sps:$4 sm:$0xff]  }
 0xa6b   : > { %16995 = vmatpush2.bf16.msra.mxu0 %v22929_v1  ;;  %v22964_v1 = vld [vmem:[%s30682_s17 + $0x2c] ss:$16 sps:$4 sm:$0xff]  }
 0xa6c   : > { %16996 = vmatprep.subr.bf16.mxu0 %v22937_v16  ;;  %v23010_v16 = vld [vmem:[%s30682_s17 + $0x220] ss:$16 sps:$4 sm:$0xff]  }
 0xa6d   : > { %16136 = vmatpush2.bf16.msra.mxu1 %v22920_v5  ;;  %v22962_v5 = vld [vmem:[%s30682_s17 + $0x28] ss:$16 sps:$4 sm:$0xff]  }
 0xa6e   : > { %16137 = vmatprep.subr.bf16.mxu1 %v22928_v13  ;;  %v23015_v13 = vld [vmem:[%s30682_s17 + $0x204] ss:$16 sps:$4 sm:$0xff]  }
 0xa6f   : > { %16997 = vmatpush2.bf16.msra.mxu0 %v22935_v47  ;;  %v22967_v47 = vld [vmem:[%s30682_s17 + $0xc] ss:$16 sps:$4 sm:$0xff]  }
 0xa70   : > { %16998 = vmatprep.subr.bf16.mxu0 %v22940_v33  ;;  %v23013_v33 = vld [vmem:[%s30682_s17 + $0x200] ss:$16 sps:$4 sm:$0xff]  }
 0xa71   : > { %16138 = vmatpush2.bf16.msra.mxu1 %v22926_v39  ;;  %v22965_v39 = vld [vmem:[%s30682_s17 + $0x8] ss:$16 sps:$4 sm:$0xff]  }
 0xa72   : > { %16139 = vmatprep.subr.bf16.mxu1 %v22934_v29  ;;  %v23018_v29 = vld [vmem:[%s30682_s17 + $0x3e4] ss:$16 sps:$4 sm:$0xff]  }
 0xa73   : > { %16999 = vmatpush2.bf16.msra.mxu0 %v22938_v49  ;;  %v22970_v49 = vld [vmem:[%s30682_s17 + $0x1ec] ss:$16 sps:$4 sm:$0xff]  }
 0xa74   : > { %17000 = vmatprep.subr.bf16.mxu0 %v22943_v41  ;;  %v23016_v41 = vld [vmem:[%s30682_s17 + $0x3e0] ss:$16 sps:$4 sm:$0xff]  }
 0xa75   : > { %16140 = vmatpush2.bf16.msra.mxu1 %v22932_v25  ;;  %v22968_v25 = vld [vmem:[%s30682_s17 + $0x1e8] ss:$16 sps:$4 sm:$0xff]  }
 0xa76   : > { %17011 = vmatprep.subr.bf16.mxu1 %v22994_v51  ;;  %v22986_v51 = vld [vmem:[%s30682_s17 + $0x128] ss:$16 sps:$4 sm:$0xff]  }
 0xa77   : > { %17001 = vmatpush2.bf16.msra.mxu0 %v22941_v37  ;;  %v23021_v37 = vld [vmem:[%s30682_s17 + $0x3c4] ss:$16 sps:$4 sm:$0xff]  }
 0xa78   : > { %v15897_v46 = vpop.f32.mrf.mxu1  ;;  %16142 = vmatmul.mubr.bf16.vlgmr.msra.gmra.mxu1 %v29554_v62  ;;  %17052 = vmatprep.subr.bf16.mxu0 %v22946_v32  ;;  %v22973_v32 = vld [vmem:[%s30682_s17 + $0x1cc] ss:$16 sps:$4 sm:$0xff]  }
 0xa79   : > { %v15898_v24 = vadd.f32 %v15897_v46, %v29987_v26  ;;  %v15938_v52 = vpop.f32.mrf.mxu0  ;;  %v22971_v46 = vld [vmem:[%s30682_s17 + $0x1c8] ss:$16 sps:$4 sm:$0xff]  }
 0xa7a   : > { %v30177_v6 = vadd.f32 %v15938_v52, %v29567_v63  ;;  %v15899_v54 = vpop.f32.mrf.mxu1  ;;  %v22992_v63 = vld [vmem:[%s30682_s17 + $0x2e0] ss:$16 sps:$4 sm:$0xff]   ;;  %v22974_v52 = vld [vmem:[%s30682_s17 + $0x1a8] ss:$16 sps:$4 sm:$0xff]  }
 0xa7b   : > { %v15900_v27 = vadd.f32 %v15899_v54, %v15859_v31  ;;  %v15940_v4 = vpop.f32.mrf.mxu0  ;;  %v16172_v18 = vadd.f32 %v16155_v3, %v15898_v24  ;;  %17012 = vmatpush1.bf16.msra.mxu1 %v22992_v63  ;;  %v23024_v3 = vld [vmem:[%s30682_s17 + $0x3a4] ss:$16 sps:$4 sm:$0xff]   ;;  %v22976_v31 = vld [vmem:[%s30682_s17 + $0x1ac] ss:$16 sps:$4 sm:$0xff]   ;;  %v23022_v24 = vld [vmem:[%s30682_s17 + $0x3a0] ss:$16 sps:$4 sm:$0xff]  }
 0xa7c   : > { %v30180_v35 = vadd.f32 %v15940_v4, %v29585_v60  ;;  %v15901_v62 = vpop.f32.mrf.mxu1  ;;  %17013 = vmatprep.subr.bf16.mxu1 %v22997_v22  ;;  %v22979_v54 = vld [vmem:[%s30682_s17 + $0x18c] ss:$16 sps:$4 sm:$0xff]   ;;  %v22977_v4 = vld [vmem:[%s30682_s17 + $0x188] ss:$16 sps:$4 sm:$0xff]  }
 0xa7d   : > { %v16173_v45 = vadd.f32 %v16159_v44, %v15900_v27  ;;  %v15942_v48 = vpop.f32.mrf.mxu0  ;;  %v30191_v60 = vpack.c.bf16 %v16172_v18, %v16172_v18  ;;  %v23027_v44 = vld [vmem:[%s30682_s17 + $0x384] ss:$16 sps:$4 sm:$0xff]   ;;  %v23025_v27 = vld [vmem:[%s30682_s17 + $0x380] ss:$16 sps:$4 sm:$0xff]   ;;  %v22982_v62 = vld [vmem:[%s30682_s17 + $0x16c] ss:$16 sps:$4 sm:$0xff]  }
 0xa7e   : > { %v15902_v15 = vpop.f32.mrf.mxu1  ;;  %v23030_v18 = vld [vmem:[%s30682_s17 + $0x364] ss:$16 sps:$4 sm:$0xff]   ;;  %v22980_v48 = vld [vmem:[%s30682_s17 + $0x168] ss:$16 sps:$4 sm:$0xff]   ;;  %v22988_v63 = vld [vmem:[%s30682_s17 + $0x12c] ss:$16 sps:$4 sm:$0xff]  }
 0xa7f   : > { %v16177_v2 = vpack.c.bf16 %v16173_v45, %v16173_v45  ;;  %v15943_v26 = vpop.f32.mrf.mxu0  ;;  %17014 = vmatpush1.bf16.msra.mxu1 %v22995_v57  ;;  %v23028_v45 = vld [vmem:[%s30682_s17 + $0x360] ss:$16 sps:$4 sm:$0xff]   ;;  %v23033_v15 = vld [vmem:[%s30682_s17 + $0x344] ss:$16 sps:$4 sm:$0xff]   ;;  %v22991_v22 = vld [vmem:[%s30682_s17 + $0x10c] ss:$16 sps:$4 sm:$0xff]  }
 0xa80   : > { %17015 = vmatprep.subr.bf16.mxu1 %v23000_v23  ;;  %v23031_v26 = vld [vmem:[%s30682_s17 + $0x340] ss:$16 sps:$4 sm:$0xff]   ;;  %v23036_v23 = vld [vmem:[%s30682_s17 + $0x324] ss:$16 sps:$4 sm:$0xff]  }
 0xa81   : > { %17002 = vmatprep.mubr.bf16.mxu0 %v16177_v2 }
 0xa82   : > { %17003 = vmatmul.mubr.bf16.vlgmr.msra.gmra.mxu0 %v30191_v60 }
 0xa83   : > { %17053 = vmatpush1.bf16.msra.mxu0 %v22944_v28  ;;  %17084 = vmatprep.mubr.bf16.mxu0 %v16177_v2  ;;  %v22985_v2 = vld [vmem:[%s30682_s17 + $0x14c] ss:$16 sps:$4 sm:$0xff]   ;;  %v22983_v28 = vld [vmem:[%s30682_s17 + $0x148] ss:$16 sps:$4 sm:$0xff]  }
 0xa84   : > { %17054 = vmatprep.subr.bf16.mxu0 %v22949_v11  ;;  %17016 = vmatpush1.bf16.msra.mxu1 %v22998_v56  ;;  %v23034_v56 = vld [vmem:[%s30682_s17 + $0x320] ss:$16 sps:$4 sm:$0xff]  }
 0xa85   : > { %17017 = vmatprep.subr.bf16.mxu1 %v23003_v61 }
 0xa87   : > { %17055 = vmatpush1.bf16.msra.mxu0 %v22947_v58 }
 0xa88   : > { %17056 = vmatprep.subr.bf16.mxu0 %v22952_v40  ;;  %17018 = vmatpush1.bf16.msra.mxu1 %v23001_v59  ;;  %v22989_v59 = vld [vmem:[%s30682_s17 + $0x108] ss:$16 sps:$4 sm:$0xff]  }
 0xa89   : > { %17019 = vmatprep.subr.bf16.mxu1 %v23006_v36 }
 0xa8b   : > { %17057 = vmatpush1.bf16.msra.mxu0 %v22950_v17 }
 0xa8c   : > { %17058 = vmatprep.subr.bf16.mxu0 %v22955_v21  ;;  %17020 = vmatpush1.bf16.msra.mxu1 %v23004_v50 }
 0xa8d   : > { %17021 = vmatprep.subr.bf16.mxu1 %v23009_v43  ;;  %v23042_v43 = vld [vmem:[%s30682_s17 + $0x2ec] ss:$16 sps:$4 sm:$0xff]  }
 0xa8f   : > { %17059 = vmatpush1.bf16.msra.mxu0 %v22953_v20 }
 0xa90   : > { %17060 = vmatprep.subr.bf16.mxu0 %v22958_v30  ;;  %17022 = vmatpush1.bf16.msra.mxu1 %v23007_v42  ;;  %v23039_v30 = vld [vmem:[%s30682_s17 + $0x304] ss:$16 sps:$4 sm:$0xff]  }
 0xa91   : > { %17023 = vmatprep.subr.bf16.mxu1 %v23012_v0 }
 0xa93   : > { %17061 = vmatpush1.bf16.msra.mxu0 %v22956_v34 }
 0xa94   : > { %17062 = vmatprep.subr.bf16.mxu0 %v22961_v38  ;;  %17024 = vmatpush1.bf16.msra.mxu1 %v23010_v16 }
 0xa95   : > { %17025 = vmatprep.subr.bf16.mxu1 %v23015_v13 }
 0xa97   : > { %17063 = vmatpush1.bf16.msra.mxu0 %v22959_v19 }
 0xa98   : > { %17064 = vmatprep.subr.bf16.mxu0 %v22964_v1  ;;  %17026 = vmatpush1.bf16.msra.mxu1 %v23013_v33 }
 0xa99   : > { %17027 = vmatprep.subr.bf16.mxu1 %v23018_v29  ;;  %v23089_v29 = vld [vmem:[%s30684_s19 + $0x38] sm:$0xff]  }
 0xa9b   : > { %17065 = vmatpush1.bf16.msra.mxu0 %v22962_v5 }
 0xa9c   : > { %17066 = vmatprep.subr.bf16.mxu0 %v22967_v47  ;;  %17028 = vmatpush2.bf16.msra.mxu1 %v23016_v41  ;;  %v23092_v41 = vld [vmem:[%s30684_s19 + $0x68] sm:$0xff]  }
 0xa9d   : > { %17029 = vmatprep.subr.bf16.mxu1 %v23021_v37  ;;  %v23094_v37 = vld [vmem:[%s30684_s19 + $0x60] sm:$0xff]  }
 0xa9f   : > { %17067 = vmatpush1.bf16.msra.mxu0 %v22965_v39  ;;  %v23088_v39 = vld [vmem:[%s30684_s19 + $0x78] sm:$0xff]  }
 0xaa0   : > { %17068 = vmatprep.subr.bf16.mxu0 %v22970_v49  ;;  %17030 = vmatpush2.bf16.msra.mxu1 %v23019_v55  ;;  %v23091_v49 = vld [vmem:[%s30684_s19 + $0x30] sm:$0xff]   ;;  %v23096_v55 = vld [vmem:[%s30684_s19 + $0x58] sm:$0xff]  }
 0xaa1   : > { %17031 = vmatprep.subr.bf16.mxu1 %v23024_v3  ;;  %v23098_v3 = vld [vmem:[%s30684_s19 + $0x50] sm:$0xff]  }
 0xaa3   : > { %17069 = vmatpush2.bf16.msra.mxu0 %v22968_v25  ;;  %v23093_v25 = vld [vmem:[%s30684_s19 + $0x28] sm:$0xff]  }
 0xaa4   : > { %17070 = vmatprep.subr.bf16.mxu0 %v22973_v32  ;;  %17032 = vmatpush2.bf16.msra.mxu1 %v23022_v24  ;;  %v23095_v32 = vld [vmem:[%s30684_s19 + $0x20] sm:$0xff]  }
 0xaa5   : > { %17033 = vmatprep.subr.bf16.mxu1 %v23027_v44  ;;  %v16163_v44 = vrot.slane %v30167_v53, %v23831_v14 }
 0xaa7   : > { %17071 = vmatpush2.bf16.msra.mxu0 %v22971_v46  ;;  %v23097_v46 = vld [vmem:[%s30684_s19 + $0x18] sm:$0xff]  }
 0xaa8   : > { %17072 = vmatprep.subr.bf16.mxu0 %v22976_v31  ;;  %17034 = vmatpush2.bf16.msra.mxu1 %v23025_v27  ;;  %v23099_v31 = vld [vmem:[%s30684_s19 + $0x10] sm:$0xff]  }
 0xaa9   : > { %17035 = vmatprep.subr.bf16.mxu1 %v23030_v18 }
 0xaab   : > { %17073 = vmatpush2.bf16.msra.mxu0 %v22974_v52 }
 0xaac   : > { %17074 = vmatprep.subr.bf16.mxu0 %v22979_v54  ;;  %17036 = vmatpush2.bf16.msra.mxu1 %v23028_v45 }
 0xaad   : > { %17037 = vmatprep.subr.bf16.mxu1 %v23033_v15 }
 0xaaf   : > { %17075 = vmatpush2.bf16.msra.mxu0 %v22977_v4  ;;  %v16167_v4 = vrot.slane %v30167_v53, %v23822_v10  ;;  %v23043_v53 = vld [vmem:[%s30682_s17 + $0x2c8] ss:$16 sps:$4 sm:$0xff]  }
 0xab0   : > { %17076 = vmatprep.subr.bf16.mxu0 %v22982_v62  ;;  %17038 = vmatpush2.bf16.msra.mxu1 %v23031_v26 }
 0xab1   : > { %17039 = vmatprep.subr.bf16.mxu1 %v23036_v23  ;;  %v23046_v23 = vld [vmem:[%s30682_s17 + $0x2a8] ss:$16 sps:$4 sm:$0xff]  }
 0xab3   : > { %17077 = vmatpush2.bf16.msra.mxu0 %v22980_v48 }
 0xab4   : > { %17078 = vmatprep.subr.bf16.mxu0 %v22985_v2  ;;  %17040 = vmatpush2.bf16.msra.mxu1 %v23034_v56  ;;  %v23051_v56 = vld [vmem:[%s30682_s17 + $0x28c] ss:$16 sps:$4 sm:$0xff]  }
 0xab5   : > { %17041 = vmatprep.subr.bf16.mxu1 %v23039_v30  ;;  %v23063_v30 = vld [vmem:[%s30682_s17 + $0x20c] ss:$16 sps:$4 sm:$0xff]  }
 0xab7   : > { %17079 = vmatpush2.bf16.msra.mxu0 %v22983_v28  ;;  %v23040_v28 = vld [vmem:[%s30682_s17 + $0x2e8] ss:$16 sps:$4 sm:$0xff]  }
 0xab8   : > { %v15979_v11 = vpop.f32.mrf.mxu1  ;;  %17080 = vmatprep.subr.bf16.mxu0 %v22988_v63 }
 0xab9   : > { %v15980_v57 = vadd.f32 %v15979_v11, %v30177_v6  ;;  %v16020_v58 = vpop.f32.mrf.mxu0 }
 0xaba   : > { %v15981_v40 = vpop.f32.mrf.mxu1 }
 0xabb   : > { %v16021_v17 = vadd.f32 %v16020_v58, %v15980_v57  ;;  %v15982_v61 = vadd.f32 %v15981_v40, %v30180_v35  ;;  %v16022_v21 = vpop.f32.mrf.mxu0  ;;  %17081 = vmatpush2.bf16.msra.mxu0 %v22986_v51  ;;  %v23037_v35 = vld [vmem:[%s30682_s17 + $0x300] ss:$16 sps:$4 sm:$0xff]   ;;  %v23045_v51 = vld [vmem:[%s30682_s17 + $0x2cc] ss:$16 sps:$4 sm:$0xff]  }
 0xabc   : > { %v15983_v6 = vpop.f32.mrf.mxu1  ;;  %17082 = vmatprep.subr.bf16.mxu0 %v22991_v22  ;;  %17042 = vmatpush2.bf16.msra.mxu1 %v23037_v35  ;;  %v23048_v57 = vld [vmem:[%s30682_s17 + $0x2ac] ss:$16 sps:$4 sm:$0xff]  }
 0xabd   : > { %v16023_v20 = vadd.f32 %v16022_v21, %v15982_v61  ;;  %v16024_v36 = vpop.f32.mrf.mxu0  ;;  %17093 = vmatprep.subr.bf16.mxu1 %v23042_v43  ;;  %v23054_v61 = vld [vmem:[%s30682_s17 + $0x26c] ss:$16 sps:$4 sm:$0xff]   ;;  %v23052_v21 = vld [vmem:[%s30682_s17 + $0x268] ss:$16 sps:$4 sm:$0xff]  }
 0xabe   : > { %v15984_v50 = vpop.f32.mrf.mxu1  ;;  %v23055_v6 = vld [vmem:[%s30682_s17 + $0x248] ss:$16 sps:$4 sm:$0xff]   ;;  %v23066_v35 = vld [vmem:[%s30682_s17 + $0x3ec] ss:$16 sps:$4 sm:$0xff]  }
 0xabf   : > { %v16025_v34 = vpop.f32.mrf.mxu0  ;;  %17083 = vmatpush2.bf16.msra.mxu0 %v22989_v59  ;;  %v23057_v59 = vld [vmem:[%s30682_s17 + $0x24c] ss:$16 sps:$4 sm:$0xff]   ;;  %v23058_v36 = vld [vmem:[%s30682_s17 + $0x228] ss:$16 sps:$4 sm:$0xff]  }
 0xac0   : > { %19825 = vmatprep.subr.bf16.mxu0 %v23088_v39  ;;  %v23061_v50 = vld [vmem:[%s30682_s17 + $0x208] ss:$16 sps:$4 sm:$0xff]   ;;  %v23069_v43 = vld [vmem:[%s30682_s17 + $0x3cc] ss:$16 sps:$4 sm:$0xff]  }
 0xac1   : > { %v23064_v34 = vld [vmem:[%s30682_s17 + $0x3e8] ss:$16 sps:$4 sm:$0xff]  }
 0xac2   : > { %17085 = vmatmul.mubr.bf16.vlgmr.msra.gmra.mxu0 %v30191_v60  ;;  %v23090_v60 = vld [vmem:[%s30684_s19 + $0x70] sm:$0xff]   ;;  %v23082_v39 = vld [vmem:[%s30682_s17 + $0x328] ss:$16 sps:$4 sm:$0xff]  }
 0xac3   : > { %19826 = vmatpush3.bf16.msra.mxu0 %v23089_v29  ;;  %v23087_v29 = vld [vmem:[%s30682_s17 + $0x30c] ss:$16 sps:$4 sm:$0xff]  }
 0xac4   : > { %19827 = vmatprep.subr.bf16.mxu0 %v23090_v60  ;;  %v23085_v60 = vld [vmem:[%s30682_s17 + $0x308] ss:$16 sps:$4 sm:$0xff]  }
 0xac7   : > { %19828 = vmatpush3.bf16.msra.mxu0 %v23091_v49  ;;  %v16308_v49 = vld [vmem:[%s30683_s18] sm:$0xf] }
 0xac8   : > { %19829 = vmatprep.subr.bf16.mxu0 %v23092_v41  ;;  %v16961_v41 = vrot.slane %v16308_v49, %v23831_v14 }
 0xacb   : > { %19830 = vmatpush3.bf16.msra.mxu0 %v23093_v25  ;;  %v16965_v25 = vrot.slane %v16308_v49, %v23822_v10  ;;  %v23102_v10 = vld [vmem:[%s30684_s19 + $0x40] sm:$0xff]  }
 0xacc   : > { %19831 = vmatprep.subr.bf16.mxu0 %v23094_v37 }
 0xacf   : > { %19832 = vmatpush3.bf16.msra.mxu0 %v23095_v32  ;;  %v23100_v32 = vld [vmem:[%s30684_s19 + $0x48] sm:$0xff]  }
 0xad0   : > { %19833 = vmatprep.subr.bf16.mxu0 %v23096_v55 }
 0xad3   : > { %19834 = vmatpush3.bf16.msra.mxu0 %v23097_v46  ;;  %v23101_v46 = vld [vmem:[%s30684_s19 + $0x8] sm:$0xff]  }
 0xad4   : > { %19835 = vmatprep.subr.bf16.mxu0 %v23098_v3 }
 0xad7   : > { %19836 = vmatpush3.bf16.msra.mxu0 %v23099_v31 }
 0xad8   : > { %19837 = vmatprep.subr.bf16.mxu0 %v23100_v32 }
 0xadb   : > { %19838 = vmatpush3.bf16.msra.mxu0 %v23101_v46 }
 0xadc   : > { %19839 = vmatprep.subr.bf16.mxu0 %v23102_v10 }
 0xaf8   : > { %v16061_v38 = vpop.f32.mrf.mxu1 }
 0xaf9   : > { %v16062_v42 = vadd.f32 %v16061_v38, %v16021_v17  ;;  %v16102_v19 = vpop.f32.mrf.mxu0  ;;  %v23049_v17 = vld [vmem:[%s30682_s17 + $0x288] ss:$16 sps:$4 sm:$0xff]  }
 0xafa   : > { %v16063_v0 = vpop.f32.mrf.mxu1  ;;  %v23067_v38 = vld [vmem:[%s30682_s17 + $0x3c8] ss:$16 sps:$4 sm:$0xff]  }
 0xafb   : > { %v16103_v1 = vadd.f32 %v16102_v19, %v16062_v42  ;;  %v16104_v16 = vpop.f32.mrf.mxu0  ;;  %v16064_v24 = vadd.f32 %v16063_v0, %v16023_v20  ;;  %v23060_v20 = vld [vmem:[%s30682_s17 + $0x22c] ss:$16 sps:$4 sm:$0xff]   ;;  %v23070_v19 = vld [vmem:[%s30682_s17 + $0x3a8] ss:$16 sps:$4 sm:$0xff]  }
 0xafc   : > { %v16065_v5 = vpop.f32.mrf.mxu1  ;;  %v23072_v42 = vld [vmem:[%s30682_s17 + $0x3ac] ss:$16 sps:$4 sm:$0xff]  }
 0xafd   : > { %v16106_v13 = vpop.f32.mrf.mxu0  ;;  %v16105_v54 = vadd.f32 %v16104_v16, %v16064_v24  ;;  %v23075_v0 = vld [vmem:[%s30682_s17 + $0x38c] ss:$16 sps:$4 sm:$0xff]   ;;  %v23076_v5 = vld [vmem:[%s30682_s17 + $0x368] ss:$16 sps:$4 sm:$0xff]   ;;  %v23103_v24 = vld [vmem:[%s30684_s19] sm:$0xff]  }
 0xafe   : > { %v16066_v47 = vpop.f32.mrf.mxu1  ;;  %v23078_v16 = vld [vmem:[%s30682_s17 + $0x36c] ss:$16 sps:$4 sm:$0xff]   ;;  %19840 = vmatpush3.bf16.msra.mxu0 %v23103_v24 }
 0xaff   : > { %v16107_v33 = vpop.f32.mrf.mxu0  ;;  %v23081_v13 = vld [vmem:[%s30682_s17 + $0x34c] ss:$16 sps:$4 sm:$0xff]   ;;  %v23079_v47 = vld [vmem:[%s30682_s17 + $0x348] ss:$16 sps:$4 sm:$0xff]  }
 0xb00   : > { %v23084_v33 = vld [vmem:[%s30682_s17 + $0x32c] ss:$16 sps:$4 sm:$0xff]  }
 0xb38   : > { %v16143_v52 = vpop.f32.mrf.mxu1 }
 0xb39   : > { %v16144_v27 = vadd.f32 %v16143_v52, %v16103_v1  ;;  %v23073_v1 = vld [vmem:[%s30682_s17 + $0x388] ss:$16 sps:$4 sm:$0xff]  }
 0xb3a   : > { %v16145_v18 = vpop.f32.mrf.mxu1 }
 0xb3b   : > { %v16146_v62 = vadd.f32 %v16145_v18, %v16105_v54  ;;  %v16174_v45 = vadd.f32 %v16163_v44, %v16144_v27  ;;  %v23104_v44 = vld [vmem:[%s30684_s19 + $0xf8] sm:$0xff]   ;;  %v23106_v27 = vld [vmem:[%s30684_s19 + $0xf0] sm:$0xff]   ;;  %v23108_v18 = vld [vmem:[%s30684_s19 + $0xe8] sm:$0xff]  }
 0xb3c   : > { %v16147_v48 = vpop.f32.mrf.mxu1  ;;  %v23105_v54 = vld [vmem:[%s30684_s19 + $0xb8] sm:$0xff]  }
 0xb3d   : > { %v16175_v15 = vadd.f32 %v16167_v4, %v16146_v62  ;;  %v30423_v63 = vpack.c.bf16 %v16174_v45, %v16174_v45  ;;  %v23107_v4 = vld [vmem:[%s30684_s19 + $0xb0] sm:$0xff]   ;;  %v23109_v62 = vld [vmem:[%s30684_s19 + $0xa8] sm:$0xff]   ;;  %v23110_v45 = vld [vmem:[%s30684_s19 + $0xe0] sm:$0xff]  }
 0xb3e   : > { %v16148_v2 = vpop.f32.mrf.mxu1  ;;  %v23111_v48 = vld [vmem:[%s30684_s19 + $0xa0] sm:$0xff]  }
 0xb3f   : > { %v16179_v26 = vpack.c.bf16 %v16175_v15, %v16175_v15  ;;  %v23112_v15 = vld [vmem:[%s30684_s19 + $0xd8] sm:$0xff]  }
 0xb40   : > { %v23113_v2 = vld [vmem:[%s30684_s19 + $0x98] sm:$0xff]  }
 0xb41   : > { %17043 = vmatprep.mubr.bf16.mxu1 %v16179_v26 }
 0xb42   : > { %v30428_v11 = vpop.f32.mrf.mxu0  ;;  %17044 = vmatmul.mubr.bf16.vlgmr.msra.gmra.mxu1 %v30423_v63 }
 0xb43   : > { %17094 = vmatpush1.bf16.msra.mxu1 %v23040_v28  ;;  %17125 = vmatprep.mubr.bf16.mxu1 %v16179_v26  ;;  %v23114_v26 = vld [vmem:[%s30684_s19 + $0xd0] sm:$0xff]  }
 0xb44   : > { %v30434_v22 = vpop.f32.mrf.mxu0  ;;  %17095 = vmatprep.subr.bf16.mxu1 %v23045_v51  ;;  %v23115_v28 = vld [vmem:[%s30684_s19 + $0x90] sm:$0xff]   ;;  %v23117_v51 = vld [vmem:[%s30684_s19 + $0x88] sm:$0xff]  }
 0xb46   : > { %v17008_v58 = vpop.f32.mrf.mxu0 }
 0xb47   : > { %17096 = vmatpush1.bf16.msra.mxu1 %v23043_v53  ;;  %v23118_v53 = vld [vmem:[%s30684_s19 + $0xc0] sm:$0xff]   ;;  %v16953_v58 = vrot.slane %v16308_v49, %v23828_v12 }
 0xb48   : > { %v17009_v40 = vpop.f32.mrf.mxu0  ;;  %17097 = vmatprep.subr.bf16.mxu1 %v23048_v57  ;;  %v23119_v57 = vld [vmem:[%s30684_s19 + $0x80] sm:$0xff]  }
 0xb49   : > { %v17005_v40 = vadd.f32 %v30428_v11, %v16953_v58 }
 0xb4b   : > { %17098 = vmatpush1.bf16.msra.mxu1 %v23046_v23  ;;  %v16957_v23 = vrot.slane %v16308_v49, %v23819_v9 }
 0xb4c   : > { %17099 = vmatprep.subr.bf16.mxu1 %v23051_v56 }
 0xb4f   : > { %17100 = vmatpush1.bf16.msra.mxu1 %v23049_v17  ;;  %v17007_v17 = vadd.f32 %v30434_v22, %v16957_v23 }
 0xb50   : > { %17101 = vmatprep.subr.bf16.mxu1 %v23054_v61 }
 0xb53   : > { %17102 = vmatpush1.bf16.msra.mxu1 %v23052_v21 }
 0xb54   : > { %17103 = vmatprep.subr.bf16.mxu1 %v23057_v59 }
 0xb57   : > { %17104 = vmatpush1.bf16.msra.mxu1 %v23055_v6 }
 0xb58   : > { %17105 = vmatprep.subr.bf16.mxu1 %v23060_v20 }
 0xb5b   : > { %17106 = vmatpush1.bf16.msra.mxu1 %v23058_v36 }
 0xb5c   : > { %17107 = vmatprep.subr.bf16.mxu1 %v23063_v30 }
 0xb5f   : > { %17108 = vmatpush1.bf16.msra.mxu1 %v23061_v50 }
 0xb60   : > { %17109 = vmatprep.subr.bf16.mxu1 %v23066_v35  ;;  %v23241_v35 = vmov 1966171168  }
 0xb61   : > { %v17496_v12 = vunpack.c.l.s4 %v23241_v35 }
 0xb63   : > { %17110 = vmatpush2.bf16.msra.mxu1 %v23064_v34  ;;  %v17497_v34 = vunpack.c.0.s8 %v17496_v12 }
 0xb64   : > { %17111 = vmatprep.subr.bf16.mxu1 %v23069_v43 }
 0xb65   : > { %v17500_v22 = vsub.s32 %v17497_v34, %v23816_v8 }
 0xb67   : > { %17112 = vmatpush2.bf16.msra.mxu1 %v23067_v38 }
 0xb68   : > { %17113 = vmatprep.subr.bf16.mxu1 %v23072_v42 }
 0xb6b   : > { %17114 = vmatpush2.bf16.msra.mxu1 %v23070_v19 }
 0xb6c   : > { %17115 = vmatprep.subr.bf16.mxu1 %v23075_v0 }
 0xb6f   : > { %17116 = vmatpush2.bf16.msra.mxu1 %v23073_v1 }
 0xb70   : > { %17117 = vmatprep.subr.bf16.mxu1 %v23078_v16 }
 0xb73   : > { %17118 = vmatpush2.bf16.msra.mxu1 %v23076_v5 }
 0xb74   : > { %17119 = vmatprep.subr.bf16.mxu1 %v23081_v13 }
 0xb77   : > { %17120 = vmatpush2.bf16.msra.mxu1 %v23079_v47 }
 0xb78   : > { %17121 = vmatprep.subr.bf16.mxu1 %v23084_v33 }
 0xb7b   : > { %17122 = vmatpush2.bf16.msra.mxu1 %v23082_v39 }
 0xb7c   : > { %17123 = vmatprep.subr.bf16.mxu1 %v23087_v29 }
 0xb7f   : > { %17124 = vmatpush2.bf16.msra.mxu1 %v23085_v60 }
 0xb80   : > { %19847 = vmatprep.subr.bf16.mxu1 %v23104_v44 }
 0xb82   : > { %v17086_v37 = vpop.f32.mrf.mxu0  ;;  %17126 = vmatmul.mubr.bf16.vlgmr.msra.gmra.mxu1 %v30423_v63  ;;  %v23116_v63 = vld [vmem:[%s30684_s19 + $0xc8] sm:$0xff]  }
 0xb83   : > { %v30529_v55 = vadd.f32 %v17086_v37, %v16961_v41  ;;  %19848 = vmatpush3.bf16.msra.mxu1 %v23105_v54  ;;  %v17202_v41 = vld [vmem:[%s30685_s20] sm:$0x1] }
 0xb84   : > { %v17088_v3 = vpop.f32.mrf.mxu0  ;;  %19849 = vmatprep.subr.bf16.mxu1 %v23106_v27 }
 0xb85   : > { %v17089_v31 = vadd.f32 %v17088_v3, %v16965_v25 }
 0xb86   : > { %v17090_v14 = vpop.f32.mrf.mxu0 }
 0xb87   : > { %19850 = vmatpush3.bf16.msra.mxu1 %v23107_v4 }
 0xb88   : > { %v17091_v52 = vpop.f32.mrf.mxu0  ;;  %19851 = vmatprep.subr.bf16.mxu1 %v23108_v18 }
 0xb8b   : > { %19852 = vmatpush3.bf16.msra.mxu1 %v23109_v62 }
 0xb8c   : > { %19853 = vmatprep.subr.bf16.mxu1 %v23110_v45 }
 0xb8f   : > { %19854 = vmatpush3.bf16.msra.mxu1 %v23111_v48 }
 0xb90   : > { %19855 = vmatprep.subr.bf16.mxu1 %v23112_v15 }
 0xb93   : > { %19856 = vmatpush3.bf16.msra.mxu1 %v23113_v2 }
 0xb94   : > { %19857 = vmatprep.subr.bf16.mxu1 %v23114_v26 }
 0xb97   : > { %19858 = vmatpush3.bf16.msra.mxu1 %v23115_v28 }
 0xb98   : > { %19859 = vmatprep.subr.bf16.mxu1 %v23116_v63 }
 0xb9b   : > { %19860 = vmatpush3.bf16.msra.mxu1 %v23117_v51 }
 0xb9c   : > { %19861 = vmatprep.subr.bf16.mxu1 %v23118_v53 }
 0xb9f   : > { %19862 = vmatpush3.bf16.msra.mxu1 %v23119_v57 }
 0xc02   : > { %v17045_v56 = vpop.f32.mrf.mxu1 }
 0xc03   : > { %v17046_v61 = vadd.f32 %v17045_v56, %v17005_v40 }
 0xc04   : > { %v17047_v21 = vpop.f32.mrf.mxu1 }
 0xc05   : > { %v17048_v59 = vadd.f32 %v17047_v21, %v17007_v17  ;;  %v17134_v30 = vpack.c.bf16 %v17046_v61, %v17046_v61 }
 0xc06   : > { %v17049_v6 = vpop.f32.mrf.mxu1 }
 0xc07   : > { %v17135_v20 = vpack.c.bf16 %v17048_v59, %v17048_v59  ;;  %v17493_v36 = vcombine.low %v17046_v61, %v17048_v59 }
 0xc08   : > { %v17050_v50 = vpop.f32.mrf.mxu1 }
 0xc09   : > { %17427 = vmatprep.mubr.bf16.mxu0 %v17135_v20  ;;  %v17501_v5 = vrot.slane %v17493_v36, %v17500_v22 }
 0xc0a   : > { %17428 = vmatmul.mubr.bf16.vlgmr.msra.gmra.mxu0 %v17134_v30 }
 0xc42   : > { %v17127_v9 = vpop.f32.mrf.mxu1 }
 0xc43   : > { %v17128_v11 = vadd.f32 %v17127_v9, %v30529_v55 }
 0xc44   : > { %v17129_v43 = vpop.f32.mrf.mxu1 }
 0xc45   : > { %v17130_v38 = vadd.f32 %v17129_v43, %v17089_v31  ;;  %v17136_v1 = vpack.c.bf16 %v17128_v11, %v17128_v11 }
 0xc46   : > { %v17131_v42 = vpop.f32.mrf.mxu1 }
 0xc47   : > { %v17137_v19 = vpack.c.bf16 %v17130_v38, %v17130_v38  ;;  %v17494_v0 = vcombine.low %v17128_v11, %v17130_v38 }
 0xc48   : > { %v17132_v16 = vpop.f32.mrf.mxu1 }
 0xc49   : > { %v17508_v13 = vrot.slane %v17494_v0, %v17500_v22  ;;  %17467 = vmatprep.mubr.bf16.mxu1 %v17137_v19 }
 0xc4a   : > { %17468 = vmatmul.mubr.bf16.vlgmr.msra.gmra.mxu1 %v17136_v1 }
 0xc4b   : > { %v17509_v47 = vcombine.low %v17501_v5, %v17508_v13 }
 0xc4d   : > { %v17516_v8 = vrot.slane %v17509_v47, %v17500_v22 }
 0xc4f   : > { %17522 = vst.msk [vmem:[%s727_s25] sm:$0xf] %vm17520_vm11, %v17516_v8  ;;  %s17544_s25 = sshll.u32 %s706_s7, 4  ;;  %s17545_s25 = int_to_ptr.vmem [resolvable:$true] %s17544_s25 }
 0xc50   : > { %s23149_s22 = scalar_lea.vmem %s17545_s25, 16  ;;  %p23156_p0 = scmp.lt.s32.totalorder %s17545_s25, %s23154_s8 }
 0xc51   : > { %p23150_p11 = scmp.ne.s32.totalorder %s17545_s25, %s23149_s22  ;;  %p23157_p1 = scmp.lt.s32.totalorder %s23155_s9, %s23149_s22 }
 0xc53   : > { %p23151_p12 = pnand %p23150_p11, %p23402_p5  ;;  %p23158_p2 = por %p23157_p1, %p23156_p0 }
 0xc55   : > { %p23152_p13 = pneg %p23151_p12 }
 0xc57   : > { %p23159_p3 = pnand %p23158_p2, %p23152_p13 }
 0xcca   : > { %v19841_v33 = vpop.f32.mrf.mxu0 }
 0xccc   : > { %v19842_v39 = vpop.f32.mrf.mxu0 }
 0xccd   : > { %v19843_v49 = vadd.f32 %v19842_v39, %v19841_v33 }
 0xcce   : > { %v19844_v29 = vpop.f32.mrf.mxu0 }
 0xccf   : > { %v17430_v32 = vadd.f32 %v19843_v49, %v17202_v41 }
 0xcd0   : > { %v19845_v60 = vpop.f32.mrf.mxu0 }
 0xd0a   : > { %v19863_v25 = vpop.f32.mrf.mxu1 }
 0xd0c   : > { %v19864_v37 = vpop.f32.mrf.mxu1 }
 0xd0d   : > { %v19865_v55 = vadd.f32 %v19864_v37, %v19863_v25 }
 0xd0e   : > { %v19866_v7 = vpop.f32.mrf.mxu1 }
 0xd0f   : > { %v17470_v46 = vadd.f32 %v19865_v55, %v17430_v32 }
 0xd10   : > { %v19867_v3 = vpop.f32.mrf.mxu1 }
 0xd11   : > { %v17476_v31 = vsel %vm17475_vm12, %v17470_v46, -inf  ;;  %17487 = vst.msk [vmem:[%s706_s7] sm:$0x1] %vm17475_vm12, %v17470_v46 }
 0xd12   : > { %17477 = vmax.xlane.f32.xlu0 %v17476_v31 }
 0xd9b   : > { %v17478_v14 = vpop.xlane.xlu0 %17477 }
 0xd9c   : > { %v17479_v10 = vsub.f32 %v17470_v46, %v17478_v14 }
 0xd9e   : > { %v17480_v24 = vmul.f32 1.442695, %v17479_v10 }
 0xda0   : > { %23144 = vpow2.f32 %v17480_v24 }
 0xdad   : > { %v23145_v52 = vpop.eup %23144 }
 0xdae   : > { %v17482_v44 = vsel %vm17475_vm12, %v23145_v52, 0.0 }
 0xdaf   : > { %17483 = vadd.xlane.f32.xlu0 %v17482_v44 }
 0xdb0   : > { %23162 = shalt.err (!%p23159_p3)
}
 0xdb1   : > { %s23163_s10 = scalar_lea.hbm %s17542_s6, 16  ;;  %s23167_s29 = scalar_lea.hbm %s30745_s3, 32 }
 0xdb2   : > { %p23164_p4 = scmp.ne.s32.totalorder %s17542_s6, %s23163_s10  ;;  %p23168_p9 = scmp.lt.s32.totalorder %s17542_s6, %s30745_s3 }
 0xdb3   : > { %p23169_p10 = scmp.lt.s32.totalorder %s23167_s29, %s23163_s10 }
 0xdb4   : > { %p23165_p7 = pnand %p23164_p4, %p23402_p5 }
 0xdb5   : > { %p23170_p11 = por %p23169_p10, %p23168_p9 }
 0xdb6   : > { %p23166_p8 = pneg %p23165_p7 }
 0xdb8   : > { %p23171_p12 = pnand %p23170_p11, %p23166_p8 }
 0xdba   : > { %23174 = shalt.err (!%p23171_p12)
}
 0xdbb   : > { %19870 = dma.vmem_to_hbm [thread:$0]  (%p23402_p5), %s17545_s25, 16, %s17542_s6, %s17524_s27  }
 0xdbc   : > { %s712_s8 = scalar_lea.vmem [#allocation4], %s30603_s0  ;;  %s30746_s2 = sshll.u32 %s23385_s5, 4 }
 0xdbd   : > { %s17557_s9 = sshll.u32 %s712_s8, 4  ;;  %s30747_s10 = sld [smem:[#allocation28_spill]]  ;;  %s17558_s9 = int_to_ptr.vmem [resolvable:$true] %s17557_s9 }
 0xdbe   : > { %s17528_s7 = scalar_lea.sflag [#allocation5], %s30603_s0  ;;  %s23175_s1 = scalar_lea.vmem %s17558_s9, 16 }
 0xdbf   : > { %p23176_p13 = scmp.ne.s32.totalorder %s17558_s9, %s23175_s1  ;;  %s23243_s6 = smov [#allocation4]  }
 0xdc0   : > { %s23179_s25 = sshll.u32 %s23243_s6, 4  ;;  %s23180_s25 = int_to_ptr.vmem [resolvable:$false] %s23179_s25 }
 0xdc1   : > { %p23177_p0 = pnand %p23176_p13, %p23402_p5  ;;  %s23181_s27 = scalar_lea.vmem %s23180_s25, 32 }
 0xdc2   : > { %p23182_p2 = scmp.lt.s32.totalorder %s17558_s9, %s23180_s25  ;;  %p23183_p3 = scmp.lt.s32.totalorder %s23181_s27, %s23175_s1 }
 0xdc3   : > { %s17555_s22 = scalar_lea.hbm %s30747_s10, %s30746_s2  ;;  %p23178_p1 = pneg %p23177_p0 }
 0xdc4   : > { %p23184_p4 = por %p23183_p3, %p23182_p2 }
 0xdc6   : > { %p23185_p7 = pnand %p23184_p4, %p23178_p1 }
 0xe38   : > { %v17484_v54 = vpop.xlane.xlu0 %17483 }
 0xe39   : > { %23146 = vrcp.f32 %v17484_v54 }
 0xe46   : > { %v23147_v27 = vpop.eup %23146 }
 0xe47   : > { %v17486_v4 = vmul.f32 %v23147_v27, %v23145_v52 }
 0xe49   : > { %17488 = vst.msk [vmem:[%s712_s8] sm:$0x1] %vm17475_vm12, %v17486_v4 }
 0xe4a   : > { %23188 = shalt.err (!%p23185_p7)
}
 0xe4b   : > { %s23189_s5 = scalar_lea.hbm %s17555_s22, 16  ;;  %s23193_s8 = scalar_lea.hbm %s30747_s10, 32 }
 0xe4c   : > { %p23190_p8 = scmp.ne.s32.totalorder %s17555_s22, %s23189_s5  ;;  %p23194_p11 = scmp.lt.s32.totalorder %s17555_s22, %s30747_s10 }
 0xe4d   : > { %p23195_p12 = scmp.lt.s32.totalorder %s23193_s8, %s23189_s5 }
 0xe4e   : > { %p23191_p9 = pnand %p23190_p8, %p23402_p5 }
 0xe4f   : > { %p23196_p13 = por %p23195_p12, %p23194_p11 }
 0xe50   : > { %p23192_p10 = pneg %p23191_p9 }
 0xe52   : > { %p23197_p0 = pnand %p23196_p13, %p23192_p10 }
 0xe54   : > { %23200 = shalt.err (!%p23197_p0)
}
 0xe55   : > { %19871 = dma.vmem_to_hbm [thread:$0]  (%p23402_p5), %s17558_s9, 16, %s17555_s22, %s17528_s7  }
 0xe56 PF: > { %s30748_s4 = sld [smem:[#allocation10_spill]] }
 0xe57   : > { %s30749_s1 = sld [smem:[#allocation8_spill]] }
 0xe5c   : > { %p19881_p1 = scmp.ge.s32.totalorder %s30748_s4, 2 }
 0xe5d   : > { %s17572_s25 = sand.u32 1, %s30749_s1  }
 0xe5e   : > { %p19875_p2 = pnand %p19881_p1, %p23406_p6  ;;  %s17573_s27 = scalar_lea.sflag [#allocation3], %s17572_s25 }
 0xe60   : > { %p19876_p3 = pneg %p19875_p2 }
 0xe62   : > { %23218 = dma.done.wait (%p19876_p3), %s17573_s27, 16  }
 0xe63   : > { %23220 = vsyncadd (%p19876_p3), %s17573_s27, 4294967280  ;;  %s17581_s0 = scalar_lea.sflag [#allocation5], %s17572_s25 }
 0xe64   : > { %23222 = dma.done.wait (%p19876_p3), %s17581_s0, 16  }
 0xe65   : > { %23224 = vsyncadd (%p19876_p3), %s17581_s0, 4294967280  ;;  %s30751_s25 = sld [smem:[#allocation11_spill]]  ;;  %s30754_s4 = smov %s23231_s30 }
 0xe66   : > { %s30752_s5 = sld [smem:[#allocation9_spill]] }
 0xe67   : > { %s30753_s24 = sld [smem:[#allocation12_spill]] }
 0xe6b   : > { %p37_p5 = scmp.ge.s32.totalorder %s30751_s25, 4  }
 0xe6c   : > { %s30755_s30 = smov %s30752_s5 }
 0xe6d   :  { %39 = sbr.rel (!%p37_p5) target bundleno = 20 (0x14), region = 168 }
 0xe72   :  { %17592 = vsyncpa [#allocation3], 1 }
 0xe73   :  { %17594 = vsyncpa [#allocation3 + $0x1], 1 }
 0xe74   :  { %17595 = vsyncpa [#allocation5], 1 }
 0xe75   :  { %17597 = vsyncpa [#allocation5 + $0x1], 1 }

</bundles_post_ra>
